<compile_context>
chip_gen: v5e
topology: v5e:2x2
jax: 0.10.0
libtpu: 0.0.40
codegen_flags: <defaults>
</compile_context>

<pallas_src>
import functools

import numpy as np
import jax
import jax.numpy as jnp
from jax import lax
from jax.experimental import pallas as pl
from jax.experimental.pallas import tpu as pltpu


# ----------------------------- configuration -------------------------------
class Config:
    def __init__(self):
        self.n_embd = 256
        self.n_head = 8
        self.block_size = 128
        self.dropout = 0.1


config = Config()

_NEG_BIG = -1e30  # finite masked logit (robust even if a row were fully masked)


# ------------------------------ Pallas kernel -------------------------------
def _mha_kernel(x_ref, wqkv_t_ref, wproj_t_ref, bproj_ref, o_ref,
                qkv_scratch, attn_scratch, *, num_heads: int):
    """One batch element per grid step.

    x_ref        : (1, T, C)  f32 input block
    wqkv_t_ref   : (C, 3C)    bf16; columns = [Q_all | K_all | V_all] head-major,
                              1/sqrt(hd) already folded into the Q columns
    wproj_t_ref  : (C, C)     bf16; proj weight pre-transposed (in, out)
    bproj_ref    : (1, C)     f32 proj bias
    o_ref        : (1, T, C)  output block
    qkv_scratch  : (T, 3C)    bf16 VMEM scratch (qkv activations)
    attn_scratch : (T, C)     bf16 VMEM scratch (concatenated per-head outputs)
    """
    T, C = x_ref.shape[1], x_ref.shape[2]
    hd = C // num_heads

    # qkv projection on the MXU: bf16 operands, f32 accumulation.
    x = x_ref[0].astype(jnp.bfloat16)                               # (T, C)
    qkv = jnp.dot(x, wqkv_t_ref[...], preferred_element_type=jnp.float32)
    qkv_scratch[...] = qkv.astype(jnp.bfloat16)                     # (T, 3C)

    # Causal (tril) mask, built once per grid step (VALU only).
    rows = lax.broadcasted_iota(jnp.int32, (T, T), 0)
    cols = lax.broadcasted_iota(jnp.int32, (T, T), 1)
    causal = rows >= cols

    for h in range(num_heads):  # static, unrolled loop over heads
        q = qkv_scratch[:, h * hd:(h + 1) * hd]                 # (T, hd) bf16
        k = qkv_scratch[:, C + h * hd:C + (h + 1) * hd]         # (T, hd) bf16
        v = qkv_scratch[:, 2 * C + h * hd:2 * C + (h + 1) * hd] # (T, hd) bf16

        # scores = q @ k^T without materializing the transpose (scale is
        # pre-folded into the Q weights).
        att = lax.dot_general(q, k, (((1,), (1,)), ((), ())),
                              preferred_element_type=jnp.float32)  # (T, T) f32
        att = jnp.where(causal, att, _NEG_BIG)

        # numerically-stable softmax in f32; divide -> EUP reciprocal-multiply
        att = jnp.exp(att - jnp.max(att, axis=-1, keepdims=True))
        inv = pl.reciprocal(jnp.sum(att, axis=-1, keepdims=True), approx=True)
        p = (att * inv).astype(jnp.bfloat16)

        head_out = jnp.dot(p, v, preferred_element_type=jnp.float32)  # (T, hd)

        # "transpose(1,2).view(B,T,C)" head-merge == lane-aligned slot write.
        attn_scratch[:, h * hd:(h + 1) * hd] = head_out.astype(jnp.bfloat16)

    # Single fused output projection (K = C = 256) + bias add.
    out = jnp.dot(attn_scratch[...], wproj_t_ref[...],
                  preferred_element_type=jnp.float32)              # (T, C) f32
    out = out + bproj_ref[...].astype(jnp.float32)                 # broadcast bias
    o_ref[0] = out.astype(o_ref.dtype)


# ------------------------------ wrapper -------------------------------------
def multi_head_attention(x, w_qkv, w_proj, b_proj, *, num_heads):
    """x: (B, T, C); w_qkv: (3C, C); w_proj: (C, C); b_proj: (C,)  (PyTorch layouts)."""
    B, T, C = x.shape
    hd = C // num_heads
    scale = float(hd) ** -0.5

    # --- free layout work (outside the kernel) -------------------------------
    # PyTorch semantics: qkv output column j belongs to head j // (3*hd); within
    # a head the first hd cols are Q, next hd are K, last hd are V.  Reorder the
    # weight rows so the flat 3C output becomes
    # [Q(all heads) | K(all heads) | V(all heads)], head-major inside each
    # C-wide slab (lane-aligned coarse splits inside the kernel).
    idx = np.arange(3 * C).reshape(num_heads, 3, hd)
    q_idx, k_idx, v_idx = (idx[:, i, :].reshape(-1) for i in range(3))

    w_q = w_qkv[q_idx, :] * scale          # fold 1/sqrt(hd) into Q weights
    w_k = w_qkv[k_idx, :]
    w_v = w_qkv[v_idx, :]
    w_qkv_t = jnp.concatenate([w_q, w_k, w_v], axis=0).T.astype(jnp.bfloat16)  # (C, 3C)
    w_proj_t = w_proj.T.astype(jnp.bfloat16)                                   # (C, C)
    b_proj_2d = b_proj.reshape(1, C).astype(jnp.float32)

    kernel = functools.partial(_mha_kernel, num_heads=num_heads)

    return pl.pallas_call(
        kernel,
        out_shape=jax.ShapeDtypeStruct((B, T, C), x.dtype),
        grid=(B,),
        in_specs=[
            pl.BlockSpec((1, T, C), lambda b: (b, 0, 0)),
            pl.BlockSpec((C, 3 * C), lambda b: (0, 0)),   # weights resident across grid
            pl.BlockSpec((C, C), lambda b: (0, 0)),
            pl.BlockSpec((1, C), lambda b: (0, 0)),
        ],
        out_specs=pl.BlockSpec((1, T, C), lambda b: (b, 0, 0)),
        scratch_shapes=[
            pltpu.VMEM((T, 3 * C), jnp.bfloat16),   # qkv activations
            pltpu.VMEM((T, C), jnp.bfloat16),       # concatenated head outputs
        ],
        compiler_params=pltpu.CompilerParams(
            dimension_semantics=("parallel",),
        ),
    )(x, w_qkv_t, w_proj_t, b_proj_2d)


# ---------------------------- pure-JAX reference ----------------------------
def multi_head_attention_ref(x, w_qkv, w_proj, b_proj, *, num_heads):
    B, T, C = x.shape
    hd = C // num_heads
    qkv = x @ w_qkv.T                                   # (B, T, 3C)
    qkv = qkv.reshape(B, T, num_heads, 3 * hd)
    q, k, v = jnp.split(qkv, 3, axis=-1)                # each (B, T, H, hd)
    q, k, v = [jnp.transpose(t, (0, 2, 1, 3)) for t in (q, k, v)]
    att = jnp.einsum("bhqd,bhkd->bhqk", q, k) * (hd ** -0.5)
    mask = jnp.tril(jnp.ones((T, T), dtype=bool))
    att = jnp.where(mask, att, -jnp.inf)
    att = jax.nn.softmax(att, axis=-1)
    out = jnp.einsum("bhqk,bhkd->bhqd", att, v)
    out = jnp.transpose(out, (0, 2, 1, 3)).reshape(B, T, C)
    return out @ w_proj.T + b_proj


# --------------------------------- main --------------------------------------
if __name__ == "__main__":
    B = 2
    T = config.block_size          # 128
    C = config.n_embd              # 256
    H = config.n_head              # 8

    key = jax.random.PRNGKey(0)
    k_x, k_qkv, k_proj, k_bias = jax.random.split(key, 4)

    x = jax.random.normal(k_x, (B, T, C), dtype=jnp.float32)
    # deterministic "parameters" (shapes match nn.Linear(out, in))
    w_qkv = jax.random.normal(k_qkv, (3 * C, C), dtype=jnp.float32) * 0.02
    w_proj = jax.random.normal(k_proj, (C, C), dtype=jnp.float32) * 0.02
    b_proj = jax.random.normal(k_bias, (C,), dtype=jnp.float32) * 0.02

    out = jax.block_until_ready(
        multi_head_attention(x, w_qkv, w_proj, b_proj, num_heads=H))
    ref = jax.block_until_ready(
        multi_head_attention_ref(x, w_qkv, w_proj, b_proj, num_heads=H))

    # bf16 MXU operands (f32 accumulation) give a few-1e-3 drift vs the pure-f32
    # reference; 2e-2 still catches any head-mapping / masking / layout bug.
    if not jnp.allclose(out, ref, atol=2e-2, rtol=2e-2):
        max_err = jnp.max(jnp.abs(out - ref))
        raise AssertionError(
            f"Pallas kernel mismatch vs reference (max |diff| = {max_err})")

    print("KERNEL_OK")
</pallas_src>

<mosaic_0001>
module attributes {stable_mosaic.version = 11 : i64} {
  func.func @_mha_kernel(%arg0: i32, %arg1: memref<1x128x256xf32, #tpu.memory_space<vmem>>, %arg2: memref<256x768xbf16, #tpu.memory_space<vmem>>, %arg3: memref<256x256xbf16, #tpu.memory_space<vmem>>, %arg4: memref<1x256xf32, #tpu.memory_space<vmem>>, %arg5: memref<1x128x256xf32, #tpu.memory_space<vmem>>, %arg6: memref<128x768xbf16, #tpu.memory_space<vmem>>, %arg7: memref<128x256xbf16, #tpu.memory_space<vmem>>) attributes {dimension_semantics = [#tpu.dimension_semantics<parallel>], iteration_bounds = array<i64: 2>, scalar_prefetch = 0 : i64, scratch_operands = 2 : i64, tpu.core_type = #tpu.core_type<tc>, window_params = [{transform_indices = @transform_0, window_bounds = array<i64: 1, 128, 256>}, {pipeline_mode = #tpu.pipeline_mode<synchronous>, transform_indices = @transform_1, window_bounds = array<i64: 256, 768>}, {pipeline_mode = #tpu.pipeline_mode<synchronous>, transform_indices = @transform_2, window_bounds = array<i64: 256, 256>}, {pipeline_mode = #tpu.pipeline_mode<synchronous>, transform_indices = @transform_3, window_bounds = array<i64: 1, 256>}, {transform_indices = @transform_4, window_bounds = array<i64: 1, 128, 256>}]} {
    %c0 = arith.constant 0 : index
    %c0_0 = arith.constant 0 : index
    %c0_1 = arith.constant 0 : index
    %0 = vector.load %arg1[%c0, %c0_0, %c0_1] : memref<1x128x256xf32, #tpu.memory_space<vmem>>, vector<1x128x256xf32>
    %1 = vector.shape_cast %0 : vector<1x128x256xf32> to vector<128x256xf32>
    %2 = arith.truncf %1 : vector<128x256xf32> to vector<128x256xbf16>
    %c0_2 = arith.constant 0 : index
    %c0_3 = arith.constant 0 : index
    %3 = vector.load %arg2[%c0_2, %c0_3] : memref<256x768xbf16, #tpu.memory_space<vmem>>, vector<256x768xbf16>
    %cst = arith.constant dense<0.000000e+00> : vector<128x768xf32>
    %4 = tpu.matmul %2, %3, %cst {dimension_numbers = #tpu.dot_dimension_numbers<[1], [0], [0], [1], [0, 0, 1, 1], [], []>} : vector<128x256xbf16>, vector<256x768xbf16>, vector<128x768xf32> -> vector<128x768xf32>
    %5 = arith.truncf %4 : vector<128x768xf32> to vector<128x768xbf16>
    %c0_4 = arith.constant 0 : index
    %c0_5 = arith.constant 0 : index
    %6 = vector.load %arg6[%c0_4, %c0_5] : memref<128x768xbf16, #tpu.memory_space<vmem>>, vector<128x768xbf16>
    tpu.vector_store %arg6[%c0_4, %c0_5], %5 {strides = array<i32>} : memref<128x768xbf16, #tpu.memory_space<vmem>>, vector<128x768xbf16>,
    %7 = tpu.iota {dimensions = array<i32: 0>} : vector<128x128xi32>
    %8 = tpu.iota {dimensions = array<i32: 1>} : vector<128x128xi32>
    %9 = arith.cmpi sge, %7, %8 : vector<128x128xi32>
    %c0_6 = arith.constant 0 : index
    %c0_7 = arith.constant 0 : index
    %10 = vector.load %arg6[%c0_6, %c0_7] : memref<128x768xbf16, #tpu.memory_space<vmem>>, vector<128x32xbf16>
    %c0_8 = arith.constant 0 : index
    %c256 = arith.constant 256 : index
    %11 = vector.load %arg6[%c0_8, %c256] : memref<128x768xbf16, #tpu.memory_space<vmem>>, vector<128x32xbf16>
    %c0_9 = arith.constant 0 : index
    %c512 = arith.constant 512 : index
    %12 = vector.load %arg6[%c0_9, %c512] : memref<128x768xbf16, #tpu.memory_space<vmem>>, vector<128x32xbf16>
    %cst_10 = arith.constant dense<0.000000e+00> : vector<128x128xf32>
    %13 = tpu.matmul %10, %11, %cst_10 {dimension_numbers = #tpu.dot_dimension_numbers<[1], [1], [0], [0], [0, 0, 1, 0], [], []>} : vector<128x32xbf16>, vector<128x32xbf16>, vector<128x128xf32> -> vector<128x128xf32>
    %cst_11 = arith.constant -1.000000e+30 : f32
    %14 = vector.broadcast %cst_11 : f32 to vector<128x128xf32>
    %15 = arith.select %9, %13, %14 : vector<128x128xi1>, vector<128x128xf32>
    %cst_12 = arith.constant dense<0xFF800000> : vector<128xf32>
    %16 = vector.multi_reduction <maximumf>, %15, %cst_12 [1] : vector<128x128xf32> to vector<128xf32>
    %17 = vector.shape_cast %16 : vector<128xf32> to vector<128x1xf32>
    %18 = vector.broadcast %17 : vector<128x1xf32> to vector<128x128xf32>
    %19 = arith.subf %15, %18 : vector<128x128xf32>
    %20 = math.exp %19 : vector<128x128xf32>
    %cst_13 = arith.constant dense<0.000000e+00> : vector<128xf32>
    %21 = vector.multi_reduction <add>, %20, %cst_13 [1] : vector<128x128xf32> to vector<128xf32>
    %22 = vector.shape_cast %21 : vector<128xf32> to vector<128x1xf32>
    %23 = tpu.reciprocal %22 {approx = true} : vector<128x1xf32> -> vector<128x1xf32>
    %24 = vector.broadcast %23 : vector<128x1xf32> to vector<128x128xf32>
    %25 = arith.mulf %20, %24 : vector<128x128xf32>
    %26 = arith.truncf %25 : vector<128x128xf32> to vector<128x128xbf16>
    %cst_14 = arith.constant dense<0.000000e+00> : vector<128x32xf32>
    %27 = tpu.matmul %26, %12, %cst_14 {dimension_numbers = #tpu.dot_dimension_numbers<[1], [0], [0], [1], [0, 0, 1, 1], [], []>} : vector<128x128xbf16>, vector<128x32xbf16>, vector<128x32xf32> -> vector<128x32xf32>
    %28 = arith.truncf %27 : vector<128x32xf32> to vector<128x32xbf16>
    %c0_15 = arith.constant 0 : index
    %c0_16 = arith.constant 0 : index
    %29 = vector.load %arg7[%c0_15, %c0_16] : memref<128x256xbf16, #tpu.memory_space<vmem>>, vector<128x32xbf16>
    tpu.vector_store %arg7[%c0_15, %c0_16], %28 {strides = array<i32>} : memref<128x256xbf16, #tpu.memory_space<vmem>>, vector<128x32xbf16>,
    %c0_17 = arith.constant 0 : index
    %c32 = arith.constant 32 : index
    %30 = vector.load %arg6[%c0_17, %c32] : memref<128x768xbf16, #tpu.memory_space<vmem>>, vector<128x32xbf16>
    %c0_18 = arith.constant 0 : index
    %c288 = arith.constant 288 : index
    %31 = vector.load %arg6[%c0_18, %c288] : memref<128x768xbf16, #tpu.memory_space<vmem>>, vector<128x32xbf16>
    %c0_19 = arith.constant 0 : index
    %c544 = arith.constant 544 : index
    %32 = vector.load %arg6[%c0_19, %c544] : memref<128x768xbf16, #tpu.memory_space<vmem>>, vector<128x32xbf16>
    %cst_20 = arith.constant dense<0.000000e+00> : vector<128x128xf32>
    %33 = tpu.matmul %30, %31, %cst_20 {dimension_numbers = #tpu.dot_dimension_numbers<[1], [1], [0], [0], [0, 0, 1, 0], [], []>} : vector<128x32xbf16>, vector<128x32xbf16>, vector<128x128xf32> -> vector<128x128xf32>
    %cst_21 = arith.constant -1.000000e+30 : f32
    %34 = vector.broadcast %cst_21 : f32 to vector<128x128xf32>
    %35 = arith.select %9, %33, %34 : vector<128x128xi1>, vector<128x128xf32>
    %cst_22 = arith.constant dense<0xFF800000> : vector<128xf32>
    %36 = vector.multi_reduction <maximumf>, %35, %cst_22 [1] : vector<128x128xf32> to vector<128xf32>
    %37 = vector.shape_cast %36 : vector<128xf32> to vector<128x1xf32>
    %38 = vector.broadcast %37 : vector<128x1xf32> to vector<128x128xf32>
    %39 = arith.subf %35, %38 : vector<128x128xf32>
    %40 = math.exp %39 : vector<128x128xf32>
    %cst_23 = arith.constant dense<0.000000e+00> : vector<128xf32>
    %41 = vector.multi_reduction <add>, %40, %cst_23 [1] : vector<128x128xf32> to vector<128xf32>
    %42 = vector.shape_cast %41 : vector<128xf32> to vector<128x1xf32>
    %43 = tpu.reciprocal %42 {approx = true} : vector<128x1xf32> -> vector<128x1xf32>
    %44 = vector.broadcast %43 : vector<128x1xf32> to vector<128x128xf32>
    %45 = arith.mulf %40, %44 : vector<128x128xf32>
    %46 = arith.truncf %45 : vector<128x128xf32> to vector<128x128xbf16>
    %cst_24 = arith.constant dense<0.000000e+00> : vector<128x32xf32>
    %47 = tpu.matmul %46, %32, %cst_24 {dimension_numbers = #tpu.dot_dimension_numbers<[1], [0], [0], [1], [0, 0, 1, 1], [], []>} : vector<128x128xbf16>, vector<128x32xbf16>, vector<128x32xf32> -> vector<128x32xf32>
    %48 = arith.truncf %47 : vector<128x32xf32> to vector<128x32xbf16>
    %c0_25 = arith.constant 0 : index
    %c32_26 = arith.constant 32 : index
    %49 = vector.load %arg7[%c0_25, %c32_26] : memref<128x256xbf16, #tpu.memory_space<vmem>>, vector<128x32xbf16>
    tpu.vector_store %arg7[%c0_25, %c32_26], %48 {strides = array<i32>} : memref<128x256xbf16, #tpu.memory_space<vmem>>, vector<128x32xbf16>,
    %c0_27 = arith.constant 0 : index
    %c64 = arith.constant 64 : index
    %50 = vector.load %arg6[%c0_27, %c64] : memref<128x768xbf16, #tpu.memory_space<vmem>>, vector<128x32xbf16>
    %c0_28 = arith.constant 0 : index
    %c320 = arith.constant 320 : index
    %51 = vector.load %arg6[%c0_28, %c320] : memref<128x768xbf16, #tpu.memory_space<vmem>>, vector<128x32xbf16>
    %c0_29 = arith.constant 0 : index
    %c576 = arith.constant 576 : index
    %52 = vector.load %arg6[%c0_29, %c576] : memref<128x768xbf16, #tpu.memory_space<vmem>>, vector<128x32xbf16>
    %cst_30 = arith.constant dense<0.000000e+00> : vector<128x128xf32>
    %53 = tpu.matmul %50, %51, %cst_30 {dimension_numbers = #tpu.dot_dimension_numbers<[1], [1], [0], [0], [0, 0, 1, 0], [], []>} : vector<128x32xbf16>, vector<128x32xbf16>, vector<128x128xf32> -> vector<128x128xf32>
    %cst_31 = arith.constant -1.000000e+30 : f32
    %54 = vector.broadcast %cst_31 : f32 to vector<128x128xf32>
    %55 = arith.select %9, %53, %54 : vector<128x128xi1>, vector<128x128xf32>
    %cst_32 = arith.constant dense<0xFF800000> : vector<128xf32>
    %56 = vector.multi_reduction <maximumf>, %55, %cst_32 [1] : vector<128x128xf32> to vector<128xf32>
    %57 = vector.shape_cast %56 : vector<128xf32> to vector<128x1xf32>
    %58 = vector.broadcast %57 : vector<128x1xf32> to vector<128x128xf32>
    %59 = arith.subf %55, %58 : vector<128x128xf32>
    %60 = math.exp %59 : vector<128x128xf32>
    %cst_33 = arith.constant dense<0.000000e+00> : vector<128xf32>
    %61 = vector.multi_reduction <add>, %60, %cst_33 [1] : vector<128x128xf32> to vector<128xf32>
    %62 = vector.shape_cast %61 : vector<128xf32> to vector<128x1xf32>
    %63 = tpu.reciprocal %62 {approx = true} : vector<128x1xf32> -> vector<128x1xf32>
    %64 = vector.broadcast %63 : vector<128x1xf32> to vector<128x128xf32>
    %65 = arith.mulf %60, %64 : vector<128x128xf32>
    %66 = arith.truncf %65 : vector<128x128xf32> to vector<128x128xbf16>
    %cst_34 = arith.constant dense<0.000000e+00> : vector<128x32xf32>
    %67 = tpu.matmul %66, %52, %cst_34 {dimension_numbers = #tpu.dot_dimension_numbers<[1], [0], [0], [1], [0, 0, 1, 1], [], []>} : vector<128x128xbf16>, vector<128x32xbf16>, vector<128x32xf32> -> vector<128x32xf32>
    %68 = arith.truncf %67 : vector<128x32xf32> to vector<128x32xbf16>
    %c0_35 = arith.constant 0 : index
    %c64_36 = arith.constant 64 : index
    %69 = vector.load %arg7[%c0_35, %c64_36] : memref<128x256xbf16, #tpu.memory_space<vmem>>, vector<128x32xbf16>
    tpu.vector_store %arg7[%c0_35, %c64_36], %68 {strides = array<i32>} : memref<128x256xbf16, #tpu.memory_space<vmem>>, vector<128x32xbf16>,
    %c0_37 = arith.constant 0 : index
    %c96 = arith.constant 96 : index
    %70 = vector.load %arg6[%c0_37, %c96] : memref<128x768xbf16, #tpu.memory_space<vmem>>, vector<128x32xbf16>
    %c0_38 = arith.constant 0 : index
    %c352 = arith.constant 352 : index
    %71 = vector.load %arg6[%c0_38, %c352] : memref<128x768xbf16, #tpu.memory_space<vmem>>, vector<128x32xbf16>
    %c0_39 = arith.constant 0 : index
    %c608 = arith.constant 608 : index
    %72 = vector.load %arg6[%c0_39, %c608] : memref<128x768xbf16, #tpu.memory_space<vmem>>, vector<128x32xbf16>
    %cst_40 = arith.constant dense<0.000000e+00> : vector<128x128xf32>
    %73 = tpu.matmul %70, %71, %cst_40 {dimension_numbers = #tpu.dot_dimension_numbers<[1], [1], [0], [0], [0, 0, 1, 0], [], []>} : vector<128x32xbf16>, vector<128x32xbf16>, vector<128x128xf32> -> vector<128x128xf32>
    %cst_41 = arith.constant -1.000000e+30 : f32
    %74 = vector.broadcast %cst_41 : f32 to vector<128x128xf32>
    %75 = arith.select %9, %73, %74 : vector<128x128xi1>, vector<128x128xf32>
    %cst_42 = arith.constant dense<0xFF800000> : vector<128xf32>
    %76 = vector.multi_reduction <maximumf>, %75, %cst_42 [1] : vector<128x128xf32> to vector<128xf32>
    %77 = vector.shape_cast %76 : vector<128xf32> to vector<128x1xf32>
    %78 = vector.broadcast %77 : vector<128x1xf32> to vector<128x128xf32>
    %79 = arith.subf %75, %78 : vector<128x128xf32>
    %80 = math.exp %79 : vector<128x128xf32>
    %cst_43 = arith.constant dense<0.000000e+00> : vector<128xf32>
    %81 = vector.multi_reduction <add>, %80, %cst_43 [1] : vector<128x128xf32> to vector<128xf32>
    %82 = vector.shape_cast %81 : vector<128xf32> to vector<128x1xf32>
    %83 = tpu.reciprocal %82 {approx = true} : vector<128x1xf32> -> vector<128x1xf32>
    %84 = vector.broadcast %83 : vector<128x1xf32> to vector<128x128xf32>
    %85 = arith.mulf %80, %84 : vector<128x128xf32>
    %86 = arith.truncf %85 : vector<128x128xf32> to vector<128x128xbf16>
    %cst_44 = arith.constant dense<0.000000e+00> : vector<128x32xf32>
    %87 = tpu.matmul %86, %72, %cst_44 {dimension_numbers = #tpu.dot_dimension_numbers<[1], [0], [0], [1], [0, 0, 1, 1], [], []>} : vector<128x128xbf16>, vector<128x32xbf16>, vector<128x32xf32> -> vector<128x32xf32>
    %88 = arith.truncf %87 : vector<128x32xf32> to vector<128x32xbf16>
    %c0_45 = arith.constant 0 : index
    %c96_46 = arith.constant 96 : index
    %89 = vector.load %arg7[%c0_45, %c96_46] : memref<128x256xbf16, #tpu.memory_space<vmem>>, vector<128x32xbf16>
    tpu.vector_store %arg7[%c0_45, %c96_46], %88 {strides = array<i32>} : memref<128x256xbf16, #tpu.memory_space<vmem>>, vector<128x32xbf16>,
    %c0_47 = arith.constant 0 : index
    %c128 = arith.constant 128 : index
    %90 = vector.load %arg6[%c0_47, %c128] : memref<128x768xbf16, #tpu.memory_space<vmem>>, vector<128x32xbf16>
    %c0_48 = arith.constant 0 : index
    %c384 = arith.constant 384 : index
    %91 = vector.load %arg6[%c0_48, %c384] : memref<128x768xbf16, #tpu.memory_space<vmem>>, vector<128x32xbf16>
    %c0_49 = arith.constant 0 : index
    %c640 = arith.constant 640 : index
    %92 = vector.load %arg6[%c0_49, %c640] : memref<128x768xbf16, #tpu.memory_space<vmem>>, vector<128x32xbf16>
    %cst_50 = arith.constant dense<0.000000e+00> : vector<128x128xf32>
    %93 = tpu.matmul %90, %91, %cst_50 {dimension_numbers = #tpu.dot_dimension_numbers<[1], [1], [0], [0], [0, 0, 1, 0], [], []>} : vector<128x32xbf16>, vector<128x32xbf16>, vector<128x128xf32> -> vector<128x128xf32>
    %cst_51 = arith.constant -1.000000e+30 : f32
    %94 = vector.broadcast %cst_51 : f32 to vector<128x128xf32>
    %95 = arith.select %9, %93, %94 : vector<128x128xi1>, vector<128x128xf32>
    %cst_52 = arith.constant dense<0xFF800000> : vector<128xf32>
    %96 = vector.multi_reduction <maximumf>, %95, %cst_52 [1] : vector<128x128xf32> to vector<128xf32>
    %97 = vector.shape_cast %96 : vector<128xf32> to vector<128x1xf32>
    %98 = vector.broadcast %97 : vector<128x1xf32> to vector<128x128xf32>
    %99 = arith.subf %95, %98 : vector<128x128xf32>
    %100 = math.exp %99 : vector<128x128xf32>
    %cst_53 = arith.constant dense<0.000000e+00> : vector<128xf32>
    %101 = vector.multi_reduction <add>, %100, %cst_53 [1] : vector<128x128xf32> to vector<128xf32>
    %102 = vector.shape_cast %101 : vector<128xf32> to vector<128x1xf32>
    %103 = tpu.reciprocal %102 {approx = true} : vector<128x1xf32> -> vector<128x1xf32>
    %104 = vector.broadcast %103 : vector<128x1xf32> to vector<128x128xf32>
    %105 = arith.mulf %100, %104 : vector<128x128xf32>
    %106 = arith.truncf %105 : vector<128x128xf32> to vector<128x128xbf16>
    %cst_54 = arith.constant dense<0.000000e+00> : vector<128x32xf32>
    %107 = tpu.matmul %106, %92, %cst_54 {dimension_numbers = #tpu.dot_dimension_numbers<[1], [0], [0], [1], [0, 0, 1, 1], [], []>} : vector<128x128xbf16>, vector<128x32xbf16>, vector<128x32xf32> -> vector<128x32xf32>
    %108 = arith.truncf %107 : vector<128x32xf32> to vector<128x32xbf16>
    %c0_55 = arith.constant 0 : index
    %c128_56 = arith.constant 128 : index
    %109 = vector.load %arg7[%c0_55, %c128_56] : memref<128x256xbf16, #tpu.memory_space<vmem>>, vector<128x32xbf16>
    tpu.vector_store %arg7[%c0_55, %c128_56], %108 {strides = array<i32>} : memref<128x256xbf16, #tpu.memory_space<vmem>>, vector<128x32xbf16>,
    %c0_57 = arith.constant 0 : index
    %c160 = arith.constant 160 : index
    %110 = vector.load %arg6[%c0_57, %c160] : memref<128x768xbf16, #tpu.memory_space<vmem>>, vector<128x32xbf16>
    %c0_58 = arith.constant 0 : index
    %c416 = arith.constant 416 : index
    %111 = vector.load %arg6[%c0_58, %c416] : memref<128x768xbf16, #tpu.memory_space<vmem>>, vector<128x32xbf16>
    %c0_59 = arith.constant 0 : index
    %c672 = arith.constant 672 : index
    %112 = vector.load %arg6[%c0_59, %c672] : memref<128x768xbf16, #tpu.memory_space<vmem>>, vector<128x32xbf16>
    %cst_60 = arith.constant dense<0.000000e+00> : vector<128x128xf32>
    %113 = tpu.matmul %110, %111, %cst_60 {dimension_numbers = #tpu.dot_dimension_numbers<[1], [1], [0], [0], [0, 0, 1, 0], [], []>} : vector<128x32xbf16>, vector<128x32xbf16>, vector<128x128xf32> -> vector<128x128xf32>
    %cst_61 = arith.constant -1.000000e+30 : f32
    %114 = vector.broadcast %cst_61 : f32 to vector<128x128xf32>
    %115 = arith.select %9, %113, %114 : vector<128x128xi1>, vector<128x128xf32>
    %cst_62 = arith.constant dense<0xFF800000> : vector<128xf32>
    %116 = vector.multi_reduction <maximumf>, %115, %cst_62 [1] : vector<128x128xf32> to vector<128xf32>
    %117 = vector.shape_cast %116 : vector<128xf32> to vector<128x1xf32>
    %118 = vector.broadcast %117 : vector<128x1xf32> to vector<128x128xf32>
    %119 = arith.subf %115, %118 : vector<128x128xf32>
    %120 = math.exp %119 : vector<128x128xf32>
    %cst_63 = arith.constant dense<0.000000e+00> : vector<128xf32>
    %121 = vector.multi_reduction <add>, %120, %cst_63 [1] : vector<128x128xf32> to vector<128xf32>
    %122 = vector.shape_cast %121 : vector<128xf32> to vector<128x1xf32>
    %123 = tpu.reciprocal %122 {approx = true} : vector<128x1xf32> -> vector<128x1xf32>
    %124 = vector.broadcast %123 : vector<128x1xf32> to vector<128x128xf32>
    %125 = arith.mulf %120, %124 : vector<128x128xf32>
    %126 = arith.truncf %125 : vector<128x128xf32> to vector<128x128xbf16>
    %cst_64 = arith.constant dense<0.000000e+00> : vector<128x32xf32>
    %127 = tpu.matmul %126, %112, %cst_64 {dimension_numbers = #tpu.dot_dimension_numbers<[1], [0], [0], [1], [0, 0, 1, 1], [], []>} : vector<128x128xbf16>, vector<128x32xbf16>, vector<128x32xf32> -> vector<128x32xf32>
    %128 = arith.truncf %127 : vector<128x32xf32> to vector<128x32xbf16>
    %c0_65 = arith.constant 0 : index
    %c160_66 = arith.constant 160 : index
    %129 = vector.load %arg7[%c0_65, %c160_66] : memref<128x256xbf16, #tpu.memory_space<vmem>>, vector<128x32xbf16>
    tpu.vector_store %arg7[%c0_65, %c160_66], %128 {strides = array<i32>} : memref<128x256xbf16, #tpu.memory_space<vmem>>, vector<128x32xbf16>,
    %c0_67 = arith.constant 0 : index
    %c192 = arith.constant 192 : index
    %130 = vector.load %arg6[%c0_67, %c192] : memref<128x768xbf16, #tpu.memory_space<vmem>>, vector<128x32xbf16>
    %c0_68 = arith.constant 0 : index
    %c448 = arith.constant 448 : index
    %131 = vector.load %arg6[%c0_68, %c448] : memref<128x768xbf16, #tpu.memory_space<vmem>>, vector<128x32xbf16>
    %c0_69 = arith.constant 0 : index
    %c704 = arith.constant 704 : index
    %132 = vector.load %arg6[%c0_69, %c704] : memref<128x768xbf16, #tpu.memory_space<vmem>>, vector<128x32xbf16>
    %cst_70 = arith.constant dense<0.000000e+00> : vector<128x128xf32>
    %133 = tpu.matmul %130, %131, %cst_70 {dimension_numbers = #tpu.dot_dimension_numbers<[1], [1], [0], [0], [0, 0, 1, 0], [], []>} : vector<128x32xbf16>, vector<128x32xbf16>, vector<128x128xf32> -> vector<128x128xf32>
    %cst_71 = arith.constant -1.000000e+30 : f32
    %134 = vector.broadcast %cst_71 : f32 to vector<128x128xf32>
    %135 = arith.select %9, %133, %134 : vector<128x128xi1>, vector<128x128xf32>
    %cst_72 = arith.constant dense<0xFF800000> : vector<128xf32>
    %136 = vector.multi_reduction <maximumf>, %135, %cst_72 [1] : vector<128x128xf32> to vector<128xf32>
    %137 = vector.shape_cast %136 : vector<128xf32> to vector<128x1xf32>
    %138 = vector.broadcast %137 : vector<128x1xf32> to vector<128x128xf32>
    %139 = arith.subf %135, %138 : vector<128x128xf32>
    %140 = math.exp %139 : vector<128x128xf32>
    %cst_73 = arith.constant dense<0.000000e+00> : vector<128xf32>
    %141 = vector.multi_reduction <add>, %140, %cst_73 [1] : vector<128x128xf32> to vector<128xf32>
    %142 = vector.shape_cast %141 : vector<128xf32> to vector<128x1xf32>
    %143 = tpu.reciprocal %142 {approx = true} : vector<128x1xf32> -> vector<128x1xf32>
    %144 = vector.broadcast %143 : vector<128x1xf32> to vector<128x128xf32>
    %145 = arith.mulf %140, %144 : vector<128x128xf32>
    %146 = arith.truncf %145 : vector<128x128xf32> to vector<128x128xbf16>
    %cst_74 = arith.constant dense<0.000000e+00> : vector<128x32xf32>
    %147 = tpu.matmul %146, %132, %cst_74 {dimension_numbers = #tpu.dot_dimension_numbers<[1], [0], [0], [1], [0, 0, 1, 1], [], []>} : vector<128x128xbf16>, vector<128x32xbf16>, vector<128x32xf32> -> vector<128x32xf32>
    %148 = arith.truncf %147 : vector<128x32xf32> to vector<128x32xbf16>
    %c0_75 = arith.constant 0 : index
    %c192_76 = arith.constant 192 : index
    %149 = vector.load %arg7[%c0_75, %c192_76] : memref<128x256xbf16, #tpu.memory_space<vmem>>, vector<128x32xbf16>
    tpu.vector_store %arg7[%c0_75, %c192_76], %148 {strides = array<i32>} : memref<128x256xbf16, #tpu.memory_space<vmem>>, vector<128x32xbf16>,
    %c0_77 = arith.constant 0 : index
    %c224 = arith.constant 224 : index
    %150 = vector.load %arg6[%c0_77, %c224] : memref<128x768xbf16, #tpu.memory_space<vmem>>, vector<128x32xbf16>
    %c0_78 = arith.constant 0 : index
    %c480 = arith.constant 480 : index
    %151 = vector.load %arg6[%c0_78, %c480] : memref<128x768xbf16, #tpu.memory_space<vmem>>, vector<128x32xbf16>
    %c0_79 = arith.constant 0 : index
    %c736 = arith.constant 736 : index
    %152 = vector.load %arg6[%c0_79, %c736] : memref<128x768xbf16, #tpu.memory_space<vmem>>, vector<128x32xbf16>
    %cst_80 = arith.constant dense<0.000000e+00> : vector<128x128xf32>
    %153 = tpu.matmul %150, %151, %cst_80 {dimension_numbers = #tpu.dot_dimension_numbers<[1], [1], [0], [0], [0, 0, 1, 0], [], []>} : vector<128x32xbf16>, vector<128x32xbf16>, vector<128x128xf32> -> vector<128x128xf32>
    %cst_81 = arith.constant -1.000000e+30 : f32
    %154 = vector.broadcast %cst_81 : f32 to vector<128x128xf32>
    %155 = arith.select %9, %153, %154 : vector<128x128xi1>, vector<128x128xf32>
    %cst_82 = arith.constant dense<0xFF800000> : vector<128xf32>
    %156 = vector.multi_reduction <maximumf>, %155, %cst_82 [1] : vector<128x128xf32> to vector<128xf32>
    %157 = vector.shape_cast %156 : vector<128xf32> to vector<128x1xf32>
    %158 = vector.broadcast %157 : vector<128x1xf32> to vector<128x128xf32>
    %159 = arith.subf %155, %158 : vector<128x128xf32>
    %160 = math.exp %159 : vector<128x128xf32>
    %cst_83 = arith.constant dense<0.000000e+00> : vector<128xf32>
    %161 = vector.multi_reduction <add>, %160, %cst_83 [1] : vector<128x128xf32> to vector<128xf32>
    %162 = vector.shape_cast %161 : vector<128xf32> to vector<128x1xf32>
    %163 = tpu.reciprocal %162 {approx = true} : vector<128x1xf32> -> vector<128x1xf32>
    %164 = vector.broadcast %163 : vector<128x1xf32> to vector<128x128xf32>
    %165 = arith.mulf %160, %164 : vector<128x128xf32>
    %166 = arith.truncf %165 : vector<128x128xf32> to vector<128x128xbf16>
    %cst_84 = arith.constant dense<0.000000e+00> : vector<128x32xf32>
    %167 = tpu.matmul %166, %152, %cst_84 {dimension_numbers = #tpu.dot_dimension_numbers<[1], [0], [0], [1], [0, 0, 1, 1], [], []>} : vector<128x128xbf16>, vector<128x32xbf16>, vector<128x32xf32> -> vector<128x32xf32>
    %168 = arith.truncf %167 : vector<128x32xf32> to vector<128x32xbf16>
    %c0_85 = arith.constant 0 : index
    %c224_86 = arith.constant 224 : index
    %169 = vector.load %arg7[%c0_85, %c224_86] : memref<128x256xbf16, #tpu.memory_space<vmem>>, vector<128x32xbf16>
    tpu.vector_store %arg7[%c0_85, %c224_86], %168 {strides = array<i32>} : memref<128x256xbf16, #tpu.memory_space<vmem>>, vector<128x32xbf16>,
    %c0_87 = arith.constant 0 : index
    %c0_88 = arith.constant 0 : index
    %170 = vector.load %arg7[%c0_87, %c0_88] : memref<128x256xbf16, #tpu.memory_space<vmem>>, vector<128x256xbf16>
    %c0_89 = arith.constant 0 : index
    %c0_90 = arith.constant 0 : index
    %171 = vector.load %arg3[%c0_89, %c0_90] : memref<256x256xbf16, #tpu.memory_space<vmem>>, vector<256x256xbf16>
    %cst_91 = arith.constant dense<0.000000e+00> : vector<128x256xf32>
    %172 = tpu.matmul %170, %171, %cst_91 {dimension_numbers = #tpu.dot_dimension_numbers<[1], [0], [0], [1], [0, 0, 1, 1], [], []>} : vector<128x256xbf16>, vector<256x256xbf16>, vector<128x256xf32> -> vector<128x256xf32>
    %c0_92 = arith.constant 0 : index
    %c0_93 = arith.constant 0 : index
    %173 = vector.load %arg4[%c0_92, %c0_93] : memref<1x256xf32, #tpu.memory_space<vmem>>, vector<1x256xf32>
    %174 = vector.broadcast %173 : vector<1x256xf32> to vector<128x256xf32>
    %175 = arith.addf %172, %174 : vector<128x256xf32>
    %c0_94 = arith.constant 0 : index
    %c0_95 = arith.constant 0 : index
    %c0_96 = arith.constant 0 : index
    %176 = vector.load %arg5[%c0_94, %c0_95, %c0_96] : memref<1x128x256xf32, #tpu.memory_space<vmem>>, vector<1x128x256xf32>
    %177 = vector.shape_cast %176 : vector<1x128x256xf32> to vector<128x256xf32>
    %178 = vector.shape_cast %175 : vector<128x256xf32> to vector<1x128x256xf32>
    tpu.vector_store %arg5[%c0_94, %c0_95, %c0_96], %178 {strides = array<i32>} : memref<1x128x256xf32, #tpu.memory_space<vmem>>, vector<1x128x256xf32>,
    return
  }
  func.func @transform_0(%arg0: i32) -> (i32, i32, i32) {
    %c0_i32 = arith.constant 0 : i32
    %c0_i32_0 = arith.constant 0 : i32
    %c0_i32_1 = arith.constant 0 : i32
    return %arg0, %c0_i32, %c0_i32_0 : i32, i32, i32
  }
  func.func @transform_1(%arg0: i32) -> (i32, i32) {
    %c0_i32 = arith.constant 0 : i32
    %c0_i32_0 = arith.constant 0 : i32
    %c0_i32_1 = arith.constant 0 : i32
    return %c0_i32, %c0_i32_0 : i32, i32
  }
  func.func @transform_2(%arg0: i32) -> (i32, i32) {
    %c0_i32 = arith.constant 0 : i32
    %c0_i32_0 = arith.constant 0 : i32
    %c0_i32_1 = arith.constant 0 : i32
    return %c0_i32, %c0_i32_0 : i32, i32
  }
  func.func @transform_3(%arg0: i32) -> (i32, i32) {
    %c0_i32 = arith.constant 0 : i32
    %c0_i32_0 = arith.constant 0 : i32
    %c0_i32_1 = arith.constant 0 : i32
    return %c0_i32, %c0_i32_0 : i32, i32
  }
  func.func @transform_4(%arg0: i32) -> (i32, i32, i32) {
    %c0_i32 = arith.constant 0 : i32
    %c0_i32_0 = arith.constant 0 : i32
    %c0_i32_1 = arith.constant 0 : i32
    return %arg0, %c0_i32, %c0_i32_0 : i32, i32, i32
  }
}

</mosaic_0001>

<bundles_post_ra>
// kernel: tpu_custom_call.1
= control target key start
LH: loop header
LB: loop body
LE: loop exit
PB: predicated region body
PF: predicated region fallthrough
CT: control target
= control target key end

     0   :  { %9 = vsyncpa [#allocation5], 0  ;;  %s12529_s0 = inlined_call_operand.hbm [shape: f32[2,128,256], index: 0, kind: input, shape index: {}]   ;;  %s12530_s1 = inlined_call_operand.hbm [shape: bf16[256,768], index: 1, kind: input, shape index: {}]   ;;  %s12531_s2 = inlined_call_operand.hbm [shape: bf16[256,256], index: 2, kind: input, shape index: {}]   ;;  %s12532_s3 = inlined_call_operand.vmem [shape: f32[1,256], index: 3, kind: input, shape index: {}]   ;;  %s12533_s4 = inlined_call_operand.hbm [shape: f32[2,128,256], index: 4, kind: output, shape index: {}]  }
   0x1   :  { %11 = vsyncpa [#allocation5 + $0x1], 0 }
   0x2   :  { %12 = vsyncpa [#allocation8], 0 }
   0x3   :  { %13 = vsyncpa [#allocation6], 0 }
   0x4   :  { %15 = vsyncpa [#allocation6 + $0x1], 0  ;;  %s9631_s15 = smov 0   ;;  %s9633_s16 = smov 0  }
   0x5   :  { %s9635_s17 = smov 0   ;;  %s9637_s18 = smov 0  }
   0x6 LB: > { %s9652_s19 = sadd.s32 4294967295, %s9591_s18   ;;  %s7077_s20 = sadd.s32 4294967294, %s9591_s18   ;;  %s9591_s18 = sphi %s9637_s18, %s12859_s18   ;;  %s9587_s17 = sphi %s9635_s17, %s12858_s17   ;;  %s9583_s16 = sphi %s9633_s16, %s12857_s16   ;;  %s9579_s15 = sphi %s9631_s15, %s12856_s15  }
   0x7   : > { %p41_p0 = scmp.ne.s32.totalorder %s9583_s16, %s9579_s15  ;;  %p42_p1 = scmp.eq.s32.totalorder %s9652_s19, 0 }
   0x8   : > { %p128_p2 = scmp.eq.s32.totalorder %s9652_s19, 1  ;;  %p134_p3 = scmp.eq.s32.totalorder %s7077_s20, 1 }
   0x9   : > { %p9661_p4 = por %p42_p1, %p41_p0  ;;  %p7078_p5 = scmp.ge.s32.totalorder %s9591_s18, 1 }
   0xa   : > { %p9666_p6 = por %p134_p3, %p41_p0  ;;  %p141_p7 = scmp.lt.s32.totalorder %s9591_s18, 3 }
   0xb   : > { %s152_s25 = sshll.u32 %s12530_s1, 4  ;;  %s9593_s27 = smov [#allocation7]   ;;  %s153_s25 = int_to_ptr.hbm [resolvable:$true] %s152_s25 }
   0xc   : > { %p9674_p8 = pnand %p7078_p5, %p141_p7  ;;  %s154_s28 = sshll.u32 %s9593_s27, 4  ;;  %s155_s28 = int_to_ptr.vmem [resolvable:$true] %s154_s28 }
   0xd   : > { %s166_s5 = sshll.u32 %s12531_s2, 4  ;;  %s9594_s6 = smov 384   ;;  %s167_s5 = int_to_ptr.hbm [resolvable:$true] %s166_s5 }
   0xe   : > { %p8853_p9 = pneg %p9674_p8  ;;  %s9595_s7 = smov 24  }
   0xf   : > { %s9596_s8 = smov [#allocation9]   ;;  %s9597_s10 = smov 128  }
  0x10   : > { %p8854_p10 = pnand %p8853_p9, %p42_p1  ;;  %s168_s9 = sshll.u32 %s9596_s8, 4  ;;  %s169_s9 = int_to_ptr.vmem [resolvable:$true] %s168_s9 }
  0x11   : > { %s9598_s11 = smov 8   ;;  %s9687_s12 = sadd.s32 1, %s9591_s18  }
  0x12   : > { %8856 = dma.hbm_to_vmem [thread:$0]  (!%p8854_p10), %s153_s25, 12288, %s155_s28, [#allocation8], %s9594_s6, %s9594_s6, %s9595_s7  }
  0x13   : > { %8859 = dma.hbm_to_vmem [thread:$0]  (!%p8854_p10), %s167_s5, 4096, %s169_s9, [#allocation8], %s9597_s10, %s9597_s10, %s9598_s11  }
  0x14   : > { %s25_s13 = ssub.s32 %s9591_s18, %s9687_s12  ;;  %s28_s14 = sadd.s32 1, %s9587_s17 }
  0x15   : > { %p26_p12 = scmp.eq.s32.totalorder %s25_s13, 0  ;;  %p35_p13 = scmp.ne.s32.totalorder %s9587_s17, %s9583_s16 }
  0x16   : > { %p36_p0 = scmp.eq.s32.totalorder %s9591_s18, 0  ;;  %p8870_p7 = scmp.lt.s32.totalorder %s9591_s18, 2 }
  0x17   : > { %s9696_s20 = scalar_select %p26_p12, %s9587_s17, %s28_s14  }
  0x18   : > { %p37_p3 = por %p36_p0, %p35_p13  ;;  %p9700_p5 = por %p128_p2, %p35_p13 }
  0x19   : > { %s185_s24 = sand.u32 1, %s9587_s17   ;;  %s8503_s27 = sshll.u32 %s9591_s18, 8 }
  0x1a   : > { %s7082_s25 = sshll.u32 %s185_s24, 8  ;;  %s194_s30 = scalar_lea.hbm %s12529_s0, %s8503_s27 }
  0x1b   : > { %s189_s5 = scalar_lea.vmem [#allocation4], %s7082_s25  ;;  %s195_s7 = sshll.u32 %s194_s30, 4  ;;  %s196_s7 = int_to_ptr.hbm [resolvable:$true] %s195_s7 }
  0x1c   : > { %s197_s6 = sshll.u32 %s189_s5, 4  ;;  %p9710_p9 = pnand %p8870_p7, %p37_p3  ;;  %s198_s6 = int_to_ptr.vmem [resolvable:$true] %s197_s6 }
  0x1d   : > { %s186_s9 = scalar_lea.sflag [#allocation5], %s185_s24  ;;  %s9491_s10 = sshra.s32 %s196_s7, 4  ;;  %s9492_s10 = int_to_ptr.hbm [resolvable:$true] %s9491_s10 }
  0x1e   : > { %s9493_s11 = scalar_lea.hbm %s9492_s10, 256  ;;  %p9495_p10 = pneg %p9710_p9 }
  0x1f   : > { %p9494_p2 = scmp.ne.s32.totalorder %s9492_s10, %s9493_s11  ;;  %s9498_s25 = scalar_lea.hbm %s12529_s0, 512 }
  0x20   : > { %p9499_p0 = scmp.lt.s32.totalorder %s9492_s10, %s12529_s0  ;;  %p9500_p3 = scmp.lt.s32.totalorder %s9498_s25, %s9493_s11 }
  0x21   : > { %p9496_p12 = pnand %p9495_p10, %p9494_p2 }
  0x22   : > { %p9501_p7 = por %p9500_p3, %p9499_p0 }
  0x23   : > { %p9497_p13 = pneg %p9496_p12 }
  0x25   : > { %p9502_p11 = pnand %p9501_p7, %p9497_p13 }
  0x27   : > { %9505 = shalt.err (!%p9502_p11)
}
  0x28   : > { %s9599_s24 = smov 256   ;;  %s9600_s29 = smov 16  }
  0x29   : > { %8863 = dma.hbm_to_vmem [thread:$0]  (!%p9710_p9), %s196_s7, 4096, %s198_s6, %s186_s9, %s9599_s24, %s9599_s24, %s9600_s29  }
  0x2a   : > { %209 = sbr.rel (%p9674_p8) target bundleno = 2683 (0xa7b), region = 36 }
  0x2f   : > { %s9727_s30 = sand.u32 1, %s9583_s16  }
  0x30   : > { %s7086_s5 = sshll.u32 %s9727_s30, 8  ;;  %s212_s10 = scalar_lea.sflag [#allocation5], %s9727_s30 }
  0x31   : > { %s9733_s11 = scalar_lea.vmem [#allocation4], %s7086_s5 }
  0x32   : > { %9566 = dma.done.wait (%p9661_p4), %s212_s10, 4096  }
  0x33   : > { %9568 = vsyncadd (%p9661_p4), %s212_s10, 4294963200 }
  0x34   : > { %9570 = dma.done.wait (%p42_p1), [#allocation8], 16384  }
  0x35   : > { %9572 = vsyncadd (%p42_p1), [#allocation8], 4294950912  ;;  %v7260_v0 = vld [vmem:[#allocation7 + $0x150] sm:$0xf]  ;;  %v8549_v1 = vld [vmem:[#allocation7 + $0x164] sm:$0xf0] }
  0x36   : > { %v7452_v2 = vld [vmem:[#allocation7 + $0x2d0] sm:$0xf]  ;;  %v7261_v3 = vor.u32 %v8549_v1, %v7260_v0  ;;  %v8597_v4 = vld [vmem:[#allocation7 + $0x2e4] sm:$0xf0]  ;;  %v8546_v5 = vld [vmem:[#allocation7 + $0x154] sm:$0xf] }
  0x37   : > { %v7262_v6 = vld [vmem:[#allocation7 + $0x168] sm:$0xf0]  ;;  %v7453_v7 = vor.u32 %v8597_v4, %v7452_v2  ;;  %v8594_v9 = vld [vmem:[#allocation7 + $0x2d4] sm:$0xf]  ;;  %v7236_v11 = vld [vmem:[#allocation7 + $0x120] sm:$0xf] }
  0x38   : > { %v7265_v8 = vor.u32 %v8546_v5, %v7262_v6  ;;  %v7454_v10 = vld [vmem:[#allocation7 + $0x2e8] sm:$0xf0]  ;;  %875 = vmatpush.bf16.msra.mxu0 %v7261_v3  ;;  %v8543_v13 = vld [vmem:[#allocation7 + $0x134] sm:$0xf0]  ;;  %v7428_v14 = vld [vmem:[#allocation7 + $0x2a0] sm:$0xf] }
  0x39   : > { %v7457_v12 = vor.u32 %v8594_v9, %v7454_v10  ;;  %v8591_v15 = vld [vmem:[#allocation7 + $0x2b4] sm:$0xf0]  ;;  %924 = vmatpush.bf16.msra.mxu1 %v7453_v7  ;;  %v7237_v16 = vor.u32 %v8543_v13, %v7236_v11  ;;  %v8540_v18 = vld [vmem:[#allocation7 + $0x124] sm:$0xf]  ;;  %v7238_v19 = vld [vmem:[#allocation7 + $0x138] sm:$0xf0] }
  0x3a   : > { %973 = vmatpush.bf16.msra.mxu2 %v7265_v8  ;;  %v7429_v17 = vor.u32 %v8591_v15, %v7428_v14  ;;  %v8588_v20 = vld [vmem:[#allocation7 + $0x2a4] sm:$0xf]  ;;  %v7241_v21 = vor.u32 %v8540_v18, %v7238_v19  ;;  %v7430_v22 = vld [vmem:[#allocation7 + $0x2b8] sm:$0xf0]  ;;  %v7212_v23 = vld [vmem:[#allocation7 + $0xf0] sm:$0xf] }
  0x3b   : > { %1022 = vmatpush.bf16.msra.mxu3 %v7457_v12  ;;  %v8537_v24 = vld [vmem:[#allocation7 + $0x104] sm:$0xf0]  ;;  %v7433_v25 = vor.u32 %v8588_v20, %v7430_v22  ;;  %v7404_v26 = vld [vmem:[#allocation7 + $0x270] sm:$0xf]  ;;  %v8534_v28 = vld [vmem:[#allocation7 + $0xf4] sm:$0xf] }
  0x3c   : > { %v8585_v27 = vld [vmem:[#allocation7 + $0x284] sm:$0xf0]  ;;  %876 = vmatpush.bf16.msra.mxu0 %v7237_v16  ;;  %v7213_v29 = vor.u32 %v8537_v24, %v7212_v23  ;;  %v7214_v30 = vld [vmem:[#allocation7 + $0x108] sm:$0xf0]  ;;  %v8582_v31 = vld [vmem:[#allocation7 + $0x274] sm:$0xf] }
  0x3d   : > { %v7406_v32 = vld [vmem:[#allocation7 + $0x288] sm:$0xf0]  ;;  %925 = vmatpush.bf16.msra.mxu1 %v7429_v17  ;;  %v7405_v33 = vor.u32 %v8585_v27, %v7404_v26  ;;  %v7217_v34 = vor.u32 %v8534_v28, %v7214_v30  ;;  %v7188_v35 = vld [vmem:[#allocation7 + $0xc0] sm:$0xf]  ;;  %v8531_v36 = vld [vmem:[#allocation7 + $0xd4] sm:$0xf0] }
  0x3e   : > { %974 = vmatpush.bf16.msra.mxu2 %v7241_v21  ;;  %v7380_v37 = vld [vmem:[#allocation7 + $0x240] sm:$0xf]  ;;  %v7409_v38 = vor.u32 %v8582_v31, %v7406_v32  ;;  %v8579_v39 = vld [vmem:[#allocation7 + $0x254] sm:$0xf0]  ;;  %v8528_v40 = vld [vmem:[#allocation7 + $0xc4] sm:$0xf]  ;;  %v7189_v44 = vor.u32 %v8531_v36, %v7188_v35 }
  0x3f   : > { %1023 = vmatpush.bf16.msra.mxu3 %v7433_v25  ;;  %v7190_v41 = vld [vmem:[#allocation7 + $0xd8] sm:$0xf0]  ;;  %v8576_v42 = vld [vmem:[#allocation7 + $0x244] sm:$0xf]  ;;  %v7381_v45 = vor.u32 %v8579_v39, %v7380_v37  ;;  %v7164_v47 = vld [vmem:[#allocation7 + $0x90] sm:$0xf] }
  0x40   : > { %v7382_v43 = vld [vmem:[#allocation7 + $0x258] sm:$0xf0]  ;;  %877 = vmatpush.bf16.msra.mxu0 %v7213_v29  ;;  %v7193_v46 = vor.u32 %v8528_v40, %v7190_v41  ;;  %v8525_v48 = vld [vmem:[#allocation7 + $0xa4] sm:$0xf0]  ;;  %v7356_v49 = vld [vmem:[#allocation7 + $0x210] sm:$0xf] }
  0x41   : > { %926 = vmatpush.bf16.msra.mxu1 %v7405_v33  ;;  %v7385_v50 = vor.u32 %v8576_v42, %v7382_v43  ;;  %v8573_v51 = vld [vmem:[#allocation7 + $0x224] sm:$0xf0]  ;;  %v8522_v52 = vld [vmem:[#allocation7 + $0x94] sm:$0xf]  ;;  %v7166_v53 = vld [vmem:[#allocation7 + $0xa8] sm:$0xf0]  ;;  %v7165_v56 = vor.u32 %v8525_v48, %v7164_v47 }
  0x42   : > { %975 = vmatpush.bf16.msra.mxu2 %v7217_v34  ;;  %v8570_v54 = vld [vmem:[#allocation7 + $0x214] sm:$0xf]  ;;  %v7358_v55 = vld [vmem:[#allocation7 + $0x228] sm:$0xf0]  ;;  %v7357_v57 = vor.u32 %v8573_v51, %v7356_v49  ;;  %v7169_v58 = vor.u32 %v8522_v52, %v7166_v53  ;;  %v7140_v59 = vld [vmem:[#allocation7 + $0x60] sm:$0xf] }
  0x43   : > { %1024 = vmatpush.bf16.msra.mxu3 %v7409_v38  ;;  %v8519_v60 = vld [vmem:[#allocation7 + $0x74] sm:$0xf0]  ;;  %v7332_v61 = vld [vmem:[#allocation7 + $0x1e0] sm:$0xf]  ;;  %v7361_v62 = vor.u32 %v8570_v54, %v7358_v55  ;;  %v8516_v0 = vld [vmem:[#allocation7 + $0x64] sm:$0xf] }
  0x44   : > { %878 = vmatpush.bf16.msra.mxu0 %v7189_v44  ;;  %v8567_v63 = vld [vmem:[#allocation7 + $0x1f4] sm:$0xf0]  ;;  %v7142_v1 = vld [vmem:[#allocation7 + $0x78] sm:$0xf0]  ;;  %v8564_v2 = vld [vmem:[#allocation7 + $0x1e4] sm:$0xf]  ;;  %v7141_v4 = vor.u32 %v8519_v60, %v7140_v59 }
  0x45   : > { %927 = vmatpush.bf16.msra.mxu1 %v7381_v45  ;;  %v7334_v3 = vld [vmem:[#allocation7 + $0x1f8] sm:$0xf0]  ;;  %v7333_v5 = vor.u32 %v8567_v63, %v7332_v61  ;;  %v7145_v6 = vor.u32 %v8516_v0, %v7142_v1  ;;  %v7116_v7 = vld [vmem:[#allocation7 + $0x30] sm:$0xf]  ;;  %v8513_v8 = vld [vmem:[#allocation7 + $0x44] sm:$0xf0] }
  0x46   : > { %976 = vmatpush.bf16.msra.mxu2 %v7193_v46  ;;  %v7308_v9 = vld [vmem:[#allocation7 + $0x1b0] sm:$0xf]  ;;  %v7337_v10 = vor.u32 %v8564_v2, %v7334_v3  ;;  %v8561_v11 = vld [vmem:[#allocation7 + $0x1c4] sm:$0xf0]  ;;  %v8510_v12 = vld [vmem:[#allocation7 + $0x34] sm:$0xf]  ;;  %v7117_v16 = vor.u32 %v8513_v8, %v7116_v7 }
  0x47   : > { %1025 = vmatpush.bf16.msra.mxu3 %v7385_v50  ;;  %v7118_v13 = vld [vmem:[#allocation7 + $0x48] sm:$0xf0]  ;;  %v8558_v14 = vld [vmem:[#allocation7 + $0x1b4] sm:$0xf]  ;;  %v7309_v17 = vor.u32 %v8561_v11, %v7308_v9  ;;  %v7092_v19 = vld [vmem:[#allocation7] sm:$0xf] }
  0x48   : > { %879 = vmatpush.bf16.msra.mxu0 %v7165_v56  ;;  %v7310_v15 = vld [vmem:[#allocation7 + $0x1c8] sm:$0xf0]  ;;  %v7121_v18 = vor.u32 %v8510_v12, %v7118_v13  ;;  %v8507_v20 = vld [vmem:[#allocation7 + $0x14] sm:$0xf0]  ;;  %v7284_v21 = vld [vmem:[#allocation7 + $0x180] sm:$0xf] }
  0x49   : > { %928 = vmatpush.bf16.msra.mxu1 %v7357_v57  ;;  %v7313_v22 = vor.u32 %v8558_v14, %v7310_v15  ;;  %v8555_v23 = vld [vmem:[#allocation7 + $0x194] sm:$0xf0]  ;;  %v8504_v24 = vld [vmem:[#allocation7 + $0x4] sm:$0xf]  ;;  %v7094_v25 = vld [vmem:[#allocation7 + $0x18] sm:$0xf0]  ;;  %v7093_v28 = vor.u32 %v8507_v20, %v7092_v19 }
  0x4a   : > { %977 = vmatpush.bf16.msra.mxu2 %v7169_v58  ;;  %v8552_v26 = vld [vmem:[#allocation7 + $0x184] sm:$0xf]  ;;  %v7286_v27 = vld [vmem:[#allocation7 + $0x198] sm:$0xf0]  ;;  %v253_v30 = vld [vmem:[%s9733_s11 + $0x10] sm:$0xff]  ;;  %v7285_v31 = vor.u32 %v8555_v23, %v7284_v21  ;;  %v7097_v32 = vor.u32 %v8504_v24, %v7094_v25  ;;  %s9601_s21 = smov 96  }
  0x4b   : > { %1026 = vmatpush.bf16.msra.mxu3 %v7361_v62  ;;  %v251_v29 = vld [vmem:[%s9733_s11] sm:$0xff]  ;;  %v252_v33 = vld [vmem:[%s9733_s11 + $0x8] sm:$0xff]  ;;  %v254_v34 = vld [vmem:[%s9733_s11 + $0x18] sm:$0xff]  ;;  %v7289_v35 = vor.u32 %v8552_v26, %v7286_v27  ;;  %s9602_s26 = smov 64   ;;  %s9603_s6 = smov 32   ;;  %vm12590_vm0 = vcmask 261120  }
  0x4c   : > { %880 = vmatpush.bf16.msra.mxu0 %v7141_v4  ;;  %v9747_v36 = vpack.c.bf16 %v253_v30, %v251_v29  ;;  %v9749_v37 = vpack.c.bf16 %v254_v34, %v252_v33  ;;  %v255_v38 = vld [vmem:[%s9733_s11 + $0x20] sm:$0xff]  ;;  %v257_v39 = vld [vmem:[%s9733_s11 + $0x30] sm:$0xff]  ;;  %v256_v40 = vld [vmem:[%s9733_s11 + $0x28] sm:$0xff]  ;;  %s12412_s9 = scalar_lea.vmem [#allocation10], %s7086_s5  ;;  %s8840_s13 = sshll.u32 %s9652_s19, 8 }
  0x4d   : > { %929 = vmatpush.bf16.msra.mxu1 %v7333_v5  ;;  %v258_v41 = vld [vmem:[%s9733_s11 + $0x38] sm:$0xff]  ;;  %v9759_v42 = vpack.c.bf16 %v257_v39, %v255_v38  ;;  %v259_v44 = vld [vmem:[%s9733_s11 + $0x40] sm:$0xff]  ;;  %v261_v45 = vld [vmem:[%s9733_s11 + $0x50] sm:$0xff]  ;;  %s6981_s27 = scalar_lea.hbm %s12533_s4, %s8840_s13  ;;  %s6982_s28 = sshll.u32 %s12412_s9, 4  ;;  %s6983_s28 = int_to_ptr.vmem [resolvable:$true] %s6982_s28 }
  0x4e   : > { %978 = vmatpush.bf16.msra.mxu2 %v7145_v6  ;;  %v9761_v43 = vpack.c.bf16 %v258_v41, %v256_v40  ;;  %v260_v46 = vld [vmem:[%s9733_s11 + $0x48] sm:$0xff]  ;;  %v262_v47 = vld [vmem:[%s9733_s11 + $0x58] sm:$0xff]  ;;  %v9771_v48 = vpack.c.bf16 %v261_v45, %v259_v44  ;;  %v7270_v51 = vld [vmem:[#allocation7 + $0x170] sm:$0xf0]  ;;  %s6984_s24 = sshll.u32 %s6981_s27, 4  ;;  %s6970_s19 = scalar_lea.sflag [#allocation6], %s9727_s30  ;;  %s6985_s24 = int_to_ptr.hbm [resolvable:$true] %s6984_s24 }
  0x4f   : > { %1027 = vmatpush.bf16.msra.mxu3 %v7337_v10  ;;  %v9773_v49 = vpack.c.bf16 %v262_v47, %v260_v46  ;;  %v8547_v50 = vld [vmem:[#allocation7 + $0x15c] sm:$0xf]  ;;  %v7462_v54 = vld [vmem:[#allocation7 + $0x2f0] sm:$0xf0]  ;;  %v7268_v55 = vld [vmem:[#allocation7 + $0x158] sm:$0xf] }
  0x50   : > { %881 = vmatpush.bf16.msra.mxu0 %v7117_v16  ;;  %v8595_v52 = vld [vmem:[#allocation7 + $0x2dc] sm:$0xf]  ;;  %v7273_v53 = vor.u32 %v8547_v50, %v7270_v51  ;;  %v8550_v56 = vld [vmem:[#allocation7 + $0x16c] sm:$0xf0]  ;;  %v7460_v59 = vld [vmem:[#allocation7 + $0x2d8] sm:$0xf] }
  0x51   : > { %930 = vmatpush.bf16.msra.mxu1 %v7309_v17  ;;  %v7465_v57 = vor.u32 %v8595_v52, %v7462_v54  ;;  %v7269_v58 = vor.u32 %v8550_v56, %v7268_v55  ;;  %v8598_v60 = vld [vmem:[#allocation7 + $0x2ec] sm:$0xf0]  ;;  %v263_v62 = vld [vmem:[%s9733_s11 + $0x60] sm:$0xff]  ;;  %v264_v0 = vld [vmem:[%s9733_s11 + $0x68] sm:$0xff]  ;;  %s9535_s29 = sshra.s32 %s6985_s24, 4  ;;  %s9536_s29 = int_to_ptr.hbm [resolvable:$true] %s9535_s29 }
  0x52   : > { %979 = vmatpush.bf16.msra.mxu2 %v7121_v18  ;;  %v7461_v61 = vor.u32 %v8598_v60, %v7460_v59  ;;  %v265_v63 = vld [vmem:[%s9733_s11 + $0x70] sm:$0xff]  ;;  %v266_v1 = vld [vmem:[%s9733_s11 + $0x78] sm:$0xff]  ;;  %v8541_v4 = vld [vmem:[#allocation7 + $0x12c] sm:$0xf]  ;;  %s9537_s5 = scalar_lea.hbm %s9536_s29, 256  ;;  %p9542_p11 = scmp.lt.s32.totalorder %s9536_s29, %s12533_s4 }
  0x53   : > { %1028 = vmatpush.bf16.msra.mxu3 %v7313_v22  ;;  %v9783_v2 = vpack.c.bf16 %v265_v63, %v263_v62  ;;  %v9785_v3 = vpack.c.bf16 %v266_v1, %v264_v0  ;;  %v7246_v5 = vld [vmem:[#allocation7 + $0x140] sm:$0xf0]  ;;  %v8589_v6 = vld [vmem:[#allocation7 + $0x2ac] sm:$0xf]  ;;  %v7244_v9 = vld [vmem:[#allocation7 + $0x128] sm:$0xf]  ;;  %p9538_p1 = scmp.ne.s32.totalorder %s9536_s29, %s9537_s5 }
  0x54   : > { %882 = vmatpush.bf16.msra.mxu0 %v7093_v28  ;;  %v7249_v7 = vor.u32 %v8541_v4, %v7246_v5  ;;  %v7438_v8 = vld [vmem:[#allocation7 + $0x2c0] sm:$0xf0]  ;;  %v8544_v10 = vld [vmem:[#allocation7 + $0x13c] sm:$0xf0]  ;;  %v7436_v13 = vld [vmem:[#allocation7 + $0x2a8] sm:$0xf] }
  0x55   : > { %931 = vmatpush.bf16.msra.mxu1 %v7285_v31  ;;  %v7441_v11 = vor.u32 %v8589_v6, %v7438_v8  ;;  %v7245_v12 = vor.u32 %v8544_v10, %v7244_v9  ;;  %v8592_v14 = vld [vmem:[#allocation7 + $0x2bc] sm:$0xf0]  ;;  %v269_v17 = vld [vmem:[%s9733_s11 + $0x90] sm:$0xff]  ;;  %v268_v18 = vld [vmem:[%s9733_s11 + $0x88] sm:$0xff]  ;;  %p9539_p4 = pnand %p9538_p1, %p9700_p5 }
  0x56   : > { %980 = vmatpush.bf16.msra.mxu2 %v7097_v32  ;;  %v7437_v15 = vor.u32 %v8592_v14, %v7436_v13  ;;  %v267_v16 = vld [vmem:[%s9733_s11 + $0x80] sm:$0xff]  ;;  %v270_v19 = vld [vmem:[%s9733_s11 + $0x98] sm:$0xff]  ;;  %v7222_v23 = vld [vmem:[#allocation7 + $0x110] sm:$0xf0] }
  0x57   : > { %1029 = vmatpush.bf16.msra.mxu3 %v7289_v35  ;;  %883 = vmatmul.bf16.vlgmr.msra.gmra.mxu0 %v9747_v36  ;;  %v9795_v20 = vpack.c.bf16 %v269_v17, %v267_v16  ;;  %v9797_v21 = vpack.c.bf16 %v270_v19, %v268_v18  ;;  %v8535_v22 = vld [vmem:[#allocation7 + $0xfc] sm:$0xf]  ;;  %v7414_v26 = vld [vmem:[#allocation7 + $0x290] sm:$0xf0]  ;;  %v7220_v27 = vld [vmem:[#allocation7 + $0xf8] sm:$0xf]  ;;  %p9540_p8 = pneg %p9539_p4 }
  0x58   : > { %932 = vmatmul.bf16.vlgmr.msra.gmra.mxu1 %v9749_v37  ;;  %1071 = vmatpush.bf16.msrb.mxu0 %v7269_v58  ;;  %v8583_v24 = vld [vmem:[#allocation7 + $0x27c] sm:$0xf]  ;;  %v7225_v25 = vor.u32 %v8535_v22, %v7222_v23  ;;  %v8538_v28 = vld [vmem:[#allocation7 + $0x10c] sm:$0xf0]  ;;  %v7412_v31 = vld [vmem:[#allocation7 + $0x278] sm:$0xf] }
  0x59   : > { %981 = vmatmul.bf16.vlgmr.msra.gmra.mxu2 %v9747_v36  ;;  %1120 = vmatpush.bf16.msrb.mxu1 %v7461_v61  ;;  %v7417_v29 = vor.u32 %v8583_v24, %v7414_v26  ;;  %v7221_v30 = vor.u32 %v8538_v28, %v7220_v27  ;;  %v8586_v32 = vld [vmem:[#allocation7 + $0x28c] sm:$0xf0]  ;;  %v7196_v33 = vld [vmem:[#allocation7 + $0xc8] sm:$0xf]  ;;  %v8532_v35 = vld [vmem:[#allocation7 + $0xdc] sm:$0xf0] }
  0x5a   : > { %1030 = vmatmul.bf16.vlgmr.msra.gmra.mxu3 %v9749_v37  ;;  %1169 = vmatpush.bf16.msrb.mxu2 %v7273_v53  ;;  %v7413_v34 = vor.u32 %v8586_v32, %v7412_v31  ;;  %v7388_v38 = vld [vmem:[#allocation7 + $0x248] sm:$0xf]  ;;  %v8580_v39 = vld [vmem:[#allocation7 + $0x25c] sm:$0xf0]  ;;  %v7197_v40 = vor.u32 %v8532_v35, %v7196_v33  ;;  %v8529_v41 = vld [vmem:[#allocation7 + $0xcc] sm:$0xf] }
  0x5b   : > { %1218 = vmatpush.bf16.msrb.mxu3 %v7465_v57  ;;  %v7198_v44 = vld [vmem:[#allocation7 + $0xe0] sm:$0xf0]  ;;  %v8577_v45 = vld [vmem:[#allocation7 + $0x24c] sm:$0xf]  ;;  %v7389_v46 = vor.u32 %v8580_v39, %v7388_v38  ;;  %v273_v53 = vld [vmem:[%s9733_s11 + $0xb0] sm:$0xff] }
  0x5c   : > { %1072 = vmatpush.bf16.msrb.mxu0 %v7245_v12  ;;  %v7201_v47 = vor.u32 %v8529_v41, %v7198_v44  ;;  %v7390_v50 = vld [vmem:[#allocation7 + $0x260] sm:$0xf0]  ;;  %v272_v54 = vld [vmem:[%s9733_s11 + $0xa8] sm:$0xff]  ;;  %v274_v55 = vld [vmem:[%s9733_s11 + $0xb8] sm:$0xff] }
  0x5d   : > { %1121 = vmatpush.bf16.msrb.mxu1 %v7437_v15  ;;  %v7393_v51 = vor.u32 %v8577_v45, %v7390_v50  ;;  %v271_v52 = vld [vmem:[%s9733_s11 + $0xa0] sm:$0xff]  ;;  %v9809_v57 = vpack.c.bf16 %v274_v55, %v272_v54  ;;  %v7172_v58 = vld [vmem:[#allocation7 + $0x98] sm:$0xf]  ;;  %v8526_v59 = vld [vmem:[#allocation7 + $0xac] sm:$0xf0] }
  0x5e   : > { %1170 = vmatpush.bf16.msrb.mxu2 %v7249_v7  ;;  %v9807_v56 = vpack.c.bf16 %v273_v53, %v271_v52  ;;  %v7364_v60 = vld [vmem:[#allocation7 + $0x218] sm:$0xf]  ;;  %v7173_v61 = vor.u32 %v8526_v59, %v7172_v58  ;;  %v8574_v62 = vld [vmem:[#allocation7 + $0x22c] sm:$0xf0]  ;;  %v8523_v63 = vld [vmem:[#allocation7 + $0x9c] sm:$0xf] }
  0x5f   : > { %1219 = vmatpush.bf16.msrb.mxu3 %v7441_v11  ;;  %v7174_v0 = vld [vmem:[#allocation7 + $0xb0] sm:$0xf0]  ;;  %v7365_v1 = vor.u32 %v8574_v62, %v7364_v60  ;;  %v8571_v5 = vld [vmem:[#allocation7 + $0x21c] sm:$0xf]  ;;  %v7148_v7 = vld [vmem:[#allocation7 + $0x68] sm:$0xf] }
  0x60   : > { %1073 = vmatpush.bf16.msrb.mxu0 %v7221_v30  ;;  %v7177_v4 = vor.u32 %v8523_v63, %v7174_v0  ;;  %v7366_v6 = vld [vmem:[#allocation7 + $0x230] sm:$0xf0]  ;;  %v8520_v9 = vld [vmem:[#allocation7 + $0x7c] sm:$0xf0]  ;;  %v7340_v10 = vld [vmem:[#allocation7 + $0x1e8] sm:$0xf] }
  0x61   : > { %1122 = vmatpush.bf16.msrb.mxu1 %v7413_v34  ;;  %v7369_v8 = vor.u32 %v8571_v5, %v7366_v6  ;;  %v8568_v11 = vld [vmem:[#allocation7 + $0x1fc] sm:$0xf0]  ;;  %v7149_v12 = vor.u32 %v8520_v9, %v7148_v7  ;;  %v8517_v14 = vld [vmem:[#allocation7 + $0x6c] sm:$0xf]  ;;  %v7150_v15 = vld [vmem:[#allocation7 + $0x80] sm:$0xf0] }
  0x62   : > { %1171 = vmatpush.bf16.msrb.mxu2 %v7225_v25  ;;  %v7341_v13 = vor.u32 %v8568_v11, %v7340_v10  ;;  %v8565_v16 = vld [vmem:[#allocation7 + $0x1ec] sm:$0xf]  ;;  %v7153_v17 = vor.u32 %v8517_v14, %v7150_v15  ;;  %v7342_v18 = vld [vmem:[#allocation7 + $0x200] sm:$0xf0]  ;;  %v7124_v19 = vld [vmem:[#allocation7 + $0x38] sm:$0xf] }
  0x63   : > { %1220 = vmatpush.bf16.msrb.mxu3 %v7417_v29  ;;  %v8514_v22 = vld [vmem:[#allocation7 + $0x4c] sm:$0xf0]  ;;  %v7345_v23 = vor.u32 %v8565_v16, %v7342_v18  ;;  %v7316_v24 = vld [vmem:[#allocation7 + $0x1b8] sm:$0xf]  ;;  %v8511_v26 = vld [vmem:[#allocation7 + $0x3c] sm:$0xf] }
  0x64   : > { %1074 = vmatpush.bf16.msrb.mxu0 %v7197_v40  ;;  %v8562_v25 = vld [vmem:[#allocation7 + $0x1cc] sm:$0xf0]  ;;  %v7125_v27 = vor.u32 %v8514_v22, %v7124_v19  ;;  %v7126_v28 = vld [vmem:[#allocation7 + $0x50] sm:$0xf0]  ;;  %v8559_v29 = vld [vmem:[#allocation7 + $0x1bc] sm:$0xf] }
  0x65   : > { %1123 = vmatpush.bf16.msrb.mxu1 %v7389_v46  ;;  %v7318_v30 = vld [vmem:[#allocation7 + $0x1d0] sm:$0xf0]  ;;  %v7317_v31 = vor.u32 %v8562_v25, %v7316_v24  ;;  %v7129_v32 = vor.u32 %v8511_v26, %v7126_v28  ;;  %v275_v33 = vld [vmem:[%s9733_s11 + $0xc0] sm:$0xff]  ;;  %v276_v38 = vld [vmem:[%s9733_s11 + $0xc8] sm:$0xff] }
  0x66   : > { %1172 = vmatpush.bf16.msrb.mxu2 %v7201_v47  ;;  %v277_v34 = vld [vmem:[%s9733_s11 + $0xd0] sm:$0xff]  ;;  %v7321_v35 = vor.u32 %v8559_v29, %v7318_v30  ;;  %v278_v39 = vld [vmem:[%s9733_s11 + $0xd8] sm:$0xff]  ;;  %v7100_v41 = vld [vmem:[#allocation7 + $0x8] sm:$0xf] }
  0x67   : > { %888 = vmatmul.bf16.gmra.mxu0 %v9759_v42  ;;  %1221 = vmatpush.bf16.msrb.mxu3 %v7393_v51  ;;  %v9819_v40 = vpack.c.bf16 %v277_v34, %v275_v33  ;;  %v8508_v44 = vld [vmem:[#allocation7 + $0x1c] sm:$0xf0]  ;;  %v7292_v45 = vld [vmem:[#allocation7 + $0x188] sm:$0xf]  ;;  %v9821_v46 = vpack.c.bf16 %v278_v39, %v276_v38  ;;  %v8505_v51 = vld [vmem:[#allocation7 + $0xc] sm:$0xf] }
  0x68   : > { %937 = vmatmul.bf16.gmra.mxu1 %v9761_v43  ;;  %1075 = vmatpush.bf16.msrb.mxu0 %v7173_v61  ;;  %v7101_v47 = vor.u32 %v8508_v44, %v7100_v41  ;;  %v8556_v50 = vld [vmem:[#allocation7 + $0x19c] sm:$0xf0]  ;;  %v7102_v52 = vld [vmem:[#allocation7 + $0x20] sm:$0xf0]  ;;  %v8553_v55 = vld [vmem:[#allocation7 + $0x18c] sm:$0xf] }
  0x69   : > { %986 = vmatmul.bf16.gmra.mxu2 %v9759_v42  ;;  %1124 = vmatpush.bf16.msrb.mxu1 %v7365_v1  ;;  %v7293_v53 = vor.u32 %v8556_v50, %v7292_v45  ;;  %v7105_v54 = vor.u32 %v8505_v51, %v7102_v52  ;;  %v7294_v58 = vld [vmem:[#allocation7 + $0x1a0] sm:$0xf0]  ;;  %v281_v61 = vld [vmem:[%s9733_s11 + $0xf0] sm:$0xff]  ;;  %v280_v62 = vld [vmem:[%s9733_s11 + $0xe8] sm:$0xff] }
  0x6a   : > { %1035 = vmatmul.bf16.gmra.mxu3 %v9761_v43  ;;  %1173 = vmatpush.bf16.msrb.mxu2 %v7177_v4  ;;  %v7297_v59 = vor.u32 %v8553_v55, %v7294_v58  ;;  %v279_v60 = vld [vmem:[%s9733_s11 + $0xe0] sm:$0xff]  ;;  %v282_v63 = vld [vmem:[%s9733_s11 + $0xf8] sm:$0xff] }
  0x6b   : > { %1222 = vmatpush.bf16.msrb.mxu3 %v7369_v8  ;;  %v9831_v0 = vpack.c.bf16 %v281_v61, %v279_v60  ;;  %v9833_v1 = vpack.c.bf16 %v282_v63, %v280_v62 }
  0x6c   : > { %1076 = vmatpush.bf16.msrb.mxu0 %v7149_v12 }
  0x6d   : > { %1125 = vmatpush.bf16.msrb.mxu1 %v7341_v13 }
  0x6e   : > { %1174 = vmatpush.bf16.msrb.mxu2 %v7153_v17 }
  0x6f   : > { %1223 = vmatpush.bf16.msrb.mxu3 %v7345_v23 }
  0x70   : > { %1077 = vmatpush.bf16.msrb.mxu0 %v7125_v27 }
  0x71   : > { %1126 = vmatpush.bf16.msrb.mxu1 %v7317_v31 }
  0x72   : > { %1175 = vmatpush.bf16.msrb.mxu2 %v7129_v32 }
  0x73   : > { %1224 = vmatpush.bf16.msrb.mxu3 %v7321_v35 }
  0x74   : > { %1078 = vmatpush.bf16.msrb.mxu0 %v7101_v47 }
  0x75   : > { %1127 = vmatpush.bf16.msrb.mxu1 %v7293_v53 }
  0x76   : > { %1176 = vmatpush.bf16.msrb.mxu2 %v7105_v54 }
  0x77   : > { %893 = vmatmul.bf16.gmra.mxu0 %v9771_v48  ;;  %1225 = vmatpush.bf16.msrb.mxu3 %v7297_v59 }
  0x78   : > { %942 = vmatmul.bf16.gmra.mxu1 %v9773_v49 }
  0x79   : > { %991 = vmatmul.bf16.gmra.mxu2 %v9771_v48 }
  0x7a   : > { %1040 = vmatmul.bf16.gmra.mxu3 %v9773_v49 }
  0x87   : > { %898 = vmatmul.bf16.gmra.mxu0 %v9783_v2 }
  0x88   : > { %947 = vmatmul.bf16.gmra.mxu1 %v9785_v3 }
  0x89   : > { %996 = vmatmul.bf16.gmra.mxu2 %v9783_v2 }
  0x8a   : > { %1045 = vmatmul.bf16.gmra.mxu3 %v9785_v3 }
  0x97   : > { %903 = vmatmul.bf16.gmra.mxu0 %v9795_v20 }
  0x98   : > { %952 = vmatmul.bf16.gmra.mxu1 %v9797_v21 }
  0x99   : > { %1001 = vmatmul.bf16.gmra.mxu2 %v9795_v20 }
  0x9a   : > { %1050 = vmatmul.bf16.gmra.mxu3 %v9797_v21 }
  0xa7   : > { %908 = vmatmul.bf16.gmra.mxu0 %v9807_v56 }
  0xa8   : > { %957 = vmatmul.bf16.gmra.mxu1 %v9809_v57 }
  0xa9   : > { %1006 = vmatmul.bf16.gmra.mxu2 %v9807_v56 }
  0xaa   : > { %1055 = vmatmul.bf16.gmra.mxu3 %v9809_v57 }
  0xb7   : > { %913 = vmatmul.bf16.gmra.mxu0 %v9819_v40 }
  0xb8   : > { %962 = vmatmul.bf16.gmra.mxu1 %v9821_v46 }
  0xb9   : > { %1011 = vmatmul.bf16.gmra.mxu2 %v9819_v40 }
  0xba   : > { %1060 = vmatmul.bf16.gmra.mxu3 %v9821_v46 }
  0xc7   : > { %918 = vmatmul.bf16.gmra.mxu0 %v9831_v0 }
  0xc8   : > { %967 = vmatmul.bf16.gmra.mxu1 %v9833_v1 }
  0xc9   : > { %1016 = vmatmul.bf16.gmra.mxu2 %v9831_v0 }
  0xca   : > { %1065 = vmatmul.bf16.gmra.mxu3 %v9833_v1 }
  0xd4   : > { %v884_v4 = vpop.f32.mrf.mxu0 }
  0xd5   : > { %v933_v5 = vpop.f32.mrf.mxu1 }
  0xd6   : > { %v934_v6 = vadd.f32 %v933_v5, %v884_v4 }
  0xd7   : > { %1079 = vmatmul.bf16.vlgmr.msrb.gmra.mxu0 %v9747_v36 }
  0xd8   : > { %1128 = vmatmul.bf16.vlgmr.msrb.gmra.mxu1 %v9749_v37 }
  0xd9   : > { %1177 = vmatmul.bf16.vlgmr.msrb.gmra.mxu2 %v9747_v36 }
  0xda   : > { %1226 = vmatmul.bf16.vlgmr.msrb.gmra.mxu3 %v9749_v37 }
  0xdc   : > { %v982_v7 = vpop.f32.mrf.mxu2  ;;  %v886_v9 = vpop.f32.mrf.mxu0 }
  0xdd   : > { %v1031_v8 = vpop.f32.mrf.mxu3  ;;  %v935_v11 = vpop.f32.mrf.mxu1 }
  0xde   : > { %v1032_v10 = vadd.f32 %v1031_v8, %v982_v7  ;;  %v936_v16 = vadd.f32 %v935_v11, %v886_v9 }
  0xe0   : > { %v1463_v12 = vpack.c.bf16 %v1032_v10, %v934_v6 }
  0xe2   : > { %1511 = vst [vmem:[#allocation2] sm:$0xff] %v1463_v12 }
  0xe4   : > { %v984_v13 = vpop.f32.mrf.mxu2  ;;  %v889_v15 = vpop.f32.mrf.mxu0 }
  0xe5   : > { %v1033_v14 = vpop.f32.mrf.mxu3  ;;  %v938_v18 = vpop.f32.mrf.mxu1 }
  0xe6   : > { %v1034_v17 = vadd.f32 %v1033_v14, %v984_v13  ;;  %v939_v22 = vadd.f32 %v938_v18, %v889_v15 }
  0xe7   : > { %1084 = vmatmul.bf16.gmra.mxu0 %v9759_v42 }
  0xe8   : > { %v1466_v19 = vpack.c.bf16 %v1034_v17, %v936_v16  ;;  %1133 = vmatmul.bf16.gmra.mxu1 %v9761_v43 }
  0xe9   : > { %1182 = vmatmul.bf16.gmra.mxu2 %v9759_v42  ;;  %v7996_v29 = vld [vmem:[#allocation2 + $0x4] sm:$0xf]  ;;  %v7684_v30 = vld [vmem:[#allocation2] sm:$0xf] }
  0xea   : > { %1514 = vst [vmem:[#allocation2 + $0x18] sm:$0xff] %v1466_v19  ;;  %1231 = vmatmul.bf16.gmra.mxu3 %v9761_v43  ;;  %v7580_v31 = vld [vmem:[#allocation2] sm:$0xf]  ;;  %v8100_v58 = vld [vmem:[#allocation2 + $0x4] sm:$0xf] }
  0xeb   : > { %v8204_v59 = vld [vmem:[#allocation2 + $0x4] sm:$0xf]  ;;  %v7788_v62 = vld [vmem:[#allocation2] sm:$0xf] }
  0xec   : > { %v987_v23 = vpop.f32.mrf.mxu2  ;;  %v891_v25 = vpop.f32.mrf.mxu0 }
  0xed   : > { %v1036_v24 = vpop.f32.mrf.mxu3  ;;  %v940_v27 = vpop.f32.mrf.mxu1 }
  0xee   : > { %v1037_v26 = vadd.f32 %v1036_v24, %v987_v23  ;;  %v941_v47 = vadd.f32 %v940_v27, %v891_v25 }
  0xf0   : > { %v1469_v28 = vpack.c.bf16 %v1037_v26, %v939_v22 }
  0xf1   : > { %v8720_v32 = vld [vmem:[#allocation2 + $0x18] sm:$0xf0]  ;;  %v8648_v33 = vld [vmem:[#allocation2 + $0x14] sm:$0xf0] }
  0xf2   : > { %v8624_v34 = vld [vmem:[#allocation2 + $0x14] sm:$0xf0]  ;;  %1517 = vst [vmem:[#allocation2 + $0x30] sm:$0xff] %v1469_v28  ;;  %v7997_v35 = vor.u32 %v8720_v32, %v7996_v29  ;;  %v7685_v38 = vor.u32 %v8648_v33, %v7684_v30  ;;  %v8744_v52 = vld [vmem:[#allocation2 + $0x18] sm:$0xf0] }
  0xf3   : > { %v7581_v39 = vor.u32 %v8624_v34, %v7580_v31  ;;  %v8768_v53 = vld [vmem:[#allocation2 + $0x18] sm:$0xf0]  ;;  %v8672_v55 = vld [vmem:[#allocation2 + $0x14] sm:$0xf0]  ;;  %v8101_v60 = vor.u32 %v8744_v52, %v8100_v58 }
  0xf4   : > { %4633 = vrot.lane.b32.xlu1 %v7997_v35, %s9601_s21  ;;  %2841 = vrot.lane.b32.xlu0 %v7685_v38, %s9602_s26  ;;  %v989_v41 = vpop.f32.mrf.mxu2  ;;  %v894_v45 = vpop.f32.mrf.mxu0  ;;  %v8205_v61 = vor.u32 %v8768_v53, %v8204_v59  ;;  %v7789_v63 = vor.u32 %v8672_v55, %v7788_v62  ;;  %v7278_v62 = vld [vmem:[#allocation7 + $0x178] sm:$0xf0] }
  0xf5   : > { %2206 = vrot.lane.b32.xlu2 %v7581_v39, %s9601_s21  ;;  %v1038_v44 = vpop.f32.mrf.mxu3  ;;  %v943_v51 = vpop.f32.mrf.mxu1 }
  0xf6   : > { %v1039_v50 = vadd.f32 %v1038_v44, %v989_v41  ;;  %v944_v4 = vadd.f32 %v943_v51, %v894_v45 }
  0xf7   : > { %1089 = vmatmul.bf16.gmra.mxu0 %v9771_v48 }
  0xf8   : > { %v1472_v54 = vpack.c.bf16 %v1039_v50, %v941_v47  ;;  %1138 = vmatmul.bf16.gmra.mxu1 %v9773_v49 }
  0xf9   : > { %1187 = vmatmul.bf16.gmra.mxu2 %v9771_v48  ;;  %v8104_v11 = vld [vmem:[#allocation2 + $0x34] sm:$0xf]  ;;  %v7688_v12 = vld [vmem:[#allocation2 + $0x30] sm:$0xf] }
  0xfa   : > { %1520 = vst [vmem:[#allocation2 + $0x48] sm:$0xff] %v1472_v54  ;;  %1236 = vmatmul.bf16.gmra.mxu3 %v9773_v49  ;;  %v7584_v13 = vld [vmem:[#allocation2 + $0x30] sm:$0xf]  ;;  %v8000_v31 = vld [vmem:[#allocation2 + $0x34] sm:$0xf] }
  0xfb   : > { %v7792_v32 = vld [vmem:[#allocation2 + $0x30] sm:$0xf]  ;;  %v8208_v51 = vld [vmem:[#allocation2 + $0x34] sm:$0xf] }
  0xfc   : > { %5267 = vrot.lane.b32.xlu1 %v8101_v60, %s9602_s26  ;;  %5901 = vrot.lane.b32.xlu0 %v8205_v61, %s9603_s6  ;;  %v992_v5 = vpop.f32.mrf.mxu2  ;;  %v896_v7 = vpop.f32.mrf.mxu0  ;;  %v8548_v61 = vld [vmem:[#allocation7 + $0x164] sm:$0xf] }
  0xfd   : > { %3476 = vrot.lane.b32.xlu2 %v7789_v63, %s9603_s6  ;;  %v1041_v6 = vpop.f32.mrf.mxu3  ;;  %v945_v9 = vpop.f32.mrf.mxu1 }
  0xfe   : > { %v1042_v8 = vadd.f32 %v1041_v6, %v992_v5  ;;  %v946_v25 = vadd.f32 %v945_v9, %v896_v7  ;;  %v8596_v5 = vld [vmem:[#allocation7 + $0x2e4] sm:$0xf]  ;;  %v7470_v6 = vld [vmem:[#allocation7 + $0x2f8] sm:$0xf0] }
  0xff   : > { %v7473_v9 = vor.u32 %v8596_v5, %v7470_v6 }
 0x100   : > { %v1475_v10 = vpack.c.bf16 %v1042_v8, %v944_v4  ;;  %v7281_v4 = vor.u32 %v8548_v61, %v7278_v62 }
 0x101   : > { %v8745_v14 = vld [vmem:[#allocation2 + $0x48] sm:$0xf0]  ;;  %v8649_v15 = vld [vmem:[#allocation2 + $0x44] sm:$0xf0]  ;;  %1414 = vmatpush.bf16.msra.mxu3 %v7473_v9  ;;  %v7252_v9 = vld [vmem:[#allocation7 + $0x130] sm:$0xf] }
 0x102   : > { %v8625_v16 = vld [vmem:[#allocation2 + $0x44] sm:$0xf0]  ;;  %1523 = vst [vmem:[#allocation2 + $0x60] sm:$0xff] %v1475_v10  ;;  %v8105_v17 = vor.u32 %v8745_v14, %v8104_v11  ;;  %v7689_v18 = vor.u32 %v8649_v15, %v7688_v12  ;;  %v8721_v28 = vld [vmem:[#allocation2 + $0x48] sm:$0xf0]  ;;  %1365 = vmatpush.bf16.msra.mxu2 %v7281_v4 }
 0x103   : > { %v7585_v19 = vor.u32 %v8625_v16, %v7584_v13  ;;  %v8673_v29 = vld [vmem:[#allocation2 + $0x44] sm:$0xf0]  ;;  %v8001_v33 = vor.u32 %v8721_v28, %v8000_v31  ;;  %v8769_v47 = vld [vmem:[#allocation2 + $0x48] sm:$0xf0]  ;;  %v8599_v31 = vld [vmem:[#allocation7 + $0x2f4] sm:$0xf0] }
 0x104   : > { %2843 = vrot.lane.b32.xlu1 %v7689_v18, %s9602_s26  ;;  %v994_v22 = vpop.f32.mrf.mxu2  ;;  %v899_v24 = vpop.f32.mrf.mxu0  ;;  %v7793_v34 = vor.u32 %v8673_v29, %v7792_v32  ;;  %v8209_v58 = vor.u32 %v8769_v47, %v8208_v51  ;;  %v7230_v4 = vld [vmem:[#allocation7 + $0x118] sm:$0xf0] }
 0x105   : > { %2208 = vrot.lane.b32.xlu0 %v7585_v19, %s9601_s21  ;;  %5269 = vrot.lane.b32.xlu2 %v8105_v17, %s9602_s26  ;;  %v1043_v23 = vpop.f32.mrf.mxu3  ;;  %v948_v27 = vpop.f32.mrf.mxu1 }
 0x106   : > { %v1044_v26 = vadd.f32 %v1043_v23, %v994_v22  ;;  %v949_v35 = vadd.f32 %v948_v27, %v899_v24 }
 0x107   : > { %1094 = vmatmul.bf16.gmra.mxu0 %v9783_v2 }
 0x108   : > { %v1478_v30 = vpack.c.bf16 %v1044_v26, %v946_v25  ;;  %1143 = vmatmul.bf16.gmra.mxu1 %v9785_v3  ;;  %v7276_v25 = vld [vmem:[#allocation7 + $0x160] sm:$0xf]  ;;  %v8551_v26 = vld [vmem:[#allocation7 + $0x174] sm:$0xf0] }
 0x109   : > { %1192 = vmatmul.bf16.gmra.mxu2 %v9783_v2  ;;  %v7692_v52 = vld [vmem:[#allocation2 + $0x60] sm:$0xf]  ;;  %v8004_v17 = vld [vmem:[#allocation2 + $0x64] sm:$0xf]  ;;  %v7277_v29 = vor.u32 %v8551_v26, %v7276_v25  ;;  %v8578_v25 = vld [vmem:[#allocation7 + $0x254] sm:$0xf] }
 0x10a   : > { %1526 = vst [vmem:[#allocation2 + $0x78] sm:$0xff] %v1478_v30  ;;  %1241 = vmatmul.bf16.gmra.mxu3 %v9785_v3  ;;  %v7588_v54 = vld [vmem:[#allocation2 + $0x60] sm:$0xf]  ;;  %v8212_v23 = vld [vmem:[#allocation2 + $0x64] sm:$0xf] }
 0x10b   : > { %v7796_v18 = vld [vmem:[#allocation2 + $0x60] sm:$0xf]  ;;  %1267 = vmatpush.bf16.msra.mxu0 %v7277_v29  ;;  %v7398_v29 = vld [vmem:[#allocation7 + $0x268] sm:$0xf0] }
 0x10c   : > { %4635 = vrot.lane.b32.xlu1 %v8001_v33, %s9601_s21  ;;  %v997_v38 = vpop.f32.mrf.mxu2  ;;  %v901_v41 = vpop.f32.mrf.mxu0  ;;  %v7468_v30 = vld [vmem:[#allocation7 + $0x2e0] sm:$0xf] }
 0x10d   : > { %3478 = vrot.lane.b32.xlu0 %v7793_v34, %s9603_s6  ;;  %v1046_v39 = vpop.f32.mrf.mxu3  ;;  %v950_v45 = vpop.f32.mrf.mxu1  ;;  %v7469_v34 = vor.u32 %v8599_v31, %v7468_v30  ;;  %v7401_v31 = vor.u32 %v8578_v25, %v7398_v29  ;;  %v8527_v29 = vld [vmem:[#allocation7 + $0xb4] sm:$0xf0] }
 0x10e   : > { %v1047_v44 = vadd.f32 %v1046_v39, %v997_v38  ;;  %v951_v10 = vadd.f32 %v950_v45, %v901_v41  ;;  %v8542_v39 = vld [vmem:[#allocation7 + $0x134] sm:$0xf]  ;;  %v7254_v41 = vld [vmem:[#allocation7 + $0x148] sm:$0xf0] }
 0x10f   : > { %1316 = vmatpush.bf16.msra.mxu1 %v7469_v34  ;;  %v7257_v47 = vor.u32 %v8542_v39, %v7254_v41 }
 0x110   : > { %v1481_v50 = vpack.c.bf16 %v1047_v44, %v949_v35  ;;  %v8590_v44 = vld [vmem:[#allocation7 + $0x2b4] sm:$0xf] }
 0x111   : > { %v8650_v53 = vld [vmem:[#allocation2 + $0x74] sm:$0xf0]  ;;  %v8722_v13 = vld [vmem:[#allocation2 + $0x78] sm:$0xf0]  ;;  %1366 = vmatpush.bf16.msra.mxu2 %v7257_v47  ;;  %v8524_v47 = vld [vmem:[#allocation7 + $0xa4] sm:$0xf] }
 0x112   : > { %v8626_v55 = vld [vmem:[#allocation2 + $0x74] sm:$0xf0]  ;;  %1529 = vst [vmem:[#allocation2 + $0x90] sm:$0xff] %v1481_v50  ;;  %v7693_v59 = vor.u32 %v8650_v53, %v7692_v52  ;;  %v8770_v16 = vld [vmem:[#allocation2 + $0x78] sm:$0xf0]  ;;  %v8005_v19 = vor.u32 %v8722_v13, %v8004_v17 }
 0x113   : > { %v7589_v60 = vor.u32 %v8626_v55, %v7588_v54  ;;  %v8674_v14 = vld [vmem:[#allocation2 + $0x74] sm:$0xf0]  ;;  %v8213_v24 = vor.u32 %v8770_v16, %v8212_v23  ;;  %v8746_v45 = vld [vmem:[#allocation2 + $0x78] sm:$0xf0]  ;;  %v7446_v50 = vld [vmem:[#allocation7 + $0x2c8] sm:$0xf0] }
 0x114   : > { %2845 = vrot.lane.b32.xlu2 %v7693_v59, %s9602_s26  ;;  %v999_v63 = vpop.f32.mrf.mxu2  ;;  %v904_v8 = vpop.f32.mrf.mxu0  ;;  %v7797_v22 = vor.u32 %v8674_v14, %v7796_v18  ;;  %v8108_v52 = vld [vmem:[#allocation2 + $0x64] sm:$0xf]  ;;  %v7449_v54 = vor.u32 %v8590_v44, %v7446_v50  ;;  %v8545_v13 = vld [vmem:[#allocation7 + $0x144] sm:$0xf0]  ;;  %v7444_v14 = vld [vmem:[#allocation7 + $0x2b0] sm:$0xf] }
 0x115   : > { %5903 = vrot.lane.b32.xlu0 %v8209_v58, %s9603_s6  ;;  %2210 = vrot.lane.b32.xlu1 %v7589_v60, %s9601_s21  ;;  %v1048_v7 = vpop.f32.mrf.mxu3  ;;  %v953_v12 = vpop.f32.mrf.mxu1  ;;  %v8109_v60 = vor.u32 %v8746_v45, %v8108_v52  ;;  %v8530_v23 = vld [vmem:[#allocation7 + $0xd4] sm:$0xf]  ;;  %v8587_v45 = vld [vmem:[#allocation7 + $0x294] sm:$0xf0]  ;;  %v7182_v50 = vld [vmem:[#allocation7 + $0xb8] sm:$0xf0] }
 0x116   : > { %v1049_v11 = vadd.f32 %v1048_v7, %v999_v63  ;;  %v954_v27 = vadd.f32 %v953_v12, %v904_v8  ;;  %1415 = vmatpush.bf16.msra.mxu3 %v7449_v54  ;;  %v8536_v63 = vld [vmem:[#allocation7 + $0x104] sm:$0xf]  ;;  %v7422_v8 = vld [vmem:[#allocation7 + $0x298] sm:$0xf0]  ;;  %v7185_v54 = vor.u32 %v8524_v47, %v7182_v50 }
 0x117   : > { %1099 = vmatmul.bf16.gmra.mxu0 %v9795_v20  ;;  %v7233_v6 = vor.u32 %v8536_v63, %v7230_v4  ;;  %v8584_v7 = vld [vmem:[#allocation7 + $0x284] sm:$0xf]  ;;  %v8533_v63 = vld [vmem:[#allocation7 + $0xe4] sm:$0xf0]  ;;  %v7396_v4 = vld [vmem:[#allocation7 + $0x250] sm:$0xf] }
 0x118   : > { %v1484_v15 = vpack.c.bf16 %v1049_v11, %v951_v10  ;;  %1148 = vmatmul.bf16.gmra.mxu1 %v9797_v21  ;;  %v7425_v12 = vor.u32 %v8584_v7, %v7422_v8  ;;  %v8560_v47 = vld [vmem:[#allocation7 + $0x1c4] sm:$0xf]  ;;  %v7326_v50 = vld [vmem:[#allocation7 + $0x1d8] sm:$0xf0] }
 0x119   : > { %1197 = vmatmul.bf16.gmra.mxu2 %v9795_v20  ;;  %v8216_v53 = vld [vmem:[#allocation2 + $0x94] sm:$0xf]  ;;  %v7696_v58 = vld [vmem:[#allocation2 + $0x90] sm:$0xf] }
 0x11a   : > { %1532 = vst [vmem:[#allocation2 + $0xa8] sm:$0xff] %v1484_v15  ;;  %1246 = vmatmul.bf16.gmra.mxu3 %v9797_v21  ;;  %v8593_v15 = vld [vmem:[#allocation7 + $0x2c4] sm:$0xf0]  ;;  %1367 = vmatpush.bf16.msra.mxu2 %v7233_v6  ;;  %v7800_v34 = vld [vmem:[#allocation2 + $0x90] sm:$0xf] }
 0x11b   : > { %1416 = vmatpush.bf16.msra.mxu3 %v7425_v12  ;;  %v8518_v12 = vld [vmem:[#allocation7 + $0x74] sm:$0xf] }
 0x11c   : > { %3480 = vrot.lane.b32.xlu2 %v7797_v22, %s9603_s6  ;;  %v1002_v28 = vpop.f32.mrf.mxu2  ;;  %v906_v33 = vpop.f32.mrf.mxu0  ;;  %v7445_v22 = vor.u32 %v8593_v15, %v7444_v14  ;;  %v8566_v14 = vld [vmem:[#allocation7 + $0x1f4] sm:$0xf] }
 0x11d   : > { %4637 = vrot.lane.b32.xlu0 %v8005_v19, %s9601_s21  ;;  %5905 = vrot.lane.b32.xlu1 %v8213_v24, %s9603_s6  ;;  %v1051_v32 = vpop.f32.mrf.mxu3  ;;  %v955_v38 = vpop.f32.mrf.mxu1  ;;  %v7253_v19 = vor.u32 %v8545_v13, %v7252_v9  ;;  %v7206_v24 = vld [vmem:[#allocation7 + $0xe8] sm:$0xf0] }
 0x11e   : > { %v1052_v35 = vadd.f32 %v1051_v32, %v1002_v28  ;;  %v956_v16 = vadd.f32 %v955_v38, %v906_v33  ;;  %v7209_v28 = vor.u32 %v8530_v23, %v7206_v24  ;;  %1317 = vmatpush.bf16.msra.mxu1 %v7445_v22  ;;  %v7228_v32 = vld [vmem:[#allocation7 + $0x100] sm:$0xf]  ;;  %v8539_v33 = vld [vmem:[#allocation7 + $0x114] sm:$0xf0]  ;;  %v7158_v13 = vld [vmem:[#allocation7 + $0x88] sm:$0xf0] }
 0x11f   : > { %v7420_v38 = vld [vmem:[#allocation7 + $0x280] sm:$0xf]  ;;  %1268 = vmatpush.bf16.msra.mxu0 %v7253_v19  ;;  %v7229_v44 = vor.u32 %v8539_v33, %v7228_v32  ;;  %1417 = vmatpush.bf16.msra.mxu3 %v7401_v31  ;;  %v8008_v19 = vld [vmem:[#allocation2 + $0x94] sm:$0xf]  ;;  %v8575_v33 = vld [vmem:[#allocation7 + $0x234] sm:$0xf0] }
 0x120   : > { %v1487_v51 = vpack.c.bf16 %v1052_v35, %v954_v27  ;;  %v7592_v35 = vld [vmem:[#allocation2 + $0x90] sm:$0xf]  ;;  %1368 = vmatpush.bf16.msra.mxu2 %v7209_v28  ;;  %v7180_v28 = vld [vmem:[#allocation7 + $0xa0] sm:$0xf] }
 0x121   : > { %v8771_v55 = vld [vmem:[#allocation2 + $0xa8] sm:$0xf0]  ;;  %v8651_v59 = vld [vmem:[#allocation2 + $0xa4] sm:$0xf0]  ;;  %v7181_v31 = vor.u32 %v8527_v29, %v7180_v28  ;;  %v7372_v32 = vld [vmem:[#allocation7 + $0x220] sm:$0xf] }
 0x122   : > { %1535 = vst [vmem:[#allocation2 + $0xc0] sm:$0xff] %v1487_v51  ;;  %v8217_v61 = vor.u32 %v8771_v55, %v8216_v53  ;;  %v7697_v62 = vor.u32 %v8651_v59, %v7696_v58  ;;  %v8675_v26 = vld [vmem:[#allocation2 + $0xa4] sm:$0xf0]  ;;  %v7421_v53 = vor.u32 %v8587_v45, %v7420_v38  ;;  %v8572_v55 = vld [vmem:[#allocation7 + $0x224] sm:$0xf] }
 0x123   : > { %v8627_v27 = vld [vmem:[#allocation2 + $0xa4] sm:$0xf0]  ;;  %v7801_v39 = vor.u32 %v8675_v26, %v7800_v34  ;;  %v7374_v58 = vld [vmem:[#allocation7 + $0x238] sm:$0xf0]  ;;  %v8747_v7 = vld [vmem:[#allocation2 + $0xa8] sm:$0xf0]  ;;  %1269 = vmatpush.bf16.msra.mxu0 %v7229_v44  ;;  %v7373_v44 = vor.u32 %v8575_v33, %v7372_v32 }
 0x124   : > { %5271 = vrot.lane.b32.xlu2 %v8109_v60, %s9602_s26  ;;  %v1004_v5 = vpop.f32.mrf.mxu2  ;;  %v909_v11 = vpop.f32.mrf.mxu0  ;;  %v7593_v41 = vor.u32 %v8627_v27, %v7592_v35  ;;  %v8723_v8 = vld [vmem:[#allocation2 + $0xa8] sm:$0xf0]  ;;  %1318 = vmatpush.bf16.msra.mxu1 %v7421_v53  ;;  %v8512_v34 = vld [vmem:[#allocation7 + $0x44] sm:$0xf]  ;;  %v7134_v45 = vld [vmem:[#allocation7 + $0x58] sm:$0xf0] }
 0x125   : > { %2847 = vrot.lane.b32.xlu0 %v7697_v62, %s9602_s26  ;;  %5907 = vrot.lane.b32.xlu1 %v8217_v61, %s9603_s6  ;;  %v1053_v10 = vpop.f32.mrf.mxu3  ;;  %v958_v18 = vpop.f32.mrf.mxu1  ;;  %v7377_v61 = vor.u32 %v8572_v55, %v7374_v58  ;;  %v7204_v62 = vld [vmem:[#allocation7 + $0xd0] sm:$0xf]  ;;  %v8009_v26 = vor.u32 %v8723_v8, %v8008_v19  ;;  %v8521_v58 = vld [vmem:[#allocation7 + $0x84] sm:$0xf0]  ;;  %v8515_v19 = vld [vmem:[#allocation7 + $0x54] sm:$0xf0] }
 0x126   : > { %v1054_v17 = vadd.f32 %v1053_v10, %v1004_v5  ;;  %v959_v51 = vadd.f32 %v958_v18, %v909_v11  ;;  %v7205_v9 = vor.u32 %v8533_v63, %v7204_v62  ;;  %v8581_v10 = vld [vmem:[#allocation7 + $0x264] sm:$0xf0]  ;;  %1369 = vmatpush.bf16.msra.mxu2 %v7185_v54  ;;  %v7350_v18 = vld [vmem:[#allocation7 + $0x208] sm:$0xf0]  ;;  %v7137_v54 = vor.u32 %v8512_v34, %v7134_v45  ;;  %v7156_v55 = vld [vmem:[#allocation7 + $0x70] sm:$0xf] }
 0x127   : > { %1104 = vmatmul.bf16.gmra.mxu0 %v9807_v56  ;;  %1418 = vmatpush.bf16.msra.mxu3 %v7377_v61  ;;  %v7397_v11 = vor.u32 %v8581_v10, %v7396_v4  ;;  %v7353_v24 = vor.u32 %v8566_v14, %v7350_v18  ;;  %v7329_v61 = vor.u32 %v8560_v47, %v7326_v50  ;;  %v8569_v63 = vld [vmem:[#allocation7 + $0x204] sm:$0xf0]  ;;  %v8506_v4 = vld [vmem:[#allocation7 + $0x14] sm:$0xf]  ;;  %v7132_v18 = vld [vmem:[#allocation7 + $0x40] sm:$0xf] }
 0x128   : > { %v1490_v30 = vpack.c.bf16 %v1054_v17, %v956_v16  ;;  %1153 = vmatmul.bf16.gmra.mxu1 %v9809_v57  ;;  %v8112_v16 = vld [vmem:[#allocation2 + $0x94] sm:$0xf]  ;;  %v7161_v17 = vor.u32 %v8518_v12, %v7158_v13  ;;  %1270 = vmatpush.bf16.msra.mxu0 %v7205_v9  ;;  %v7157_v62 = vor.u32 %v8521_v58, %v7156_v55  ;;  %v7300_v32 = vld [vmem:[#allocation7 + $0x190] sm:$0xf] }
 0x129   : > { %1202 = vmatmul.bf16.gmra.mxu2 %v9807_v56  ;;  %v7700_v22 = vld [vmem:[#allocation2 + $0xc0] sm:$0xf]  ;;  %v8113_v25 = vor.u32 %v8747_v7, %v8112_v16  ;;  %1319 = vmatpush.bf16.msra.mxu1 %v7397_v11  ;;  %v8220_v10 = vld [vmem:[#allocation2 + $0xc4] sm:$0xf] }
 0x12a   : > { %1538 = vst [vmem:[#allocation2 + $0xd8] sm:$0xff] %v1490_v30  ;;  %1251 = vmatmul.bf16.gmra.mxu3 %v9809_v57  ;;  %1370 = vmatpush.bf16.msra.mxu2 %v7161_v17  ;;  %v7596_v11 = vld [vmem:[#allocation2 + $0xc0] sm:$0xf] }
 0x12b   : > { %1419 = vmatpush.bf16.msra.mxu3 %v7353_v24  ;;  %v7804_v14 = vld [vmem:[#allocation2 + $0xc0] sm:$0xf] }
 0x12c   : > { %2212 = vrot.lane.b32.xlu2 %v7593_v41, %s9601_s21  ;;  %v1007_v52 = vpop.f32.mrf.mxu2  ;;  %v911_v60 = vpop.f32.mrf.mxu0  ;;  %1271 = vmatpush.bf16.msra.mxu0 %v7181_v31  ;;  %v8509_v31 = vld [vmem:[#allocation7 + $0x24] sm:$0xf0] }
 0x12d   : > { %3482 = vrot.lane.b32.xlu0 %v7801_v39, %s9603_s6  ;;  %v1056_v59 = vpop.f32.mrf.mxu3  ;;  %v960_v6 = vpop.f32.mrf.mxu1  ;;  %1320 = vmatpush.bf16.msra.mxu1 %v7373_v44 }
 0x12e   : > { %v1057_v5 = vadd.f32 %v1056_v59, %v1007_v52  ;;  %v7348_v59 = vld [vmem:[#allocation7 + $0x1f0] sm:$0xf]  ;;  %1371 = vmatpush.bf16.msra.mxu2 %v7137_v54 }
 0x12f   : > { %v7349_v9 = vor.u32 %v8569_v63, %v7348_v59  ;;  %1420 = vmatpush.bf16.msra.mxu3 %v7329_v61 }
 0x130   : > { %v1493_v15 = vpack.c.bf16 %v1057_v5, %v959_v51  ;;  %v961_v51 = vadd.f32 %v960_v6, %v911_v60  ;;  %v7110_v5 = vld [vmem:[#allocation7 + $0x28] sm:$0xf0]  ;;  %v8554_v60 = vld [vmem:[#allocation7 + $0x194] sm:$0xf]  ;;  %1272 = vmatpush.bf16.msra.mxu0 %v7157_v62 }
 0x131   : > { %v8652_v23 = vld [vmem:[#allocation2 + $0xd4] sm:$0xf0]  ;;  %v8772_v39 = vld [vmem:[#allocation2 + $0xd8] sm:$0xf0]  ;;  %v7302_v6 = vld [vmem:[#allocation7 + $0x1a8] sm:$0xf0]  ;;  %v7113_v12 = vor.u32 %v8506_v4, %v7110_v5  ;;  %1321 = vmatpush.bf16.msra.mxu1 %v7349_v9 }
 0x132   : > { %1541 = vst [vmem:[#allocation2 + $0xf0] sm:$0xff] %v1493_v15  ;;  %v7701_v27 = vor.u32 %v8652_v23, %v7700_v22  ;;  %v8628_v41 = vld [vmem:[#allocation2 + $0xd4] sm:$0xf0]  ;;  %v8221_v13 = vor.u32 %v8772_v39, %v8220_v10  ;;  %v7305_v17 = vor.u32 %v8554_v60, %v7302_v6  ;;  %v7324_v22 = vld [vmem:[#allocation7 + $0x1c0] sm:$0xf] }
 0x133   : > { %v8676_v8 = vld [vmem:[#allocation2 + $0xd4] sm:$0xf0]  ;;  %v7597_v15 = vor.u32 %v8628_v41, %v7596_v11  ;;  %1372 = vmatpush.bf16.msra.mxu2 %v7113_v12  ;;  %v8724_v44 = vld [vmem:[#allocation2 + $0xd8] sm:$0xf0]  ;;  %v8116_v10 = vld [vmem:[#allocation2 + $0xc4] sm:$0xf] }
 0x134   : > { %4639 = vrot.lane.b32.xlu2 %v8009_v26, %s9601_s21  ;;  %v1009_v30 = vpop.f32.mrf.mxu2  ;;  %2849 = vrot.lane.b32.xlu1 %v7701_v27, %s9602_s26  ;;  %v914_v38 = vpop.f32.mrf.mxu0  ;;  %v7805_v16 = vor.u32 %v8676_v8, %v7804_v14  ;;  %v8563_v26 = vld [vmem:[#allocation7 + $0x1d4] sm:$0xf0]  ;;  %v8748_v9 = vld [vmem:[#allocation2 + $0xd8] sm:$0xf0] }
 0x135   : > { %5273 = vrot.lane.b32.xlu0 %v8113_v25, %s9602_s26  ;;  %v1058_v35 = vpop.f32.mrf.mxu3  ;;  %v963_v53 = vpop.f32.mrf.mxu1  ;;  %v7133_v25 = vor.u32 %v8515_v19, %v7132_v18  ;;  %v7325_v29 = vor.u32 %v8563_v26, %v7324_v22  ;;  %1421 = vmatpush.bf16.msra.mxu3 %v7305_v17 }
 0x136   : > { %v1059_v52 = vadd.f32 %v1058_v35, %v1009_v30  ;;  %v964_v23 = vadd.f32 %v963_v53, %v914_v38  ;;  %v7108_v30 = vld [vmem:[#allocation7 + $0x10] sm:$0xf]  ;;  %v8557_v38 = vld [vmem:[#allocation7 + $0x1a4] sm:$0xf0] }
 0x137   : > { %1109 = vmatmul.bf16.gmra.mxu0 %v9819_v40  ;;  %v7109_v35 = vor.u32 %v8509_v31, %v7108_v30  ;;  %1322 = vmatpush.bf16.msra.mxu1 %v7325_v29  ;;  %v7301_v39 = vor.u32 %v8557_v38, %v7300_v32 }
 0x138   : > { %v1496_v7 = vpack.c.bf16 %v1059_v52, %v961_v51  ;;  %1158 = vmatmul.bf16.gmra.mxu1 %v9821_v46  ;;  %1273 = vmatpush.bf16.msra.mxu0 %v7133_v25  ;;  %v8012_v52 = vld [vmem:[#allocation2 + $0xc4] sm:$0xf] }
 0x139   : > { %1207 = vmatmul.bf16.gmra.mxu2 %v9819_v40  ;;  %v7808_v45 = vld [vmem:[#allocation2 + $0xf0] sm:$0xf]  ;;  %v8013_v55 = vor.u32 %v8724_v44, %v8012_v52  ;;  %v8016_v60 = vld [vmem:[#allocation2 + $0xf4] sm:$0xf] }
 0x13a   : > { %1544 = vst [vmem:[#allocation2 + $0x108] sm:$0xff] %v1496_v7  ;;  %1256 = vmatmul.bf16.gmra.mxu3 %v9821_v46  ;;  %v7600_v50 = vld [vmem:[#allocation2 + $0xf0] sm:$0xf] }
 0x13b   : > { %1323 = vmatpush.bf16.msra.mxu1 %v7301_v39  ;;  %v7704_v6 = vld [vmem:[#allocation2 + $0xf0] sm:$0xf] }
 0x13c   : > { %5909 = vrot.lane.b32.xlu2 %v8221_v13, %s9603_s6  ;;  %v1012_v24 = vpop.f32.mrf.mxu2  ;;  %3484 = vrot.lane.b32.xlu1 %v7805_v16, %s9603_s6  ;;  %v916_v28 = vpop.f32.mrf.mxu0  ;;  %v8117_v13 = vor.u32 %v8748_v9, %v8116_v10 }
 0x13d   : > { %2214 = vrot.lane.b32.xlu0 %v7597_v15, %s9601_s21  ;;  %v1061_v27 = vpop.f32.mrf.mxu3  ;;  %v965_v34 = vpop.f32.mrf.mxu1  ;;  %1274 = vmatpush.bf16.msra.mxu0 %v7109_v35 }
 0x13e   : > { %v1062_v33 = vadd.f32 %v1061_v27, %v1012_v24  ;;  %v966_v62 = vadd.f32 %v965_v34, %v916_v28  ;;  %v8224_v24 = vld [vmem:[#allocation2 + $0xf4] sm:$0xf] }
 0x140   : > { %v1499_v41 = vpack.c.bf16 %v1062_v33, %v964_v23 }
 0x141   : > { %v8677_v47 = vld [vmem:[#allocation2 + $0x104] sm:$0xf0]  ;;  %v8725_v5 = vld [vmem:[#allocation2 + $0x108] sm:$0xf0] }
 0x142   : > { %v8629_v51 = vld [vmem:[#allocation2 + $0x104] sm:$0xf0]  ;;  %1547 = vst [vmem:[#allocation2 + $0x120] sm:$0xff] %v1499_v41  ;;  %v7809_v53 = vor.u32 %v8677_v47, %v7808_v45  ;;  %v8017_v11 = vor.u32 %v8725_v5, %v8016_v60  ;;  %v8773_v22 = vld [vmem:[#allocation2 + $0x108] sm:$0xf0] }
 0x143   : > { %v7601_v54 = vor.u32 %v8629_v51, %v7600_v50  ;;  %v8653_v7 = vld [vmem:[#allocation2 + $0x104] sm:$0xf0]  ;;  %v8225_v27 = vor.u32 %v8773_v22, %v8224_v24 }
 0x144   : > { %v1014_v58 = vpop.f32.mrf.mxu2  ;;  %4641 = vrot.lane.b32.xlu1 %v8013_v55, %s9601_s21  ;;  %v919_v61 = vpop.f32.mrf.mxu0  ;;  %v7705_v12 = vor.u32 %v8653_v7, %v7704_v6 }
 0x145   : > { %3486 = vrot.lane.b32.xlu0 %v7809_v53, %s9603_s6  ;;  %2216 = vrot.lane.b32.xlu2 %v7601_v54, %s9601_s21  ;;  %v1063_v59 = vpop.f32.mrf.mxu3  ;;  %v968_v4 = vpop.f32.mrf.mxu1 }
 0x146   : > { %v1064_v63 = vadd.f32 %v1063_v59, %v1014_v58  ;;  %v969_v14 = vadd.f32 %v968_v4, %v919_v61 }
 0x147   : > { %1114 = vmatmul.bf16.gmra.mxu0 %v9831_v0 }
 0x148   : > { %v1502_v8 = vpack.c.bf16 %v1064_v63, %v966_v62  ;;  %1163 = vmatmul.bf16.gmra.mxu1 %v9833_v1 }
 0x149   : > { %1212 = vmatmul.bf16.gmra.mxu2 %v9831_v0  ;;  %v7604_v25 = vld [vmem:[#allocation2 + $0x120] sm:$0xf]  ;;  %v8020_v5 = vld [vmem:[#allocation2 + $0x124] sm:$0xf] }
 0x14a   : > { %1550 = vst [vmem:[#allocation2 + $0x138] sm:$0xff] %v1502_v8  ;;  %1261 = vmatmul.bf16.gmra.mxu3 %v9833_v1  ;;  %v7708_v44 = vld [vmem:[#allocation2 + $0x120] sm:$0xf] }
 0x14b   : > { %v7812_v47 = vld [vmem:[#allocation2 + $0x120] sm:$0xf] }
 0x14c   : > { %v1017_v15 = vpop.f32.mrf.mxu2  ;;  %5275 = vrot.lane.b32.xlu1 %v8117_v13, %s9602_s26  ;;  %v921_v17 = vpop.f32.mrf.mxu0 }
 0x14d   : > { %4643 = vrot.lane.b32.xlu0 %v8017_v11, %s9601_s21  ;;  %2851 = vrot.lane.b32.xlu2 %v7705_v12, %s9602_s26  ;;  %v1066_v16 = vpop.f32.mrf.mxu3  ;;  %v970_v19 = vpop.f32.mrf.mxu1 }
 0x14e   : > { %v1067_v18 = vadd.f32 %v1066_v16, %v1017_v15  ;;  %v971_v32 = vadd.f32 %v970_v19, %v921_v17 }
 0x14f   : > { %v9907_v38 = vpop.permute.xlu2 %2206 }
 0x150   : > { %v1505_v23 = vpack.c.bf16 %v1067_v18, %v969_v14 }
 0x151   : > { %v8630_v26 = vld [vmem:[#allocation2 + $0x134] sm:$0xf0]  ;;  %v8726_v59 = vld [vmem:[#allocation2 + $0x138] sm:$0xf0] }
 0x152   : > { %1553 = vst [vmem:[#allocation2 + $0x150] sm:$0xff] %v1505_v23  ;;  %v7605_v28 = vor.u32 %v8630_v26, %v7604_v25  ;;  %v8654_v35 = vld [vmem:[#allocation2 + $0x134] sm:$0xf0]  ;;  %v8021_v9 = vor.u32 %v8726_v59, %v8020_v5 }
 0x153   : > { %v8678_v41 = vld [vmem:[#allocation2 + $0x134] sm:$0xf0]  ;;  %v7709_v45 = vor.u32 %v8654_v35, %v7708_v44 }
 0x154   : > { %v1019_v29 = vpop.f32.mrf.mxu2  ;;  %2218 = vrot.lane.b32.xlu1 %v7605_v28, %s9601_s21  ;;  %v1080_v31 = vpop.f32.mrf.mxu0  ;;  %v7813_v50 = vor.u32 %v8678_v41, %v7812_v47 }
 0x155   : > { %5911 = vrot.lane.b32.xlu0 %v8225_v27, %s9603_s6  ;;  %v1068_v30 = vpop.f32.mrf.mxu3  ;;  %v1129_v34 = vpop.f32.mrf.mxu1 }
 0x156   : > { %v1069_v33 = vadd.f32 %v1068_v30, %v1019_v29  ;;  %v1130_v51 = vadd.f32 %v1129_v34, %v1080_v31 }
 0x157   : > { %1275 = vmatmul.bf16.vlgmr.msra.gmra.mxu0 %v9747_v36 }
 0x158   : > { %v1508_v39 = vpack.c.bf16 %v1069_v33, %v971_v32  ;;  %1324 = vmatmul.bf16.vlgmr.msra.gmra.mxu1 %v9749_v37 }
 0x159   : > { %1373 = vmatmul.bf16.vlgmr.msra.gmra.mxu2 %v9747_v36  ;;  %v8024_v61 = vld [vmem:[#allocation2 + $0x154] sm:$0xf]  ;;  %v7608_v63 = vld [vmem:[#allocation2 + $0x150] sm:$0xf] }
 0x15a   : > { %1556 = vst [vmem:[#allocation2 + $0x168] sm:$0xff] %v1508_v39  ;;  %1422 = vmatmul.bf16.vlgmr.msra.gmra.mxu3 %v9749_v37  ;;  %v9915_v37 = vpop.permute.xlu2 %3476  ;;  %v7816_v19 = vld [vmem:[#allocation2 + $0x150] sm:$0xf] }
 0x15b   : > { %12601 = vst [vmem:[#allocation14_spill] sm:$0xff] %v9915_v37  ;;  %v7712_v22 = vld [vmem:[#allocation2 + $0x150] sm:$0xf] }
 0x15c   : > { %v1178_v52 = vpop.f32.mrf.mxu2  ;;  %3488 = vrot.lane.b32.xlu1 %v7813_v50, %s9603_s6  ;;  %v1082_v54 = vpop.f32.mrf.mxu0  ;;  %v7488_v37 = vld [vmem:[#allocation2 + $0x90] sm:$0xf] }
 0x15d   : > { %2853 = vrot.lane.b32.xlu0 %v7709_v45, %s9602_s26  ;;  %v1227_v53 = vpop.f32.mrf.mxu3  ;;  %v1131_v58 = vpop.f32.mrf.mxu1 }
 0x15e   : > { %v1228_v55 = vadd.f32 %v1227_v53, %v1178_v52  ;;  %v1132_v11 = vadd.f32 %v1131_v58, %v1082_v54 }
 0x160   : > { %v1464_v36 = vpack.c.bf16 %v1228_v55, %v1130_v51 }
 0x161   : > { %v8727_v62 = vld [vmem:[#allocation2 + $0x168] sm:$0xf0]  ;;  %v8631_v4 = vld [vmem:[#allocation2 + $0x164] sm:$0xf0] }
 0x162   : > { %1512 = vst [vmem:[#allocation2 + $0x8] sm:$0xff] %v1464_v36  ;;  %v8025_v7 = vor.u32 %v8727_v62, %v8024_v61  ;;  %v7609_v8 = vor.u32 %v8631_v4, %v7608_v63  ;;  %v8679_v16 = vld [vmem:[#allocation2 + $0x164] sm:$0xf0]  ;;  %v9928_v25 = vpop.permute.xlu2 %5269 }
 0x163   : > { %v8655_v18 = vld [vmem:[#allocation2 + $0x164] sm:$0xf0]  ;;  %v7817_v23 = vor.u32 %v8679_v16, %v7816_v19  ;;  %12603 = vst [vmem:[#allocation16_spill] sm:$0xff] %v9928_v25 }
 0x164   : > { %4647 = vrot.lane.b32.xlu2 %v8025_v7, %s9601_s21  ;;  %v1180_v60 = vpop.f32.mrf.mxu2  ;;  %4645 = vrot.lane.b32.xlu1 %v8021_v9, %s9601_s21  ;;  %v1085_v10 = vpop.f32.mrf.mxu0  ;;  %v7713_v24 = vor.u32 %v8655_v18, %v7712_v22 }
 0x165   : > { %2220 = vrot.lane.b32.xlu0 %v7609_v8, %s9601_s21  ;;  %v1229_v6 = vpop.f32.mrf.mxu3  ;;  %v1134_v15 = vpop.f32.mrf.mxu1 }
 0x166   : > { %v1230_v12 = vadd.f32 %v1229_v6, %v1180_v60  ;;  %v9920_v13 = vpop.permute.xlu1 %4633  ;;  %v9922_v14 = vpop.permute.xlu0 %2841  ;;  %v1135_v26 = vadd.f32 %v1134_v15, %v1085_v10 }
 0x167   : > { %12602 = vst [vmem:[#allocation15_spill] sm:$0xff] %v9920_v13  ;;  %1280 = vmatmul.bf16.gmra.mxu0 %v9759_v42 }
 0x168   : > { %v1467_v17 = vpack.c.bf16 %v1230_v12, %v1132_v11  ;;  %1329 = vmatmul.bf16.gmra.mxu1 %v9761_v43 }
 0x169   : > { %1378 = vmatmul.bf16.gmra.mxu2 %v9759_v42  ;;  %v7612_v33 = vld [vmem:[#allocation2 + $0x8] sm:$0xf] }
 0x16a   : > { %1515 = vst [vmem:[#allocation2 + $0x20] sm:$0xff] %v1467_v17  ;;  %1427 = vmatmul.bf16.gmra.mxu3 %v9761_v43  ;;  %v7716_v58 = vld [vmem:[#allocation2 + $0x8] sm:$0xf] }
 0x16b   : > { %v7820_v60 = vld [vmem:[#allocation2 + $0x8] sm:$0xf] }
 0x16c   : > { %v1183_v27 = vpop.f32.mrf.mxu2  ;;  %2855 = vrot.lane.b32.xlu1 %v7713_v24, %s9602_s26  ;;  %v1087_v29 = vpop.f32.mrf.mxu0 }
 0x16d   : > { %3490 = vrot.lane.b32.xlu0 %v7817_v23, %s9603_s6  ;;  %v1232_v28 = vpop.f32.mrf.mxu3  ;;  %v1136_v32 = vpop.f32.mrf.mxu1 }
 0x16e   : > { %v1233_v42 = vadd.f32 %v1232_v28, %v1183_v27  ;;  %v9932_v30 = vpop.permute.xlu1 %5267  ;;  %v9934_v31 = vpop.permute.xlu0 %5901  ;;  %v1137_v47 = vadd.f32 %v1136_v32, %v1087_v29  ;;  %v8028_v32 = vld [vmem:[#allocation2 + $0xc] sm:$0xf] }
 0x16f   : > { %12604 = vst [vmem:[#allocation17_spill] sm:$0xff] %v9932_v30  ;;  %v9937_v45 = vpop.permute.xlu2 %2845 }
 0x170   : > { %12605 = vst [vmem:[#allocation18_spill] sm:$0xff] %v9934_v31  ;;  %v1470_v43 = vpack.c.bf16 %v1233_v42, %v1135_v26 }
 0x171   : > { %v8632_v34 = vld [vmem:[#allocation2 + $0x1c] sm:$0xf0]  ;;  %v8728_v26 = vld [vmem:[#allocation2 + $0x20] sm:$0xf0] }
 0x172   : > { %1518 = vst [vmem:[#allocation2 + $0x38] sm:$0xff] %v1470_v43  ;;  %v7613_v35 = vor.u32 %v8632_v34, %v7612_v33  ;;  %v8656_v53 = vld [vmem:[#allocation2 + $0x1c] sm:$0xf0]  ;;  %v8029_v34 = vor.u32 %v8728_v26, %v8028_v32 }
 0x173   : > { %v7717_v36 = vor.u32 %v8656_v53, %v7716_v58  ;;  %v8680_v8 = vld [vmem:[#allocation2 + $0x1c] sm:$0xf0] }
 0x174   : > { %2262 = vrot.lane.b32.xlu2 %v7613_v35, %s9601_s21  ;;  %v1185_v39 = vpop.f32.mrf.mxu2  ;;  %v1090_v44 = vpop.f32.mrf.mxu0  ;;  %v7821_v15 = vor.u32 %v8680_v8, %v7820_v60 }
 0x175   : > { %v1234_v41 = vpop.f32.mrf.mxu3  ;;  %v1139_v52 = vpop.f32.mrf.mxu1 }
 0x176   : > { %v1235_v50 = vadd.f32 %v1234_v41, %v1185_v39  ;;  %v9941_v55 = vpop.permute.xlu1 %2843  ;;  %v1140_v59 = vadd.f32 %v1139_v52, %v1090_v44  ;;  %v8776_v52 = vld [vmem:[#allocation2 + $0x20] sm:$0xf0] }
 0x177   : > { %v9939_v51 = vpop.permute.xlu0 %2208  ;;  %1285 = vmatmul.bf16.gmra.mxu0 %v9771_v48  ;;  %v9950_v9 = vpop.permute.xlu2 %3480 }
 0x178   : > { %v1473_v54 = vpack.c.bf16 %v1235_v50, %v1137_v47  ;;  %1334 = vmatmul.bf16.gmra.mxu1 %v9773_v49  ;;  %12607 = vst [vmem:[#allocation20_spill] sm:$0xff] %v9950_v9 }
 0x179   : > { %1383 = vmatmul.bf16.gmra.mxu2 %v9771_v48  ;;  %v7616_v6 = vld [vmem:[#allocation2 + $0x38] sm:$0xf]  ;;  %v8032_v43 = vld [vmem:[#allocation2 + $0x3c] sm:$0xf] }
 0x17a   : > { %1521 = vst [vmem:[#allocation2 + $0x50] sm:$0xff] %v1473_v54  ;;  %1432 = vmatmul.bf16.gmra.mxu3 %v9773_v49  ;;  %v7720_v11 = vld [vmem:[#allocation2 + $0x38] sm:$0xf] }
 0x17c   : > { %2897 = vrot.lane.b32.xlu2 %v7717_v36, %s9602_s26  ;;  %v1188_v61 = vpop.f32.mrf.mxu2  ;;  %v1092_v63 = vpop.f32.mrf.mxu0  ;;  %v8236_v36 = vld [vmem:[#allocation2 + $0xc] sm:$0xf] }
 0x17d   : > { %v1237_v62 = vpop.f32.mrf.mxu3  ;;  %v1141_v7 = vpop.f32.mrf.mxu1 }
 0x17e   : > { %v1238_v4 = vadd.f32 %v1237_v62, %v1188_v61  ;;  %v9952_v12 = vpop.permute.xlu1 %4635  ;;  %v1142_v23 = vadd.f32 %v1141_v7, %v1092_v63  ;;  %v8237_v63 = vor.u32 %v8776_v52, %v8236_v36 }
 0x17f   : > { %v9948_v5 = vpop.permute.xlu0 %3478  ;;  %12608 = vst [vmem:[#allocation21_spill] sm:$0xff] %v9952_v12  ;;  %v9962_v33 = vpop.permute.xlu2 %5271 }
 0x180   : > { %12606 = vst [vmem:[#allocation19_spill] sm:$0xff] %v9948_v5  ;;  %v1476_v48 = vpack.c.bf16 %v1238_v4, %v1140_v59  ;;  %v8240_v59 = vld [vmem:[#allocation2 + $0x3c] sm:$0xf] }
 0x181   : > { %v8633_v10 = vld [vmem:[#allocation2 + $0x4c] sm:$0xf0]  ;;  %v8729_v27 = vld [vmem:[#allocation2 + $0x50] sm:$0xf0]  ;;  %12610 = vst [vmem:[#allocation23_spill] sm:$0xff] %v9962_v33 }
 0x182   : > { %v8657_v49 = vld [vmem:[#allocation2 + $0x4c] sm:$0xf0]  ;;  %1524 = vst [vmem:[#allocation2 + $0x68] sm:$0xff] %v1476_v48  ;;  %v7617_v16 = vor.u32 %v8633_v10, %v7616_v6  ;;  %v8033_v35 = vor.u32 %v8729_v27, %v8032_v43  ;;  %v8777_v53 = vld [vmem:[#allocation2 + $0x50] sm:$0xf0] }
 0x183   : > { %v7721_v17 = vor.u32 %v8657_v49, %v7720_v11  ;;  %v8241_v4 = vor.u32 %v8777_v53, %v8240_v59  ;;  %v7824_v53 = vld [vmem:[#allocation2 + $0x38] sm:$0xf] }
 0x184   : > { %3532 = vrot.lane.b32.xlu2 %v7821_v15, %s9603_s6  ;;  %2264 = vrot.lane.b32.xlu1 %v7617_v16, %s9601_s21  ;;  %v1190_v18 = vpop.f32.mrf.mxu2  ;;  %v1095_v22 = vpop.f32.mrf.mxu0  ;;  %v8752_v15 = vld [vmem:[#allocation2 + $0x20] sm:$0xf0]  ;;  %v8753_v16 = vld [vmem:[#allocation2 + $0x50] sm:$0xf0] }
 0x185   : > { %2899 = vrot.lane.b32.xlu0 %v7721_v17, %s9602_s26  ;;  %v1239_v19 = vpop.f32.mrf.mxu3  ;;  %v1144_v42 = vpop.f32.mrf.mxu1 }
 0x186   : > { %v1240_v24 = vadd.f32 %v1239_v19, %v1190_v18  ;;  %v1145_v41 = vadd.f32 %v1144_v42, %v1095_v22  ;;  %v8132_v22 = vld [vmem:[#allocation2 + $0xc] sm:$0xf] }
 0x187   : > { %v9957_v29 = vpop.permute.xlu0 %5903  ;;  %1290 = vmatmul.bf16.gmra.mxu0 %v9783_v2  ;;  %v9965_v39 = vpop.permute.xlu1 %2210 }
 0x188   : > { %v1479_v28 = vpack.c.bf16 %v1240_v24, %v1142_v23  ;;  %12609 = vst [vmem:[#allocation22_spill] sm:$0xff] %v9957_v29  ;;  %1339 = vmatmul.bf16.gmra.mxu1 %v9785_v3  ;;  %v9971_v8 = vpop.permute.xlu2 %2212  ;;  %v8136_v23 = vld [vmem:[#allocation2 + $0x3c] sm:$0xf]  ;;  %v8133_v24 = vor.u32 %v8752_v15, %v8132_v22 }
 0x189   : > { %1388 = vmatmul.bf16.gmra.mxu2 %v9783_v2  ;;  %v8137_v26 = vor.u32 %v8753_v16, %v8136_v23  ;;  %v8244_v27 = vld [vmem:[#allocation2 + $0x6c] sm:$0xf] }
 0x18a   : > { %1527 = vst [vmem:[#allocation2 + $0x80] sm:$0xff] %v1479_v28  ;;  %1437 = vmatmul.bf16.gmra.mxu3 %v9785_v3  ;;  %v7620_v3 = vld [vmem:[#allocation2 + $0x68] sm:$0xf]  ;;  %v8140_v59 = vld [vmem:[#allocation2 + $0x6c] sm:$0xf] }
 0x18c   : > { %4689 = vrot.lane.b32.xlu2 %v8029_v34, %s9601_s21  ;;  %4691 = vrot.lane.b32.xlu1 %v8033_v35, %s9601_s21  ;;  %v1193_v44 = vpop.f32.mrf.mxu2  ;;  %v1097_v47 = vpop.f32.mrf.mxu0 }
 0x18d   : > { %v1242_v2 = vpop.f32.mrf.mxu3  ;;  %v1146_v58 = vpop.f32.mrf.mxu1 }
 0x18e   : > { %v1243_v50 = vadd.f32 %v1242_v2, %v1193_v44  ;;  %v1147_v11 = vadd.f32 %v1146_v58, %v1097_v47 }
 0x18f   : > { %v9969_v62 = vpop.permute.xlu0 %4637  ;;  %v9976_v10 = vpop.permute.xlu1 %5905 }
 0x190   : > { %v1482_v54 = vpack.c.bf16 %v1243_v50, %v1145_v41  ;;  %12611 = vst [vmem:[#allocation24_spill] sm:$0xff] %v9969_v62  ;;  %v9987_v41 = vpop.permute.xlu2 %4639  ;;  %v8609_v62 = vld [vmem:[#allocation2 + $0x4c] sm:$0xf0] }
 0x191   : > { %v8634_v61 = vld [vmem:[#allocation2 + $0x7c] sm:$0xf0]  ;;  %12612 = vst [vmem:[#allocation25_spill] sm:$0xff] %v9976_v10  ;;  %v8778_v19 = vld [vmem:[#allocation2 + $0x80] sm:$0xf0] }
 0x192   : > { %1530 = vst [vmem:[#allocation2 + $0x98] sm:$0xff] %v1482_v54  ;;  %v7621_v7 = vor.u32 %v8634_v61, %v7620_v3  ;;  %v8245_v28 = vor.u32 %v8778_v19, %v8244_v27  ;;  %v8658_v44 = vld [vmem:[#allocation2 + $0x7c] sm:$0xf0]  ;;  %v8754_v52 = vld [vmem:[#allocation2 + $0x80] sm:$0xf0] }
 0x193   : > { %12613 = vst [vmem:[#allocation26_spill] sm:$0xff] %v9987_v41  ;;  %v7724_v54 = vld [vmem:[#allocation2 + $0x68] sm:$0xf]  ;;  %v8141_v3 = vor.u32 %v8754_v52, %v8140_v59 }
 0x194   : > { %5957 = vrot.lane.b32.xlu2 %v8237_v63, %s9603_s6  ;;  %5959 = vrot.lane.b32.xlu1 %v8241_v4, %s9603_s6  ;;  %v1195_v48 = vpop.f32.mrf.mxu2  ;;  %v1100_v6 = vpop.f32.mrf.mxu0  ;;  %v7725_v36 = vor.u32 %v8658_v44, %v7724_v54  ;;  %v8036_v44 = vld [vmem:[#allocation2 + $0x6c] sm:$0xf] }
 0x195   : > { %2266 = vrot.lane.b32.xlu0 %v7621_v7, %s9601_s21  ;;  %v1244_v60 = vpop.f32.mrf.mxu3  ;;  %v1149_v18 = vpop.f32.mrf.mxu1 }
 0x196   : > { %v1245_v49 = vadd.f32 %v1244_v60, %v1195_v48  ;;  %v1150_v32 = vadd.f32 %v1149_v18, %v1100_v6  ;;  %v8682_v6 = vld [vmem:[#allocation2 + $0x7c] sm:$0xf0]  ;;  %v7828_v18 = vld [vmem:[#allocation2 + $0x68] sm:$0xf] }
 0x197   : > { %1295 = vmatmul.bf16.gmra.mxu0 %v9795_v20  ;;  %v9982_v42 = vpop.permute.xlu0 %2847  ;;  %v9989_v2 = vpop.permute.xlu1 %5907  ;;  %v7829_v23 = vor.u32 %v8682_v6, %v7828_v18 }
 0x198   : > { %v1485_v17 = vpack.c.bf16 %v1245_v49, %v1147_v11  ;;  %1344 = vmatmul.bf16.gmra.mxu1 %v9797_v21  ;;  %12614 = vst [vmem:[#allocation27_spill] sm:$0xff] %v9989_v2  ;;  %v10001_v22 = vpop.permute.xlu2 %5909 }
 0x199   : > { %1393 = vmatmul.bf16.gmra.mxu2 %v9795_v20  ;;  %v7832_v19 = vld [vmem:[#allocation2 + $0x98] sm:$0xf]  ;;  %12616 = vst [vmem:[#allocation29_spill] sm:$0xff] %v10001_v22 }
 0x19a   : > { %1533 = vst [vmem:[#allocation2 + $0xb0] sm:$0xff] %v1485_v17  ;;  %1442 = vmatmul.bf16.gmra.mxu3 %v9797_v21  ;;  %v8681_v21 = vld [vmem:[#allocation2 + $0x4c] sm:$0xf0]  ;;  %v7624_v18 = vld [vmem:[#allocation2 + $0x98] sm:$0xf] }
 0x19b   : > { %v7825_v58 = vor.u32 %v8681_v21, %v7824_v53 }
 0x19c   : > { %5323 = vrot.lane.b32.xlu2 %v8133_v24, %s9602_s26  ;;  %5325 = vrot.lane.b32.xlu1 %v8137_v26, %s9602_s26  ;;  %v1198_v43 = vpop.f32.mrf.mxu2  ;;  %v1102_v34 = vpop.f32.mrf.mxu0  ;;  %v8248_v26 = vld [vmem:[#allocation2 + $0x9c] sm:$0xf] }
 0x19d   : > { %5961 = vrot.lane.b32.xlu0 %v8245_v28, %s9603_s6  ;;  %v1247_v20 = vpop.f32.mrf.mxu3  ;;  %v1151_v50 = vpop.f32.mrf.mxu1 }
 0x19e   : > { %v1248_v35 = vadd.f32 %v1247_v20, %v1198_v43  ;;  %v1152_v48 = vadd.f32 %v1151_v50, %v1102_v34  ;;  %v8730_v34 = vld [vmem:[#allocation2 + $0x80] sm:$0xf0] }
 0x19f   : > { %v9994_v7 = vpop.permute.xlu0 %3482 }
 0x1a0   : > { %v1488_v47 = vpack.c.bf16 %v1248_v35, %v1150_v32  ;;  %12615 = vst [vmem:[#allocation28_spill] sm:$0xff] %v9994_v7 }
 0x1a1   : > { %v8683_v11 = vld [vmem:[#allocation2 + $0xac] sm:$0xf0]  ;;  %v8779_v17 = vld [vmem:[#allocation2 + $0xb0] sm:$0xf0] }
 0x1a2   : > { %1536 = vst [vmem:[#allocation2 + $0xc8] sm:$0xff] %v1488_v47  ;;  %v7833_v24 = vor.u32 %v8683_v11, %v7832_v19  ;;  %v8249_v27 = vor.u32 %v8779_v17, %v8248_v26  ;;  %v8635_v6 = vld [vmem:[#allocation2 + $0xac] sm:$0xf0] }
 0x1a3   : > { %v8611_v31 = vld [vmem:[#allocation2 + $0xac] sm:$0xf0] }
 0x1a4   : > { %3534 = vrot.lane.b32.xlu2 %v7825_v58, %s9603_s6  ;;  %2901 = vrot.lane.b32.xlu1 %v7725_v36, %s9602_s26  ;;  %v1200_v61 = vpop.f32.mrf.mxu2  ;;  %v1105_v4 = vpop.f32.mrf.mxu0  ;;  %v8037_v58 = vor.u32 %v8730_v34, %v8036_v44 }
 0x1a5   : > { %5327 = vrot.lane.b32.xlu0 %v8141_v3, %s9602_s26  ;;  %v1249_v63 = vpop.f32.mrf.mxu3  ;;  %v1154_v16 = vpop.f32.mrf.mxu1 }
 0x1a6   : > { %v1250_v60 = vadd.f32 %v1249_v63, %v1200_v61  ;;  %v9996_v15 = vpop.permute.xlu1 %2849  ;;  %v1155_v28 = vadd.f32 %v1154_v16, %v1105_v4  ;;  %v10011_v3 = vpop.permute.xlu2 %2216 }
 0x1a7   : > { %1300 = vmatmul.bf16.gmra.mxu0 %v9807_v56  ;;  %v10007_v35 = vpop.permute.xlu0 %5273 }
 0x1a8   : > { %v1491_v49 = vpack.c.bf16 %v1250_v60, %v1152_v48  ;;  %1349 = vmatmul.bf16.gmra.mxu1 %v9809_v57  ;;  %12617 = vst [vmem:[#allocation30_spill] sm:$0xff] %v10007_v35 }
 0x1a9   : > { %1398 = vmatmul.bf16.gmra.mxu2 %v9807_v56  ;;  %v7628_v47 = vld [vmem:[#allocation2 + $0xc8] sm:$0xf] }
 0x1aa   : > { %1539 = vst [vmem:[#allocation2 + $0xe0] sm:$0xff] %v1491_v49  ;;  %1447 = vmatmul.bf16.gmra.mxu3 %v9809_v57  ;;  %v7732_v52 = vld [vmem:[#allocation2 + $0xc8] sm:$0xf] }
 0x1ab   : > { %v7836_v19 = vld [vmem:[#allocation2 + $0xc8] sm:$0xf] }
 0x1ac   : > { %3536 = vrot.lane.b32.xlu2 %v7829_v23, %s9603_s6  ;;  %3538 = vrot.lane.b32.xlu1 %v7833_v24, %s9603_s6  ;;  %v1203_v32 = vpop.f32.mrf.mxu2  ;;  %v1107_v43 = vpop.f32.mrf.mxu0  ;;  %v7625_v24 = vor.u32 %v8635_v6, %v7624_v18 }
 0x1ad   : > { %5963 = vrot.lane.b32.xlu0 %v8249_v27, %s9603_s6  ;;  %v1252_v56 = vpop.f32.mrf.mxu3  ;;  %v1156_v57 = vpop.f32.mrf.mxu1  ;;  %v8044_v27 = vld [vmem:[#allocation2 + $0xcc] sm:$0xf] }
 0x1ae   : > { %v1253_v20 = vadd.f32 %v1252_v56, %v1203_v32  ;;  %v10009_v54 = vpop.permute.xlu1 %3484  ;;  %v1157_v48 = vadd.f32 %v1156_v57, %v1107_v43  ;;  %v10027_v34 = vpop.permute.xlu2 %2851 }
 0x1af   : > { %12618 = vst [vmem:[#allocation31_spill] sm:$0xff] %v10009_v54  ;;  %v10019_v23 = vpop.permute.xlu0 %2214 }
 0x1b0   : > { %v1494_v21 = vpack.c.bf16 %v1253_v20, %v1155_v28 }
 0x1b1   : > { %v8636_v50 = vld [vmem:[#allocation2 + $0xdc] sm:$0xf0]  ;;  %v8732_v17 = vld [vmem:[#allocation2 + $0xe0] sm:$0xf0] }
 0x1b2   : > { %v8660_v53 = vld [vmem:[#allocation2 + $0xdc] sm:$0xf0]  ;;  %1542 = vst [vmem:[#allocation2 + $0xf8] sm:$0xff] %v1494_v21  ;;  %v7629_v36 = vor.u32 %v8636_v50, %v7628_v47  ;;  %v8045_v28 = vor.u32 %v8732_v17, %v8044_v27  ;;  %v8780_v47 = vld [vmem:[#allocation2 + $0xe0] sm:$0xf0] }
 0x1b3   : > { %v7733_v59 = vor.u32 %v8660_v53, %v7732_v52  ;;  %v8684_v11 = vld [vmem:[#allocation2 + $0xdc] sm:$0xf0]  ;;  %v7728_v50 = vld [vmem:[#allocation2 + $0x98] sm:$0xf]  ;;  %v8731_v17 = vld [vmem:[#allocation2 + $0xb0] sm:$0xf0] }
 0x1b4   : > { %4693 = vrot.lane.b32.xlu2 %v8037_v58, %s9601_s21  ;;  %2270 = vrot.lane.b32.xlu1 %v7629_v36, %s9601_s21  ;;  %v1205_v61 = vpop.f32.mrf.mxu2  ;;  %v1110_v4 = vpop.f32.mrf.mxu0  ;;  %v7837_v26 = vor.u32 %v8684_v11, %v7836_v19  ;;  %v8040_v27 = vld [vmem:[#allocation2 + $0x9c] sm:$0xf] }
 0x1b5   : > { %2905 = vrot.lane.b32.xlu0 %v7733_v59, %s9602_s26  ;;  %v1254_v63 = vpop.f32.mrf.mxu3  ;;  %v1159_v16 = vpop.f32.mrf.mxu1  ;;  %v8252_v59 = vld [vmem:[#allocation2 + $0xcc] sm:$0xf] }
 0x1b6   : > { %v1255_v60 = vadd.f32 %v1254_v63, %v1205_v61  ;;  %v10022_v32 = vpop.permute.xlu1 %4641  ;;  %v1160_v56 = vadd.f32 %v1159_v16, %v1110_v4  ;;  %v8253_v61 = vor.u32 %v8780_v47, %v8252_v59  ;;  %v8144_v59 = vld [vmem:[#allocation2 + $0x9c] sm:$0xf] }
 0x1b7   : > { %1305 = vmatmul.bf16.gmra.mxu0 %v9819_v40  ;;  %12619 = vst [vmem:[#allocation32_spill] sm:$0xff] %v10022_v32  ;;  %v10029_v63 = vpop.permute.xlu0 %3486 }
 0x1b8   : > { %v1497_v49 = vpack.c.bf16 %v1255_v60, %v1157_v48  ;;  %1354 = vmatmul.bf16.gmra.mxu1 %v9821_v46  ;;  %12620 = vst [vmem:[#allocation33_spill] sm:$0xff] %v10029_v63  ;;  %v8601_v63 = vld [vmem:[#allocation2 + $0x44] sm:$0xf0] }
 0x1b9   : > { %1403 = vmatmul.bf16.gmra.mxu2 %v9819_v40  ;;  %v7736_v52 = vld [vmem:[#allocation2 + $0xf8] sm:$0xf] }
 0x1ba   : > { %1545 = vst [vmem:[#allocation2 + $0x110] sm:$0xff] %v1497_v49  ;;  %1452 = vmatmul.bf16.gmra.mxu3 %v9821_v46  ;;  %v8659_v46 = vld [vmem:[#allocation2 + $0xac] sm:$0xf0] }
 0x1bb   : > { %v7729_v58 = vor.u32 %v8659_v46, %v7728_v50 }
 0x1bc   : > { %2268 = vrot.lane.b32.xlu2 %v7625_v24, %s9601_s21  ;;  %3540 = vrot.lane.b32.xlu1 %v7837_v26, %s9603_s6  ;;  %v1208_v40 = vpop.f32.mrf.mxu2  ;;  %v1112_v20 = vpop.f32.mrf.mxu0 }
 0x1bd   : > { %4697 = vrot.lane.b32.xlu0 %v8045_v28, %s9601_s21  ;;  %v1257_v43 = vpop.f32.mrf.mxu3  ;;  %v1161_v44 = vpop.f32.mrf.mxu1  ;;  %v7840_v28 = vld [vmem:[#allocation2 + $0xf8] sm:$0xf] }
 0x1be   : > { %v1258_v21 = vadd.f32 %v1257_v43, %v1208_v40  ;;  %v10034_v6 = vpop.permute.xlu1 %5275  ;;  %v10036_v11 = vpop.permute.xlu2 %4647  ;;  %v1162_v49 = vadd.f32 %v1161_v44, %v1112_v20  ;;  %v7632_v43 = vld [vmem:[#allocation2 + $0xf8] sm:$0xf] }
 0x1bf   : > { %12621 = vst [vmem:[#allocation34_spill] sm:$0xff] %v10034_v6  ;;  %v10045_v44 = vpop.permute.xlu0 %4643 }
 0x1c0   : > { %v1500_v57 = vpack.c.bf16 %v1258_v21, %v1160_v56  ;;  %12622 = vst [vmem:[#allocation35_spill] sm:$0xff] %v10036_v11  ;;  %v8041_v56 = vor.u32 %v8731_v17, %v8040_v27 }
 0x1c1   : > { %v8661_v53 = vld [vmem:[#allocation2 + $0x10c] sm:$0xf0]  ;;  %12623 = vst [vmem:[#allocation36_spill] sm:$0xff] %v10045_v44 }
 0x1c2   : > { %1548 = vst [vmem:[#allocation2 + $0x128] sm:$0xff] %v1500_v57  ;;  %v7737_v36 = vor.u32 %v8661_v53, %v7736_v52  ;;  %v8685_v18 = vld [vmem:[#allocation2 + $0x10c] sm:$0xf0]  ;;  %v8733_v52 = vld [vmem:[#allocation2 + $0x110] sm:$0xf0] }
 0x1c3   : > { %v8637_v26 = vld [vmem:[#allocation2 + $0x10c] sm:$0xf0]  ;;  %v7841_v40 = vor.u32 %v8685_v18, %v7840_v28  ;;  %v8756_v28 = vld [vmem:[#allocation2 + $0xe0] sm:$0xf0] }
 0x1c4   : > { %2903 = vrot.lane.b32.xlu2 %v7729_v58, %s9602_s26  ;;  %2907 = vrot.lane.b32.xlu1 %v7737_v36, %s9602_s26  ;;  %v1210_v4 = vpop.f32.mrf.mxu2  ;;  %v1115_v60 = vpop.f32.mrf.mxu0  ;;  %v7633_v20 = vor.u32 %v8637_v26, %v7632_v43 }
 0x1c5   : > { %5965 = vrot.lane.b32.xlu0 %v8253_v61, %s9603_s6  ;;  %v1259_v48 = vpop.f32.mrf.mxu3  ;;  %v1164_v24 = vpop.f32.mrf.mxu1  ;;  %v8048_v61 = vld [vmem:[#allocation2 + $0xfc] sm:$0xf] }
 0x1c6   : > { %v1260_v16 = vadd.f32 %v1259_v48, %v1210_v4  ;;  %v1165_v21 = vadd.f32 %v1164_v24, %v1115_v60  ;;  %v10049_v53 = vpop.permute.xlu1 %2218 }
 0x1c7   : > { %1310 = vmatmul.bf16.gmra.mxu0 %v9831_v0 }
 0x1c8   : > { %v1503_v19 = vpack.c.bf16 %v1260_v16, %v1162_v49  ;;  %1359 = vmatmul.bf16.gmra.mxu1 %v9833_v1  ;;  %v8049_v49 = vor.u32 %v8733_v52, %v8048_v61 }
 0x1c9   : > { %1408 = vmatmul.bf16.gmra.mxu2 %v9831_v0  ;;  %v7844_v4 = vld [vmem:[#allocation2 + $0x128] sm:$0xf] }
 0x1ca   : > { %1551 = vst [vmem:[#allocation2 + $0x140] sm:$0xff] %v1503_v19  ;;  %1457 = vmatmul.bf16.gmra.mxu3 %v9833_v1  ;;  %v8755_v1 = vld [vmem:[#allocation2 + $0xb0] sm:$0xf0] }
 0x1cb   : > { %v8145_v60 = vor.u32 %v8755_v1, %v8144_v59  ;;  %v8781_v59 = vld [vmem:[#allocation2 + $0x110] sm:$0xf0] }
 0x1cc   : > { %4695 = vrot.lane.b32.xlu2 %v8041_v56, %s9601_s21  ;;  %3542 = vrot.lane.b32.xlu1 %v7841_v40, %s9603_s6  ;;  %v1213_v46 = vpop.f32.mrf.mxu2  ;;  %v1117_v57 = vpop.f32.mrf.mxu0 }
 0x1cd   : > { %2272 = vrot.lane.b32.xlu0 %v7633_v20, %s9601_s21  ;;  %v1262_v0 = vpop.f32.mrf.mxu3  ;;  %v1166_v36 = vpop.f32.mrf.mxu1  ;;  %v8148_v20 = vld [vmem:[#allocation2 + $0xcc] sm:$0xf] }
 0x1ce   : > { %v1263_v47 = vadd.f32 %v1262_v0, %v1213_v46  ;;  %v10047_v50 = vpop.permute.xlu2 %2262  ;;  %v1167_v24 = vadd.f32 %v1166_v36, %v1117_v57  ;;  %v10056_v56 = vpop.permute.xlu0 %5911  ;;  %v8149_v46 = vor.u32 %v8756_v28, %v8148_v20  ;;  %v8256_v36 = vld [vmem:[#allocation2 + $0xfc] sm:$0xf] }
 0x1cf   : > { %12624 = vst [vmem:[#allocation37_spill] sm:$0xff] %v10056_v56 }
 0x1d0   : > { %v1506_v58 = vpack.c.bf16 %v1263_v47, %v1165_v21  ;;  %v10058_v21 = vpop.permute.xlu1 %3488 }
 0x1d1   : > { %v8686_v48 = vld [vmem:[#allocation2 + $0x13c] sm:$0xf0]  ;;  %12625 = vst [vmem:[#allocation38_spill] sm:$0xff] %v10058_v21 }
 0x1d2   : > { %1554 = vst [vmem:[#allocation2 + $0x158] sm:$0xff] %v1506_v58  ;;  %v7845_v16 = vor.u32 %v8686_v48, %v7844_v4 }
 0x1d4   : > { %5329 = vrot.lane.b32.xlu2 %v8145_v60, %s9602_s26  ;;  %4699 = vrot.lane.b32.xlu1 %v8049_v49, %s9601_s21  ;;  %v1215_v17 = vpop.f32.mrf.mxu2  ;;  %v1276_v19 = vpop.f32.mrf.mxu0 }
 0x1d5   : > { %3544 = vrot.lane.b32.xlu0 %v7845_v16, %s9603_s6  ;;  %v1264_v18 = vpop.f32.mrf.mxu3  ;;  %v1325_v43 = vpop.f32.mrf.mxu1 }
 0x1d6   : > { %v1265_v26 = vadd.f32 %v1264_v18, %v1215_v17  ;;  %v10054_v27 = vpop.permute.xlu2 %2897  ;;  %v1326_v0 = vadd.f32 %v1325_v43, %v1276_v19  ;;  %v8257_v19 = vor.u32 %v8781_v59, %v8256_v36 }
 0x1d8   : > { %v1509_v40 = vpack.c.bf16 %v1265_v26, %v1167_v24  ;;  %v10063_v24 = vpop.permute.xlu0 %2853  ;;  %v10065_v43 = vpop.permute.xlu1 %4645 }
 0x1d9   : > { %v7640_v4 = vld [vmem:[#allocation2 + $0x158] sm:$0xf]  ;;  %12626 = vst [vmem:[#allocation39_spill] sm:$0xff] %v10063_v24  ;;  %v8056_v56 = vld [vmem:[#allocation2 + $0x15c] sm:$0xf] }
 0x1da   : > { %1557 = vst [vmem:[#allocation2 + $0x170] sm:$0xff] %v1509_v40  ;;  %v7744_v48 = vld [vmem:[#allocation2 + $0x158] sm:$0xf] }
 0x1db   : > { %v7536_v49 = vld [vmem:[#allocation2 + $0x158] sm:$0xf]  ;;  %12627 = vst [vmem:[#allocation40_spill] sm:$0xff] %v10065_v43 }
 0x1dc   : > { %5331 = vrot.lane.b32.xlu2 %v8149_v46, %s9602_s26  ;;  %v1374_v47 = vpop.f32.mrf.mxu2  ;;  %v1278_v52 = vpop.f32.mrf.mxu0 }
 0x1dd   : > { %v1423_v1 = vpop.f32.mrf.mxu3  ;;  %v1327_v60 = vpop.f32.mrf.mxu1 }
 0x1de   : > { %v1424_v57 = vadd.f32 %v1423_v1, %v1374_v47  ;;  %v10061_v58 = vpop.permute.xlu2 %3532  ;;  %v1328_v20 = vadd.f32 %v1327_v60, %v1278_v52  ;;  %v7848_v60 = vld [vmem:[#allocation2 + $0x158] sm:$0xf] }
 0x1e0   : > { %v1465_v61 = vpack.c.bf16 %v1424_v57, %v1326_v0  ;;  %v8614_v57 = vld [vmem:[#allocation2 + $0x13c] sm:$0xf0] }
 0x1e1   : > { %v8639_v16 = vld [vmem:[#allocation2 + $0x16c] sm:$0xf0] }
 0x1e2   : > { %v8663_v17 = vld [vmem:[#allocation2 + $0x16c] sm:$0xf0]  ;;  %1513 = vst [vmem:[#allocation2 + $0x10] sm:$0xff] %v1465_v61  ;;  %v7641_v26 = vor.u32 %v8639_v16, %v7640_v4  ;;  %v8757_v61 = vld [vmem:[#allocation2 + $0x110] sm:$0xf0] }
 0x1e3   : > { %v8615_v18 = vld [vmem:[#allocation2 + $0x16c] sm:$0xf0]  ;;  %v7745_v28 = vor.u32 %v8663_v17, %v7744_v48  ;;  %v7532_v4 = vld [vmem:[#allocation2 + $0x128] sm:$0xf] }
 0x1e4   : > { %v7537_v40 = vor.u32 %v8615_v18, %v7536_v49  ;;  %5967 = vrot.lane.b32.xlu2 %v8257_v19, %s9603_s6  ;;  %2276 = vrot.lane.b32.xlu1 %v7641_v26, %s9601_s21  ;;  %v1376_v46 = vpop.f32.mrf.mxu2  ;;  %v1281_v1 = vpop.f32.mrf.mxu0  ;;  %v8687_v49 = vld [vmem:[#allocation2 + $0x16c] sm:$0xf0]  ;;  %v7533_v17 = vor.u32 %v8614_v57, %v7532_v4  ;;  %v8152_v18 = vld [vmem:[#allocation2 + $0xfc] sm:$0xf]  ;;  %v8638_v4 = vld [vmem:[#allocation2 + $0x13c] sm:$0xf0] }
 0x1e5   : > { %2911 = vrot.lane.b32.xlu0 %v7745_v28, %s9602_s26  ;;  %v1425_v47 = vpop.f32.mrf.mxu3  ;;  %v1330_v16 = vpop.f32.mrf.mxu1  ;;  %v8153_v52 = vor.u32 %v8757_v61, %v8152_v18  ;;  %v7849_v19 = vor.u32 %v8687_v49, %v7848_v60  ;;  %v7636_v60 = vld [vmem:[#allocation2 + $0x128] sm:$0xf] }
 0x1e6   : > { %v1769_v0 = vsel %vm12590_vm0, %v7537_v40, 0  ;;  %v1426_v36 = vadd.f32 %v1425_v47, %v1376_v46  ;;  %v10071_v59 = vpop.permute.xlu2 %4689  ;;  %v10073_v26 = vpop.permute.xlu0 %2220  ;;  %v1331_v28 = vadd.f32 %v1330_v16, %v1281_v1  ;;  %v1766_v46 = vsel %vm12590_vm0, %v7533_v17, 0  ;;  %v8613_v47 = vld [vmem:[#allocation2 + $0x10c] sm:$0xf0] }
 0x1e7   : > { %1771 = vmatpush.bf16.xpose.msrb.mxu0 %v1769_v0  ;;  %12628 = vst [vmem:[#allocation41_spill] sm:$0xff] %v10073_v26  ;;  %v10078_v57 = vpop.permute.xlu1 %2855 }
 0x1e8   : > { %v1468_v48 = vpack.c.bf16 %v1426_v36, %v1328_v20  ;;  %12629 = vst [vmem:[#allocation42_spill] sm:$0xff] %v10078_v57 }
 0x1e9   : > { %v7652_v49 = vld [vmem:[#allocation2 + $0x10] sm:$0xf] }
 0x1ea   : > { %1516 = vst [vmem:[#allocation2 + $0x28] sm:$0xff] %v1468_v48  ;;  %v7528_v48 = vld [vmem:[#allocation2 + $0xf8] sm:$0xf] }
 0x1eb   : > { %v7529_v16 = vor.u32 %v8613_v47, %v7528_v48 }
 0x1ec   : > { %5333 = vrot.lane.b32.xlu2 %v8153_v52, %s9602_s26  ;;  %v1379_v40 = vpop.f32.mrf.mxu2  ;;  %v1283_v20 = vpop.f32.mrf.mxu0  ;;  %v8735_v52 = vld [vmem:[#allocation2 + $0x170] sm:$0xf0] }
 0x1ed   : > { %3546 = vrot.lane.b32.xlu0 %v7849_v19, %s9603_s6  ;;  %v1428_v0 = vpop.f32.mrf.mxu3  ;;  %v1332_v1 = vpop.f32.mrf.mxu1  ;;  %v7637_v19 = vor.u32 %v8638_v4, %v7636_v60  ;;  %v8057_v22 = vor.u32 %v8735_v52, %v8056_v56  ;;  %v7756_v56 = vld [vmem:[#allocation2 + $0x10] sm:$0xf] }
 0x1ee   : > { %v1429_v36 = vadd.f32 %v1428_v0, %v1379_v40  ;;  %v10080_v61 = vpop.permute.xlu2 %5957  ;;  %v1333_v2 = vadd.f32 %v1332_v1, %v1283_v20  ;;  %v1763_v0 = vsel %vm12590_vm0, %v7529_v16, 0  ;;  %v10090_v52 = vpop.permute.xlu0 %3490  ;;  %v8662_v20 = vld [vmem:[#allocation2 + $0x13c] sm:$0xf0]  ;;  %v7524_v1 = vld [vmem:[#allocation2 + $0xc8] sm:$0xf] }
 0x1ef   : > { %1772 = vmatpush.bf16.xpose.msrb.mxu0 %v1766_v46  ;;  %12630 = vst [vmem:[#allocation43_spill] sm:$0xff] %v10080_v61 }
 0x1f0   : > { %v1471_v18 = vpack.c.bf16 %v1429_v36, %v1331_v28  ;;  %v8612_v36 = vld [vmem:[#allocation2 + $0xdc] sm:$0xf0]  ;;  %12632 = vst [vmem:[#allocation45_spill] sm:$0xff] %v10090_v52 }
 0x1f1   : > { %v8640_v17 = vld [vmem:[#allocation2 + $0x24] sm:$0xf0] }
 0x1f2   : > { %1519 = vst [vmem:[#allocation2 + $0x40] sm:$0xff] %v1471_v18  ;;  %v7653_v46 = vor.u32 %v8640_v17, %v7652_v49  ;;  %v8664_v49 = vld [vmem:[#allocation2 + $0x24] sm:$0xf0]  ;;  %v7525_v17 = vor.u32 %v8612_v36, %v7524_v1 }
 0x1f4   : > { %2274 = vrot.lane.b32.xlu2 %v7637_v19, %s9601_s21  ;;  %v1381_v40 = vpop.f32.mrf.mxu2  ;;  %2583 = vrot.lane.b32.xlu1 %v7653_v46, %s9601_s21  ;;  %v1286_v47 = vpop.f32.mrf.mxu0  ;;  %v7740_v19 = vld [vmem:[#allocation2 + $0x128] sm:$0xf] }
 0x1f5   : > { %4703 = vrot.lane.b32.xlu0 %v8057_v22, %s9601_s21  ;;  %v1430_v28 = vpop.f32.mrf.mxu3  ;;  %v1335_v60 = vpop.f32.mrf.mxu1  ;;  %v7757_v22 = vor.u32 %v8664_v49, %v7756_v56  ;;  %v7741_v46 = vor.u32 %v8662_v20, %v7740_v19  ;;  %v8734_v56 = vld [vmem:[#allocation2 + $0x140] sm:$0xf0]  ;;  %v7520_v49 = vld [vmem:[#allocation2 + $0x98] sm:$0xf]  ;;  %v8052_v19 = vld [vmem:[#allocation2 + $0x12c] sm:$0xf] }
 0x1f6   : > { %v1431_v48 = vadd.f32 %v1430_v28, %v1381_v40  ;;  %v10086_v18 = vpop.permute.xlu2 %5323  ;;  %v10088_v4 = vpop.permute.xlu1 %2264  ;;  %v1336_v40 = vadd.f32 %v1335_v60, %v1286_v47  ;;  %v1760_v28 = vsel %vm12590_vm0, %v7525_v17, 0  ;;  %v7860_v60 = vld [vmem:[#allocation2 + $0x10] sm:$0xf]  ;;  %v8688_v17 = vld [vmem:[#allocation2 + $0x24] sm:$0xf0] }
 0x1f7   : > { %1773 = vmatpush.bf16.xpose.msrb.mxu0 %v1763_v0  ;;  %12631 = vst [vmem:[#allocation44_spill] sm:$0xff] %v10086_v18 }
 0x1f8   : > { %v1474_v16 = vpack.c.bf16 %v1431_v48, %v1333_v2  ;;  %v10099_v48 = vpop.permute.xlu0 %2899 }
 0x1f9   : > { %v7760_v20 = vld [vmem:[#allocation2 + $0x40] sm:$0xf] }
 0x1fa   : > { %1522 = vst [vmem:[#allocation2 + $0x58] sm:$0xff] %v1474_v16  ;;  %v7521_v16 = vor.u32 %v8611_v31, %v7520_v49  ;;  %v8610_v31 = vld [vmem:[#allocation2 + $0x7c] sm:$0xf0] }
 0x1fc   : > { %2909 = vrot.lane.b32.xlu2 %v7741_v46, %s9602_s26  ;;  %v1384_v0 = vpop.f32.mrf.mxu2  ;;  %v1288_v29 = vpop.f32.mrf.mxu0  ;;  %v1757_v44 = vsel %vm12590_vm0, %v7521_v16, 0  ;;  %v8782_v16 = vld [vmem:[#allocation2 + $0x140] sm:$0xf0] }
 0x1fd   : > { %v1433_v10 = vpop.f32.mrf.mxu3  ;;  %3218 = vrot.lane.b32.xlu0 %v7757_v22, %s9602_s26  ;;  %v1337_v1 = vpop.f32.mrf.mxu1 }
 0x1fe   : > { %v1434_v11 = vadd.f32 %v1433_v10, %v1384_v0  ;;  %v10095_v2 = vpop.permute.xlu2 %3534  ;;  %v10097_v36 = vpop.permute.xlu1 %4691  ;;  %v7861_v10 = vor.u32 %v8688_v17, %v7860_v60  ;;  %v1338_v0 = vadd.f32 %v1337_v1, %v1288_v29  ;;  %v7656_v60 = vld [vmem:[#allocation2 + $0x40] sm:$0xf]  ;;  %v7516_v17 = vld [vmem:[#allocation2 + $0x68] sm:$0xf] }
 0x1ff   : > { %1774 = vmatpush.bf16.xpose.msrb.mxu0 %v1760_v28  ;;  %v8053_v28 = vor.u32 %v8734_v56, %v8052_v19 }
 0x200   : > { %v1477_v47 = vpack.c.bf16 %v1434_v11, %v1336_v40  ;;  %v7864_v40 = vld [vmem:[#allocation2 + $0x40] sm:$0xf] }
 0x201   : > { %v8665_v46 = vld [vmem:[#allocation2 + $0x54] sm:$0xf0] }
 0x202   : > { %1525 = vst [vmem:[#allocation2 + $0x70] sm:$0xff] %v1477_v47  ;;  %v7761_v22 = vor.u32 %v8665_v46, %v7760_v20  ;;  %v8689_v49 = vld [vmem:[#allocation2 + $0x54] sm:$0xf0] }
 0x203   : > { %v8641_v29 = vld [vmem:[#allocation2 + $0x54] sm:$0xf0] }
 0x204   : > { %4701 = vrot.lane.b32.xlu2 %v8053_v28, %s9601_s21  ;;  %v1386_v43 = vpop.f32.mrf.mxu2  ;;  %3220 = vrot.lane.b32.xlu1 %v7761_v22, %s9602_s26  ;;  %v1291_v11 = vpop.f32.mrf.mxu0  ;;  %v7865_v28 = vor.u32 %v8689_v49, %v7864_v40  ;;  %v8260_v22 = vld [vmem:[#allocation2 + $0x12c] sm:$0xf]  ;;  %v7657_v32 = vor.u32 %v8641_v29, %v7656_v60 }
 0x205   : > { %v1435_v6 = vpop.f32.mrf.mxu3  ;;  %3853 = vrot.lane.b32.xlu0 %v7861_v10, %s9603_s6  ;;  %v1340_v46 = vpop.f32.mrf.mxu1  ;;  %v8261_v10 = vor.u32 %v8782_v16, %v8260_v22 }
 0x206   : > { %v1436_v47 = vadd.f32 %v1435_v6, %v1386_v43  ;;  %v10105_v56 = vpop.permute.xlu2 %3536  ;;  %v10107_v20 = vpop.permute.xlu1 %5959  ;;  %v1341_v6 = vadd.f32 %v1340_v46, %v1291_v11  ;;  %v7512_v11 = vld [vmem:[#allocation2 + $0x38] sm:$0xf] }
 0x207   : > { %1775 = vmatpush.bf16.xpose.msrb.mxu0 %v1757_v44  ;;  %12633 = vst [vmem:[#allocation46_spill] sm:$0xff] %v10107_v20  ;;  %v10109_v1 = vpop.permute.xlu0 %2266  ;;  %v7517_v44 = vor.u32 %v8610_v31, %v7516_v17  ;;  %v7513_v16 = vor.u32 %v8609_v62, %v7512_v11  ;;  %v8156_v17 = vld [vmem:[#allocation2 + $0x12c] sm:$0xf]  ;;  %v8783_v62 = vld [vmem:[#allocation2 + $0x170] sm:$0xf0] }
 0x208   : > { %v1480_v19 = vpack.c.bf16 %v1436_v47, %v1338_v0  ;;  %v8758_v47 = vld [vmem:[#allocation2 + $0x140] sm:$0xf0] }
 0x209   : > { %v1754_v35 = vsel %vm12590_vm0, %v7517_v44, 0  ;;  %v7764_v61 = vld [vmem:[#allocation2 + $0x70] sm:$0xf] }
 0x20a   : > { %1528 = vst [vmem:[#allocation2 + $0x88] sm:$0xff] %v1480_v19  ;;  %v8157_v19 = vor.u32 %v8758_v47, %v8156_v17 }
 0x20c   : > { %5969 = vrot.lane.b32.xlu2 %v8261_v10, %s9603_s6  ;;  %v1389_v43 = vpop.f32.mrf.mxu2  ;;  %3855 = vrot.lane.b32.xlu1 %v7865_v28, %s9603_s6  ;;  %v1293_v33 = vpop.f32.mrf.mxu0  ;;  %v8608_v28 = vld [vmem:[#allocation2 + $0x1c] sm:$0xf0] }
 0x20d   : > { %v1438_v41 = vpop.f32.mrf.mxu3  ;;  %2585 = vrot.lane.b32.xlu0 %v7657_v32, %s9601_s21  ;;  %v1342_v29 = vpop.f32.mrf.mxu1 }
 0x20e   : > { %v1439_v0 = vadd.f32 %v1438_v41, %v1389_v43  ;;  %v10115_v31 = vpop.permute.xlu2 %4693  ;;  %v10117_v40 = vpop.permute.xlu1 %5325  ;;  %v1751_v41 = vsel %vm12590_vm0, %v7513_v16, 0 }
 0x20f   : > { %1776 = vmatpush.bf16.xpose.msrb.mxu0 %v1754_v35  ;;  %v10119_v49 = vpop.permute.xlu0 %5961  ;;  %v1343_v35 = vadd.f32 %v1342_v29, %v1293_v33  ;;  %v8264_v33 = vld [vmem:[#allocation2 + $0x15c] sm:$0xf] }
 0x210   : > { %12634 = vst [vmem:[#allocation47_spill] sm:$0xff] %v10119_v49  ;;  %v1483_v60 = vpack.c.bf16 %v1439_v0, %v1341_v6  ;;  %v7508_v0 = vld [vmem:[#allocation2 + $0x8] sm:$0xf]  ;;  %v8265_v29 = vor.u32 %v8783_v62, %v8264_v33  ;;  %v7476_v33 = vld [vmem:[#allocation2] sm:$0xf] }
 0x212   : > { %1531 = vst [vmem:[#allocation2 + $0xa0] sm:$0xff] %v1483_v60  ;;  %v7509_v60 = vor.u32 %v8608_v28, %v7508_v0  ;;  %v8600_v28 = vld [vmem:[#allocation2 + $0x14] sm:$0xf0] }
 0x214   : > { %5335 = vrot.lane.b32.xlu2 %v8157_v19, %s9602_s26  ;;  %v1391_v46 = vpop.f32.mrf.mxu2  ;;  %v1296_v44 = vpop.f32.mrf.mxu0  ;;  %v1748_v19 = vsel %vm12590_vm0, %v7509_v60, 0  ;;  %v7477_v60 = vor.u32 %v8600_v28, %v7476_v33 }
 0x215   : > { %v1440_v32 = vpop.f32.mrf.mxu3  ;;  %v1345_v11 = vpop.f32.mrf.mxu1 }
 0x216   : > { %v1441_v22 = vadd.f32 %v1440_v32, %v1391_v46  ;;  %v10123_v10 = vpop.permute.xlu2 %2268  ;;  %v10125_v43 = vpop.permute.xlu1 %2901  ;;  %v1346_v16 = vadd.f32 %v1345_v11, %v1296_v44  ;;  %v8160_v44 = vld [vmem:[#allocation2 + $0x15c] sm:$0xf] }
 0x217   : > { %1777 = vmatpush.bf16.xpose.msrb.mxu0 %v1751_v41  ;;  %v10127_v6 = vpop.permute.xlu0 %5327 }
 0x218   : > { %v1486_v47 = vpack.c.bf16 %v1441_v22, %v1343_v35  ;;  %v8759_v22 = vld [vmem:[#allocation2 + $0x170] sm:$0xf0] }
 0x219   : > { %v7664_v0 = vld [vmem:[#allocation2 + $0xa0] sm:$0xf] }
 0x21a   : > { %1534 = vst [vmem:[#allocation2 + $0xb8] sm:$0xff] %v1486_v47  ;;  %v7768_v21 = vld [vmem:[#allocation2 + $0xa0] sm:$0xf] }
 0x21c   : > { %5971 = vrot.lane.b32.xlu2 %v8265_v29, %s9603_s6  ;;  %v1394_v17 = vpop.f32.mrf.mxu2  ;;  %v1298_v41 = vpop.f32.mrf.mxu0  ;;  %v8161_v29 = vor.u32 %v8759_v22, %v8160_v44  ;;  %v7660_v22 = vld [vmem:[#allocation2 + $0x70] sm:$0xf] }
 0x21d   : > { %v1443_v46 = vpop.f32.mrf.mxu3  ;;  %v1347_v47 = vpop.f32.mrf.mxu1 }
 0x21e   : > { %v1444_v32 = vadd.f32 %v1443_v46, %v1394_v17  ;;  %v10131_v25 = vpop.permute.xlu2 %2903  ;;  %v10133_v12 = vpop.permute.xlu1 %3538  ;;  %v1348_v17 = vadd.f32 %v1347_v47, %v1298_v41 }
 0x21f   : > { %1778 = vmatpush.bf16.xpose.msrb.mxu0 %v1748_v19  ;;  %v10135_v35 = vpop.permute.xlu0 %5963 }
 0x220   : > { %12635 = vst [vmem:[#allocation48_spill] sm:$0xff] %v10135_v35  ;;  %v1489_v62 = vpack.c.bf16 %v1444_v32, %v1346_v16 }
 0x221   : > { %v8643_v11 = vld [vmem:[#allocation2 + $0xb4] sm:$0xf0] }
 0x222   : > { %1537 = vst [vmem:[#allocation2 + $0xd0] sm:$0xff] %v1489_v62  ;;  %v7665_v19 = vor.u32 %v8643_v11, %v7664_v0  ;;  %v8667_v62 = vld [vmem:[#allocation2 + $0xb4] sm:$0xf0]  ;;  %v8642_v0 = vld [vmem:[#allocation2 + $0x84] sm:$0xf0] }
 0x223   : > { %v7769_v11 = vor.u32 %v8667_v62, %v7768_v21  ;;  %v7661_v41 = vor.u32 %v8642_v0, %v7660_v22  ;;  %v8691_v62 = vld [vmem:[#allocation2 + $0xb4] sm:$0xf0]  ;;  %v7480_v0 = vld [vmem:[#allocation2 + $0x30] sm:$0xf] }
 0x224   : > { %5337 = vrot.lane.b32.xlu2 %v8161_v29, %s9602_s26  ;;  %v1396_v46 = vpop.f32.mrf.mxu2  ;;  %v1301_v13 = vpop.f32.mrf.mxu0  ;;  %2589 = vrot.lane.b32.xlu0 %v7665_v19, %s9601_s21 }
 0x225   : > { %v1445_v30 = vpop.f32.mrf.mxu3  ;;  %v1350_v44 = vpop.f32.mrf.mxu1 }
 0x226   : > { %7538 = vmatmul.msk.bf16.vlgmr.msrb.gmra.mxu0 %vm12590_vm0, %v7477_v60  ;;  %v1446_v52 = vadd.f32 %v1445_v30, %v1396_v46  ;;  %v10140_v16 = vpop.permute.xlu2 %4695  ;;  %v10142_v32 = vpop.permute.xlu1 %2270  ;;  %v1351_v47 = vadd.f32 %v1350_v44, %v1301_v13  ;;  %v8666_v13 = vld [vmem:[#allocation2 + $0x84] sm:$0xf0]  ;;  %v7481_v44 = vor.u32 %v8601_v63, %v7480_v0 }
 0x227   : > { %v10144_v28 = vpop.permute.xlu0 %2905 }
 0x228   : > { %v1492_v33 = vpack.c.bf16 %v1446_v52, %v1348_v17  ;;  %v7872_v17 = vld [vmem:[#allocation2 + $0xa0] sm:$0xf] }
 0x229   : > { %v7668_v54 = vld [vmem:[#allocation2 + $0xd0] sm:$0xf] }
 0x22a   : > { %1540 = vst [vmem:[#allocation2 + $0xe8] sm:$0xff] %v1492_v33  ;;  %v7772_v49 = vld [vmem:[#allocation2 + $0xd0] sm:$0xf] }
 0x22c   : > { %v1399_v60 = vpop.f32.mrf.mxu2  ;;  %2587 = vrot.lane.b32.xlu2 %v7661_v41, %s9601_s21  ;;  %v1303_v29 = vpop.f32.mrf.mxu0  ;;  %3224 = vrot.lane.b32.xlu0 %v7769_v11, %s9602_s26  ;;  %v7873_v41 = vor.u32 %v8691_v62, %v7872_v17  ;;  %v7868_v17 = vld [vmem:[#allocation2 + $0x70] sm:$0xf]  ;;  %v8690_v62 = vld [vmem:[#allocation2 + $0x84] sm:$0xf0] }
 0x22d   : > { %v1448_v30 = vpop.f32.mrf.mxu3  ;;  %v1352_v21 = vpop.f32.mrf.mxu1 }
 0x22e   : > { %v1449_v19 = vadd.f32 %v1448_v30, %v1399_v60  ;;  %v10148_v46 = vpop.permute.xlu2 %5329  ;;  %v10150_v52 = vpop.permute.xlu1 %3540  ;;  %v7765_v60 = vor.u32 %v8666_v13, %v7764_v61  ;;  %v1353_v30 = vadd.f32 %v1352_v21, %v1303_v29  ;;  %v7869_v13 = vor.u32 %v8690_v62, %v7868_v17 }
 0x22f   : > { %v10152_v22 = vpop.permute.xlu0 %4697 }
 0x230   : > { %v1495_v20 = vpack.c.bf16 %v1449_v19, %v1351_v47 }
 0x231   : > { %v8644_v33 = vld [vmem:[#allocation2 + $0xe4] sm:$0xf0] }
 0x232   : > { %1543 = vst [vmem:[#allocation2 + $0x100] sm:$0xff] %v1495_v20  ;;  %v7669_v11 = vor.u32 %v8644_v33, %v7668_v54  ;;  %v8668_v35 = vld [vmem:[#allocation2 + $0xe4] sm:$0xf0] }
 0x233   : > { %v7773_v61 = vor.u32 %v8668_v35, %v7772_v49  ;;  %v8602_v49 = vld [vmem:[#allocation2 + $0x74] sm:$0xf0] }
 0x234   : > { %v1401_v7 = vpop.f32.mrf.mxu2  ;;  %2591 = vrot.lane.b32.xlu1 %v7669_v11, %s9601_s21  ;;  %v1306_v19 = vpop.f32.mrf.mxu0  ;;  %3859 = vrot.lane.b32.xlu0 %v7873_v41, %s9603_s6 }
 0x235   : > { %v1450_v47 = vpop.f32.mrf.mxu3  ;;  %3222 = vrot.lane.b32.xlu2 %v7765_v60, %s9602_s26  ;;  %v1355_v63 = vpop.f32.mrf.mxu1 }
 0x236   : > { %7539 = vmatmul.msk.bf16.gmra.mxu0 %vm12590_vm0, %v7481_v44  ;;  %v1451_v9 = vadd.f32 %v1450_v47, %v1401_v7  ;;  %v10158_v20 = vpop.permute.xlu2 %5331  ;;  %v10160_v29 = vpop.permute.xlu1 %2907  ;;  %v1356_v0 = vadd.f32 %v1355_v63, %v1306_v19  ;;  %v8692_v47 = vld [vmem:[#allocation2 + $0xe4] sm:$0xf0] }
 0x237   : > { %v10162_v21 = vpop.permute.xlu0 %5965 }
 0x238   : > { %v1498_v54 = vpack.c.bf16 %v1451_v9, %v1353_v30  ;;  %12636 = vst [vmem:[#allocation49_spill] sm:$0xff] %v10162_v21  ;;  %v7876_v30 = vld [vmem:[#allocation2 + $0xd0] sm:$0xf] }
 0x239   : > { %v7776_v35 = vld [vmem:[#allocation2 + $0x100] sm:$0xf]  ;;  %v7877_v17 = vor.u32 %v8692_v47, %v7876_v30 }
 0x23a   : > { %1546 = vst [vmem:[#allocation2 + $0x118] sm:$0xff] %v1498_v54  ;;  %v7484_v54 = vld [vmem:[#allocation2 + $0x60] sm:$0xf] }
 0x23b   : > { %v7485_v19 = vor.u32 %v8602_v49, %v7484_v54 }
 0x23c   : > { %v1404_v33 = vpop.f32.mrf.mxu2  ;;  %3226 = vrot.lane.b32.xlu1 %v7773_v61, %s9602_s26  ;;  %v1308_v11 = vpop.f32.mrf.mxu0 }
 0x23d   : > { %v1453_v44 = vpop.f32.mrf.mxu3  ;;  %3857 = vrot.lane.b32.xlu2 %v7869_v13, %s9603_s6  ;;  %v1357_v60 = vpop.f32.mrf.mxu1 }
 0x23e   : > { %v1454_v7 = vadd.f32 %v1453_v44, %v1404_v33  ;;  %v10166_v9 = vpop.permute.xlu2 %5967  ;;  %v10168_v61 = vpop.permute.xlu1 %3542  ;;  %v1358_v62 = vadd.f32 %v1357_v60, %v1308_v11  ;;  %v7880_v44 = vld [vmem:[#allocation2 + $0x100] sm:$0xf] }
 0x23f   : > { %12637 = vst [vmem:[#allocation50_spill] sm:$0xff] %v10166_v9  ;;  %v10172_v33 = vpop.permute.xlu0 %2272 }
 0x240   : > { %v1501_v41 = vpack.c.bf16 %v1454_v7, %v1356_v0 }
 0x241   : > { %v8669_v21 = vld [vmem:[#allocation2 + $0x114] sm:$0xf0] }
 0x242   : > { %1549 = vst [vmem:[#allocation2 + $0x130] sm:$0xff] %v1501_v41  ;;  %v7777_v63 = vor.u32 %v8669_v21, %v7776_v35  ;;  %v8693_v7 = vld [vmem:[#allocation2 + $0x114] sm:$0xf0]  ;;  %v7672_v41 = vld [vmem:[#allocation2 + $0x100] sm:$0xf] }
 0x243   : > { %v8645_v49 = vld [vmem:[#allocation2 + $0x114] sm:$0xf0]  ;;  %v7881_v47 = vor.u32 %v8693_v7, %v7880_v44 }
 0x244   : > { %v1406_v13 = vpop.f32.mrf.mxu2  ;;  %3228 = vrot.lane.b32.xlu0 %v7777_v63, %s9602_s26  ;;  %v1311_v21 = vpop.f32.mrf.mxu0  ;;  %v7673_v11 = vor.u32 %v8645_v49, %v7672_v41 }
 0x245   : > { %v1455_v0 = vpop.f32.mrf.mxu3  ;;  %3861 = vrot.lane.b32.xlu2 %v7877_v17, %s9603_s6  ;;  %v1360_v30 = vpop.f32.mrf.mxu1 }
 0x246   : > { %7540 = vmatmul.msk.bf16.gmra.mxu0 %vm12590_vm0, %v7485_v19  ;;  %v1456_v9 = vadd.f32 %v1455_v0, %v1406_v13  ;;  %v10175_v54 = vpop.permute.xlu2 %5333  ;;  %v1361_v60 = vadd.f32 %v1360_v30, %v1311_v21  ;;  %v10179_v5 = vpop.permute.xlu1 %4699  ;;  %v8603_v0 = vld [vmem:[#allocation2 + $0xa4] sm:$0xf0] }
 0x247   : > { %v10181_v13 = vpop.permute.xlu0 %3544  ;;  %v7489_v30 = vor.u32 %v8603_v0, %v7488_v37 }
 0x248   : > { %v1504_v35 = vpack.c.bf16 %v1456_v9, %v1358_v62 }
 0x249   : > { %v8092_v9 = vld [vmem:[#allocation2 + $0x134] sm:$0xf]  ;;  %v7676_v62 = vld [vmem:[#allocation2 + $0x130] sm:$0xf] }
 0x24a   : > { %1552 = vst [vmem:[#allocation2 + $0x148] sm:$0xff] %v1504_v35  ;;  %v7780_v7 = vld [vmem:[#allocation2 + $0x130] sm:$0xf] }
 0x24c   : > { %v1409_v19 = vpop.f32.mrf.mxu2  ;;  %3863 = vrot.lane.b32.xlu0 %v7881_v47, %s9603_s6  ;;  %v1313_v41 = vpop.f32.mrf.mxu0 }
 0x24d   : > { %v1458_v63 = vpop.f32.mrf.mxu3  ;;  %2593 = vrot.lane.b32.xlu2 %v7673_v11, %s9601_s21  ;;  %v1362_v49 = vpop.f32.mrf.mxu1 }
 0x24e   : > { %v1459_v17 = vadd.f32 %v1458_v63, %v1409_v19  ;;  %v2275_v26 = vpop.permute.xlu2 %2274  ;;  %v1363_v19 = vadd.f32 %v1362_v49, %v1313_v41 }
 0x250   : > { %v1507_v44 = vpack.c.bf16 %v1459_v17, %v1361_v60 }
 0x251   : > { %v8742_v21 = vld [vmem:[#allocation2 + $0x148] sm:$0xf0]  ;;  %v8646_v35 = vld [vmem:[#allocation2 + $0x144] sm:$0xf0] }
 0x252   : > { %1555 = vst [vmem:[#allocation2 + $0x160] sm:$0xff] %v1507_v44  ;;  %v8093_v47 = vor.u32 %v8742_v21, %v8092_v9  ;;  %v7677_v57 = vor.u32 %v8646_v35, %v7676_v62  ;;  %v8670_v11 = vld [vmem:[#allocation2 + $0x144] sm:$0xf0]  ;;  %v7884_v44 = vld [vmem:[#allocation2 + $0x130] sm:$0xf] }
 0x253   : > { %v7781_v24 = vor.u32 %v8670_v11, %v7780_v7  ;;  %v8694_v37 = vld [vmem:[#allocation2 + $0x144] sm:$0xf0]  ;;  %v7492_v11 = vld [vmem:[#allocation2 + $0xc0] sm:$0xf] }
 0x254   : > { %v1411_v63 = vpop.f32.mrf.mxu2  ;;  %5022 = vrot.lane.b32.xlu1 %v8093_v47, %s9601_s21  ;;  %2595 = vrot.lane.b32.xlu0 %v7677_v57, %s9601_s21  ;;  %v7885_v41 = vor.u32 %v8694_v37, %v7884_v44  ;;  %v8604_v57 = vld [vmem:[#allocation2 + $0xd4] sm:$0xf0] }
 0x255   : > { %v1460_v60 = vpop.f32.mrf.mxu3  ;;  %3230 = vrot.lane.b32.xlu2 %v7781_v24, %s9602_s26  ;;  %v2321_v24 = vsel %vm12590_vm0, %v2275_v26, 0 }
 0x256   : > { %7541 = vmatmul.msk.bf16.gmra.mxu0 %vm12590_vm0, %v7489_v30  ;;  %v1461_v17 = vadd.f32 %v1460_v60, %v1411_v63  ;;  %v2277_v18 = vpop.permute.xlu1 %2276  ;;  %v2910_v49 = vpop.permute.xlu2 %2909  ;;  %v7493_v60 = vor.u32 %v8604_v57, %v7492_v11  ;;  %v2318_v57 = vsel %vm12590_vm0, %v10172_v33, 0  ;;  %v7564_v11 = vld [vmem:[#allocation2 + $0xd0] sm:$0xf]  ;;  %v2315_v33 = vsel %vm12590_vm0, %v10142_v32, 0 }
 0x257   : > { %v2324_v0 = vsel %vm12590_vm0, %v2277_v18, 0  ;;  %v2912_v9 = vpop.permute.xlu0 %2911  ;;  %v2956_v30 = vsel %vm12590_vm0, %v2910_v49, 0  ;;  %v2312_v32 = vsel %vm12590_vm0, %v10123_v10, 0  ;;  %v2944_v10 = vsel %vm12590_vm0, %v10125_v43, 0  ;;  %v7952_v43 = vld [vmem:[#allocation2 + $0x15c] sm:$0xf] }
 0x258   : > { %v1510_v62 = vpack.c.bf16 %v1461_v17, %v1363_v19  ;;  %v2959_v7 = vsel %vm12590_vm0, %v2912_v9, 0  ;;  %2326 = vmatpush.bf16.xpose.msrb.mxu2 %v2324_v0  ;;  %v7572_v9 = vld [vmem:[#allocation2 + $0x130] sm:$0xf] }
 0x259   : > { %2961 = vmatpush.bf16.xpose.msra.mxu0 %v2959_v7  ;;  %v7576_v21 = vld [vmem:[#allocation2 + $0x160] sm:$0xf]  ;;  %v8096_v47 = vld [vmem:[#allocation2 + $0x164] sm:$0xf] }
 0x25a   : > { %1558 = vst [vmem:[#allocation2 + $0x178] sm:$0xff] %v1510_v62  ;;  %v7680_v35 = vld [vmem:[#allocation2 + $0x160] sm:$0xf]  ;;  %v8622_v62 = vld [vmem:[#allocation2 + $0x144] sm:$0xf0] }
 0x25b   : > { %v7888_v18 = vld [vmem:[#allocation2 + $0x160] sm:$0xf] }
 0x25c   : > { %v7784_v49 = vld [vmem:[#allocation2 + $0x160] sm:$0xf] }
 0x25d   : > { %3865 = vrot.lane.b32.xlu2 %v7885_v41, %s9603_s6  ;;  %v7573_v41 = vor.u32 %v8622_v62, %v7572_v9  ;;  %v7556_v62 = vld [vmem:[#allocation2 + $0x70] sm:$0xf] }
 0x260   : > { %2327 = vmatpush.bf16.xpose.msrb.mxu2 %v2321_v24 }
 0x261   : > { %2962 = vmatpush.bf16.xpose.msra.mxu0 %v2956_v30  ;;  %v8623_v19 = vld [vmem:[#allocation2 + $0x174] sm:$0xf0]  ;;  %v8743_v0 = vld [vmem:[#allocation2 + $0x178] sm:$0xf0]  ;;  %v2953_v30 = vsel %vm12590_vm0, %v10160_v29, 0  ;;  %v2950_v29 = vsel %vm12590_vm0, %v10144_v28, 0 }
 0x262   : > { %v8647_v63 = vld [vmem:[#allocation2 + $0x174] sm:$0xf0]  ;;  %v7577_v17 = vor.u32 %v8623_v19, %v7576_v21  ;;  %v8097_v26 = vor.u32 %v8743_v0, %v8096_v47  ;;  %v7568_v21 = vld [vmem:[#allocation2 + $0x100] sm:$0xf]  ;;  %v8620_v19 = vld [vmem:[#allocation2 + $0xe4] sm:$0xf0] }
 0x263   : > { %v7681_v44 = vor.u32 %v8647_v63, %v7680_v35  ;;  %v8695_v37 = vld [vmem:[#allocation2 + $0x174] sm:$0xf0]  ;;  %v7565_v63 = vor.u32 %v8620_v19, %v7564_v11  ;;  %v2947_v28 = vsel %vm12590_vm0, %v10131_v25, 0  ;;  %v10214_v11 = vpop.permute.xlu2 %4701  ;;  %v7500_v25 = vld [vmem:[#allocation2 + $0x120] sm:$0xf] }
 0x264   : > { %v7889_v7 = vor.u32 %v8695_v37, %v7888_v18  ;;  %2036 = vmatpush.bf16.msrb.mxu1 %v7577_v17  ;;  %v8671_v24 = vld [vmem:[#allocation2 + $0x174] sm:$0xf0]  ;;  %v7560_v17 = vld [vmem:[#allocation2 + $0xa0] sm:$0xf]  ;;  %v7496_v37 = vld [vmem:[#allocation2 + $0xf0] sm:$0xf] }
 0x265   : > { %2597 = vrot.lane.b32.xlu1 %v7681_v44, %s9601_s21  ;;  %5024 = vrot.lane.b32.xlu2 %v8097_v26, %s9601_s21  ;;  %v8621_v35 = vld [vmem:[#allocation2 + $0x114] sm:$0xf0]  ;;  %v7785_v18 = vor.u32 %v8671_v24, %v7784_v49 }
 0x266   : > { %7542 = vmatmul.msk.bf16.gmra.mxu0 %vm12590_vm0, %v7493_v60  ;;  %3867 = vrot.lane.b32.xlu0 %v7889_v7, %s9603_s6  ;;  %v7569_v47 = vor.u32 %v8621_v35, %v7568_v21  ;;  %v8605_v60 = vld [vmem:[#allocation2 + $0x104] sm:$0xf0]  ;;  %v8619_v44 = vld [vmem:[#allocation2 + $0xb4] sm:$0xf0] }
 0x267   : > { %v7497_v0 = vor.u32 %v8605_v60, %v7496_v37  ;;  %v7561_v9 = vor.u32 %v8619_v44, %v7560_v17  ;;  %v8618_v7 = vld [vmem:[#allocation2 + $0x84] sm:$0xf0]  ;;  %v8617_v49 = vld [vmem:[#allocation2 + $0x54] sm:$0xf0] }
 0x268   : > { %2037 = vmatpush.bf16.msrb.mxu1 %v7573_v41  ;;  %2328 = vmatpush.bf16.xpose.msrb.mxu2 %v2318_v57  ;;  %v7557_v26 = vor.u32 %v8618_v7, %v7556_v62  ;;  %v7552_v41 = vld [vmem:[#allocation2 + $0x40] sm:$0xf]  ;;  %v7548_v57 = vld [vmem:[#allocation2 + $0x10] sm:$0xf]  ;;  %v8616_v21 = vld [vmem:[#allocation2 + $0x24] sm:$0xf0] }
 0x269   : > { %2963 = vmatpush.bf16.xpose.msra.mxu0 %v2953_v30  ;;  %v7553_v24 = vor.u32 %v8617_v49, %v7552_v41  ;;  %v7549_v35 = vor.u32 %v8616_v21, %v7548_v57  ;;  %v3547_v30 = vpop.permute.xlu0 %3546  ;;  %v8607_v37 = vld [vmem:[#allocation2 + $0x164] sm:$0xf0]  ;;  %v8710_v7 = vld [vmem:[#allocation2 + $0x140] sm:$0xf0]  ;;  %v3591_v49 = vsel %vm12590_vm0, %v10181_v13, 0  ;;  %v12638_v13 = vmov 0 }
 0x26b   : > { %v10223_v17 = vpop.permute.xlu2 %5969 }
 0x26c   : > { %2038 = vmatpush.bf16.msrb.mxu1 %v7569_v47  ;;  %v8606_v47 = vld [vmem:[#allocation2 + $0x134] sm:$0xf0] }
 0x26d   : > { %3232 = vrot.lane.b32.xlu1 %v7785_v18, %s9602_s26  ;;  %v2309_v18 = vsel %vm12590_vm0, %v10109_v1, 0  ;;  %v7501_v19 = vor.u32 %v8606_v47, %v7500_v25  ;;  %v2941_v1 = vsel %vm12590_vm0, %v10099_v48, 0  ;;  %v10247_v47 = vpop.permute.xlu1 %2583 }
 0x270   : > { %2039 = vmatpush.bf16.msrb.mxu1 %v7565_v63  ;;  %2329 = vmatpush.bf16.xpose.msrb.mxu2 %v2315_v33  ;;  %v2306_v63 = vsel %vm12590_vm0, %v10088_v4, 0  ;;  %v8711_v33 = vld [vmem:[#allocation2 + $0x170] sm:$0xf0]  ;;  %v2938_v4 = vsel %vm12590_vm0, %v10054_v27, 0  ;;  %v1559_v27 = vlaneseq }
 0x271   : > { %2964 = vmatpush.bf16.xpose.msra.mxu0 %v2950_v29  ;;  %v10221_v60 = vpop.permute.xlu0 %4703  ;;  %v7953_v44 = vor.u32 %v8711_v33, %v7952_v43  ;;  %v2303_v29 = vsel %vm12590_vm0, %v10047_v50, 0  ;;  %v7948_v50 = vld [vmem:[#allocation2 + $0x12c] sm:$0xf] }
 0x272   : > { %v7949_v41 = vor.u32 %v8710_v7, %v7948_v50  ;;  %v10241_v57 = vshrl.u32 %v1559_v27, 7  ;;  %v10243_v21 = vand.u32 127, %v1559_v27  ;;  %v7940_v43 = vld [vmem:[#allocation2 + $0xcc] sm:$0xf]  ;;  %v7936_v7 = vld [vmem:[#allocation2 + $0x9c] sm:$0xf] }
 0x273   : > { %v4197_v48 = vsel %vm12590_vm0, %v7953_v44, 0  ;;  %v3582_v27 = vsel %vm12590_vm0, %v10133_v12, 0  ;;  %v7932_v12 = vld [vmem:[#allocation2 + $0x6c] sm:$0xf] }
 0x274   : > { %2040 = vmatpush.bf16.msrb.mxu1 %v7561_v9  ;;  %v7504_v9 = vld [vmem:[#allocation2 + $0x150] sm:$0xf]  ;;  %vm10253_vm1 = vcmp.ge.s32.totalorder %v10241_v57, %v10243_v21  ;;  %v1561_v33 = vadd.s32 8, %v10241_v57 }
 0x275   : > { %v7505_v62 = vor.u32 %v8607_v37, %v7504_v9  ;;  %v12639_v13 = vsel %vm10253_vm1, 4294967295, %v12638_v13  ;;  %v3585_v37 = vsel %vm12590_vm0, %v10150_v52, 0  ;;  %v8707_v9 = vld [vmem:[#allocation2 + $0xb0] sm:$0xf0] }
 0x276   : > { %7543 = vmatmul.msk.bf16.gmra.mxu0 %vm12590_vm0, %v7497_v0  ;;  %v3594_v0 = vsel %vm12590_vm0, %v3547_v30, 0  ;;  %12640 = vst [vmem:[#allocation51_spill] sm:$0xff] %v12639_v13  ;;  %vm10273_vm2 = vcmp.ge.s32.totalorder %v1561_v33, %v10243_v21  ;;  %v7937_v52 = vor.u32 %v8707_v9, %v7936_v7  ;;  %v7928_v9 = vld [vmem:[#allocation2 + $0x3c] sm:$0xf]  ;;  %v7976_v13 = vld [vmem:[#allocation2 + $0xa4] sm:$0xf] }
 0x277   : > { %v8296_v7 = vld [vmem:[#allocation2 + $0x104] sm:$0xf] }
 0x278   : > { %2041 = vmatpush.bf16.msrb.mxu1 %v7557_v26  ;;  %2330 = vmatpush.bf16.xpose.msrb.mxu2 %v2312_v32  ;;  %v10234_v32 = vpop.permute.xlu2 %5335 }
 0x279   : > { %2965 = vmatpush.bf16.xpose.msra.mxu0 %v2947_v28  ;;  %v10231_v26 = vpop.permute.xlu0 %3218  ;;  %v4194_v28 = vsel %vm12590_vm0, %v7949_v41, 0  ;;  %v12643_v41 = vmov 0 }
 0x27c   : > { %2042 = vmatpush.bf16.msrb.mxu1 %v7553_v24  ;;  %v8709_v24 = vld [vmem:[#allocation2 + $0x110] sm:$0xf0] }
 0x280   : > { %2043 = vmatpush.bf16.msrb.mxu1 %v7549_v35  ;;  %2331 = vmatpush.bf16.xpose.msrb.mxu2 %v2309_v18  ;;  %v7944_v35 = vld [vmem:[#allocation2 + $0xfc] sm:$0xf] }
 0x281   : > { %2966 = vmatpush.bf16.xpose.msra.mxu0 %v2944_v10  ;;  %v7945_v30 = vor.u32 %v8709_v24, %v7944_v35  ;;  %v10245_v18 = vpop.permute.xlu0 %3853  ;;  %v3588_v10 = vsel %vm12590_vm0, %v10168_v61, 0  ;;  %v8706_v35 = vld [vmem:[#allocation2 + $0x80] sm:$0xf0] }
 0x286   : > { %7544 = vmatmul.msk.bf16.gmra.mxu0 %vm12590_vm0, %v7501_v19  ;;  %v4191_v19 = vsel %vm12590_vm0, %v7945_v30, 0 }
 0x288   : > { %2332 = vmatpush.bf16.xpose.msrb.mxu2 %v2306_v63 }
 0x289   : > { %2967 = vmatpush.bf16.xpose.msra.mxu0 %v2941_v1  ;;  %v8708_v1 = vld [vmem:[#allocation2 + $0xe0] sm:$0xf0]  ;;  %v10268_v61 = vpop.permute.xlu0 %2585 }
 0x28a   : > { %v7941_v44 = vor.u32 %v8708_v1, %v7940_v43  ;;  %v3579_v43 = vsel %vm12590_vm0, %v10105_v56, 0 }
 0x290   : > { %2333 = vmatpush.bf16.xpose.msrb.mxu2 %v2303_v29 }
 0x291   : > { %2968 = vmatpush.bf16.xpose.msra.mxu0 %v2938_v4 }
 0x296   : > { %7545 = vmatmul.msk.bf16.gmra.mxu0 %vm12590_vm0, %v7505_v62  ;;  %v1562_v62 = vadd.s32 16, %v10241_v57  ;;  %v10290_v50 = vpop.permute.xlu0 %2589 }
 0x297   : > { %7642 = vmatmul.msk.bf16.vlgmr.msrb.gmra.mxu2 %vm12590_vm0, %v9907_v38  ;;  %v10249_v38 = vpop.permute.xlu2 %5971 }
 0x298   : > { %3596 = vmatpush.bf16.xpose.msra.mxu2 %v3594_v0  ;;  %v10279_v0 = vpop.permute.xlu1 %3220  ;;  %vm10293_vm3 = vcmp.ge.s32.totalorder %v1562_v62, %v10243_v21 }
 0x299   : > { %4199 = vmatpush.bf16.xpose.msrb.mxu0 %v4197_v48  ;;  %v4188_v48 = vsel %vm12590_vm0, %v7941_v44, 0  ;;  %v12644_v41 = vsel %vm10293_vm3, 4294967295, %v12643_v41 }
 0x29a   : > { %12645 = vst [vmem:[#allocation52_spill] sm:$0xff] %v12644_v41 }
 0x29e   : > { %v10314_v1 = vpop.permute.xlu0 %3224 }
 0x29f   : > { %v10281_v4 = vpop.permute.xlu2 %5337 }
 0x2a0   : > { %3597 = vmatpush.bf16.xpose.msra.mxu2 %v3591_v49 }
 0x2a1   : > { %4200 = vmatpush.bf16.xpose.msrb.mxu0 %v4194_v28  ;;  %v4185_v28 = vsel %vm12590_vm0, %v7937_v52, 0  ;;  %v3576_v52 = vsel %vm12590_vm0, %v10095_v2, 0  ;;  %v7924_v2 = vld [vmem:[#allocation2 + $0xc] sm:$0xf] }
 0x2a3   : > { %v1780_v25 = vpop.f32.mrf.mxu0 }
 0x2a4   : > { %v10262_v63 = vsel %vm10253_vm1, %v1780_v25, -1e+30  ;;  %v1563_v25 = vadd.s32 24, %v10241_v57 }
 0x2a5   : > { %1836 = vmax.xlane.f32.xlu0 %v10262_v63 }
 0x2a6   : > { %7746 = vmatmul.msk.bf16.vlgmr.msra.gmra.mxu0 %vm12590_vm0, %v9922_v14  ;;  %vm10317_vm4 = vcmp.ge.s32.totalorder %v1563_v25, %v10243_v21  ;;  %v8704_v25 = vld [vmem:[#allocation2 + $0x20] sm:$0xf0] }
 0x2a7   : > { %7643 = vmatmul.msk.bf16.gmra.mxu2 %vm12590_vm0, %v9939_v51  ;;  %v10304_v30 = vpop.permute.xlu2 %2587 }
 0x2a8   : > { %3598 = vmatpush.bf16.xpose.msra.mxu2 %v3588_v10  ;;  %v10307_v10 = vpop.permute.xlu1 %3855 }
 0x2a9   : > { %4201 = vmatpush.bf16.xpose.msrb.mxu0 %v4191_v19  ;;  %v7933_v19 = vor.u32 %v8706_v35, %v7932_v12  ;;  %v1565_v12 = vadd.s32 40, %v10241_v57 }
 0x2ab   : > { %v1782_v14 = vpop.f32.mrf.mxu0  ;;  %vm10359_vm6 = vcmp.ge.s32.totalorder %v1565_v12, %v10243_v21  ;;  %v5382_v12 = vsel %vm12590_vm0, %v10234_v32, 0 }
 0x2ac   : > { %v10286_v51 = vsel %vm10273_vm2, %v1782_v14, -1e+30 }
 0x2ad   : > { %1838 = vmax.xlane.f32.xlu0 %v10286_v51 }
 0x2af   : > { %v10332_v62 = vpop.permute.xlu2 %3222 }
 0x2b0   : > { %3599 = vmatpush.bf16.xpose.msra.mxu2 %v3585_v37  ;;  %v4182_v37 = vsel %vm12590_vm0, %v7933_v19, 0  ;;  %v10329_v14 = vpop.permute.xlu1 %2591 }
 0x2b1   : > { %4202 = vmatpush.bf16.xpose.msrb.mxu0 %v4188_v48  ;;  %v1564_v48 = vadd.s32 32, %v10241_v57 }
 0x2b3   : > { %v1785_v49 = vpop.f32.mrf.mxu0  ;;  %vm10335_vm5 = vcmp.ge.s32.totalorder %v1564_v48, %v10243_v21 }
 0x2b4   : > { %v10302_v24 = vsel %vm10293_vm3, %v1785_v49, -1e+30 }
 0x2b5   : > { %1840 = vmax.xlane.f32.xlu1 %v10302_v24 }
 0x2b6   : > { %7747 = vmatmul.msk.bf16.gmra.mxu0 %vm12590_vm0, %v9941_v55 }
 0x2b7   : > { %7644 = vmatmul.msk.bf16.gmra.mxu2 %vm12590_vm0, %v9965_v39  ;;  %v8705_v39 = vld [vmem:[#allocation2 + $0x50] sm:$0xf0] }
 0x2b8   : > { %3600 = vmatpush.bf16.xpose.msra.mxu2 %v3582_v27  ;;  %v7929_v56 = vor.u32 %v8705_v39, %v7928_v9  ;;  %v10352_v19 = vpop.permute.xlu1 %3226  ;;  %v3573_v39 = vsel %vm12590_vm0, %v10061_v58, 0  ;;  %v1566_v58 = vadd.s32 48, %v10241_v57 }
 0x2b9   : > { %4203 = vmatpush.bf16.xpose.msrb.mxu0 %v4185_v28  ;;  %v10342_v28 = vpop.permute.xlu0 %3859 }
 0x2ba   : > { %v4179_v49 = vsel %vm12590_vm0, %v7929_v56, 0  ;;  %vm10379_vm7 = vcmp.ge.s32.totalorder %v1566_v58, %v10243_v21  ;;  %v1568_v58 = vadd.s32 64, %v10241_v57 }
 0x2bb   : > { %v1787_v44 = vpop.f32.mrf.mxu0 }
 0x2bc   : > { %v10326_v55 = vsel %vm10317_vm4, %v1787_v44, -1e+30  ;;  %v10354_v44 = vpop.permute.xlu2 %3857  ;;  %vm10417_vm9 = vcmp.ge.s32.totalorder %v1568_v58, %v10243_v21 }
 0x2bd   : > { %1842 = vmax.xlane.f32.xlu1 %v10326_v55 }
 0x2c0   : > { %3601 = vmatpush.bf16.xpose.msra.mxu2 %v3579_v43  ;;  %v7925_v43 = vor.u32 %v8704_v25, %v7924_v2  ;;  %v4748_v25 = vsel %vm12590_vm0, %v10214_v11, 0  ;;  %v12655_v11 = vmov 0 }
 0x2c1   : > { %4204 = vmatpush.bf16.xpose.msrb.mxu0 %v4182_v37  ;;  %v3229_v56 = vpop.permute.xlu0 %3228 }
 0x2c2   : > { %v4176_v9 = vsel %vm12590_vm0, %v7925_v43, 0 }
 0x2c3   : > { %v1790_v27 = vpop.f32.mrf.mxu0 }
 0x2c4   : > { %v10346_v35 = vsel %vm10335_vm5, %v1790_v27, -1e+30  ;;  %v12653_v27 = vmov 0 }
 0x2c5   : > { %1844 = vmax.xlane.f32.xlu2 %v10346_v35  ;;  %v12654_v27 = vsel %vm10379_vm7, 4294967295, %v12653_v27 }
 0x2c6   : > { %7748 = vmatmul.msk.bf16.gmra.mxu0 %vm12590_vm0, %v9937_v45  ;;  %v4751_v45 = vsel %vm12590_vm0, %v10221_v60, 0  ;;  %v10376_v60 = vpop.permute.xlu1 %5022 }
 0x2c7   : > { %7645 = vmatmul.msk.bf16.gmra.mxu2 %vm12590_vm0, %v9971_v8  ;;  %12652 = vst [vmem:[#allocation53_spill] sm:$0xff] %v10376_v60 }
 0x2c8   : > { %3602 = vmatpush.bf16.xpose.msra.mxu2 %v3576_v52  ;;  %v5385_v52 = vsel %vm12590_vm0, %v10281_v4, 0  ;;  %v10383_v4 = vpop.permute.xlu2 %3861 }
 0x2c9   : > { %4205 = vmatpush.bf16.xpose.msrb.mxu0 %v4179_v49  ;;  %v10393_v43 = vpop.permute.xlu0 %3863 }
 0x2cb   : > { %v1792_v48 = vpop.f32.mrf.mxu0 }
 0x2cc   : > { %v10372_v8 = vsel %vm10359_vm6, %v1792_v48, -1e+30 }
 0x2cd   : > { %1846 = vmax.xlane.f32.xlu2 %v10372_v8 }
 0x2d0   : > { %3603 = vmatpush.bf16.xpose.msra.mxu2 %v3573_v39  ;;  %v1567_v39 = vadd.s32 56, %v10241_v57  ;;  %v2594_v48 = vpop.permute.xlu2 %2593 }
 0x2d1   : > { %4206 = vmatpush.bf16.xpose.msrb.mxu0 %v4176_v9  ;;  %v4745_v9 = vsel %vm12590_vm0, %v10179_v5, 0 }
 0x2d2   : > { %vm10402_vm8 = vcmp.ge.s32.totalorder %v1567_v39, %v10243_v21 }
 0x2d3   : > { %v1795_v49 = vpop.f32.mrf.mxu0  ;;  %v12656_v11 = vsel %vm10402_vm8, 4294967295, %v12655_v11 }
 0x2d4   : > { %v10391_v2 = vsel %vm10379_vm7, %v1795_v49, -1e+30  ;;  %12657 = vst [vmem:[#allocation54_spill] sm:$0xff] %v12656_v11 }
 0x2d5   : > { %1848 = vmax.xlane.f32.xlu0 %v10391_v2 }
 0x2d6   : > { %7749 = vmatmul.msk.bf16.gmra.mxu0 %vm12590_vm0, %v9982_v42 }
 0x2d7   : > { %7646 = vmatmul.msk.bf16.gmra.mxu2 %vm12590_vm0, %v10019_v23  ;;  %v2596_v23 = vpop.permute.xlu0 %2595 }
 0x2d8   : > { %4753 = vmatpush.bf16.xpose.msrb.mxu2 %v4751_v45  ;;  %v2598_v45 = vpop.permute.xlu1 %2597 }
 0x2d9   : > { %5387 = vmatpush.bf16.xpose.msra.mxu0 %v5385_v52  ;;  %2607 = vmatpush.bf16.msrb.mxu3 %v2598_v45  ;;  %v5379_v52 = vsel %vm12590_vm0, %v10175_v54, 0  ;;  %v4742_v54 = vsel %vm12590_vm0, %v10152_v22, 0  ;;  %v3231_v45 = vpop.permute.xlu2 %3230  ;;  %v12661_v22 = vmov 0 }
 0x2db   : > { %v1797_v32 = vpop.f32.mrf.mxu0 }
 0x2dc   : > { %v10412_v42 = vsel %vm10402_vm8, %v1797_v32, -1e+30  ;;  %v1569_v32 = vadd.s32 72, %v10241_v57 }
 0x2dd   : > { %1850 = vmax.xlane.f32.xlu1 %v10412_v42  ;;  %2608 = vmatpush.bf16.msrb.mxu3 %v2596_v23  ;;  %v12674_v23 = vld [vmem:[#allocation39_spill] sm:$0xff] }
 0x2de   : > { %vm10437_vm10 = vcmp.ge.s32.totalorder %v1569_v32, %v10243_v21  ;;  %v6019_v32 = vsel %vm12590_vm0, %v10249_v38, 0 }
 0x2df   : > { %v12662_v22 = vsel %vm10437_vm10, 4294967295, %v12661_v22 }
 0x2e0   : > { %4754 = vmatpush.bf16.xpose.msrb.mxu2 %v4748_v25  ;;  %v3233_v49 = vpop.permute.xlu1 %3232  ;;  %v12658_v25 = vmov 0  ;;  %12663 = vst [vmem:[#allocation56_spill] sm:$0xff] %v12662_v22 }
 0x2e1   : > { %5388 = vmatpush.bf16.xpose.msra.mxu0 %v5382_v12  ;;  %v12659_v25 = vsel %vm10417_vm9, 4294967295, %v12658_v25  ;;  %2609 = vmatpush.bf16.msrb.mxu3 %v2594_v48  ;;  %v5376_v12 = vsel %vm12590_vm0, %v10158_v20, 0  ;;  %v4739_v48 = vsel %vm12590_vm0, %v10140_v16, 0  ;;  %v12664_v16 = vmov 0 }
 0x2e2   : > { %12660 = vst [vmem:[#allocation55_spill] sm:$0xff] %v12659_v25  ;;  %3242 = vmatpush.bf16.msra.mxu1 %v3233_v49 }
 0x2e3   : > { %v1800_v5 = vpop.f32.mrf.mxu0 }
 0x2e4   : > { %v10427_v39 = vsel %vm10417_vm9, %v1800_v5, -1e+30  ;;  %v1574_v5 = vadd.s32 112, %v10241_v57 }
 0x2e5   : > { %1852 = vmax.xlane.f32.xlu2 %v10427_v39  ;;  %2610 = vmatpush.bf16.msrb.mxu3 %v10329_v14  ;;  %v5373_v14 = vsel %vm12590_vm0, %v10148_v46, 0 }
 0x2e6   : > { %3243 = vmatpush.bf16.msra.mxu1 %v3231_v45  ;;  %7750 = vmatmul.msk.bf16.gmra.mxu0 %vm12590_vm0, %v9996_v15  ;;  %vm10530_vm15 = vcmp.ge.s32.totalorder %v1574_v5, %v10243_v21  ;;  %v12682_v45 = vld [vmem:[#allocation42_spill] sm:$0xff] }
 0x2e7   : > { %7647 = vmatmul.msk.bf16.gmra.mxu2 %vm12590_vm0, %v10011_v3  ;;  %v1570_v3 = vadd.s32 80, %v10241_v57 }
 0x2e8   : > { %4755 = vmatpush.bf16.xpose.msrb.mxu2 %v4745_v9  ;;  %v12673_v9 = vld [vmem:[#allocation44_spill] sm:$0xff] }
 0x2e9   : > { %5389 = vmatpush.bf16.xpose.msra.mxu0 %v5379_v52  ;;  %2611 = vmatpush.bf16.msrb.mxu3 %v10290_v50  ;;  %vm10455_vm11 = vcmp.ge.s32.totalorder %v1570_v3, %v10243_v21  ;;  %v4736_v50 = vsel %vm12590_vm0, %v10115_v31, 0  ;;  %v12667_v31 = vmov 0  ;;  %v5364_v52 = vsel %vm12590_vm0, %v12673_v9, 0 }
 0x2ea   : > { %3244 = vmatpush.bf16.msra.mxu1 %v3229_v56  ;;  %v12665_v16 = vsel %vm10455_vm11, 4294967295, %v12664_v16  ;;  %v5370_v56 = vsel %vm12590_vm0, %v10127_v6, 0  ;;  %v3866_v6 = vpop.permute.xlu2 %3865 }
 0x2eb   : > { %v1802_v20 = vpop.f32.mrf.mxu0  ;;  %12666 = vst [vmem:[#allocation57_spill] sm:$0xff] %v12665_v16 }
 0x2ec   : > { %v10448_v15 = vsel %vm10437_vm10, %v1802_v20, -1e+30 }
 0x2ed   : > { %1854 = vmax.xlane.f32.xlu0 %v10448_v15  ;;  %2612 = vmatpush.bf16.msrb.mxu3 %v10304_v30 }
 0x2ee   : > { %3245 = vmatpush.bf16.msra.mxu1 %v10352_v19  ;;  %v1571_v19 = vadd.s32 88, %v10241_v57 }
 0x2f0   : > { %4756 = vmatpush.bf16.xpose.msrb.mxu2 %v4742_v54  ;;  %vm10478_vm12 = vcmp.ge.s32.totalorder %v1571_v19, %v10243_v21 }
 0x2f1   : > { %5390 = vmatpush.bf16.xpose.msra.mxu0 %v5376_v12  ;;  %2613 = vmatpush.bf16.msrb.mxu3 %v10268_v61  ;;  %v3868_v61 = vpop.permute.xlu0 %3867  ;;  %v12668_v31 = vsel %vm10478_vm12, 4294967295, %v12667_v31  ;;  %v1575_v12 = vadd.s32 120, %v10241_v57 }
 0x2f2   : > { %3246 = vmatpush.bf16.msra.mxu1 %v10314_v1  ;;  %12669 = vst [vmem:[#allocation58_spill] sm:$0xff] %v12668_v31  ;;  %v4733_v1 = vsel %vm12590_vm0, %v10097_v36, 0  ;;  %v12670_v36 = vmov 0  ;;  %v12708_v31 = vld [vmem:[#allocation15_spill] sm:$0xff] }
 0x2f3   : > { %v1805_v46 = vpop.f32.mrf.mxu0 }
 0x2f4   : > { %v10467_v30 = vsel %vm10455_vm11, %v1805_v46, -1e+30 }
 0x2f5   : > { %1856 = vmax.xlane.f32.xlu1 %v10467_v30  ;;  %2614 = vmatpush.bf16.msrb.mxu3 %v10247_v47 }
 0x2f6   : > { %3247 = vmatpush.bf16.msra.mxu1 %v10332_v62  ;;  %7751 = vmatmul.msk.bf16.gmra.mxu0 %vm12590_vm0, %v10027_v34  ;;  %v5367_v34 = vsel %vm12590_vm0, %v10117_v40, 0  ;;  %v1572_v62 = vadd.s32 96, %v10241_v57 }
 0x2f7   : > { %7648 = vmatmul.msk.bf16.gmra.mxu2 %vm12590_vm0, %v10049_v53 }
 0x2f8   : > { %4757 = vmatpush.bf16.xpose.msrb.mxu2 %v4739_v48  ;;  %vm10496_vm13 = vcmp.ge.s32.totalorder %v1572_v62, %v10243_v21  ;;  %v12683_v48 = vld [vmem:[#allocation14_spill] sm:$0xff] }
 0x2f9   : > { %5391 = vmatpush.bf16.xpose.msra.mxu0 %v5373_v14  ;;  %3877 = vmatpush.bf16.msra.mxu3 %v3868_v61  ;;  %v12671_v36 = vsel %vm10496_vm13, 4294967295, %v12670_v36 }
 0x2fa   : > { %3248 = vmatpush.bf16.msra.mxu1 %v10279_v0  ;;  %12672 = vst [vmem:[#allocation59_spill] sm:$0xff] %v12671_v36  ;;  %v4730_v0 = vsel %vm12590_vm0, %v10071_v59, 0  ;;  %v12676_v59 = vmov 0 }
 0x2fb   : > { %v1807_v47 = vpop.f32.mrf.mxu0 }
 0x2fc   : > { %v10489_v53 = vsel %vm10478_vm12, %v1807_v47, -1e+30 }
 0x2fd   : > { %3878 = vmatpush.bf16.msra.mxu3 %v3866_v6  ;;  %1858 = vmax.xlane.f32.xlu2 %v10489_v53 }
 0x2fe   : > { %3249 = vmatpush.bf16.msra.mxu1 %v10231_v26 }
 0x300   : > { %4758 = vmatpush.bf16.xpose.msrb.mxu2 %v4736_v50  ;;  %v8696_v50 = vld [vmem:[#allocation2 + $0x18] sm:$0xf0] }
 0x301   : > { %5392 = vmatpush.bf16.xpose.msra.mxu0 %v5370_v56  ;;  %3879 = vmatpush.bf16.msra.mxu3 %v10393_v43  ;;  %v1573_v43 = vadd.s32 104, %v10241_v57 }
 0x303   : > { %v1810_v40 = vpop.f32.mrf.mxu0  ;;  %vm10517_vm14 = vcmp.ge.s32.totalorder %v1573_v43, %v10243_v21 }
 0x304   : > { %v10507_v26 = vsel %vm10496_vm13, %v1810_v40, -1e+30  ;;  %v12677_v59 = vsel %vm10517_vm14, 4294967295, %v12676_v59  ;;  %vm10549_vm13 = vcmp.ge.s32.totalorder %v1575_v12, %v10243_v21  ;;  %v6016_v21 = vsel %vm12590_vm0, %v10223_v17, 0  ;;  %v12687_v40 = vld [vmem:[#allocation19_spill] sm:$0xff]  ;;  %v12690_v12 = vld [vmem:[#allocation49_spill] sm:$0xff] }
 0x305   : > { %3880 = vmatpush.bf16.msra.mxu3 %v10383_v4  ;;  %1860 = vmax.xlane.f32.xlu0 %v10507_v26  ;;  %v12675_v4 = vld [vmem:[#allocation41_spill] sm:$0xff]  ;;  %12678 = vst [vmem:[#allocation44_spill] sm:$0xff] %v12677_v59 }
 0x306   : > { %7752 = vmatmul.msk.bf16.gmra.mxu0 %vm12590_vm0, %v12674_v23 }
 0x307   : > { %7649 = vmatmul.msk.bf16.gmra.mxu2 %vm12590_vm0, %v12675_v4 }
 0x308   : > { %4759 = vmatpush.bf16.xpose.msrb.mxu2 %v4733_v1  ;;  %v7892_v1 = vld [vmem:[#allocation2 + $0x4] sm:$0xf] }
 0x309   : > { %5393 = vmatpush.bf16.xpose.msra.mxu0 %v5367_v34  ;;  %3881 = vmatpush.bf16.msra.mxu3 %v10342_v28  ;;  %v12679_v28 = vmov 0 }
 0x30a   : > { %v12680_v28 = vsel %vm10530_vm15, 4294967295, %v12679_v28 }
 0x30b   : > { %v1812_v58 = vpop.f32.mrf.mxu0  ;;  %12681 = vst [vmem:[#allocation39_spill] sm:$0xff] %v12680_v28  ;;  %v12714_v28 = vld [vmem:[#allocation21_spill] sm:$0xff] }
 0x30c   : > { %v10524_v49 = vsel %vm10517_vm14, %v1812_v58, -1e+30 }
 0x30d   : > { %3882 = vmatpush.bf16.msra.mxu3 %v10354_v44  ;;  %1862 = vmax.xlane.f32.xlu1 %v10524_v49 }
 0x310   : > { %4760 = vmatpush.bf16.xpose.msrb.mxu2 %v4730_v0  ;;  %v12688_v0 = vld [vmem:[#allocation50_spill] sm:$0xff] }
 0x311   : > { %5394 = vmatpush.bf16.xpose.msra.mxu0 %v5364_v52  ;;  %3883 = vmatpush.bf16.msra.mxu3 %v10307_v10  ;;  %v6013_v9 = vsel %vm12590_vm0, %v12688_v0, 0 }
 0x313   : > { %v1815_v54 = vpop.f32.mrf.mxu0 }
 0x314   : > { %v10537_v44 = vsel %vm10530_vm15, %v1815_v54, -1e+30 }
 0x315   : > { %3884 = vmatpush.bf16.msra.mxu3 %v10245_v18  ;;  %1864 = vmax.xlane.f32.xlu2 %v10537_v44  ;;  %v12684_v18 = vmov 0 }
 0x316   : > { %7753 = vmatmul.msk.bf16.gmra.mxu0 %vm12590_vm0, %v12682_v45  ;;  %v12685_v18 = vsel %vm10549_vm13, 4294967295, %v12684_v18  ;;  %v6010_v45 = vsel %vm12590_vm0, %v12690_v12, 0 }
 0x317   : > { %7850 = vmatmul.msk.bf16.vlgmr.msra.gmra.mxu2 %vm12590_vm0, %v12683_v48  ;;  %12686 = vst [vmem:[#allocation41_spill] sm:$0xff] %v12685_v18 }
 0x318   : > { %v1837_v10 = vpop.xlane.xlu0 %1836  ;;  %6021 = vmatpush.bf16.xpose.msra.mxu2 %v6019_v32 }
 0x319   : > { %v1868_v20 = vsub.f32 %v10262_v63, %v1837_v10  ;;  %v8697_v10 = vld [vmem:[#allocation2 + $0x48] sm:$0xf0] }
 0x31a   : > { %v2335_v3 = vpop.f32.mrf.mxu2 }
 0x31b   : > { %v1884_v14 = vmul.f32 1.442695, %v1868_v20  ;;  %v1817_v57 = vpop.f32.mrf.mxu0  ;;  %v10566_v47 = vsel %vm10253_vm1, %v2335_v3, -1e+30  ;;  %v7896_v3 = vld [vmem:[#allocation2 + $0x34] sm:$0xf] }
 0x31c   : > { %v10555_v46 = vsel %vm10549_vm13, %v1817_v57, -1e+30 }
 0x31d   : > { %8919 = vpow2.f32 %v1884_v14  ;;  %1866 = vmax.xlane.f32.xlu0 %v10555_v46 }
 0x320   : > { %v1839_v38 = vpop.xlane.xlu0 %1838  ;;  %6022 = vmatpush.bf16.xpose.msra.mxu2 %v6016_v21 }
 0x321   : > { %v1869_v63 = vsub.f32 %v10286_v51, %v1839_v38  ;;  %v7893_v51 = vor.u32 %v8696_v50, %v7892_v1  ;;  %v12691_v50 = vld [vmem:[#allocation20_spill] sm:$0xff] }
 0x322   : > { %v2337_v6 = vpop.f32.mrf.mxu2 }
 0x323   : > { %v10561_v56 = vpop.eup %8919  ;;  %v1886_v19 = vmul.f32 1.442695, %v1869_v63  ;;  %v2970_v61 = vpop.f32.mrf.mxu0  ;;  %v10571_v17 = vsel %vm10273_vm2, %v2337_v6, -1e+30 }
 0x324   : > { %1916 = vadd.xlane.f32.xlu1 %v10561_v56  ;;  %2393 = vmax.xlane.f32.xlu2 %v10571_v17  ;;  %v10582_v23 = vsel %vm10253_vm1, %v2970_v61, -1e+30 }
 0x325   : > { %2391 = vmax.xlane.f32.xlu0 %v10566_v47  ;;  %8921 = vpow2.f32 %v1886_v19  ;;  %v12692_v19 = vld [vmem:[#allocation48_spill] sm:$0xff] }
 0x326   : > { %7954 = vmatmul.msk.bf16.vlgmr.msrb.gmra.mxu0 %vm12590_vm0, %v7893_v51  ;;  %v6007_v61 = vsel %vm12590_vm0, %v12692_v19, 0 }
 0x327   : > { %7851 = vmatmul.msk.bf16.gmra.mxu2 %vm12590_vm0, %v12687_v40 }
 0x328   : > { %v1841_v34 = vpop.xlane.xlu1 %1840  ;;  %6023 = vmatpush.bf16.xpose.msra.mxu2 %v6013_v9  ;;  %v12693_v9 = vld [vmem:[#allocation47_spill] sm:$0xff] }
 0x329   : > { %v1870_v62 = vsub.f32 %v10302_v24, %v1841_v34  ;;  %v10588_v24 = vpop.permute.xlu2 %5024 }
 0x32a   : > { %v2340_v4 = vpop.f32.mrf.mxu2  ;;  %12689 = vst [vmem:[#allocation42_spill] sm:$0xff] %v10588_v24 }
 0x32b   : > { %v1888_v52 = vmul.f32 1.442695, %v1870_v62  ;;  %v2972_v43 = vpop.f32.mrf.mxu0  ;;  %v10585_v58 = vpop.eup %8921  ;;  %v10597_v14 = vsel %vm10293_vm3, %v2340_v4, -1e+30 }
 0x32c   : > { %3026 = vmax.xlane.f32.xlu1 %v10582_v23  ;;  %1918 = vadd.xlane.f32.xlu2 %v10585_v58  ;;  %v10603_v38 = vsel %vm10273_vm2, %v2972_v43, -1e+30  ;;  %v8698_v43 = vld [vmem:[#allocation2 + $0x78] sm:$0xf0] }
 0x32d   : > { %8923 = vpow2.f32 %v1888_v52  ;;  %v6004_v52 = vsel %vm12590_vm0, %v12693_v9, 0  ;;  %v8699_v9 = vld [vmem:[#allocation2 + $0xa8] sm:$0xf0] }
 0x330   : > { %v1843_v5 = vpop.xlane.xlu1 %1842  ;;  %6024 = vmatpush.bf16.xpose.msra.mxu2 %v6010_v45 }
 0x331   : > { %v1871_v54 = vsub.f32 %v10326_v55, %v1843_v5  ;;  %v7897_v55 = vor.u32 %v8697_v10, %v7896_v3 }
 0x332   : > { %v2342_v57 = vpop.f32.mrf.mxu2 }
 0x333   : > { %v10593_v32 = vpop.eup %8923  ;;  %v1890_v20 = vmul.f32 1.442695, %v1871_v54  ;;  %v2975_v48 = vpop.f32.mrf.mxu0  ;;  %v10634_v12 = vsel %vm10317_vm4, %v2342_v57, -1e+30  ;;  %v12695_v57 = vld [vmem:[#allocation46_spill] sm:$0xff] }
 0x334   : > { %2395 = vmax.xlane.f32.xlu1 %v10597_v14  ;;  %1920 = vadd.xlane.f32.xlu0 %v10593_v32  ;;  %v10616_v34 = vsel %vm10293_vm3, %v2975_v48, -1e+30 }
 0x335   : > { %8925 = vpow2.f32 %v1890_v20  ;;  %3028 = vmax.xlane.f32.xlu2 %v10603_v38 }
 0x336   : > { %7955 = vmatmul.msk.bf16.gmra.mxu0 %vm12590_vm0, %v7897_v55  ;;  %v12694_v55 = vld [vmem:[#allocation28_spill] sm:$0xff] }
 0x337   : > { %7852 = vmatmul.msk.bf16.gmra.mxu2 %vm12590_vm0, %v12691_v50 }
 0x338   : > { %v1845_v63 = vpop.xlane.xlu2 %1844  ;;  %6025 = vmatpush.bf16.xpose.msra.mxu2 %v6007_v61 }
 0x339   : > { %v1872_v21 = vsub.f32 %v10346_v35, %v1845_v63  ;;  %v6001_v63 = vsel %vm12590_vm0, %v12695_v57, 0 }
 0x33a   : > { %v2345_v62 = vpop.f32.mrf.mxu2 }
 0x33b   : > { %v10612_v6 = vpop.eup %8925  ;;  %v1892_v1 = vmul.f32 1.442695, %v1872_v21  ;;  %v2977_v51 = vpop.f32.mrf.mxu0  ;;  %v10622_v35 = vsel %vm10335_vm5, %v2345_v62, -1e+30 }
 0x33c   : > { %1922 = vadd.xlane.f32.xlu1 %v10612_v6  ;;  %3030 = vmax.xlane.f32.xlu0 %v10616_v34  ;;  %v10630_v54 = vsel %vm10317_vm4, %v2977_v51, -1e+30 }
 0x33d   : > { %2399 = vmax.xlane.f32.xlu2 %v10622_v35  ;;  %8927 = vpow2.f32 %v1892_v1 }
 0x340   : > { %v1847_v40 = vpop.xlane.xlu2 %1846  ;;  %6026 = vmatpush.bf16.xpose.msra.mxu2 %v6004_v52 }
 0x341   : > { %v1873_v0 = vsub.f32 %v10372_v8, %v1847_v40  ;;  %v7900_v8 = vld [vmem:[#allocation2 + $0x64] sm:$0xf]  ;;  %v12696_v40 = vld [vmem:[#allocation43_spill] sm:$0xff] }
 0x342   : > { %v2347_v45 = vpop.f32.mrf.mxu2  ;;  %v7901_v20 = vor.u32 %v8698_v43, %v7900_v8  ;;  %v7904_v8 = vld [vmem:[#allocation2 + $0x94] sm:$0xf] }
 0x343   : > { %v1894_v4 = vmul.f32 1.442695, %v1873_v0  ;;  %v2980_v5 = vpop.f32.mrf.mxu0  ;;  %v10638_v10 = vpop.eup %8927  ;;  %v10651_v61 = vsel %vm10359_vm6, %v2347_v45, -1e+30  ;;  %v5998_v0 = vsel %vm12590_vm0, %v12696_v40, 0 }
 0x344   : > { %3032 = vmax.xlane.f32.xlu1 %v10630_v54  ;;  %2397 = vmax.xlane.f32.xlu0 %v10634_v12  ;;  %v8700_v40 = vld [vmem:[#allocation2 + $0xd8] sm:$0xf0] }
 0x345   : > { %8929 = vpow2.f32 %v1894_v4  ;;  %1924 = vadd.xlane.f32.xlu2 %v10638_v10 }
 0x346   : > { %7956 = vmatmul.msk.bf16.gmra.mxu0 %vm12590_vm0, %v7901_v20 }
 0x347   : > { %7853 = vmatmul.msk.bf16.gmra.mxu2 %vm12590_vm0, %v12694_v55  ;;  %v12697_v55 = vld [vmem:[#allocation31_spill] sm:$0xff] }
 0x348   : > { %v1849_v48 = vpop.xlane.xlu0 %1848  ;;  %6027 = vmatpush.bf16.xpose.msra.mxu2 %v6001_v63 }
 0x349   : > { %v1874_v3 = vsub.f32 %v10391_v2, %v1849_v48  ;;  %v10657_v2 = vsel %vm10335_vm5, %v2980_v5, -1e+30 }
 0x34a   : > { %v2350_v1 = vpop.f32.mrf.mxu2 }
 0x34b   : > { %v10647_v21 = vpop.eup %8929  ;;  %v1896_v50 = vmul.f32 1.442695, %v1874_v3  ;;  %v2982_v19 = vpop.f32.mrf.mxu0  ;;  %v10682_v57 = vsel %vm10379_vm7, %v2350_v1, -1e+30 }
 0x34c   : > { %2401 = vmax.xlane.f32.xlu1 %v10651_v61  ;;  %1926 = vadd.xlane.f32.xlu0 %v10647_v21  ;;  %v10667_v45 = vsel %vm10359_vm6, %v2982_v19, -1e+30 }
 0x34d   : > { %8931 = vpow2.f32 %v1896_v50  ;;  %3034 = vmax.xlane.f32.xlu2 %v10657_v2 }
 0x350   : > { %v1851_v51 = vpop.xlane.xlu1 %1850  ;;  %6028 = vmatpush.bf16.xpose.msra.mxu2 %v5998_v0 }
 0x351   : > { %v1875_v62 = vsub.f32 %v10412_v42, %v1851_v51  ;;  %v7905_v42 = vor.u32 %v8699_v9, %v7904_v8  ;;  %v7908_v8 = vld [vmem:[#allocation2 + $0xc4] sm:$0xf] }
 0x352   : > { %v2352_v5 = vpop.f32.mrf.mxu2 }
 0x353   : > { %v10663_v52 = vpop.eup %8931  ;;  %v1898_v43 = vmul.f32 1.442695, %v1875_v62  ;;  %v2985_v4 = vpop.f32.mrf.mxu0  ;;  %v10673_v20 = vsel %vm10402_vm8, %v2352_v5, -1e+30 }
 0x354   : > { %1928 = vadd.xlane.f32.xlu1 %v10663_v52  ;;  %3036 = vmax.xlane.f32.xlu0 %v10667_v45  ;;  %v10686_v19 = vsel %vm10379_vm7, %v2985_v4, -1e+30 }
 0x355   : > { %2405 = vmax.xlane.f32.xlu2 %v10673_v20  ;;  %8933 = vpow2.f32 %v1898_v43 }
 0x356   : > { %7957 = vmatmul.msk.bf16.gmra.mxu0 %vm12590_vm0, %v7905_v42  ;;  %v7909_v42 = vor.u32 %v8700_v40, %v7908_v8  ;;  %v8701_v8 = vld [vmem:[#allocation2 + $0x108] sm:$0xf0] }
 0x357   : > { %7854 = vmatmul.msk.bf16.gmra.mxu2 %vm12590_vm0, %v12697_v55  ;;  %v12698_v55 = vld [vmem:[#allocation33_spill] sm:$0xff] }
 0x358   : > { %v1853_v48 = vpop.xlane.xlu2 %1852 }
 0x359   : > { %v1876_v3 = vsub.f32 %v10427_v39, %v1853_v48 }
 0x35a   : > { %v2355_v51 = vpop.f32.mrf.mxu2 }
 0x35b   : > { %v1900_v63 = vmul.f32 1.442695, %v1876_v3  ;;  %v2987_v50 = vpop.f32.mrf.mxu0  ;;  %v10690_v62 = vpop.eup %8933  ;;  %v10698_v43 = vsel %vm10417_vm9, %v2355_v51, -1e+30 }
 0x35c   : > { %3038 = vmax.xlane.f32.xlu1 %v10686_v19  ;;  %2403 = vmax.xlane.f32.xlu0 %v10682_v57 }
 0x35d   : > { %8935 = vpow2.f32 %v1900_v63  ;;  %1930 = vadd.xlane.f32.xlu2 %v10690_v62 }
 0x360   : > { %v1855_v39 = vpop.xlane.xlu0 %1854 }
 0x361   : > { %v1877_v1 = vsub.f32 %v10448_v15, %v1855_v39  ;;  %v10704_v15 = vsel %vm10402_vm8, %v2987_v50, -1e+30 }
 0x362   : > { %v2357_v5 = vpop.f32.mrf.mxu2 }
 0x363   : > { %v10694_v0 = vpop.eup %8935  ;;  %v1902_v9 = vmul.f32 1.442695, %v1877_v1  ;;  %v2990_v4 = vpop.f32.mrf.mxu0 }
 0x364   : > { %2407 = vmax.xlane.f32.xlu1 %v10698_v43  ;;  %1932 = vadd.xlane.f32.xlu0 %v10694_v0  ;;  %v10715_v51 = vsel %vm10417_vm9, %v2990_v4, -1e+30 }
 0x365   : > { %8937 = vpow2.f32 %v1902_v9  ;;  %3040 = vmax.xlane.f32.xlu2 %v10704_v15 }
 0x366   : > { %7958 = vmatmul.msk.bf16.gmra.mxu0 %vm12590_vm0, %v7909_v42 }
 0x367   : > { %7855 = vmatmul.msk.bf16.gmra.mxu2 %vm12590_vm0, %v12698_v55 }
 0x368   : > { %v1857_v48 = vpop.xlane.xlu1 %1856 }
 0x369   : > { %v1878_v3 = vsub.f32 %v10467_v30, %v1857_v48  ;;  %v10731_v48 = vsel %vm10437_vm10, %v2357_v5, -1e+30  ;;  %v12700_v5 = vld [vmem:[#allocation38_spill] sm:$0xff] }
 0x36a   : > { %v2360_v50 = vpop.f32.mrf.mxu2 }
 0x36b   : > { %v10711_v63 = vpop.eup %8937  ;;  %v1904_v39 = vmul.f32 1.442695, %v1878_v3  ;;  %v2992_v1 = vpop.f32.mrf.mxu0  ;;  %v10721_v40 = vsel %vm10455_vm11, %v2360_v50, -1e+30 }
 0x36c   : > { %1934 = vadd.xlane.f32.xlu1 %v10711_v63  ;;  %3042 = vmax.xlane.f32.xlu0 %v10715_v51  ;;  %12699 = vst [vmem:[#allocation14_spill] sm:$0xff] %v10721_v40  ;;  %v10727_v42 = vsel %vm10437_vm10, %v2992_v1, -1e+30 }
 0x36d   : > { %2411 = vmax.xlane.f32.xlu2 %v10721_v40  ;;  %8939 = vpow2.f32 %v1904_v39  ;;  %v7912_v39 = vld [vmem:[#allocation2 + $0xf4] sm:$0xf] }
 0x370   : > { %v1859_v30 = vpop.xlane.xlu2 %1858 }
 0x371   : > { %v1879_v9 = vsub.f32 %v10489_v53, %v1859_v30  ;;  %v7913_v53 = vor.u32 %v8701_v8, %v7912_v39 }
 0x372   : > { %v2362_v55 = vpop.f32.mrf.mxu2 }
 0x373   : > { %v1906_v4 = vmul.f32 1.442695, %v1879_v9  ;;  %v2995_v3 = vpop.f32.mrf.mxu0  ;;  %v10735_v50 = vpop.eup %8939  ;;  %v10746_v24 = vsel %vm10478_vm12, %v2362_v55, -1e+30 }
 0x374   : > { %3044 = vmax.xlane.f32.xlu1 %v10727_v42  ;;  %2409 = vmax.xlane.f32.xlu0 %v10731_v48  ;;  %12701 = vst [vmem:[#allocation19_spill] sm:$0xff] %v10746_v24  ;;  %v10752_v8 = vsel %vm10455_vm11, %v2995_v3, -1e+30 }
 0x375   : > { %8941 = vpow2.f32 %v1906_v4  ;;  %1936 = vadd.xlane.f32.xlu2 %v10735_v50 }
 0x376   : > { %7959 = vmatmul.msk.bf16.gmra.mxu0 %vm12590_vm0, %v7913_v53  ;;  %v8702_v53 = vld [vmem:[#allocation2 + $0x138] sm:$0xf0] }
 0x377   : > { %7856 = vmatmul.msk.bf16.gmra.mxu2 %vm12590_vm0, %v12700_v5 }
 0x378   : > { %v1861_v1 = vpop.xlane.xlu0 %1860 }
 0x379   : > { %v1880_v30 = vsub.f32 %v10507_v26, %v1861_v1 }
 0x37a   : > { %v2365_v4 = vpop.f32.mrf.mxu2 }
 0x37b   : > { %v10742_v9 = vpop.eup %8941  ;;  %v1908_v60 = vmul.f32 1.442695, %v1880_v30  ;;  %v2997_v22 = vpop.f32.mrf.mxu0 }
 0x37c   : > { %2413 = vmax.xlane.f32.xlu1 %v10746_v24  ;;  %1938 = vadd.xlane.f32.xlu0 %v10742_v9  ;;  %v10760_v30 = vsel %vm10478_vm12, %v2997_v22, -1e+30  ;;  %vm12704_vm12 = vnez %v12671_v36  ;;  %v7920_v36 = vld [vmem:[#allocation2 + $0x154] sm:$0xf] }
 0x37d   : > { %8943 = vpow2.f32 %v1908_v60  ;;  %3046 = vmax.xlane.f32.xlu2 %v10752_v8  ;;  %v7916_v60 = vld [vmem:[#allocation2 + $0x124] sm:$0xf] }
 0x37e   : > { %v7917_v3 = vor.u32 %v8702_v53, %v7916_v60 }
 0x380   : > { %v1863_v26 = vpop.xlane.xlu1 %1862 }
 0x381   : > { %v1881_v39 = vsub.f32 %v10524_v49, %v1863_v26  ;;  %v12703_v26 = vld [vmem:[#allocation45_spill] sm:$0xff] }
 0x382   : > { %v2367_v24 = vpop.f32.mrf.mxu2 }
 0x383   : > { %v10756_v1 = vpop.eup %8943  ;;  %v1910_v55 = vmul.f32 1.442695, %v1881_v39  ;;  %v3000_v5 = vpop.f32.mrf.mxu0  ;;  %v10766_v40 = vsel %vm10517_vm14, %v2367_v24, -1e+30  ;;  %v10775_v39 = vsel %vm12704_vm12, %v2365_v4, -1e+30 }
 0x384   : > { %1940 = vadd.xlane.f32.xlu1 %v10756_v1  ;;  %3048 = vmax.xlane.f32.xlu0 %v10760_v30  ;;  %12702 = vst [vmem:[#allocation50_spill] sm:$0xff] %v10766_v40  ;;  %v10779_v53 = vsel %vm12704_vm12, %v3000_v5, -1e+30 }
 0x385   : > { %2417 = vmax.xlane.f32.xlu2 %v10766_v40  ;;  %8945 = vpow2.f32 %v1910_v55  ;;  %12705 = vst [vmem:[#allocation49_spill] sm:$0xff] %v10779_v53 }
 0x386   : > { %7960 = vmatmul.msk.bf16.gmra.mxu0 %vm12590_vm0, %v7917_v3  ;;  %v8703_v3 = vld [vmem:[#allocation2 + $0x168] sm:$0xf0] }
 0x387   : > { %7857 = vmatmul.msk.bf16.gmra.mxu2 %vm12590_vm0, %v12703_v26 }
 0x388   : > { %v1865_v49 = vpop.xlane.xlu2 %1864 }
 0x389   : > { %v1882_v22 = vsub.f32 %v10537_v44, %v1865_v49 }
 0x38a   : > { %v2370_v40 = vpop.f32.mrf.mxu2 }
 0x38b   : > { %v1912_v24 = vmul.f32 1.442695, %v1882_v22  ;;  %v3002_v60 = vpop.f32.mrf.mxu0  ;;  %v10783_v55 = vpop.eup %8945  ;;  %v10791_v5 = vsel %vm10530_vm15, %v2370_v40, -1e+30 }
 0x38c   : > { %3050 = vmax.xlane.f32.xlu1 %v10779_v53  ;;  %2415 = vmax.xlane.f32.xlu0 %v10775_v39  ;;  %12707 = vst [vmem:[#allocation48_spill] sm:$0xff] %v10791_v5  ;;  %v10797_v53 = vsel %vm10517_vm14, %v3002_v60, -1e+30 }
 0x38d   : > { %8947 = vpow2.f32 %v1912_v24  ;;  %1942 = vadd.xlane.f32.xlu2 %v10783_v55  ;;  %v7921_v24 = vor.u32 %v8703_v3, %v7920_v36 }
 0x390   : > { %v1867_v44 = vpop.xlane.xlu0 %1866 }
 0x391   : > { %v1883_v4 = vsub.f32 %v10555_v46, %v1867_v44 }
 0x392   : > { %v2372_v26 = vpop.f32.mrf.mxu2 }
 0x393   : > { %v10787_v49 = vpop.eup %8947  ;;  %v1914_v22 = vmul.f32 1.442695, %v1883_v4  ;;  %v3005_v46 = vpop.f32.mrf.mxu0 }
 0x394   : > { %12706 = vst [vmem:[#allocation20_spill] sm:$0xff] %v10787_v49  ;;  %2419 = vmax.xlane.f32.xlu1 %v10791_v5  ;;  %1944 = vadd.xlane.f32.xlu0 %v10787_v49  ;;  %v10808_v36 = vsel %vm10530_vm15, %v3005_v46, -1e+30  ;;  %v10817_v46 = vsel %vm10549_vm13, %v2372_v26, -1e+30 }
 0x395   : > { %8949 = vpow2.f32 %v1914_v22  ;;  %3052 = vmax.xlane.f32.xlu2 %v10797_v53  ;;  %12709 = vst [vmem:[#allocation47_spill] sm:$0xff] %v10808_v36 }
 0x396   : > { %7961 = vmatmul.msk.bf16.gmra.mxu0 %vm12590_vm0, %v7921_v24  ;;  %12711 = vst [vmem:[#allocation46_spill] sm:$0xff] %v10817_v46 }
 0x397   : > { %v1917_v40 = vpop.xlane.xlu1 %1916  ;;  %8058 = vmatmul.msk.bf16.vlgmr.msrb.gmra.mxu2 %vm12590_vm0, %v12708_v31  ;;  %v2394_v49 = vpop.xlane.xlu2 %2393 }
 0x398   : > { %v2392_v44 = vpop.xlane.xlu0 %2391 }
 0x399   : > { %v2423_v4 = vsub.f32 %v10566_v47, %v2392_v44 }
 0x39a   : > { %v3605_v3 = vpop.f32.mrf.mxu2 }
 0x39b   : > { %v10804_v5 = vpop.eup %8949  ;;  %v2439_v60 = vmul.f32 1.442695, %v2423_v4  ;;  %v3007_v47 = vpop.f32.mrf.mxu0 }
 0x39c   : > { %3054 = vmax.xlane.f32.xlu0 %v10808_v36  ;;  %1946 = vadd.xlane.f32.xlu1 %v10804_v5  ;;  %v10821_v4 = vsel %vm10549_vm13, %v3007_v47, -1e+30 }
 0x39d   : > { %8951 = vpow2.f32 %v2439_v60  ;;  %12712 = vst [vmem:[#allocation43_spill] sm:$0xff] %v10821_v4 }
 0x39e   : > { %8953 = vrcp.f32 %v1917_v40 }
 0x39f   : > { %v3027_v22 = vpop.xlane.xlu1 %3026  ;;  %v1919_v31 = vpop.xlane.xlu2 %1918 }
 0x3a0   : > { %v3058_v24 = vsub.f32 %v10582_v23, %v3027_v22  ;;  %8955 = vrcp.f32 %v1919_v31  ;;  %v2424_v23 = vsub.f32 %v10571_v17, %v2394_v49  ;;  %v12713_v22 = vld [vmem:[#allocation17_spill] sm:$0xff] }
 0x3a1   : > { %v8719_v17 = vld [vmem:[#allocation2 + $0x178] sm:$0xf0] }
 0x3a2   : > { %v3074_v44 = vmul.f32 1.442695, %v3058_v24  ;;  %v3607_v60 = vpop.f32.mrf.mxu2  ;;  %v2441_v18 = vmul.f32 1.442695, %v2424_v23 }
 0x3a3   : > { %v10813_v59 = vpop.eup %8951 }
 0x3a4   : > { %12710 = vst [vmem:[#allocation28_spill] sm:$0xff] %v10813_v59  ;;  %8957 = vpow2.f32 %v3074_v44  ;;  %2421 = vmax.xlane.f32.xlu0 %v10817_v46  ;;  %3056 = vmax.xlane.f32.xlu1 %v10821_v4  ;;  %v8954_v40 = vpop.eup %8953  ;;  %v7992_v46 = vld [vmem:[#allocation2 + $0x164] sm:$0xf] }
 0x3a5   : > { %2471 = vadd.xlane.f32.xlu2 %v10813_v59  ;;  %v1964_v47 = vmul.f32 %v8954_v40, %v10561_v56  ;;  %v10842_v56 = vsel %vm10273_vm2, %v3607_v60, -1e+30  ;;  %8959 = vpow2.f32 %v2441_v18 }
 0x3a6   : > { %8162 = vmatmul.msk.bf16.vlgmr.msra.gmra.mxu0 %vm12590_vm0, %v12713_v22  ;;  %v8956_v31 = vpop.eup %8955  ;;  %v10838_v22 = vsel %vm10253_vm1, %v3605_v3, -1e+30  ;;  %12716 = vst [vmem:[#allocation33_spill] sm:$0xff] %v10842_v56  ;;  %v4208_v3 = vpop.f32.mrf.mxu0 }
 0x3a7   : > { %v2396_v26 = vpop.xlane.xlu1 %2395  ;;  %v1921_v24 = vpop.xlane.xlu0 %1920  ;;  %v1965_v44 = vmul.f32 %v8956_v31, %v10585_v58  ;;  %8059 = vmatmul.msk.bf16.gmra.mxu2 %vm12590_vm0, %v12714_v28  ;;  %v7993_v28 = vor.u32 %v8719_v17, %v7992_v46 }
 0x3a8   : > { %v3029_v4 = vpop.xlane.xlu2 %3028  ;;  %v2425_v40 = vsub.f32 %v10597_v14, %v2396_v26  ;;  %v10856_v14 = vsel %vm10253_vm1, %v4208_v3, -1e+30 }
 0x3a9   : > { %v3059_v59 = vsub.f32 %v10603_v38, %v3029_v4  ;;  %v1980_v36 = vpack.c.bf16 %v1965_v44, %v1964_v47  ;;  %v7988_v38 = vld [vmem:[#allocation2 + $0x134] sm:$0xf]  ;;  %v8718_v4 = vld [vmem:[#allocation2 + $0x148] sm:$0xf0]  ;;  %v7984_v44 = vld [vmem:[#allocation2 + $0x104] sm:$0xf] }
 0x3aa   : > { %v10833_v49 = vpop.eup %8957  ;;  %v3610_v23 = vpop.f32.mrf.mxu2  ;;  %v2443_v46 = vmul.f32 1.442695, %v2425_v40  ;;  %12718 = vst [vmem:[#allocation45_spill] sm:$0xff] %v10856_v14 }
 0x3ab   : > { %12715 = vst [vmem:[#allocation31_spill] sm:$0xff] %v10833_v49  ;;  %v3076_v58 = vmul.f32 1.442695, %v3059_v59  ;;  %2044 = vmatmul.bf16.vlgmr.msrb.gmra.mxu1 %v1980_v36  ;;  %v7989_v59 = vor.u32 %v8718_v4, %v7988_v38  ;;  %v10850_v18 = vpop.eup %8959  ;;  %v12719_v4 = vld [vmem:[#allocation16_spill] sm:$0xff] }
 0x3ac   : > { %3663 = vmax.xlane.f32.xlu0 %v10842_v56  ;;  %3661 = vmax.xlane.f32.xlu1 %v10838_v22  ;;  %v8717_v56 = vld [vmem:[#allocation2 + $0x118] sm:$0xf0] }
 0x3ad   : > { %3106 = vadd.xlane.f32.xlu2 %v10833_v49  ;;  %8961 = vpow2.f32 %v3076_v58  ;;  %4464 = vmatpush.bf16.msrb.mxu1 %v7993_v28  ;;  %v7985_v58 = vor.u32 %v8717_v56, %v7984_v44  ;;  %v8716_v28 = vld [vmem:[#allocation2 + $0xe8] sm:$0xf0]  ;;  %v12720_v44 = vld [vmem:[#allocation24_spill] sm:$0xff] }
 0x3af   : > { %v1923_v60 = vpop.xlane.xlu1 %1922  ;;  %v3031_v31 = vpop.xlane.xlu0 %3030 }
 0x3b0   : > { %8963 = vrcp.f32 %v1923_v60  ;;  %v10848_v47 = vpop.xlane.xlu2 %2399  ;;  %v3060_v26 = vsub.f32 %v10616_v34, %v3031_v31  ;;  %v4210_v60 = vpop.f32.mrf.mxu0 }
 0x3b1   : > { %8965 = vrcp.f32 %v1921_v24  ;;  %4465 = vmatpush.bf16.msrb.mxu1 %v7989_v59  ;;  %v7980_v24 = vld [vmem:[#allocation2 + $0xd4] sm:$0xf] }
 0x3b2   : > { %v10859_v17 = vpop.f32.mrf.mxu2  ;;  %8967 = vpow2.f32 %v2443_v46  ;;  %v3078_v31 = vmul.f32 1.442695, %v3060_v26  ;;  %v7981_v59 = vor.u32 %v8716_v28, %v7980_v24 }
 0x3b3   : > { %v10852_v36 = vpop.eup %8961 }
 0x3b4   : > { %12717 = vst [vmem:[#allocation38_spill] sm:$0xff] %v10852_v36  ;;  %2473 = vadd.xlane.f32.xlu1 %v10850_v18  ;;  %3108 = vadd.xlane.f32.xlu0 %v10852_v36  ;;  %v8715_v36 = vld [vmem:[#allocation2 + $0xb8] sm:$0xf0]  ;;  %8969 = vpow2.f32 %v3078_v31  ;;  %v7968_v31 = vld [vmem:[#allocation2 + $0x44] sm:$0xf] }
 0x3b5   : > { %4264 = vmax.xlane.f32.xlu2 %v10856_v14  ;;  %4466 = vmatpush.bf16.msrb.mxu1 %v7985_v58  ;;  %v7977_v28 = vor.u32 %v8715_v36, %v7976_v13 }
 0x3b6   : > { %v8964_v38 = vpop.eup %8963  ;;  %8163 = vmatmul.msk.bf16.gmra.mxu0 %vm12590_vm0, %v12719_v4  ;;  %v10874_v4 = vsel %vm10273_vm2, %v4210_v60, -1e+30 }
 0x3b7   : > { %v10866_v3 = vpop.xlane.xlu1 %3032  ;;  %v2398_v34 = vpop.xlane.xlu0 %2397  ;;  %8060 = vmatmul.msk.bf16.gmra.mxu2 %vm12590_vm0, %v12720_v44  ;;  %v1967_v46 = vmul.f32 %v8964_v38, %v10612_v6  ;;  %12721 = vst [vmem:[#allocation15_spill] sm:$0xff] %v10874_v4  ;;  %v7972_v38 = vld [vmem:[#allocation2 + $0x74] sm:$0xf] }
 0x3b8   : > { %v8966_v40 = vpop.eup %8965  ;;  %v2426_v56 = vsub.f32 %v10634_v12, %v2398_v34  ;;  %v1925_v14 = vpop.xlane.xlu2 %1924  ;;  %v10881_v12 = vsel %vm10293_vm3, %v3610_v23, -1e+30  ;;  %v8714_v34 = vld [vmem:[#allocation2 + $0x88] sm:$0xf0] }
 0x3b9   : > { %4467 = vmatpush.bf16.msrb.mxu1 %v7981_v59  ;;  %v1966_v49 = vmul.f32 %v8966_v40, %v10593_v32  ;;  %v10877_v26 = vpop.eup %8967  ;;  %v7973_v23 = vor.u32 %v8714_v34, %v7972_v38  ;;  %v4213_v44 = vpop.f32.mrf.mxu0 }
 0x3ba   : > { %v2445_v58 = vmul.f32 1.442695, %v2426_v56  ;;  %v3615_v24 = vpop.f32.mrf.mxu2  ;;  %v8713_v56 = vld [vmem:[#allocation2 + $0x58] sm:$0xf0]  ;;  %v10886_v59 = vpop.eup %8969 }
 0x3bb   : > { %v1981_v6 = vpack.c.bf16 %v1967_v46, %v1966_v49  ;;  %v2427_v49 = vsub.f32 %v10622_v35, %v10848_v47  ;;  %v10895_v46 = vsel %vm10335_vm5, %v3615_v24, -1e+30  ;;  %v8712_v35 = vld [vmem:[#allocation2 + $0x28] sm:$0xf0]  ;;  %v12760_v11 = vld [vmem:[#allocation38_spill] sm:$0xff] }
 0x3bc   : > { %4266 = vmax.xlane.f32.xlu1 %v10874_v4  ;;  %8971 = vpow2.f32 %v2445_v58  ;;  %2475 = vadd.xlane.f32.xlu0 %v10877_v26  ;;  %v12722_v24 = vld [vmem:[#allocation23_spill] sm:$0xff] }
 0x3bd   : > { %3665 = vmax.xlane.f32.xlu2 %v10881_v12  ;;  %4468 = vmatpush.bf16.msrb.mxu1 %v7977_v28 }
 0x3be   : > { %2049 = vmatmul.bf16.gmra.mxu1 %v1981_v6  ;;  %v7969_v6 = vor.u32 %v8713_v56, %v7968_v31 }
 0x3bf   : > { %v2402_v32 = vpop.xlane.xlu1 %2401  ;;  %v1927_v40 = vpop.xlane.xlu0 %1926 }
 0x3c0   : > { %8973 = vrcp.f32 %v1927_v40  ;;  %v3035_v60 = vpop.xlane.xlu2 %3034  ;;  %v2428_v38 = vsub.f32 %v10651_v61, %v2402_v32  ;;  %v10915_v61 = vsel %vm10317_vm4, %v10859_v17, -1e+30 }
 0x3c1   : > { %8975 = vrcp.f32 %v1925_v14  ;;  %4469 = vmatpush.bf16.msrb.mxu1 %v7973_v23  ;;  %v3062_v13 = vsub.f32 %v10657_v2, %v3035_v60  ;;  %v3061_v14 = vsub.f32 %v10630_v54, %v10866_v3  ;;  %v7964_v2 = vld [vmem:[#allocation2 + $0x14] sm:$0xf]  ;;  %v2447_v60 = vmul.f32 1.442695, %v2427_v49  ;;  %v12723_v3 = vld [vmem:[#allocation26_spill] sm:$0xff]  ;;  %v4215_v17 = vpop.f32.mrf.mxu0 }
 0x3c2   : > { %v10889_v36 = vpop.eup %8971  ;;  %v10897_v28 = vpop.f32.mrf.mxu2  ;;  %v7965_v31 = vor.u32 %v8712_v35, %v7964_v2  ;;  %v2449_v4 = vmul.f32 1.442695, %v2428_v38  ;;  %v10922_v49 = vsel %vm10293_vm3, %v4213_v44, -1e+30 }
 0x3c3   : > { %v3082_v58 = vmul.f32 1.442695, %v3062_v13  ;;  %v3080_v54 = vmul.f32 1.442695, %v3061_v14  ;;  %12724 = vst [vmem:[#allocation17_spill] sm:$0xff] %v10922_v49 }
 0x3c4   : > { %3110 = vadd.xlane.f32.xlu1 %v10886_v59  ;;  %3669 = vmax.xlane.f32.xlu0 %v10895_v46 }
 0x3c5   : > { %2477 = vadd.xlane.f32.xlu2 %v10889_v36  ;;  %8977 = vpow2.f32 %v3082_v58  ;;  %4470 = vmatpush.bf16.msrb.mxu1 %v7969_v6 }
 0x3c6   : > { %v8974_v47 = vpop.eup %8973  ;;  %8164 = vmatmul.msk.bf16.gmra.mxu0 %vm12590_vm0, %v12722_v24  ;;  %8979 = vpow2.f32 %v2447_v60 }
 0x3c7   : > { %v1929_v34 = vpop.xlane.xlu1 %1928  ;;  %v3037_v40 = vpop.xlane.xlu0 %3036  ;;  %8061 = vmatmul.msk.bf16.gmra.mxu2 %vm12590_vm0, %v12723_v3  ;;  %v1969_v13 = vmul.f32 %v8974_v47, %v10647_v21  ;;  %8981 = vpow2.f32 %v3080_v54 }
 0x3c8   : > { %v8976_v23 = vpop.eup %8975  ;;  %v10909_v56 = vpop.xlane.xlu2 %2405  ;;  %8983 = vpow2.f32 %v2449_v4  ;;  %v3063_v24 = vsub.f32 %v10667_v45, %v3037_v40 }
 0x3c9   : > { %4471 = vmatpush.bf16.msrb.mxu1 %v7965_v31  ;;  %v1968_v32 = vmul.f32 %v8976_v23, %v10638_v10  ;;  %8985 = vrcp.f32 %v1929_v34  ;;  %v12725_v23 = vld [vmem:[#allocation30_spill] sm:$0xff]  ;;  %v4218_v3 = vpop.f32.mrf.mxu0 }
 0x3ca   : > { %v10924_v6 = vpop.f32.mrf.mxu2 }
 0x3cb   : > { %v10918_v58 = vpop.eup %8977  ;;  %v1982_v21 = vpack.c.bf16 %v1969_v13, %v1968_v32  ;;  %v3084_v13 = vmul.f32 1.442695, %v3063_v24  ;;  %v12726_v32 = vld [vmem:[#allocation32_spill] sm:$0xff]  ;;  %v10958_v24 = vsel %vm10359_vm6, %v10897_v28, -1e+30 }
 0x3cc   : > { %3667 = vmax.xlane.f32.xlu1 %v10915_v61  ;;  %3114 = vadd.xlane.f32.xlu0 %v10918_v58  ;;  %v10929_v35 = vpop.eup %8979 }
 0x3cd   : > { %4268 = vmax.xlane.f32.xlu2 %v10922_v49  ;;  %v10931_v44 = vpop.eup %8981 }
 0x3ce   : > { %2054 = vmatmul.bf16.gmra.mxu1 %v1982_v21  ;;  %v10933_v47 = vpop.eup %8983 }
 0x3cf   : > { %v3039_v10 = vpop.xlane.xlu1 %3038  ;;  %v2404_v14 = vpop.xlane.xlu0 %2403 }
 0x3d0   : > { %v1931_v2 = vpop.xlane.xlu2 %1930  ;;  %v8986_v4 = vpop.eup %8985  ;;  %v2429_v34 = vsub.f32 %v10682_v57, %v2404_v14  ;;  %v10948_v57 = vsel %vm10317_vm4, %v4215_v17, -1e+30 }
 0x3d1   : > { %8987 = vrcp.f32 %v1931_v2  ;;  %v1970_v45 = vmul.f32 %v8986_v4, %v10663_v52  ;;  %12727 = vst [vmem:[#allocation21_spill] sm:$0xff] %v10948_v57  ;;  %v3064_v52 = vsub.f32 %v10686_v19, %v3039_v10 }
 0x3d2   : > { %v3622_v38 = vpop.f32.mrf.mxu2  ;;  %v2451_v2 = vmul.f32 1.442695, %v2429_v34  ;;  %8989 = vpow2.f32 %v3084_v13 }
 0x3d3   : > { %v3086_v34 = vmul.f32 1.442695, %v3064_v52  ;;  %v10973_v19 = vsel %vm10402_vm8, %v3622_v38, -1e+30 }
 0x3d4   : > { %2479 = vadd.xlane.f32.xlu1 %v10929_v35  ;;  %2481 = vadd.xlane.f32.xlu0 %v10933_v47  ;;  %8991 = vpow2.f32 %v2451_v2 }
 0x3d5   : > { %3112 = vadd.xlane.f32.xlu2 %v10931_v44 }
 0x3d6   : > { %8165 = vmatmul.msk.bf16.gmra.mxu0 %vm12590_vm0, %v12725_v23  ;;  %v10952_v23 = vsel %vm10335_vm5, %v4218_v3, -1e+30 }
 0x3d7   : > { %v2408_v60 = vpop.xlane.xlu1 %2407  ;;  %v1933_v31 = vpop.xlane.xlu0 %1932  ;;  %8062 = vmatmul.msk.bf16.gmra.mxu2 %vm12590_vm0, %v12726_v32  ;;  %12728 = vst [vmem:[#allocation16_spill] sm:$0xff] %v10952_v23 }
 0x3d8   : > { %v8988_v54 = vpop.eup %8987  ;;  %v3041_v21 = vpop.xlane.xlu2 %3040 }
 0x3d9   : > { %v1971_v40 = vmul.f32 %v8988_v54, %v10690_v62  ;;  %v3065_v62 = vsub.f32 %v10704_v15, %v3041_v21  ;;  %v10966_v3 = vpop.eup %8989  ;;  %v2430_v15 = vsub.f32 %v10673_v20, %v10909_v56  ;;  %v12729_v21 = vld [vmem:[#allocation34_spill] sm:$0xff] }
 0x3da   : > { %v3625_v49 = vpop.f32.mrf.mxu2  ;;  %v10968_v13 = vpop.eup %8991 }
 0x3db   : > { %v1983_v14 = vpack.c.bf16 %v1971_v40, %v1970_v45  ;;  %v3088_v28 = vmul.f32 1.442695, %v3065_v62  ;;  %v2453_v2 = vmul.f32 1.442695, %v2430_v15 }
 0x3dc   : > { %4270 = vmax.xlane.f32.xlu1 %v10948_v57  ;;  %4272 = vmax.xlane.f32.xlu0 %v10952_v23 }
 0x3dd   : > { %3671 = vmax.xlane.f32.xlu2 %v10958_v24 }
 0x3de   : > { %2059 = vmatmul.bf16.gmra.mxu1 %v1983_v14  ;;  %v12730_v14 = vld [vmem:[#allocation36_spill] sm:$0xff] }
 0x3df   : > { %v1935_v17 = vpop.xlane.xlu1 %1934  ;;  %v3043_v4 = vpop.xlane.xlu0 %3042 }
 0x3e0   : > { %8993 = vrcp.f32 %v1935_v17  ;;  %v10964_v54 = vpop.xlane.xlu2 %2411 }
 0x3e1   : > { %8995 = vrcp.f32 %v1933_v31  ;;  %v2431_v31 = vsub.f32 %v10698_v43, %v2408_v60  ;;  %v10992_v43 = vsel %vm10379_vm7, %v10924_v6, -1e+30 }
 0x3e2   : > { %8997 = vpow2.f32 %v3086_v34  ;;  %v10980_v32 = vpop.f32.mrf.mxu2  ;;  %v3066_v34 = vsub.f32 %v10715_v51, %v3043_v4  ;;  %v11008_v4 = vsel %vm10417_vm9, %v3625_v49, -1e+30 }
 0x3e3   : > { %8999 = vpow2.f32 %v3088_v28  ;;  %v2455_v52 = vmul.f32 1.442695, %v2431_v31 }
 0x3e4   : > { %3116 = vadd.xlane.f32.xlu1 %v10966_v3  ;;  %3675 = vmax.xlane.f32.xlu0 %v10973_v19  ;;  %9001 = vpow2.f32 %v2453_v2 }
 0x3e5   : > { %2483 = vadd.xlane.f32.xlu2 %v10968_v13  ;;  %9003 = vpow2.f32 %v2455_v52 }
 0x3e6   : > { %v8994_v10 = vpop.eup %8993  ;;  %8166 = vmatmul.msk.bf16.gmra.mxu0 %vm12590_vm0, %v12729_v21 }
 0x3e7   : > { %v3045_v45 = vpop.xlane.xlu1 %3044  ;;  %v2410_v38 = vpop.xlane.xlu0 %2409  ;;  %8063 = vmatmul.msk.bf16.gmra.mxu2 %vm12590_vm0, %v12730_v14  ;;  %v1973_v56 = vmul.f32 %v8994_v10, %v10711_v63 }
 0x3e8   : > { %v8996_v40 = vpop.eup %8995  ;;  %v1937_v20 = vpop.xlane.xlu2 %1936  ;;  %v2432_v28 = vsub.f32 %v10731_v48, %v2410_v38  ;;  %v3067_v48 = vsub.f32 %v10727_v42, %v3045_v45 }
 0x3e9   : > { %v10987_v62 = vpop.eup %8997  ;;  %v1972_v60 = vmul.f32 %v8996_v40, %v10694_v0  ;;  %v3090_v0 = vmul.f32 1.442695, %v3066_v34 }
 0x3ea   : > { %v10995_v17 = vpop.eup %8999  ;;  %v3630_v10 = vpop.f32.mrf.mxu2  ;;  %v2457_v21 = vmul.f32 1.442695, %v2432_v28  ;;  %v3092_v52 = vmul.f32 1.442695, %v3067_v48 }
 0x3eb   : > { %v1984_v63 = vpack.c.bf16 %v1973_v56, %v1972_v60  ;;  %v11002_v40 = vpop.eup %9001  ;;  %v12731_v60 = vld [vmem:[#allocation40_spill] sm:$0xff] }
 0x3ec   : > { %3673 = vmax.xlane.f32.xlu1 %v10992_v43  ;;  %3120 = vadd.xlane.f32.xlu0 %v10995_v17  ;;  %v11004_v51 = vpop.eup %9003 }
 0x3ed   : > { %3118 = vadd.xlane.f32.xlu2 %v10987_v62 }
 0x3ee   : > { %2064 = vmatmul.bf16.gmra.mxu1 %v1984_v63 }
 0x3ef   : > { %v2414_v6 = vpop.xlane.xlu1 %2413  ;;  %v1939_v15 = vpop.xlane.xlu0 %1938 }
 0x3f0   : > { %9005 = vrcp.f32 %v1939_v15  ;;  %v3047_v31 = vpop.xlane.xlu2 %3046 }
 0x3f1   : > { %9007 = vrcp.f32 %v1937_v20  ;;  %v3068_v2 = vsub.f32 %v10752_v8, %v3047_v31  ;;  %v11027_v8 = vsel %vm10455_vm11, %v3630_v10, -1e+30 }
 0x3f2   : > { %9009 = vpow2.f32 %v3090_v0  ;;  %v3632_v45 = vpop.f32.mrf.mxu2  ;;  %v12732_v0 = vld [vmem:[#allocation14_spill] sm:$0xff] }
 0x3f3   : > { %9011 = vpow2.f32 %v2457_v21  ;;  %v3094_v42 = vmul.f32 1.442695, %v3068_v2  ;;  %v2433_v31 = vsub.f32 %v12732_v0, %v10964_v54  ;;  %v12733_v21 = vld [vmem:[#allocation19_spill] sm:$0xff] }
 0x3f4   : > { %2485 = vadd.xlane.f32.xlu1 %v11002_v40  ;;  %2487 = vadd.xlane.f32.xlu0 %v11004_v51  ;;  %9013 = vpow2.f32 %v3092_v52  ;;  %v2434_v48 = vsub.f32 %v12733_v21, %v2414_v6  ;;  %v11040_v52 = vsel %vm10437_vm10, %v10980_v32, -1e+30  ;;  %v12735_v21 = vld [vmem:[#allocation35_spill] sm:$0xff] }
 0x3f5   : > { %3677 = vmax.xlane.f32.xlu2 %v11008_v4  ;;  %9015 = vpow2.f32 %v3094_v42  ;;  %v2459_v10 = vmul.f32 1.442695, %v2433_v31 }
 0x3f6   : > { %v9006_v38 = vpop.eup %9005 }
 0x3f7   : > { %v1941_v14 = vpop.xlane.xlu1 %1940  ;;  %v3049_v20 = vpop.xlane.xlu0 %3048  ;;  %8064 = vmatmul.msk.bf16.gmra.mxu2 %vm12590_vm0, %v12731_v60  ;;  %v1975_v34 = vmul.f32 %v9006_v38, %v10742_v9 }
 0x3f8   : > { %v9008_v56 = vpop.eup %9007  ;;  %v11017_v49 = vpop.xlane.xlu2 %2417  ;;  %9017 = vrcp.f32 %v1941_v14  ;;  %v3069_v6 = vsub.f32 %v10760_v30, %v3049_v20 }
 0x3f9   : > { %v11020_v63 = vpop.eup %9009  ;;  %v1974_v28 = vmul.f32 %v9008_v56, %v10735_v50  ;;  %v2461_v56 = vmul.f32 1.442695, %v2434_v48 }
 0x3fa   : > { %v11023_v15 = vpop.eup %9011 }
 0x3fb   : > { %v1985_v9 = vpack.c.bf16 %v1975_v34, %v1974_v28  ;;  %v11035_v60 = vpop.eup %9013  ;;  %v3635_v34 = vpop.f32.mrf.mxu2 }
 0x3fc   : > { %3122 = vadd.xlane.f32.xlu1 %v11020_v63  ;;  %3681 = vmax.xlane.f32.xlu0 %v11027_v8  ;;  %v11042_v0 = vpop.eup %9015  ;;  %v11087_v57 = vsel %vm12704_vm12, %v3635_v34, -1e+30 }
 0x3fd   : > { %2489 = vadd.xlane.f32.xlu2 %v11023_v15  ;;  %12745 = vst [vmem:[#allocation23_spill] sm:$0xff] %v11087_v57 }
 0x3fe   : > { %2069 = vmatmul.bf16.gmra.mxu1 %v1985_v9  ;;  %v9018_v14 = vpop.eup %9017  ;;  %v3096_v9 = vmul.f32 1.442695, %v3069_v6 }
 0x3ff   : > { %v3051_v50 = vpop.xlane.xlu1 %3050  ;;  %v2416_v38 = vpop.xlane.xlu0 %2415  ;;  %v1976_v48 = vmul.f32 %v9018_v14, %v10756_v1 }
 0x400   : > { %v1943_v2 = vpop.xlane.xlu2 %1942  ;;  %v2435_v42 = vsub.f32 %v10775_v39, %v2416_v38  ;;  %v12736_v39 = vld [vmem:[#allocation58_spill] sm:$0xff] }
 0x401   : > { %9019 = vrcp.f32 %v1943_v2  ;;  %vm12737_vm11 = vnez %v12736_v39 }
 0x402   : > { %9021 = vpow2.f32 %v2459_v10  ;;  %v2463_v30 = vmul.f32 1.442695, %v2435_v42  ;;  %v11060_v38 = vsel %vm12737_vm11, %v3632_v45, -1e+30 }
 0x403   : > { %9023 = vpow2.f32 %v2461_v56  ;;  %12738 = vst [vmem:[#allocation24_spill] sm:$0xff] %v11060_v38  ;;  %v12739_v56 = vld [vmem:[#allocation49_spill] sm:$0xff]  ;;  %v3637_v1 = vpop.f32.mrf.mxu2 }
 0x404   : > { %3679 = vmax.xlane.f32.xlu1 %v11040_v52  ;;  %3126 = vadd.xlane.f32.xlu0 %v11042_v0  ;;  %9025 = vpow2.f32 %v3096_v9  ;;  %v3070_v6 = vsub.f32 %v12739_v56, %v3051_v50 }
 0x405   : > { %3124 = vadd.xlane.f32.xlu2 %v11035_v60  ;;  %9027 = vpow2.f32 %v2463_v30 }
 0x407   : > { %v2420_v28 = vpop.xlane.xlu1 %2419  ;;  %v1945_v31 = vpop.xlane.xlu0 %1944  ;;  %8065 = vmatmul.msk.bf16.gmra.mxu2 %vm12590_vm0, %v12735_v21 }
 0x408   : > { %v9020_v32 = vpop.eup %9019  ;;  %v3053_v2 = vpop.xlane.xlu2 %3052 }
 0x409   : > { %v1977_v10 = vmul.f32 %v9020_v32, %v10783_v55  ;;  %v11053_v20 = vpop.eup %9021  ;;  %v3071_v55 = vsub.f32 %v10797_v53, %v3053_v2  ;;  %v3098_v32 = vmul.f32 1.442695, %v3070_v6 }
 0x40a   : > { %v11055_v16 = vpop.eup %9023 }
 0x40b   : > { %v1986_v23 = vpack.c.bf16 %v1977_v10, %v1976_v48  ;;  %v3100_v21 = vmul.f32 1.442695, %v3071_v55  ;;  %v11066_v45 = vpop.eup %9025  ;;  %v11073_v48 = vsel %vm10517_vm14, %v3637_v1, -1e+30  ;;  %v12741_v10 = vld [vmem:[#allocation50_spill] sm:$0xff]  ;;  %v3640_v50 = vpop.f32.mrf.mxu2 }
 0x40c   : > { %2491 = vadd.xlane.f32.xlu1 %v11053_v20  ;;  %2493 = vadd.xlane.f32.xlu0 %v11055_v16  ;;  %v11068_v9 = vpop.eup %9027  ;;  %v2436_v53 = vsub.f32 %v12741_v10, %v11017_v49  ;;  %v12743_v1 = vld [vmem:[#allocation18_spill] sm:$0xff] }
 0x40d   : > { %3683 = vmax.xlane.f32.xlu2 %v11060_v38 }
 0x40e   : > { %2074 = vmatmul.bf16.gmra.mxu1 %v1986_v23 }
 0x40f   : > { %v1947_v14 = vpop.xlane.xlu1 %1946  ;;  %v3055_v42 = vpop.xlane.xlu0 %3054 }
 0x410   : > { %9029 = vrcp.f32 %v1947_v14  ;;  %v2465_v14 = vmul.f32 1.442695, %v2436_v53  ;;  %v12748_v53 = vld [vmem:[#allocation46_spill] sm:$0xff] }
 0x411   : > { %9031 = vrcp.f32 %v1945_v31  ;;  %v12742_v31 = vld [vmem:[#allocation48_spill] sm:$0xff] }
 0x412   : > { %9033 = vpow2.f32 %v3098_v32  ;;  %v2437_v30 = vsub.f32 %v12742_v31, %v2420_v28  ;;  %v12746_v28 = vld [vmem:[#allocation47_spill] sm:$0xff]  ;;  %v12747_v31 = vld [vmem:[#allocation20_spill] sm:$0xff] }
 0x413   : > { %9035 = vpow2.f32 %v3100_v21  ;;  %v3072_v21 = vsub.f32 %v12746_v28, %v3055_v42 }
 0x414   : > { %3128 = vadd.xlane.f32.xlu1 %v11066_v45  ;;  %3687 = vmax.xlane.f32.xlu0 %v11073_v48  ;;  %v2467_v32 = vmul.f32 1.442695, %v2437_v30  ;;  %9037 = vpow2.f32 %v2465_v14 }
 0x415   : > { %2495 = vadd.xlane.f32.xlu2 %v11068_v9 }
 0x416   : > { %v9030_v23 = vpop.eup %9029  ;;  %9039 = vpow2.f32 %v2467_v32 }
 0x417   : > { %v3057_v2 = vpop.xlane.xlu1 %3056  ;;  %v2422_v56 = vpop.xlane.xlu0 %2421  ;;  %8266 = vmatmul.msk.bf16.vlgmr.msra.gmra.mxu2 %vm12590_vm0, %v12743_v1  ;;  %v1979_v49 = vmul.f32 %v9030_v23, %v10804_v5  ;;  %v3102_v23 = vmul.f32 1.442695, %v3072_v21 }
 0x418   : > { %v9032_v6 = vpop.eup %9031  ;;  %v2472_v55 = vpop.xlane.xlu2 %2471  ;;  %v2438_v1 = vsub.f32 %v12748_v53, %v2422_v56  ;;  %v12759_v53 = vld [vmem:[#allocation31_spill] sm:$0xff] }
 0x419   : > { %v11083_v10 = vpop.eup %9033  ;;  %v1978_v25 = vmul.f32 %v9032_v6, %v12747_v31  ;;  %9041 = vpow2.f32 %v3102_v23  ;;  %v3642_v56 = vpop.f32.mrf.mxu2 }
 0x41a   : > { %v11091_v54 = vpop.eup %9035  ;;  %v2469_v28 = vmul.f32 1.442695, %v2438_v1  ;;  %9043 = vrcp.f32 %v2472_v55 }
 0x41b   : > { %v1987_v5 = vpack.c.bf16 %v1979_v49, %v1978_v25  ;;  %v11100_v39 = vpop.eup %9037  ;;  %v11106_v25 = vsel %vm10530_vm15, %v3640_v50, -1e+30  ;;  %v12755_v50 = vld [vmem:[#allocation22_spill] sm:$0xff]  ;;  %vm12589_vm15 = vcmask 257024  }
 0x41c   : > { %3685 = vmax.xlane.f32.xlu1 %v11087_v57  ;;  %3132 = vadd.xlane.f32.xlu0 %v11091_v54  ;;  %v11102_v14 = vpop.eup %9039  ;;  %12751 = vst [vmem:[#allocation30_spill] sm:$0xff] %v11106_v25  ;;  %9045 = vpow2.f32 %v2469_v28 }
 0x41d   : > { %3130 = vadd.xlane.f32.xlu2 %v11083_v10  ;;  %12749 = vst [vmem:[#allocation26_spill] sm:$0xff] %v11102_v14 }
 0x41e   : > { %2079 = vmatmul.bf16.gmra.mxu1 %v1987_v5 }
 0x41f   : > { %v3662_v34 = vpop.xlane.xlu1 %3661  ;;  %v11097_v30 = vpop.xlane.xlu0 %3663 }
 0x420   : > { %v3693_v42 = vsub.f32 %v10838_v22, %v3662_v34  ;;  %v3107_v6 = vpop.xlane.xlu2 %3106  ;;  %v12752_v22 = vld [vmem:[#allocation43_spill] sm:$0xff]  ;;  %v11114_v5 = vpop.eup %9041 }
 0x421   : > { %v3073_v49 = vsub.f32 %v12752_v22, %v3057_v2  ;;  %12754 = vst [vmem:[#allocation34_spill] sm:$0xff] %v11114_v5  ;;  %v9044_v55 = vpop.eup %9043 }
 0x422   : > { %v3709_v31 = vmul.f32 1.442695, %v3693_v42  ;;  %v11118_v42 = vpop.eup %9045 }
 0x423   : > { %v3104_v23 = vmul.f32 1.442695, %v3073_v49  ;;  %12756 = vst [vmem:[#allocation36_spill] sm:$0xff] %v11118_v42 }
 0x424   : > { %2497 = vadd.xlane.f32.xlu1 %v11100_v39  ;;  %2499 = vadd.xlane.f32.xlu0 %v11102_v14  ;;  %9047 = vpow2.f32 %v3709_v31  ;;  %v4762_v31 = vpop.f32.mrf.mxu2 }
 0x425   : > { %3689 = vmax.xlane.f32.xlu2 %v11106_v25  ;;  %9049 = vrcp.f32 %v3107_v6 }
 0x427   : > { %v2474_v32 = vpop.xlane.xlu1 %2473  ;;  %v3109_v1 = vpop.xlane.xlu0 %3108  ;;  %8267 = vmatmul.msk.bf16.gmra.mxu2 %vm12590_vm0, %v12755_v50 }
 0x428   : > { %9051 = vrcp.f32 %v2474_v32  ;;  %v11112_v21 = vpop.xlane.xlu2 %4264  ;;  %v2045_v34 = vpop.f32.mrf.mxu1  ;;  %v12758_v32 = vld [vmem:[#allocation28_spill] sm:$0xff] }
 0x429   : > { %12753 = vst [vmem:[#allocation32_spill] sm:$0xff] %v11112_v21  ;;  %9053 = vrcp.f32 %v3109_v1  ;;  %v2085_v2 = vpack.c.bf16 %v2045_v34, %v2045_v34  ;;  %v2519_v1 = vmul.f32 %v9044_v55, %v12758_v32 }
 0x42a   : > { %v11120_v28 = vpop.eup %9047  ;;  %9055 = vpow2.f32 %v3104_v23  ;;  %v11134_v23 = vsel %vm10549_vm13, %v3642_v56, -1e+30 }
 0x42b   : > { %12757 = vst [vmem:[#allocation40_spill] sm:$0xff] %v11120_v28  ;;  %v9050_v6 = vpop.eup %9049 }
 0x42c   : > { %3134 = vadd.xlane.f32.xlu1 %v11114_v5  ;;  %2102 = vst.msk [vmem:[#allocation3] sm:$0xf] %vm12589_vm15, %v2085_v2  ;;  %3741 = vadd.xlane.f32.xlu0 %v11120_v28  ;;  %v3154_v21 = vmul.f32 %v9050_v6, %v12759_v53  ;;  %v4764_v53 = vpop.f32.mrf.mxu2 }
 0x42d   : > { %2501 = vadd.xlane.f32.xlu2 %v11118_v42 }
 0x42e   : > { %v9052_v22 = vpop.eup %9051 }
 0x42f   : > { %v9054_v49 = vpop.eup %9053  ;;  %v2520_v50 = vmul.f32 %v9052_v22, %v10850_v18  ;;  %v11128_v34 = vpop.xlane.xlu1 %4266  ;;  %v12762_v22 = vld [vmem:[#allocation42_spill] sm:$0xff] }
 0x430   : > { %v3155_v25 = vmul.f32 %v9054_v49, %v12760_v11  ;;  %v3666_v57 = vpop.xlane.xlu2 %3665  ;;  %v2476_v38 = vpop.xlane.xlu0 %2475  ;;  %v12763_v11 = vld [vmem:[#allocation33_spill] sm:$0xff] }
 0x431   : > { %v2535_v2 = vpack.c.bf16 %v2520_v50, %v2519_v1  ;;  %v2047_v14 = vpop.f32.mrf.mxu1  ;;  %v11136_v55 = vpop.eup %9055  ;;  %v3695_v18 = vsub.f32 %v10881_v12, %v3666_v57  ;;  %9057 = vrcp.f32 %v2476_v38  ;;  %v12765_v49 = vld [vmem:[#allocation25_spill] sm:$0xff]  ;;  %v11155_v38 = vsel %vm10253_vm1, %v4762_v31, -1e+30 }
 0x432   : > { %v3170_v5 = vpack.c.bf16 %v3155_v25, %v3154_v21  ;;  %v2086_v42 = vpack.c.bf16 %v2047_v14, %v2047_v14  ;;  %v3694_v14 = vsub.f32 %v12763_v11, %v11097_v30  ;;  %v12764_v21 = vld [vmem:[#allocation53_spill] sm:$0xff] }
 0x433   : > { %2615 = vmatmul.bf16.vlgmr.msrb.gmra.mxu3 %v2535_v2  ;;  %v3713_v25 = vmul.f32 1.442695, %v3695_v18 }
 0x434   : > { %5034 = vmatpush.bf16.msrb.mxu3 %v12762_v22  ;;  %3691 = vmax.xlane.f32.xlu1 %v11134_v23  ;;  %2103 = vst.msk [vmem:[#allocation3 + $0x8] sm:$0xf] %vm12589_vm15, %v2086_v42  ;;  %v3711_v42 = vmul.f32 1.442695, %v3694_v14 }
 0x435   : > { %3136 = vadd.xlane.f32.xlu2 %v11136_v55  ;;  %3250 = vmatmul.bf16.vlgmr.msra.gmra.mxu1 %v3170_v5  ;;  %v11151_v5 = vsel %vm10273_vm2, %v4764_v53, -1e+30  ;;  %v4767_v53 = vpop.f32.mrf.mxu2 }
 0x437   : > { %v3111_v56 = vpop.xlane.xlu1 %3110  ;;  %8268 = vmatmul.msk.bf16.gmra.mxu2 %vm12590_vm0, %v12765_v49  ;;  %v9058_v50 = vpop.eup %9057 }
 0x438   : > { %5035 = vmatpush.bf16.msrb.mxu3 %v12764_v21  ;;  %v2478_v6 = vpop.xlane.xlu2 %2477  ;;  %v3670_v12 = vpop.xlane.xlu0 %3669  ;;  %v2521_v31 = vmul.f32 %v9058_v50, %v10877_v26  ;;  %v12767_v50 = vld [vmem:[#allocation27_spill] sm:$0xff] }
 0x439   : > { %9059 = vrcp.f32 %v2478_v6  ;;  %v3697_v57 = vsub.f32 %v10895_v46, %v3670_v12 }
 0x43a   : > { %9061 = vpow2.f32 %v3713_v25 }
 0x43b   : > { %v3717_v32 = vmul.f32 1.442695, %v3697_v57  ;;  %v2050_v1 = vpop.f32.mrf.mxu1 }
 0x43c   : > { %4820 = vmax.xlane.f32.xlu1 %v11151_v5  ;;  %v2087_v46 = vpack.c.bf16 %v2050_v1, %v2050_v1 }
 0x43d   : > { %9063 = vpow2.f32 %v3717_v32  ;;  %4818 = vmax.xlane.f32.xlu2 %v11155_v38 }
 0x43e   : > { %9065 = vpow2.f32 %v3711_v42  ;;  %2104 = vst.msk [vmem:[#allocation3 + $0x10] sm:$0xf] %vm12589_vm15, %v2087_v46  ;;  %v4769_v46 = vpop.f32.mrf.mxu2 }
 0x43f   : > { %v9060_v2 = vpop.eup %9059  ;;  %v3668_v18 = vpop.xlane.xlu1 %3667  ;;  %9067 = vrcp.f32 %v3111_v56 }
 0x440   : > { %v11160_v22 = vpop.xlane.xlu2 %4268  ;;  %v3115_v11 = vpop.xlane.xlu0 %3114  ;;  %v2522_v14 = vmul.f32 %v9060_v2, %v10889_v36  ;;  %v3696_v49 = vsub.f32 %v10915_v61, %v3668_v18  ;;  %v11179_v61 = vsel %vm10293_vm3, %v4767_v53, -1e+30 }
 0x441   : > { %v11164_v25 = vpop.eup %9061 }
 0x442   : > { %v2536_v21 = vpack.c.bf16 %v2522_v14, %v2521_v31  ;;  %v3715_v1 = vmul.f32 1.442695, %v3696_v49 }
 0x443   : > { %v11166_v6 = vpop.eup %9063  ;;  %v2052_v57 = vpop.f32.mrf.mxu1 }
 0x444   : > { %v11168_v12 = vpop.eup %9065  ;;  %2620 = vmatmul.bf16.gmra.mxu3 %v2536_v21  ;;  %3745 = vadd.xlane.f32.xlu1 %v11164_v25  ;;  %v2088_v42 = vpack.c.bf16 %v2052_v57, %v2052_v57 }
 0x445   : > { %3743 = vadd.xlane.f32.xlu2 %v11168_v12  ;;  %3749 = vadd.xlane.f32.xlu0 %v11166_v6  ;;  %v9068_v56 = vpop.eup %9067 }
 0x446   : > { %2105 = vst.msk [vmem:[#allocation3 + $0x18] sm:$0xf] %vm12589_vm15, %v2088_v42  ;;  %v3156_v53 = vmul.f32 %v9068_v56, %v10886_v59  ;;  %v12768_v56 = vld [vmem:[#allocation29_spill] sm:$0xff] }
 0x447   : > { %v2480_v26 = vpop.xlane.xlu1 %2479  ;;  %8269 = vmatmul.msk.bf16.gmra.mxu2 %vm12590_vm0, %v12767_v50 }
 0x448   : > { %9069 = vrcp.f32 %v2480_v26  ;;  %v3113_v36 = vpop.xlane.xlu2 %3112  ;;  %v2482_v32 = vpop.xlane.xlu0 %2481 }
 0x449   : > { %9071 = vrcp.f32 %v3113_v36 }
 0x44a   : > { %9073 = vrcp.f32 %v2482_v32 }
 0x44b   : > { %v2055_v2 = vpop.f32.mrf.mxu1  ;;  %9075 = vpow2.f32 %v3715_v1 }
 0x44c   : > { %4822 = vmax.xlane.f32.xlu1 %v11179_v61  ;;  %v2089_v18 = vpack.c.bf16 %v2055_v2, %v2055_v2 }
 0x44e   : > { %v9070_v31 = vpop.eup %9069  ;;  %2106 = vst.msk [vmem:[#allocation3 + $0x20] sm:$0xf] %vm12589_vm15, %v2089_v18 }
 0x44f   : > { %v9072_v14 = vpop.eup %9071  ;;  %v11183_v21 = vpop.xlane.xlu1 %4270  ;;  %v2523_v57 = vmul.f32 %v9070_v31, %v10929_v35 }
 0x450   : > { %v9074_v49 = vpop.eup %9073  ;;  %v3672_v42 = vpop.xlane.xlu2 %3671  ;;  %v3157_v36 = vmul.f32 %v9072_v14, %v10931_v44 }
 0x451   : > { %v11186_v26 = vpop.xlane.xlu0 %4272  ;;  %v3698_v32 = vsub.f32 %v10958_v24, %v3672_v42  ;;  %v2524_v1 = vmul.f32 %v9074_v49, %v10933_v47  ;;  %v11192_v2 = vpop.eup %9075  ;;  %v11203_v49 = vsel %vm10317_vm4, %v4769_v46, -1e+30 }
 0x452   : > { %v3171_v50 = vpack.c.bf16 %v3157_v36, %v3156_v53  ;;  %v4772_v35 = vpop.f32.mrf.mxu2 }
 0x453   : > { %v3719_v18 = vmul.f32 1.442695, %v3698_v32  ;;  %v2537_v41 = vpack.c.bf16 %v2524_v1, %v2523_v57  ;;  %v2057_v30 = vpop.f32.mrf.mxu1 }
 0x454   : > { %3255 = vmatmul.bf16.gmra.mxu1 %v3171_v50  ;;  %3747 = vadd.xlane.f32.xlu1 %v11192_v2  ;;  %v2090_v31 = vpack.c.bf16 %v2057_v30, %v2057_v30 }
 0x455   : > { %9077 = vpow2.f32 %v3719_v18  ;;  %2625 = vmatmul.bf16.gmra.mxu3 %v2537_v41 }
 0x456   : > { %9079 = vrcp.f32 %v3115_v11  ;;  %2107 = vst.msk [vmem:[#allocation3 + $0x28] sm:$0xf] %vm12589_vm15, %v2090_v31 }
 0x457   : > { %v3117_v59 = vpop.xlane.xlu1 %3116  ;;  %8270 = vmatmul.msk.bf16.gmra.mxu2 %vm12590_vm0, %v12768_v56 }
 0x458   : > { %9081 = vrcp.f32 %v3117_v59  ;;  %v2484_v44 = vpop.xlane.xlu2 %2483 }
 0x459   : > { %v3676_v47 = vpop.xlane.xlu0 %3675 }
 0x45a   : > { %v3700_v24 = vsub.f32 %v10973_v19, %v3676_v47  ;;  %v4774_v19 = vpop.f32.mrf.mxu2 }
 0x45b   : > { %v11199_v14 = vpop.eup %9077  ;;  %v2060_v30 = vpop.f32.mrf.mxu1  ;;  %v11215_v47 = vsel %vm10359_vm6, %v4774_v19, -1e+30 }
 0x45c   : > { %v3723_v57 = vmul.f32 1.442695, %v3700_v24  ;;  %v9080_v41 = vpop.eup %9079  ;;  %3751 = vadd.xlane.f32.xlu2 %v11199_v14  ;;  %4824 = vmax.xlane.f32.xlu1 %v11203_v49  ;;  %v2091_v11 = vpack.c.bf16 %v2060_v30, %v2060_v30  ;;  %v11219_v24 = vsel %vm10335_vm5, %v4772_v35, -1e+30  ;;  %v12769_v30 = vld [vmem:[#allocation37_spill] sm:$0xff] }
 0x45d   : > { %v3158_v36 = vmul.f32 %v9080_v41, %v10918_v58 }
 0x45e   : > { %9083 = vpow2.f32 %v3723_v57  ;;  %v9082_v42 = vpop.eup %9081  ;;  %2108 = vst.msk [vmem:[#allocation3 + $0x30] sm:$0xf] %vm12589_vm15, %v2091_v11 }
 0x45f   : > { %v3674_v53 = vpop.xlane.xlu1 %3673  ;;  %v3159_v32 = vmul.f32 %v9082_v42, %v10966_v3 }
 0x460   : > { %v3699_v46 = vsub.f32 %v10992_v43, %v3674_v53  ;;  %v3119_v1 = vpop.xlane.xlu2 %3118 }
 0x461   : > { %v3121_v50 = vpop.xlane.xlu0 %3120  ;;  %v3172_v18 = vpack.c.bf16 %v3159_v32, %v3158_v36  ;;  %9085 = vrcp.f32 %v3119_v1 }
 0x462   : > { %v3721_v31 = vmul.f32 1.442695, %v3699_v46 }
 0x463   : > { %v2062_v58 = vpop.f32.mrf.mxu1 }
 0x464   : > { %v11211_v59 = vpop.eup %9083  ;;  %9087 = vpow2.f32 %v3721_v31  ;;  %4828 = vmax.xlane.f32.xlu2 %v11215_v47  ;;  %3260 = vmatmul.bf16.gmra.mxu1 %v3172_v18  ;;  %v2092_v3 = vpack.c.bf16 %v2062_v58, %v2062_v58 }
 0x465   : > { %9089 = vrcp.f32 %v3121_v50  ;;  %4826 = vmax.xlane.f32.xlu1 %v11219_v24  ;;  %3755 = vadd.xlane.f32.xlu0 %v11211_v59 }
 0x466   : > { %9091 = vrcp.f32 %v2484_v44  ;;  %2109 = vst.msk [vmem:[#allocation3 + $0x38] sm:$0xf] %vm12589_vm15, %v2092_v3 }
 0x467   : > { %v2486_v43 = vpop.xlane.xlu1 %2485  ;;  %v9086_v35 = vpop.eup %9085  ;;  %8271 = vmatmul.msk.bf16.gmra.mxu2 %vm12590_vm0, %v12769_v30  ;;  %v8088_v30 = vld [vmem:[#allocation2 + $0x104] sm:$0xf] }
 0x468   : > { %9093 = vrcp.f32 %v2486_v43  ;;  %v3678_v56 = vpop.xlane.xlu2 %3677  ;;  %v3160_v46 = vmul.f32 %v9086_v35, %v10987_v62  ;;  %v8749_v62 = vld [vmem:[#allocation2 + $0x108] sm:$0xf0]  ;;  %v8120_v35 = vld [vmem:[#allocation2 + $0xf4] sm:$0xf] }
 0x469   : > { %v2488_v57 = vpop.xlane.xlu0 %2487  ;;  %v3701_v41 = vsub.f32 %v11008_v4, %v3678_v56 }
 0x46a   : > { %v11228_v11 = vpop.eup %9087 }
 0x46b   : > { %v9090_v42 = vpop.eup %9089  ;;  %v3725_v19 = vmul.f32 1.442695, %v3701_v41  ;;  %v2065_v36 = vpop.f32.mrf.mxu1 }
 0x46c   : > { %v9092_v53 = vpop.eup %9091  ;;  %v2093_v44 = vpack.c.bf16 %v2065_v36, %v2065_v36  ;;  %v3161_v1 = vmul.f32 %v9090_v42, %v10995_v17  ;;  %v8741_v42 = vld [vmem:[#allocation2 + $0x118] sm:$0xf0]  ;;  %v4220_v36 = vpop.f32.mrf.mxu0 }
 0x46d   : > { %9095 = vpow2.f32 %v3725_v19  ;;  %3753 = vadd.xlane.f32.xlu1 %v11228_v11  ;;  %v2525_v50 = vmul.f32 %v9092_v53, %v10968_v13 }
 0x46e   : > { %v9094_v32 = vpop.eup %9093  ;;  %2110 = vst.msk [vmem:[#allocation3 + $0x40] sm:$0xf] %vm12589_vm15, %v2093_v44  ;;  %v3173_v43 = vpack.c.bf16 %v3161_v1, %v3160_v46 }
 0x46f   : > { %v3123_v4 = vpop.xlane.xlu1 %3122  ;;  %v2526_v18 = vmul.f32 %v9094_v32, %v11002_v40  ;;  %v8121_v40 = vor.u32 %v8749_v62, %v8120_v35  ;;  %v8089_v32 = vor.u32 %v8741_v42, %v8088_v30 }
 0x470   : > { %v2490_v31 = vpop.xlane.xlu2 %2489 }
 0x471   : > { %v11236_v58 = vpop.xlane.xlu0 %3681  ;;  %v2538_v3 = vpack.c.bf16 %v2526_v18, %v2525_v50  ;;  %9097 = vrcp.f32 %v2490_v31  ;;  %v8740_v50 = vld [vmem:[#allocation2 + $0xe8] sm:$0xf0] }
 0x472   : > { %9099 = vrcp.f32 %v2488_v57  ;;  %v11248_v57 = vsel %vm10359_vm6, %v4220_v36, -1e+30 }
 0x473   : > { %v11238_v56 = vpop.eup %9095  ;;  %2630 = vmatmul.bf16.gmra.mxu3 %v2538_v3  ;;  %v2067_v41 = vpop.f32.mrf.mxu1  ;;  %9101 = vrcp.f32 %v3123_v4  ;;  %v8084_v4 = vld [vmem:[#allocation2 + $0xd4] sm:$0xf] }
 0x474   : > { %3265 = vmatmul.bf16.gmra.mxu1 %v3173_v43  ;;  %v2094_v17 = vpack.c.bf16 %v2067_v41, %v2067_v41  ;;  %v8085_v62 = vor.u32 %v8740_v50, %v8084_v4 }
 0x475   : > { %3757 = vadd.xlane.f32.xlu1 %v11238_v56 }
 0x476   : > { %2111 = vst.msk [vmem:[#allocation3 + $0x48] sm:$0xf] %vm12589_vm15, %v2094_v17 }
 0x477   : > { %v11242_v13 = vpop.xlane.xlu1 %3679  ;;  %v9098_v44 = vpop.eup %9097 }
 0x478   : > { %v3125_v19 = vpop.xlane.xlu2 %3124  ;;  %v9100_v46 = vpop.eup %9099  ;;  %v2528_v3 = vmul.f32 %v9098_v44, %v11023_v15  ;;  %v8774_v44 = vld [vmem:[#allocation2 + $0x138] sm:$0xf0] }
 0x479   : > { %v3127_v53 = vpop.xlane.xlu0 %3126  ;;  %9103 = vrcp.f32 %v3125_v19  ;;  %5277 = vrot.lane.b32.xlu0 %v8121_v40, %s9602_s26  ;;  %v9102_v18 = vpop.eup %9101  ;;  %v2527_v17 = vmul.f32 %v9100_v46, %v11004_v51  ;;  %v8228_v51 = vld [vmem:[#allocation2 + $0x124] sm:$0xf] }
 0x47a   : > { %v3162_v30 = vmul.f32 %v9102_v18, %v11020_v63 }
 0x47b   : > { %v2070_v1 = vpop.f32.mrf.mxu1  ;;  %v2539_v19 = vpack.c.bf16 %v2528_v3, %v2527_v17 }
 0x47c   : > { %5020 = vrot.lane.b32.xlu2 %v8089_v32, %s9601_s21  ;;  %v2095_v31 = vpack.c.bf16 %v2070_v1, %v2070_v1  ;;  %v8229_v1 = vor.u32 %v8774_v44, %v8228_v51 }
 0x47d   : > { %4274 = vmax.xlane.f32.xlu1 %v11248_v57 }
 0x47e   : > { %2112 = vst.msk [vmem:[#allocation3 + $0x50] sm:$0xf] %vm12589_vm15, %v2095_v31 }
 0x47f   : > { %v9104_v43 = vpop.eup %9103  ;;  %v2492_v41 = vpop.xlane.xlu1 %2491 }
 0x480   : > { %v11254_v35 = vpop.xlane.xlu2 %3683  ;;  %v3163_v42 = vmul.f32 %v9104_v43, %v11035_v60  ;;  %9105 = vrcp.f32 %v2492_v41 }
 0x481   : > { %v2494_v40 = vpop.xlane.xlu0 %2493  ;;  %5018 = vrot.lane.b32.xlu0 %v8085_v62, %s9601_s21 }
 0x482   : > { %v3174_v36 = vpack.c.bf16 %v3163_v42, %v3162_v30  ;;  %9107 = vrcp.f32 %v2494_v40 }
 0x483   : > { %2635 = vmatmul.bf16.gmra.mxu3 %v2539_v19  ;;  %v2072_v15 = vpop.f32.mrf.mxu1  ;;  %9109 = vrcp.f32 %v3127_v53 }
 0x484   : > { %3270 = vmatmul.bf16.gmra.mxu1 %v3174_v36  ;;  %v2096_v32 = vpack.c.bf16 %v2072_v15, %v2072_v15 }
 0x486   : > { %2113 = vst.msk [vmem:[#allocation3 + $0x58] sm:$0xf] %vm12589_vm15, %v2096_v32  ;;  %v9106_v4 = vpop.eup %9105 }
 0x487   : > { %v3129_v46 = vpop.xlane.xlu1 %3128  ;;  %v2529_v53 = vmul.f32 %v9106_v4, %v11053_v20 }
 0x488   : > { %9111 = vrcp.f32 %v3129_v46  ;;  %v2496_v63 = vpop.xlane.xlu2 %2495  ;;  %v9108_v18 = vpop.eup %9107 }
 0x489   : > { %v3688_v60 = vpop.xlane.xlu0 %3687  ;;  %5913 = vrot.lane.b32.xlu0 %v8229_v1, %s9603_s6  ;;  %v9110_v3 = vpop.eup %9109  ;;  %v2530_v62 = vmul.f32 %v9108_v18, %v11055_v16 }
 0x48a   : > { %v3706_v50 = vsub.f32 %v11073_v48, %v3688_v60  ;;  %v3164_v30 = vmul.f32 %v9110_v3, %v11042_v0 }
 0x48b   : > { %v2075_v43 = vpop.f32.mrf.mxu1  ;;  %v2540_v19 = vpack.c.bf16 %v2530_v62, %v2529_v53 }
 0x48c   : > { %v3735_v31 = vmul.f32 1.442695, %v3706_v50  ;;  %v2097_v41 = vpack.c.bf16 %v2075_v43, %v2075_v43 }
 0x48e   : > { %9113 = vpow2.f32 %v3735_v31  ;;  %v9112_v17 = vpop.eup %9111  ;;  %2114 = vst.msk [vmem:[#allocation3 + $0x60] sm:$0xf] %vm12589_vm15, %v2097_v41  ;;  %v4777_v41 = vpop.f32.mrf.mxu2 }
 0x48f   : > { %v11265_v40 = vpop.xlane.xlu1 %3685  ;;  %v3165_v42 = vmul.f32 %v9112_v17, %v11066_v45  ;;  %v3702_v17 = vsub.f32 %v11040_v52, %v11242_v13 }
 0x490   : > { %v3131_v48 = vpop.xlane.xlu2 %3130 }
 0x491   : > { %v3175_v36 = vpack.c.bf16 %v3165_v42, %v3164_v30  ;;  %v3133_v15 = vpop.xlane.xlu0 %3132  ;;  %9115 = vrcp.f32 %v3131_v48  ;;  %v8080_v48 = vld [vmem:[#allocation2 + $0xa4] sm:$0xf] }
 0x492   : > { %9117 = vrcp.f32 %v3133_v15 }
 0x493   : > { %2640 = vmatmul.bf16.gmra.mxu3 %v2540_v19  ;;  %v2077_v20 = vpop.f32.mrf.mxu1  ;;  %9119 = vrcp.f32 %v2496_v63  ;;  %v8739_v19 = vld [vmem:[#allocation2 + $0xb8] sm:$0xf0] }
 0x494   : > { %v11269_v44 = vpop.eup %9113  ;;  %3275 = vmatmul.bf16.gmra.mxu1 %v3175_v36  ;;  %v2098_v16 = vpack.c.bf16 %v2077_v20, %v2077_v20  ;;  %v8081_v20 = vor.u32 %v8739_v19, %v8080_v48 }
 0x495   : > { %3767 = vadd.xlane.f32.xlu1 %v11269_v44 }
 0x496   : > { %2115 = vst.msk [vmem:[#allocation3 + $0x68] sm:$0xf] %vm12589_vm15, %v2098_v16 }
 0x497   : > { %v2498_v0 = vpop.xlane.xlu1 %2497  ;;  %v9116_v32 = vpop.eup %9115 }
 0x498   : > { %9121 = vrcp.f32 %v2498_v0  ;;  %v11273_v45 = vpop.xlane.xlu2 %3689  ;;  %v9118_v51 = vpop.eup %9117  ;;  %v3166_v50 = vmul.f32 %v9116_v32, %v11083_v10  ;;  %v11284_v10 = vsel %vm10379_vm7, %v4777_v41, -1e+30  ;;  %v3703_v0 = vsub.f32 %v11027_v8, %v11236_v58 }
 0x499   : > { %v9120_v46 = vpop.eup %9119  ;;  %v3167_v18 = vmul.f32 %v9118_v51, %v11091_v54  ;;  %v2500_v30 = vpop.xlane.xlu0 %2499  ;;  %v12770_v51 = vld [vmem:[#allocation36_spill] sm:$0xff] }
 0x49a   : > { %v2531_v63 = vmul.f32 %v9120_v46, %v11068_v9 }
 0x49b   : > { %v2080_v1 = vpop.f32.mrf.mxu1  ;;  %v3176_v62 = vpack.c.bf16 %v3167_v18, %v3166_v50  ;;  %v12771_v50 = vld [vmem:[#allocation26_spill] sm:$0xff] }
 0x49c   : > { %v2099_v60 = vpack.c.bf16 %v2080_v1, %v2080_v1 }
 0x49e   : > { %v9122_v4 = vpop.eup %9121  ;;  %2116 = vst.msk [vmem:[#allocation3 + $0x70] sm:$0xf] %vm12589_vm15, %v2099_v60  ;;  %v3729_v60 = vmul.f32 1.442695, %v3703_v0 }
 0x49f   : > { %v3135_v31 = vpop.xlane.xlu1 %3134  ;;  %v2532_v3 = vmul.f32 %v9122_v4, %v11100_v39  ;;  %v3727_v39 = vmul.f32 1.442695, %v3702_v17 }
 0x4a0   : > { %v2502_v43 = vpop.xlane.xlu2 %2501 }
 0x4a1   : > { %v2541_v53 = vpack.c.bf16 %v2532_v3, %v2531_v63  ;;  %9123 = vrcp.f32 %v2502_v43  ;;  %v3742_v17 = vpop.xlane.xlu0 %3741 }
 0x4a2   : > { %9125 = vrcp.f32 %v2500_v30 }
 0x4a3   : > { %2645 = vmatmul.bf16.gmra.mxu3 %v2541_v53  ;;  %v2082_v54 = vpop.f32.mrf.mxu1  ;;  %9127 = vrcp.f32 %v3135_v31  ;;  %v12772_v31 = vld [vmem:[#allocation34_spill] sm:$0xff]  ;;  %v12773_v53 = vld [vmem:[#allocation24_spill] sm:$0xff] }
 0x4a4   : > { %3280 = vmatmul.bf16.gmra.mxu1 %v3176_v62  ;;  %v2100_v42 = vpack.c.bf16 %v2082_v54, %v2082_v54  ;;  %v3704_v62 = vsub.f32 %v12773_v53, %v11254_v35 }
 0x4a5   : > { %4830 = vmax.xlane.f32.xlu2 %v11284_v10 }
 0x4a6   : > { %2117 = vst.msk [vmem:[#allocation3 + $0x78] sm:$0xf] %vm12589_vm15, %v2100_v42  ;;  %v3731_v54 = vmul.f32 1.442695, %v3704_v62  ;;  %vm12594_vm15 = vcmask 519424  }
 0x4a7   : > { %v3692_v9 = vpop.xlane.xlu1 %3691  ;;  %v9124_v15 = vpop.eup %9123 }
 0x4a8   : > { %v3708_v52 = vsub.f32 %v11134_v23, %v3692_v9  ;;  %v3137_v13 = vpop.xlane.xlu2 %3136  ;;  %v9126_v16 = vpop.eup %9125  ;;  %v2534_v46 = vmul.f32 %v9124_v15, %v12770_v51  ;;  %v12774_v9 = vld [vmem:[#allocation23_spill] sm:$0xff] }
 0x4a9   : > { %9129 = vrcp.f32 %v3137_v13  ;;  %v9128_v32 = vpop.eup %9127  ;;  %v2533_v18 = vmul.f32 %v9126_v16, %v12771_v50 }
 0x4aa   : > { %v3739_v36 = vmul.f32 1.442695, %v3708_v52  ;;  %9131 = vpow2.f32 %v3727_v39  ;;  %v3168_v63 = vmul.f32 %v9128_v32, %v12772_v31  ;;  %v3705_v52 = vsub.f32 %v12774_v9, %v11265_v40  ;;  %v12776_v40 = vld [vmem:[#allocation30_spill] sm:$0xff] }
 0x4ab   : > { %v2542_v58 = vpack.c.bf16 %v2534_v46, %v2533_v18  ;;  %v3707_v46 = vsub.f32 %v12776_v40, %v11273_v45 }
 0x4ac   : > { %9133 = vpow2.f32 %v3739_v36  ;;  %v3733_v15 = vmul.f32 1.442695, %v3705_v52 }
 0x4ad   : > { %9135 = vpow2.f32 %v3729_v60  ;;  %v3737_v50 = vmul.f32 1.442695, %v3707_v46 }
 0x4ae   : > { %5016 = vrot.lane.b32.xlu1 %v8081_v20, %s9601_s21  ;;  %9137 = vrcp.f32 %v3742_v17  ;;  %v12775_v20 = vld [vmem:[#allocation40_spill] sm:$0xff] }
 0x4af   : > { %v9130_v1 = vpop.eup %9129  ;;  %v11293_v23 = vpop.xlane.xlu1 %4820 }
 0x4b0   : > { %v11295_v4 = vpop.xlane.xlu2 %4818  ;;  %v3169_v3 = vmul.f32 %v9130_v1, %v11136_v55  ;;  %v11300_v43 = vpop.eup %9131 }
 0x4b2   : > { %v11302_v8 = vpop.eup %9133  ;;  %v3177_v41 = vpack.c.bf16 %v3169_v3, %v3168_v63  ;;  %v11315_v19 = vpop.f32.mrf.mxu1 }
 0x4b3   : > { %3759 = vadd.xlane.f32.xlu0 %v11300_v43  ;;  %3771 = vadd.xlane.f32.xlu2 %v11302_v8  ;;  %v11308_v39 = vpop.eup %9135 }
 0x4b4   : > { %2650 = vmatmul.bf16.gmra.mxu3 %v2542_v58  ;;  %3285 = vmatmul.bf16.gmra.mxu1 %v3177_v41  ;;  %v9138_v13 = vpop.eup %9137 }
 0x4b5   : > { %v3789_v16 = vmul.f32 %v9138_v13, %v12775_v20 }
 0x4b6   : > { %v2616_v30 = vpop.f32.mrf.mxu3 }
 0x4b7   : > { %v3746_v55 = vpop.xlane.xlu1 %3745  ;;  %v2656_v31 = vpack.c.bf16 %v2616_v30, %v2616_v30 }
 0x4b8   : > { %v3744_v42 = vpop.xlane.xlu2 %3743  ;;  %v3750_v9 = vpop.xlane.xlu0 %3749 }
 0x4b9   : > { %9139 = vrcp.f32 %v3744_v42 }
 0x4ba   : > { %9141 = vpow2.f32 %v3731_v54  ;;  %v3253_v63 = vpop.f32.mrf.mxu1 }
 0x4bb   : > { %3761 = vadd.xlane.f32.xlu0 %v11308_v39  ;;  %9143 = vpow2.f32 %v3733_v15  ;;  %v3292_v17 = vpack.c.bf16 %v3253_v63, %v3253_v63 }
 0x4bc   : > { %9145 = vrcp.f32 %v3746_v55 }
 0x4be   : > { %v11313_v48 = vpop.f32.mrf.mxu3 }
 0x4bf   : > { %v9140_v35 = vpop.eup %9139  ;;  %v11317_v36 = vpop.xlane.xlu1 %4822 }
 0x4c0   : > { %v3790_v0 = vmul.f32 %v9140_v35, %v11168_v12  ;;  %v11321_v32 = vpop.eup %9141  ;;  %v8280_v35 = vld [vmem:[#allocation2 + $0x44] sm:$0xf] }
 0x4c1   : > { %v11326_v3 = vpop.eup %9143 }
 0x4c2   : > { %v3805_v51 = vpack.c.bf16 %v3790_v0, %v3789_v16  ;;  %v9146_v12 = vpop.eup %9145 }
 0x4c3   : > { %3763 = vadd.xlane.f32.xlu0 %v11321_v32  ;;  %v3791_v41 = vmul.f32 %v9146_v12, %v11164_v25  ;;  %v4779_v25 = vpop.f32.mrf.mxu2 }
 0x4c4   : > { %3885 = vmatmul.bf16.vlgmr.msra.gmra.mxu3 %v3805_v51  ;;  %v11348_v15 = vsel %vm10402_vm8, %v4779_v25, -1e+30 }
 0x4c7   : > { %v2621_v1 = vpop.f32.mrf.mxu3  ;;  %v3748_v60 = vpop.xlane.xlu1 %3747 }
 0x4c8   : > { %v2658_v18 = vpack.c.bf16 %v2621_v1, %v2621_v1  ;;  %9147 = vrcp.f32 %v3748_v60 }
 0x4c9   : > { %9149 = vpow2.f32 %v3737_v50 }
 0x4ca   : > { %2692 = vrot.lane.b32.xlu1 %v2658_v18, %s9603_s6 }
 0x4cb   : > { %3765 = vadd.xlane.f32.xlu0 %v11326_v3  ;;  %2688 = vrot.lane.b32.xlu2 %v2656_v31, %s9603_s6 }
 0x4ce   : > { %v9148_v45 = vpop.eup %9147 }
 0x4cf   : > { %v3752_v58 = vpop.xlane.xlu2 %3751  ;;  %v3792_v53 = vmul.f32 %v9148_v45, %v11192_v2  ;;  %v11333_v62 = vpop.xlane.xlu1 %4824  ;;  %v3291_v45 = vpack.c.bf16 %v11315_v19, %v11315_v19 }
 0x4d0   : > { %v11335_v54 = vpop.eup %9149  ;;  %9151 = vrcp.f32 %v3752_v58  ;;  %v11344_v13 = vpop.f32.mrf.mxu3 }
 0x4d1   : > { %v3256_v30 = vpop.f32.mrf.mxu1  ;;  %v3806_v55 = vpack.c.bf16 %v3792_v53, %v3791_v41  ;;  %9153 = vrcp.f32 %v3750_v9  ;;  %v4850_v41 = vsub.f32 %v11155_v38, %v11295_v4  ;;  %v8738_v4 = vld [vmem:[#allocation2 + $0x88] sm:$0xf0] }
 0x4d2   : > { %v3293_v42 = vpack.c.bf16 %v3256_v30, %v3256_v30 }
 0x4d3   : > { %3769 = vadd.xlane.f32.xlu0 %v11335_v54  ;;  %3325 = vrot.lane.b32.xlu2 %v3292_v17, %s9602_s26 }
 0x4d4   : > { %3327 = vrot.lane.b32.xlu1 %v3293_v42, %s9602_s26  ;;  %3890 = vmatmul.bf16.gmra.mxu3 %v3806_v55  ;;  %v4866_v42 = vmul.f32 1.442695, %v4850_v41 }
 0x4d6   : > { %v9152_v20 = vpop.eup %9151 }
 0x4d7   : > { %v11340_v2 = vpop.xlane.xlu2 %4828  ;;  %v9154_v16 = vpop.eup %9153  ;;  %v3794_v0 = vmul.f32 %v9152_v20, %v11199_v14  ;;  %v4851_v14 = vsub.f32 %v11151_v5, %v11293_v23  ;;  %v2657_v5 = vpack.c.bf16 %v11313_v48, %v11313_v48  ;;  %v8076_v23 = vld [vmem:[#allocation2 + $0x74] sm:$0xf] }
 0x4d8   : > { %v11342_v52 = vpop.xlane.xlu1 %4826  ;;  %v3793_v40 = vmul.f32 %v9154_v16, %v11166_v6  ;;  %v3756_v60 = vpop.xlane.xlu0 %3755  ;;  %v8077_v20 = vor.u32 %v8738_v4, %v8076_v23 }
 0x4d9   : > { %v2626_v50 = vpop.f32.mrf.mxu3  ;;  %v3258_v18 = vpop.f32.mrf.mxu1  ;;  %v4868_v30 = vmul.f32 1.442695, %v4851_v14 }
 0x4da   : > { %v3807_v1 = vpack.c.bf16 %v3794_v0, %v3793_v40  ;;  %v4223_v48 = vpop.f32.mrf.mxu0  ;;  %v3294_v40 = vpack.c.bf16 %v3258_v18, %v3258_v18 }
 0x4db   : > { %4832 = vmax.xlane.f32.xlu0 %v11348_v15  ;;  %v11380_v0 = vsel %vm10379_vm7, %v4223_v48, -1e+30  ;;  %v8750_v48 = vld [vmem:[#allocation2 + $0x138] sm:$0xf0]  ;;  %vm12781_vm7 = vcmask 261120  }
 0x4df   : > { %v5021_v51 = vpop.permute.xlu2 %5020 }
 0x4e0   : > { %5036 = vmatpush.bf16.msrb.mxu3 %v5021_v51  ;;  %v3754_v46 = vpop.xlane.xlu1 %3753 }
 0x4e1   : > { %9155 = vrcp.f32 %v3754_v46  ;;  %v2628_v6 = vpop.f32.mrf.mxu3  ;;  %v11362_v53 = vpop.f32.mrf.mxu1 }
 0x4e2   : > { %9157 = vrcp.f32 %v3756_v60  ;;  %v4225_v60 = vpop.f32.mrf.mxu0  ;;  %v2661_v18 = vpack.c.bf16 %v2628_v6, %v2628_v6  ;;  %v2659_v6 = vpack.c.bf16 %v11344_v13, %v11344_v13 }
 0x4e3   : > { %9159 = vpow2.f32 %v4868_v30 }
 0x4e4   : > { %3895 = vmatmul.bf16.gmra.mxu3 %v3807_v1  ;;  %9161 = vpow2.f32 %v4866_v42 }
 0x4e7   : > { %v9156_v31 = vpop.eup %9155 }
 0x4e8   : > { %v9158_v12 = vpop.eup %9157  ;;  %v3795_v58 = vmul.f32 %v9156_v31, %v11228_v11  ;;  %v3758_v46 = vpop.xlane.xlu1 %3757  ;;  %v11386_v31 = vsel %vm10402_vm8, %v4225_v60, -1e+30 }
 0x4e9   : > { %v3796_v17 = vmul.f32 %v9158_v12, %v11211_v59  ;;  %v3263_v38 = vpop.f32.mrf.mxu1  ;;  %v11370_v19 = vpop.eup %9159  ;;  %9163 = vrcp.f32 %v3758_v46 }
 0x4ea   : > { %v11374_v25 = vpop.eup %9161 }
 0x4eb   : > { %v5278_v63 = vpop.permute.xlu0 %5277  ;;  %v3808_v55 = vpack.c.bf16 %v3796_v17, %v3795_v58 }
 0x4ec   : > { %8167 = vmatmul.msk.bf16.gmra.mxu0 %vm12590_vm0, %v5278_v63  ;;  %v2660_v63 = vpack.c.bf16 %v2626_v50, %v2626_v50 }
 0x4ef   : > { %3323 = vrot.lane.b32.xlu0 %v3291_v45, %s9602_s26  ;;  %v9164_v13 = vpop.eup %9163 }
 0x4f0   : > { %v11393_v45 = vpop.xlane.xlu1 %4274 }
 0x4f1   : > { %v3266_v51 = vpop.f32.mrf.mxu1 }
 0x4f2   : > { %v3297_v58 = vpack.c.bf16 %v3266_v51, %v3266_v51  ;;  %v8124_v51 = vld [vmem:[#allocation2 + $0x124] sm:$0xf] }
 0x4f3   : > { %v5019_v9 = vpop.permute.xlu0 %5018 }
 0x4f4   : > { %3900 = vmatmul.bf16.gmra.mxu3 %v3808_v55  ;;  %v3296_v55 = vpack.c.bf16 %v3263_v38, %v3263_v38 }
 0x4f5   : > { %5037 = vmatpush.bf16.msrb.mxu3 %v5019_v9 }
 0x4f6   : > { %v11367_v11 = vpop.f32.mrf.mxu3 }
 0x4f7   : > { %2690 = vrot.lane.b32.xlu0 %v2657_v5, %s9603_s6 }
 0x4f9   : > { %v11389_v12 = vpop.f32.mrf.mxu1 }
 0x4fb   : > { %v5914_v59 = vpop.permute.xlu0 %5913 }
 0x4fc   : > { %8272 = vmatmul.msk.bf16.gmra.mxu2 %vm12590_vm0, %v5914_v59  ;;  %4900 = vadd.xlane.f32.xlu2 %v11370_v19  ;;  %vm12593_vm0 = vcmask 781824  }
 0x4fe   : > { %4898 = vadd.xlane.f32.xlu1 %v11374_v25  ;;  %v2633_v16 = vpop.f32.mrf.mxu3 }
 0x4ff   : > { %5014 = vrot.lane.b32.xlu0 %v8077_v20, %s9601_s21  ;;  %v2663_v50 = vpack.c.bf16 %v2633_v16, %v2633_v16 }
 0x501   : > { %v3271_v30 = vpop.f32.mrf.mxu1 }
 0x504   : > { %4276 = vmax.xlane.f32.xlu2 %v11380_v0 }
 0x506   : > { %v2636_v1 = vpop.f32.mrf.mxu3 }
 0x507   : > { %3329 = vrot.lane.b32.xlu0 %v3294_v40, %s9602_s26  ;;  %v2664_v4 = vpack.c.bf16 %v2636_v1, %v2636_v1  ;;  %v8125_v40 = vor.u32 %v8750_v48, %v8124_v51  ;;  %v3299_v1 = vpack.c.bf16 %v3271_v30, %v3271_v30 }
 0x508   : > { %v11396_v17 = vpop.xlane.xlu1 %3767 }
 0x509   : > { %v3273_v23 = vpop.f32.mrf.mxu1 }
 0x50a   : > { %v3300_v59 = vpack.c.bf16 %v3273_v23, %v3273_v23 }
 0x50c   : > { %4278 = vmax.xlane.f32.xlu2 %v11386_v31 }
 0x50e   : > { %v11391_v14 = vpop.f32.mrf.mxu3 }
 0x50f   : > { %2696 = vrot.lane.b32.xlu0 %v2660_v63, %s9603_s6 }
 0x516   : > { %v2641_v41 = vpop.f32.mrf.mxu3 }
 0x517   : > { %3335 = vrot.lane.b32.xlu0 %v3297_v58, %s9602_s26  ;;  %2698 = vrot.lane.b32.xlu1 %v2661_v18, %s9603_s6  ;;  %v2666_v60 = vpack.c.bf16 %v2641_v41, %v2641_v41  ;;  %v3797_v58 = vmul.f32 %v9164_v13, %v11238_v56 }
 0x518   : > { %v11400_v42 = vpop.xlane.xlu2 %4830 }
 0x51e   : > { %v2643_v9 = vpop.f32.mrf.mxu3 }
 0x51f   : > { %2702 = vrot.lane.b32.xlu0 %v2663_v50, %s9603_s6  ;;  %3333 = vrot.lane.b32.xlu1 %v3296_v55, %s9602_s26  ;;  %v3276_v50 = vpop.f32.mrf.mxu1  ;;  %v2667_v41 = vpack.c.bf16 %v2643_v9, %v2643_v9 }
 0x520   : > { %v5017_v5 = vpop.permute.xlu1 %5016 }
 0x521   : > { %5038 = vmatpush.bf16.msrb.mxu3 %v5017_v5 }
 0x524   : > { %2694 = vrot.lane.b32.xlu2 %v2659_v6, %s9603_s6  ;;  %v3295_v6 = vpack.c.bf16 %v11362_v53, %v11362_v53 }
 0x526   : > { %v3760_v38 = vpop.xlane.xlu0 %3759  ;;  %v11407_v20 = vpop.xlane.xlu2 %3771 }
 0x527   : > { %9165 = vrcp.f32 %v3760_v38  ;;  %3341 = vrot.lane.b32.xlu0 %v3300_v59, %s9602_s26  ;;  %2704 = vrot.lane.b32.xlu1 %v2664_v4, %s9603_s6  ;;  %v11411_v16 = vpop.f32.mrf.mxu3  ;;  %v3278_v4 = vpop.f32.mrf.mxu1 }
 0x528   : > { %v3302_v48 = vpack.c.bf16 %v3278_v4, %v3278_v4 }
 0x52c   : > { %5279 = vrot.lane.b32.xlu2 %v8125_v40, %s9602_s26 }
 0x52d   : > { %v9166_v46 = vpop.eup %9165 }
 0x52e   : > { %v3762_v63 = vpop.xlane.xlu0 %3761  ;;  %v2689_v18 = vpop.permute.xlu2 %2688  ;;  %v3798_v55 = vmul.f32 %v9166_v46, %v11300_v43  ;;  %v2662_v43 = vpack.c.bf16 %v11367_v11, %v11367_v11  ;;  %v3298_v11 = vpack.c.bf16 %v11389_v12, %v11389_v12 }
 0x52f   : > { %2737 = vst.msk [vmem:[#allocation3] sm:$0xf] %vm12594_vm15, %v2689_v18  ;;  %2708 = vrot.lane.b32.xlu0 %v2666_v60, %s9603_s6  ;;  %3339 = vrot.lane.b32.xlu1 %v3299_v1, %s9602_s26  ;;  %v2648_v23 = vpop.f32.mrf.mxu3  ;;  %9167 = vrcp.f32 %v3762_v63 }
 0x530   : > { %v3809_v5 = vpack.c.bf16 %v3798_v55, %v3797_v58  ;;  %v2669_v56 = vpack.c.bf16 %v2648_v23, %v2648_v23  ;;  %v12778_v58 = vld [vmem:[#allocation32_spill] sm:$0xff]  ;;  %v12779_v55 = vld [vmem:[#allocation45_spill] sm:$0xff] }
 0x532   : > { %3905 = vmatmul.bf16.gmra.mxu3 %v3809_v5  ;;  %v4296_v5 = vsub.f32 %v12779_v55, %v12778_v58 }
 0x534   : > { %3331 = vrot.lane.b32.xlu2 %v3295_v6, %s9602_s26  ;;  %v3281_v6 = vpop.f32.mrf.mxu1 }
 0x535   : > { %v9168_v59 = vpop.eup %9167 }
 0x536   : > { %v3764_v30 = vpop.xlane.xlu0 %3763  ;;  %v3799_v9 = vmul.f32 %v9168_v59, %v11308_v39 }
 0x537   : > { %9169 = vrcp.f32 %v3764_v30  ;;  %2714 = vrot.lane.b32.xlu0 %v2669_v56, %s9603_s6  ;;  %2710 = vrot.lane.b32.xlu1 %v2667_v41, %s9603_s6  ;;  %v2668_v56 = vpack.c.bf16 %v11411_v16, %v11411_v16 }
 0x53c   : > { %v2693_v38 = vpop.permute.xlu1 %2692  ;;  %2700 = vrot.lane.b32.xlu2 %v2662_v43, %s9603_s6 }
 0x53d   : > { %v9170_v53 = vpop.eup %9169  ;;  %2739 = vst.msk [vmem:[#allocation3 + $0x10] sm:$0xf] %vm12594_vm15, %v2693_v38 }
 0x53e   : > { %v3800_v51 = vmul.f32 %v9170_v53, %v11321_v32  ;;  %v3766_v40 = vpop.xlane.xlu0 %3765  ;;  %v2665_v32 = vpack.c.bf16 %v11391_v14, %v11391_v14  ;;  %v4312_v14 = vmul.f32 1.442695, %v4296_v5 }
 0x53f   : > { %3345 = vrot.lane.b32.xlu1 %v3302_v48, %s9602_s26  ;;  %9171 = vrcp.f32 %v3766_v40  ;;  %v3326_v48 = vpop.permute.xlu2 %3325 }
 0x540   : > { %v3810_v13 = vpack.c.bf16 %v3800_v51, %v3799_v9  ;;  %9173 = vrcp.f32 %v11396_v17  ;;  %v3301_v17 = vpack.c.bf16 %v3276_v50, %v3276_v50  ;;  %v3283_v50 = vpop.f32.mrf.mxu1  ;;  %v8068_v9 = vld [vmem:[#allocation2 + $0x14] sm:$0xf] }
 0x541   : > { %v3304_v5 = vpack.c.bf16 %v3283_v50, %v3283_v50  ;;  %v8072_v50 = vld [vmem:[#allocation2 + $0x44] sm:$0xf] }
 0x542   : > { %3910 = vmatmul.bf16.gmra.mxu3 %v3810_v13 }
 0x544   : > { %3337 = vrot.lane.b32.xlu2 %v3298_v11, %s9602_s26  ;;  %v8775_v11 = vld [vmem:[#allocation2 + $0x168] sm:$0xf0] }
 0x545   : > { %v9172_v39 = vpop.eup %9171 }
 0x546   : > { %v3328_v46 = vpop.permute.xlu1 %3327  ;;  %v9174_v1 = vpop.eup %9173  ;;  %v3801_v60 = vmul.f32 %v9172_v39, %v11326_v3  ;;  %v8232_v39 = vld [vmem:[#allocation2 + $0x154] sm:$0xf] }
 0x547   : > { %3374 = vst.msk [vmem:[#allocation3 + $0x10] sm:$0xf] %vm12593_vm0, %v3328_v46  ;;  %v3802_v12 = vmul.f32 %v9174_v1, %v11269_v44  ;;  %v3770_v63 = vpop.xlane.xlu0 %3769  ;;  %v12780_v44 = vld [vmem:[#allocation15_spill] sm:$0xff]  ;;  %v8233_v1 = vor.u32 %v8775_v11, %v8232_v39 }
 0x548   : > { %9175 = vrcp.f32 %v3770_v63  ;;  %v4297_v3 = vsub.f32 %v12780_v44, %v11128_v34  ;;  %v3303_v34 = vpack.c.bf16 %v3281_v6, %v3281_v6  ;;  %v3286_v16 = vpop.f32.mrf.mxu1 }
 0x549   : > { %v3811_v18 = vpack.c.bf16 %v3802_v12, %v3801_v60  ;;  %9177 = vrcp.f32 %v11407_v20  ;;  %v2651_v12 = vpop.f32.mrf.mxu3 }
 0x54a   : > { %9179 = vpow2.f32 %v4312_v14  ;;  %v4314_v4 = vmul.f32 1.442695, %v4297_v3  ;;  %v2670_v44 = vpack.c.bf16 %v2651_v12, %v2651_v12 }
 0x54c   : > { %2706 = vrot.lane.b32.xlu2 %v2665_v32, %s9603_s6  ;;  %9181 = vpow2.f32 %v4314_v4 }
 0x54e   : > { %v9176_v23 = vpop.eup %9175 }
 0x54f   : > { %v11445_v41 = vpop.xlane.xlu0 %4832  ;;  %v9178_v30 = vpop.eup %9177  ;;  %v3803_v43 = vmul.f32 %v9176_v23, %v11335_v54  ;;  %v8736_v54 = vld [vmem:[#allocation2 + $0x28] sm:$0xf0] }
 0x550   : > { %v3804_v20 = vmul.f32 %v9178_v30, %v11302_v8  ;;  %v11454_v59 = vpop.eup %9179  ;;  %v8069_v40 = vor.u32 %v8736_v54, %v8068_v9  ;;  %v3288_v46 = vpop.f32.mrf.mxu1 }
 0x551   : > { %v3306_v60 = vpack.c.bf16 %v3288_v46, %v3288_v46  ;;  %v2653_v55 = vpop.f32.mrf.mxu3 }
 0x552   : > { %3915 = vmatmul.bf16.gmra.mxu3 %v3811_v18  ;;  %v3812_v38 = vpack.c.bf16 %v3804_v20, %v3803_v43  ;;  %v11459_v51 = vpop.eup %9181  ;;  %v3305_v18 = vpack.c.bf16 %v3286_v16, %v3286_v16  ;;  %v2671_v14 = vpack.c.bf16 %v2653_v55, %v2653_v55  ;;  %v8737_v43 = vld [vmem:[#allocation2 + $0x58] sm:$0xf0]  ;;  %v4853_v16 = vsub.f32 %v11203_v49, %v11333_v62 }
 0x553   : > { %v8073_v20 = vor.u32 %v8737_v43, %v8072_v50 }
 0x554   : > { %3343 = vrot.lane.b32.xlu2 %v3301_v17, %s9602_s26 }
 0x559   : > { %v11800_v37 = vpop.f32.mrf.mxu3 }
 0x55c   : > { %2712 = vrot.lane.b32.xlu2 %v2668_v56, %s9603_s6 }
 0x561   : > { %4344 = vadd.xlane.f32.xlu0 %v11454_v59  ;;  %v3324_v53 = vpop.permute.xlu0 %3323 }
 0x562   : > { %3372 = vst.msk [vmem:[#allocation3] sm:$0xf] %vm12593_vm0, %v3324_v53  ;;  %3920 = vmatmul.bf16.gmra.mxu3 %v3812_v38  ;;  %v4782_v38 = vpop.f32.mrf.mxu2 }
 0x564   : > { %3347 = vrot.lane.b32.xlu2 %v3303_v34, %s9602_s26 }
 0x569   : > { %4346 = vadd.xlane.f32.xlu1 %v11459_v51  ;;  %v2691_v8 = vpop.permute.xlu0 %2690 }
 0x56a   : > { %2738 = vst.msk [vmem:[#allocation3 + $0x8] sm:$0xf] %vm12594_vm15, %v2691_v8  ;;  %v4784_v8 = vpop.f32.mrf.mxu2 }
 0x56b   : > { %3373 = vst.msk [vmem:[#allocation3 + $0x8] sm:$0xf] %vm12593_vm0, %v3326_v48  ;;  %v11493_v46 = vsel %vm10437_vm10, %v4784_v8, -1e+30 }
 0x56c   : > { %5010 = vrot.lane.b32.xlu2 %v8069_v40, %s9601_s21  ;;  %v4872_v40 = vmul.f32 1.442695, %v4853_v16 }
 0x56e   : > { %9183 = vpow2.f32 %v4872_v40 }
 0x56f   : > { %v11465_v13 = vpop.xlane.xlu2 %4900 }
 0x571   : > { %v5015_v32 = vpop.permute.xlu0 %5014  ;;  %v11474_v6 = vpop.xlane.xlu1 %4898 }
 0x572   : > { %5039 = vmatpush.bf16.msrb.mxu3 %v5015_v32 }
 0x574   : > { %5915 = vrot.lane.b32.xlu2 %v8233_v1, %s9603_s6  ;;  %v11500_v32 = vpop.eup %9183  ;;  %v12783_v1 = vld [vmem:[#allocation17_spill] sm:$0xff] }
 0x575   : > { %3353 = vrot.lane.b32.xlu0 %v3306_v60, %s9602_s26  ;;  %v4298_v60 = vsub.f32 %v12783_v1, %v11160_v22  ;;  %v4852_v22 = vsub.f32 %v11179_v61, %v11317_v36  ;;  %v12785_v36 = vld [vmem:[#allocation21_spill] sm:$0xff]  ;;  %v8128_v1 = vld [vmem:[#allocation2 + $0x154] sm:$0xf] }
 0x576   : > { %v4299_v43 = vsub.f32 %v12785_v36, %v11183_v21  ;;  %v12786_v21 = vld [vmem:[#allocation57_spill] sm:$0xff] }
 0x577   : > { %v11469_v63 = vpop.xlane.xlu2 %4276  ;;  %v4316_v55 = vmul.f32 1.442695, %v4298_v60 }
 0x579   : > { %v3330_v58 = vpop.permute.xlu0 %3329  ;;  %9185 = vpow2.f32 %v4316_v55 }
 0x57c   : > { %3351 = vrot.lane.b32.xlu2 %v3305_v18, %s9602_s26  ;;  %v4228_v18 = vpop.f32.mrf.mxu0 }
 0x57f   : > { %v11472_v17 = vpop.xlane.xlu2 %4278  ;;  %v11523_v61 = vpop.eup %9185 }
 0x581   : > { %v2697_v23 = vpop.permute.xlu0 %2696 }
 0x582   : > { %3349 = vrot.lane.b32.xlu1 %v3304_v5, %s9602_s26  ;;  %2741 = vst.msk [vmem:[#allocation3 + $0x20] sm:$0xf] %vm12594_vm15, %v2697_v23  ;;  %v11510_v23 = vsel %vm10417_vm9, %v4782_v38, -1e+30 }
 0x584   : > { %2718 = vrot.lane.b32.xlu2 %v2671_v14, %s9603_s6  ;;  %v4230_v50 = vpop.f32.mrf.mxu0 }
 0x587   : > { %v2695_v3 = vpop.permute.xlu2 %2694 }
 0x588   : > { %2740 = vst.msk [vmem:[#allocation3 + $0x18] sm:$0xf] %vm12594_vm15, %v2695_v3 }
 0x589   : > { %v2699_v56 = vpop.permute.xlu1 %2698  ;;  %3375 = vst.msk [vmem:[#allocation3 + $0x18] sm:$0xf] %vm12593_vm0, %v3330_v58  ;;  %v3336_v30 = vpop.permute.xlu0 %3335 }
 0x58a   : > { %2716 = vrot.lane.b32.xlu1 %v2670_v44, %s9603_s6  ;;  %2742 = vst.msk [vmem:[#allocation3 + $0x28] sm:$0xf] %vm12594_vm15, %v2699_v56  ;;  %v11517_v44 = vsel %vm10417_vm9, %v4228_v18, -1e+30  ;;  %v4870_v56 = vmul.f32 1.442695, %v4852_v22 }
 0x58c   : > { %9187 = vpow2.f32 %v4870_v56 }
 0x58f   : > { %v5280_v4 = vpop.permute.xlu2 %5279 }
 0x590   : > { %8168 = vmatmul.msk.bf16.gmra.mxu0 %vm12781_vm7, %v5280_v4  ;;  %v4855_v4 = vsub.f32 %v11215_v47, %v11340_v2  ;;  %vm12787_vm7 = vnez %v12786_v21  ;;  %v4233_v47 = vpop.f32.mrf.mxu0 }
 0x591   : > { %v3334_v53 = vpop.permute.xlu1 %3333  ;;  %v2703_v34 = vpop.permute.xlu0 %2702 }
 0x592   : > { %3377 = vst.msk [vmem:[#allocation3 + $0x28] sm:$0xf] %vm12593_vm0, %v3334_v53  ;;  %5012 = vrot.lane.b32.xlu1 %v8073_v20, %s9601_s21  ;;  %v11532_v20 = vsel %vm10437_vm10, %v4230_v50, -1e+30  ;;  %v4318_v53 = vmul.f32 1.442695, %v4299_v43 }
 0x593   : > { %2744 = vst.msk [vmem:[#allocation3 + $0x38] sm:$0xf] %vm12594_vm15, %v2703_v34  ;;  %v4787_v34 = vpop.f32.mrf.mxu2  ;;  %v4876_v16 = vmul.f32 1.442695, %v4855_v4 }
 0x594   : > { %9189 = vpow2.f32 %v4318_v53 }
 0x595   : > { %9191 = vpow2.f32 %v4876_v16 }
 0x597   : > { %v3332_v48 = vpop.permute.xlu2 %3331 }
 0x598   : > { %3376 = vst.msk [vmem:[#allocation3 + $0x20] sm:$0xf] %vm12593_vm0, %v3332_v48  ;;  %v11536_v48 = vpop.eup %9187  ;;  %v4235_v60 = vpop.f32.mrf.mxu0 }
 0x599   : > { %v2705_v9 = vpop.permute.xlu1 %2704  ;;  %v3342_v54 = vpop.permute.xlu0 %3341 }
 0x59a   : > { %2745 = vst.msk [vmem:[#allocation3 + $0x40] sm:$0xf] %vm12594_vm15, %v2705_v9  ;;  %v11540_v9 = vsel %vm12787_vm7, %v4787_v34, -1e+30 }
 0x59b   : > { %v4789_v40 = vpop.f32.mrf.mxu2 }
 0x59c   : > { %v11557_v55 = vsel %vm12737_vm11, %v4789_v40, -1e+30 }
 0x59f   : > { %4836 = vmax.xlane.f32.xlu0 %v11493_v46  ;;  %v2701_v39 = vpop.permute.xlu2 %2700 }
 0x5a0   : > { %2743 = vst.msk [vmem:[#allocation3 + $0x30] sm:$0xf] %vm12594_vm15, %v2701_v39  ;;  %v4301_v39 = vsub.f32 %v11248_v57, %v11393_v45  ;;  %v12789_v57 = vld [vmem:[#allocation16_spill] sm:$0xff] }
 0x5a1   : > { %v3340_v49 = vpop.permute.xlu1 %3339  ;;  %3378 = vst.msk [vmem:[#allocation3 + $0x30] sm:$0xf] %vm12593_vm0, %v3336_v30  ;;  %v2709_v62 = vpop.permute.xlu0 %2708  ;;  %v4300_v45 = vsub.f32 %v12789_v57, %v11186_v26  ;;  %v4857_v26 = vsub.f32 %v11348_v15, %v11445_v41 }
 0x5a2   : > { %3380 = vst.msk [vmem:[#allocation3 + $0x40] sm:$0xf] %vm12593_vm0, %v3340_v49  ;;  %v8751_v49 = vld [vmem:[#allocation2 + $0x168] sm:$0xf0]  ;;  %v4322_v18 = vmul.f32 1.442695, %v4301_v39  ;;  %v4238_v15 = vpop.f32.mrf.mxu0 }
 0x5a3   : > { %2747 = vst.msk [vmem:[#allocation3 + $0x50] sm:$0xf] %vm12594_vm15, %v2709_v62  ;;  %v4792_v22 = vpop.f32.mrf.mxu2  ;;  %v4320_v56 = vmul.f32 1.442695, %v4300_v45 }
 0x5a4   : > { %9193 = vpow2.f32 %v4322_v18 }
 0x5a5   : > { %9195 = vpow2.f32 %v4320_v56 }
 0x5a7   : > { %4904 = vadd.xlane.f32.xlu0 %v11500_v32  ;;  %v3338_v12 = vpop.permute.xlu2 %3337 }
 0x5a8   : > { %3379 = vst.msk [vmem:[#allocation3 + $0x38] sm:$0xf] %vm12593_vm0, %v3338_v12  ;;  %v8129_v12 = vor.u32 %v8751_v49, %v8128_v1  ;;  %v11592_v1 = vsel %vm12704_vm12, %v4792_v22, -1e+30 }
 0x5a9   : > { %v2711_v58 = vpop.permute.xlu1 %2710  ;;  %v2715_v5 = vpop.permute.xlu0 %2714 }
 0x5aa   : > { %2748 = vst.msk [vmem:[#allocation3 + $0x58] sm:$0xf] %vm12594_vm15, %v2711_v58  ;;  %v4240_v45 = vpop.f32.mrf.mxu0 }
 0x5ab   : > { %2750 = vst.msk [vmem:[#allocation3 + $0x68] sm:$0xf] %vm12594_vm15, %v2715_v5  ;;  %v11562_v5 = vsel %vm12737_vm11, %v4235_v60, -1e+30  ;;  %v4794_v4 = vpop.f32.mrf.mxu2 }
 0x5ad   : > { %4834 = vmax.xlane.f32.xlu2 %v11510_v23 }
 0x5af   : > { %4280 = vmax.xlane.f32.xlu0 %v11517_v44  ;;  %v2707_v3 = vpop.permute.xlu2 %2706 }
 0x5b0   : > { %2746 = vst.msk [vmem:[#allocation3 + $0x48] sm:$0xf] %vm12594_vm15, %v2707_v3 }
 0x5b1   : > { %v3346_v30 = vpop.permute.xlu1 %3345  ;;  %3381 = vst.msk [vmem:[#allocation3 + $0x48] sm:$0xf] %vm12593_vm0, %v3342_v54  ;;  %v11545_v54 = vpop.eup %9189 }
 0x5b2   : > { %3383 = vst.msk [vmem:[#allocation3 + $0x58] sm:$0xf] %vm12593_vm0, %v3346_v30  ;;  %v11547_v8 = vpop.eup %9191  ;;  %v11571_v30 = vsel %vm12787_vm7, %v4233_v47, -1e+30  ;;  %v11585_v47 = vsel %vm10517_vm14, %v4794_v4, -1e+30 }
 0x5b3   : > { %v11573_v50 = vpop.eup %9193  ;;  %v11618_v4 = vsel %vm12704_vm12, %v4238_v15, -1e+30  ;;  %vm12797_vm12 = vcmask 519424  }
 0x5b4   : > { %v11580_v53 = vpop.eup %9195 }
 0x5b5   : > { %4348 = vadd.xlane.f32.xlu2 %v11523_v61 }
 0x5b7   : > { %4282 = vmax.xlane.f32.xlu0 %v11532_v20  ;;  %v3344_v38 = vpop.permute.xlu2 %3343 }
 0x5b8   : > { %3382 = vst.msk [vmem:[#allocation3 + $0x50] sm:$0xf] %vm12593_vm0, %v3344_v38  ;;  %v4880_v38 = vmul.f32 1.442695, %v4857_v26  ;;  %v4797_v26 = vpop.f32.mrf.mxu2 }
 0x5bc   : > { %4902 = vadd.xlane.f32.xlu1 %v11536_v48 }
 0x5bd   : > { %4838 = vmax.xlane.f32.xlu2 %v11540_v9 }
 0x5bf   : > { %v2713_v2 = vpop.permute.xlu2 %2712 }
 0x5c0   : > { %2749 = vst.msk [vmem:[#allocation3 + $0x60] sm:$0xf] %vm12594_vm15, %v2713_v2  ;;  %v4856_v2 = vsub.f32 %v11284_v10, %v11400_v42  ;;  %v4854_v10 = vsub.f32 %v11219_v24, %v11342_v52  ;;  %v4303_v24 = vsub.f32 %v11386_v31, %v11472_v17  ;;  %v4302_v52 = vsub.f32 %v11380_v0, %v11469_v63  ;;  %v4799_v15 = vpop.f32.mrf.mxu2 }
 0x5c2   : > { %v4878_v39 = vmul.f32 1.442695, %v4856_v2  ;;  %v4874_v56 = vmul.f32 1.442695, %v4854_v10 }
 0x5c4   : > { %4350 = vadd.xlane.f32.xlu1 %v11545_v54 }
 0x5c5   : > { %4908 = vadd.xlane.f32.xlu2 %v11547_v8 }
 0x5c7   : > { %v3348_v62 = vpop.permute.xlu2 %3347 }
 0x5c8   : > { %3384 = vst.msk [vmem:[#allocation3 + $0x60] sm:$0xf] %vm12593_vm0, %v3348_v62  ;;  %vm12790_vm0 = vcmask 261120   ;;  %v12792_v62 = vld [vmem:[#allocation59_spill] sm:$0xff] }
 0x5cb   : > { %5281 = vrot.lane.b32.xlu0 %v8129_v12, %s9602_s26 }
 0x5cc   : > { %4840 = vmax.xlane.f32.xlu1 %v11557_v55 }
 0x5cd   : > { %4286 = vmax.xlane.f32.xlu2 %v11562_v5 }
 0x5cf   : > { %v11567_v3 = vpop.permute.xlu2 %5010 }
 0x5d4   : > { %4284 = vmax.xlane.f32.xlu1 %v11571_v30  ;;  %v4345_v36 = vpop.xlane.xlu0 %4344 }
 0x5d5   : > { %4354 = vadd.xlane.f32.xlu2 %v11573_v50  ;;  %9197 = vrcp.f32 %v4345_v36  ;;  %v4326_v36 = vmul.f32 1.442695, %v4303_v24 }
 0x5d7   : > { %v5916_v43 = vpop.permute.xlu2 %5915 }
 0x5d8   : > { %8273 = vmatmul.msk.bf16.gmra.mxu2 %vm12790_vm0, %v5916_v43  ;;  %vm12793_vm0 = vcmask 781824   ;;  %v4324_v43 = vmul.f32 1.442695, %v4302_v52 }
 0x5db   : > { %v9198_v40 = vpop.eup %9197 }
 0x5dc   : > { %v4347_v34 = vpop.xlane.xlu1 %4346  ;;  %4352 = vadd.xlane.f32.xlu1 %v11580_v53  ;;  %v4392_v12 = vmul.f32 %v9198_v40, %v11454_v59 }
 0x5dd   : > { %9199 = vrcp.f32 %v4347_v34  ;;  %4844 = vmax.xlane.f32.xlu2 %v11585_v47  ;;  %v12794_v34 = vld [vmem:[#allocation39_spill] sm:$0xff] }
 0x5de   : > { %9201 = vpow2.f32 %v4880_v38 }
 0x5df   : > { %v3352_v41 = vpop.permute.xlu2 %3351  ;;  %9203 = vpow2.f32 %v4878_v39 }
 0x5e0   : > { %9205 = vpow2.f32 %v4874_v56 }
 0x5e1   : > { %9207 = vpow2.f32 %v4326_v36  ;;  %v6030_v36 = vpop.f32.mrf.mxu2 }
 0x5e2   : > { %9209 = vpow2.f32 %v4324_v43 }
 0x5e3   : > { %v9200_v49 = vpop.eup %9199  ;;  %9211 = vrcp.f32 %v11465_v13 }
 0x5e4   : > { %v11594_v60 = vpop.eup %9201  ;;  %v4393_v18 = vmul.f32 %v9200_v49, %v11459_v51  ;;  %4842 = vmax.xlane.f32.xlu1 %v11592_v1  ;;  %v11609_v51 = vsel %vm10517_vm14, %v4240_v45, -1e+30  ;;  %9213 = vrcp.f32 %v11474_v6 }
 0x5e5   : > { %4912 = vadd.xlane.f32.xlu2 %v11594_v60  ;;  %v11604_v59 = vpop.eup %9203 }
 0x5e6   : > { %v4408_v42 = vpack.c.bf16 %v4393_v18, %v4392_v12  ;;  %v11620_v38 = vpop.eup %9205  ;;  %v11642_v12 = vsel %vm10549_vm13, %v4799_v15, -1e+30  ;;  %v4243_v18 = vpop.f32.mrf.mxu0 }
 0x5e7   : > { %v2719_v57 = vpop.permute.xlu2 %2718  ;;  %v3354_v22 = vpop.permute.xlu0 %3353 }
 0x5e8   : > { %4472 = vmatmul.bf16.vlgmr.msrb.gmra.mxu1 %v4408_v42  ;;  %2752 = vst.msk [vmem:[#allocation3 + $0x78] sm:$0xf] %vm12594_vm15, %v2719_v57  ;;  %vm12796_vm15 = vcmask 781824   ;;  %v11630_v0 = vpop.eup %9207 }
 0x5e9   : > { %3387 = vst.msk [vmem:[#allocation3 + $0x78] sm:$0xf] %vm12793_vm0, %v3354_v22  ;;  %vm12795_vm0 = vnez %v12794_v34  ;;  %v11632_v63 = vpop.eup %9209 }
 0x5ea   : > { %v11624_v2 = vsel %vm12795_vm0, %v4797_v26, -1e+30  ;;  %v9212_v40 = vpop.eup %9211 }
 0x5eb   : > { %v9214_v39 = vpop.eup %9213  ;;  %v4947_v13 = vmul.f32 %v9212_v40, %v11370_v19 }
 0x5ec   : > { %4910 = vadd.xlane.f32.xlu1 %v11604_v59  ;;  %v4946_v6 = vmul.f32 %v9214_v39, %v11374_v25 }
 0x5ed   : > { %4290 = vmax.xlane.f32.xlu2 %v11609_v51 }
 0x5ee   : > { %v4962_v10 = vpack.c.bf16 %v4947_v13, %v4946_v6  ;;  %v6032_v13 = vpop.f32.mrf.mxu2 }
 0x5f4   : > { %v3350_v31 = vpop.permute.xlu1 %3349  ;;  %4288 = vmax.xlane.f32.xlu1 %v11618_v4 }
 0x5f5   : > { %3385 = vst.msk [vmem:[#allocation3 + $0x68] sm:$0xf] %vm12796_vm15, %v3350_v31  ;;  %4906 = vadd.xlane.f32.xlu0 %v11620_v38  ;;  %4846 = vmax.xlane.f32.xlu2 %v11624_v2 }
 0x5fc   : > { %4358 = vadd.xlane.f32.xlu1 %v11630_v0  ;;  %v2717_v17 = vpop.permute.xlu1 %2716 }
 0x5fd   : > { %2751 = vst.msk [vmem:[#allocation3 + $0x70] sm:$0xf] %vm12797_vm12, %v2717_v17  ;;  %4356 = vadd.xlane.f32.xlu0 %v11632_v63  ;;  %vm12799_vm12 = vcmask 261120  }
 0x5fe   : > { %3386 = vst.msk [vmem:[#allocation3 + $0x70] sm:$0xf] %vm12796_vm15, %v3352_v41  ;;  %v11650_v41 = vsel %vm12795_vm0, %v4243_v18, -1e+30 }
 0x604   : > { %v5013_v49 = vpop.permute.xlu1 %5012 }
 0x605   : > { %4848 = vmax.xlane.f32.xlu0 %v11642_v12  ;;  %5040 = vmatpush.bf16.msrb.mxu3 %v5013_v49 }
 0x609   : > { %5041 = vmatpush.bf16.msrb.mxu3 %v11567_v3 }
 0x60c   : > { %5042 = vmatmul.bf16.vlgmr.msrb.gmra.mxu3 %v4962_v10 }
 0x60d   : > { %4292 = vmax.xlane.f32.xlu0 %v11650_v41 }
 0x612   : > { %v4837_v42 = vpop.xlane.xlu0 %4836 }
 0x613   : > { %v4859_v57 = vsub.f32 %v11493_v46, %v4837_v42  ;;  %v11676_v42 = vsel %vm10273_vm2, %v6032_v13, -1e+30 }
 0x615   : > { %v4884_v45 = vmul.f32 1.442695, %v4859_v57 }
 0x617   : > { %9215 = vpow2.f32 %v4884_v45 }
 0x61a   : > { %v4905_v22 = vpop.xlane.xlu0 %4904 }
 0x61d   : > { %v11654_v19 = vpop.eup %9215 }
 0x61e   : > { %4916 = vadd.xlane.f32.xlu2 %v11654_v19 }
 0x620   : > { %v4835_v25 = vpop.xlane.xlu2 %4834 }
 0x621   : > { %v4858_v3 = vsub.f32 %v11510_v23, %v4835_v25  ;;  %v4245_v23 = vpop.f32.mrf.mxu0 }
 0x622   : > { %v4281_v56 = vpop.xlane.xlu0 %4280 }
 0x623   : > { %v4882_v24 = vmul.f32 1.442695, %v4858_v3  ;;  %v4304_v52 = vsub.f32 %v11517_v44, %v4281_v56 }
 0x625   : > { %9217 = vpow2.f32 %v4882_v24  ;;  %v4328_v26 = vmul.f32 1.442695, %v4304_v52 }
 0x627   : > { %9219 = vpow2.f32 %v4328_v26  ;;  %v11688_v26 = vsel %vm10253_vm1, %v6030_v36, -1e+30 }
 0x628   : > { %v4349_v43 = vpop.xlane.xlu2 %4348  ;;  %9221 = vrcp.f32 %v4905_v22 }
 0x629   : > { %v5396_v25 = vpop.f32.mrf.mxu0 }
 0x62a   : > { %v4283_v46 = vpop.xlane.xlu0 %4282 }
 0x62b   : > { %v11659_v31 = vpop.eup %9217  ;;  %v4305_v17 = vsub.f32 %v11532_v20, %v4283_v46  ;;  %v11669_v20 = vsel %vm10549_vm13, %v4245_v23, -1e+30 }
 0x62c   : > { %4914 = vadd.xlane.f32.xlu1 %v11659_v31 }
 0x62d   : > { %v11663_v15 = vpop.eup %9219  ;;  %v4330_v40 = vmul.f32 1.442695, %v4305_v17 }
 0x62e   : > { %4360 = vadd.xlane.f32.xlu2 %v11663_v15  ;;  %v9222_v18 = vpop.eup %9221 }
 0x62f   : > { %9223 = vpow2.f32 %v4330_v40  ;;  %v4903_v44 = vpop.xlane.xlu1 %4902  ;;  %v4949_v22 = vmul.f32 %v9222_v18, %v11500_v32 }
 0x630   : > { %9225 = vrcp.f32 %v4903_v44  ;;  %v4839_v39 = vpop.xlane.xlu2 %4838 }
 0x631   : > { %v4860_v49 = vsub.f32 %v11540_v9, %v4839_v39  ;;  %v5398_v13 = vpop.f32.mrf.mxu0 }
 0x633   : > { %v4886_v6 = vmul.f32 1.442695, %v4860_v49 }
 0x634   : > { %4294 = vmax.xlane.f32.xlu1 %v11669_v20 }
 0x635   : > { %v11672_v10 = vpop.eup %9223  ;;  %9227 = vpow2.f32 %v4886_v6 }
 0x636   : > { %v9226_v57 = vpop.eup %9225  ;;  %9229 = vrcp.f32 %v4349_v43  ;;  %6088 = vmax.xlane.f32.xlu2 %v11676_v42  ;;  %4362 = vadd.xlane.f32.xlu0 %v11672_v10 }
 0x637   : > { %v4351_v9 = vpop.xlane.xlu1 %4350  ;;  %v4948_v45 = vmul.f32 %v9226_v57, %v11536_v48  ;;  %v11693_v48 = vsel %vm10253_vm1, %v5396_v25, -1e+30  ;;  %v11704_v57 = vsel %vm10273_vm2, %v5398_v13, -1e+30  ;;  %vm12801_vm1 = vcmask 257024  }
 0x638   : > { %9231 = vrcp.f32 %v4351_v9  ;;  %v11682_v3 = vpop.xlane.xlu2 %4908  ;;  %vm12802_vm2 = vmmov %vm12801_vm1 }
 0x639   : > { %v4963_v56 = vpack.c.bf16 %v4949_v22, %v4948_v45  ;;  %vm12807_vm15 = vmmov %vm12801_vm1 }
 0x63b   : > { %v11684_v24 = vpop.eup %9227  ;;  %5047 = vmatmul.bf16.gmra.mxu3 %v4963_v56 }
 0x63c   : > { %v9230_v43 = vpop.eup %9229  ;;  %6086 = vmax.xlane.f32.xlu1 %v11688_v26 }
 0x63d   : > { %v5282_v32 = vpop.permute.xlu0 %5281  ;;  %v4394_v36 = vmul.f32 %v9230_v43, %v11523_v61 }
 0x63e   : > { %v9232_v46 = vpop.eup %9231  ;;  %5452 = vmax.xlane.f32.xlu2 %v11693_v48  ;;  %4918 = vadd.xlane.f32.xlu0 %v11684_v24 }
 0x63f   : > { %8169 = vmatmul.msk.bf16.gmra.mxu0 %vm12799_vm12, %v5282_v32  ;;  %v4841_v17 = vpop.xlane.xlu1 %4840  ;;  %v4395_v40 = vmul.f32 %v9232_v46, %v11545_v54  ;;  %vm12808_vm12 = vmmov %vm12801_vm1 }
 0x640   : > { %v4861_v23 = vsub.f32 %v11557_v55, %v4841_v17  ;;  %v4287_v44 = vpop.xlane.xlu2 %4286 }
 0x641   : > { %v4307_v39 = vsub.f32 %v11562_v5, %v4287_v44  ;;  %v4409_v49 = vpack.c.bf16 %v4395_v40, %v4394_v36  ;;  %v6035_v5 = vpop.f32.mrf.mxu2 }
 0x642   : > { %v4888_v6 = vmul.f32 1.442695, %v4861_v23  ;;  %v11716_v25 = vsel %vm10293_vm3, %v6035_v5, -1e+30 }
 0x643   : > { %v4334_v18 = vmul.f32 1.442695, %v4307_v39  ;;  %4477 = vmatmul.bf16.gmra.mxu1 %v4409_v49 }
 0x644   : > { %9233 = vpow2.f32 %v4888_v6 }
 0x645   : > { %9235 = vpow2.f32 %v4334_v18 }
 0x646   : > { %5454 = vmax.xlane.f32.xlu0 %v11704_v57 }
 0x647   : > { %v4285_v61 = vpop.xlane.xlu1 %4284 }
 0x648   : > { %v4306_v54 = vsub.f32 %v11571_v30, %v4285_v61  ;;  %v4355_v55 = vpop.xlane.xlu2 %4354 }
 0x649   : > { %v6037_v36 = vpop.f32.mrf.mxu2 }
 0x64a   : > { %v11708_v9 = vpop.eup %9233  ;;  %v4332_v45 = vmul.f32 1.442695, %v4306_v54 }
 0x64b   : > { %v11710_v22 = vpop.eup %9235  ;;  %4920 = vadd.xlane.f32.xlu1 %v11708_v9 }
 0x64c   : > { %9237 = vpow2.f32 %v4332_v45  ;;  %4366 = vadd.xlane.f32.xlu2 %v11710_v22 }
 0x64d   : > { %9239 = vrcp.f32 %v4355_v55 }
 0x64e   : > { %6090 = vmax.xlane.f32.xlu0 %v11716_v25 }
 0x64f   : > { %v4353_v30 = vpop.xlane.xlu1 %4352 }
 0x650   : > { %9241 = vrcp.f32 %v4353_v30  ;;  %v4845_v56 = vpop.xlane.xlu2 %4844 }
 0x651   : > { %v4863_v52 = vsub.f32 %v11585_v47, %v4845_v56  ;;  %v11728_v47 = vsel %vm10317_vm4, %v6037_v36, -1e+30 }
 0x652   : > { %v11720_v43 = vpop.eup %9237 }
 0x653   : > { %v4892_v32 = vmul.f32 1.442695, %v4863_v52  ;;  %4364 = vadd.xlane.f32.xlu1 %v11720_v43  ;;  %v9240_v46 = vpop.eup %9239 }
 0x654   : > { %v4397_v44 = vmul.f32 %v9240_v46, %v11573_v50 }
 0x655   : > { %9243 = vpow2.f32 %v4892_v32 }
 0x656   : > { %v9242_v17 = vpop.eup %9241 }
 0x657   : > { %v4843_v40 = vpop.xlane.xlu1 %4842  ;;  %v4396_v23 = vmul.f32 %v9242_v17, %v11580_v53  ;;  %v5401_v53 = vpop.f32.mrf.mxu0 }
 0x658   : > { %v4862_v39 = vsub.f32 %v11592_v1, %v4843_v40  ;;  %v4913_v49 = vpop.xlane.xlu2 %4912  ;;  %v11739_v55 = vsel %vm10293_vm3, %v5401_v53, -1e+30  ;;  %vm12803_vm3 = vmmov %vm12801_vm1 }
 0x659   : > { %v4410_v13 = vpack.c.bf16 %v4397_v44, %v4396_v23  ;;  %v6040_v23 = vpop.f32.mrf.mxu2 }
 0x65a   : > { %v4890_v6 = vmul.f32 1.442695, %v4862_v39 }
 0x65b   : > { %v11730_v18 = vpop.eup %9243  ;;  %6092 = vmax.xlane.f32.xlu1 %v11728_v47  ;;  %4482 = vmatmul.bf16.gmra.mxu1 %v4410_v13 }
 0x65c   : > { %9245 = vpow2.f32 %v4890_v6  ;;  %4924 = vadd.xlane.f32.xlu0 %v11730_v18 }
 0x65f   : > { %v4911_v61 = vpop.xlane.xlu1 %4910  ;;  %v5403_v56 = vpop.f32.mrf.mxu0 }
 0x660   : > { %v4291_v50 = vpop.xlane.xlu2 %4290  ;;  %v11748_v17 = vsel %vm10317_vm4, %v5403_v56, -1e+30  ;;  %vm12804_vm4 = vmmov %vm12801_vm1 }
 0x661   : > { %v4309_v1 = vsub.f32 %v11609_v51, %v4291_v50 }
 0x662   : > { %v11735_v54 = vpop.eup %9245 }
 0x663   : > { %v4338_v5 = vmul.f32 1.442695, %v4309_v1  ;;  %5456 = vmax.xlane.f32.xlu1 %v11739_v55  ;;  %4922 = vadd.xlane.f32.xlu2 %v11735_v54 }
 0x665   : > { %9247 = vpow2.f32 %v4338_v5  ;;  %v4473_v45 = vpop.f32.mrf.mxu1 }
 0x666   : > { %v4513_v30 = vpack.c.bf16 %v4473_v45, %v4473_v45  ;;  %9249 = vrcp.f32 %v11682_v3 }
 0x667   : > { %v4289_v52 = vpop.xlane.xlu1 %4288 }
 0x668   : > { %4529 = vst.msk [vmem:[#allocation3 + $0x4] sm:$0xf] %vm12801_vm1, %v4513_v30  ;;  %v4308_v51 = vsub.f32 %v11618_v4, %v4289_v52  ;;  %v4907_v32 = vpop.xlane.xlu0 %4906  ;;  %v4847_v29 = vpop.xlane.xlu2 %4846 }
 0x669   : > { %9251 = vrcp.f32 %v4907_v32  ;;  %v4864_v3 = vsub.f32 %v11624_v2, %v4847_v29  ;;  %v11762_v2 = vsel %vm10335_vm5, %v6040_v23, -1e+30 }
 0x66a   : > { %v4336_v46 = vmul.f32 1.442695, %v4308_v51 }
 0x66b   : > { %v11750_v36 = vpop.eup %9247  ;;  %5458 = vmax.xlane.f32.xlu2 %v11748_v17  ;;  %v4894_v6 = vmul.f32 1.442695, %v4864_v3 }
 0x66c   : > { %9253 = vpow2.f32 %v4336_v46  ;;  %4370 = vadd.xlane.f32.xlu1 %v11750_v36  ;;  %v9250_v40 = vpop.eup %9249 }
 0x66d   : > { %v4475_v4 = vpop.f32.mrf.mxu1  ;;  %v4951_v50 = vmul.f32 %v9250_v40, %v11547_v8  ;;  %v8791_v40 = vld [vmem:[#allocation2 + $0x178] sm:$0xf0] }
 0x66e   : > { %v4514_v44 = vpack.c.bf16 %v4475_v4, %v4475_v4 }
 0x66f   : > { %v9252_v39 = vpop.eup %9251  ;;  %v4359_v13 = vpop.xlane.xlu1 %4358 }
 0x670   : > { %4530 = vst.msk [vmem:[#allocation3 + $0xc] sm:$0xf] %vm12802_vm2, %v4514_v44  ;;  %9255 = vrcp.f32 %v4359_v13  ;;  %v4357_v33 = vpop.xlane.xlu0 %4356  ;;  %v4950_v53 = vmul.f32 %v9252_v39, %v11620_v38  ;;  %v6042_v38 = vpop.f32.mrf.mxu2  ;;  %v8200_v13 = vld [vmem:[#allocation2 + $0x164] sm:$0xf]  ;;  %vm12810_vm2 = vmmov %vm12801_vm1 }
 0x671   : > { %9257 = vrcp.f32 %v4357_v33  ;;  %v11773_v29 = vsel %vm10359_vm6, %v6042_v38, -1e+30  ;;  %v5406_v39 = vpop.f32.mrf.mxu0 }
 0x672   : > { %v11758_v1 = vpop.eup %9253  ;;  %v4964_v5 = vpack.c.bf16 %v4951_v50, %v4950_v53  ;;  %9259 = vpow2.f32 %v4894_v6  ;;  %v8767_v6 = vld [vmem:[#allocation2 + $0x178] sm:$0xf0]  ;;  %v8300_v50 = vld [vmem:[#allocation2 + $0x134] sm:$0xf] }
 0x673   : > { %6094 = vmax.xlane.f32.xlu2 %v11762_v2  ;;  %4368 = vadd.xlane.f32.xlu0 %v11758_v1  ;;  %9261 = vrcp.f32 %v4911_v61 }
 0x674   : > { %5052 = vmatmul.bf16.gmra.mxu3 %v4964_v5  ;;  %9263 = vrcp.f32 %v4913_v49  ;;  %v8304_v49 = vld [vmem:[#allocation2 + $0x164] sm:$0xf]  ;;  %v8790_v5 = vld [vmem:[#allocation2 + $0x148] sm:$0xf0] }
 0x675   : > { %v8305_v44 = vor.u32 %v8791_v40, %v8304_v49  ;;  %v8301_v38 = vor.u32 %v8790_v5, %v8300_v50  ;;  %v8192_v40 = vld [vmem:[#allocation2 + $0x104] sm:$0xf]  ;;  %v11806_v50 = vpop.f32.mrf.mxu3  ;;  %v8196_v5 = vld [vmem:[#allocation2 + $0x134] sm:$0xf] }
 0x676   : > { %v9256_v45 = vpop.eup %9255 }
 0x677   : > { %v9258_v30 = vpop.eup %9257  ;;  %v4399_v8 = vmul.f32 %v9256_v45, %v11630_v0 }
 0x678   : > { %v4849_v56 = vpop.xlane.xlu0 %4848  ;;  %v4398_v52 = vmul.f32 %v9258_v30, %v11632_v63  ;;  %v11769_v32 = vpop.eup %9259 }
 0x679   : > { %v4865_v51 = vsub.f32 %v11642_v12, %v4849_v56  ;;  %v9262_v3 = vpop.eup %9261  ;;  %v5408_v45 = vpop.f32.mrf.mxu0  ;;  %v8789_v56 = vld [vmem:[#allocation2 + $0x118] sm:$0xf0] }
 0x67a   : > { %v4411_v46 = vpack.c.bf16 %v4399_v8, %v4398_v52  ;;  %v9264_v0 = vpop.eup %9263  ;;  %v4952_v63 = vmul.f32 %v9262_v3, %v11604_v59  ;;  %v11785_v59 = vsel %vm10335_vm5, %v5406_v39, -1e+30  ;;  %v11793_v8 = vsel %vm10359_vm6, %v5408_v45, -1e+30  ;;  %v8788_v3 = vld [vmem:[#allocation2 + $0xe8] sm:$0xf0]  ;;  %vm12806_vm6 = vmmov %vm12801_vm1 }
 0x67b   : > { %v4896_v61 = vmul.f32 1.442695, %v4865_v51  ;;  %4926 = vadd.xlane.f32.xlu2 %v11769_v32  ;;  %6096 = vmax.xlane.f32.xlu0 %v11773_v29  ;;  %v4953_v12 = vmul.f32 %v9264_v0, %v11594_v60  ;;  %v8201_v60 = vor.u32 %v8767_v6, %v8200_v13  ;;  %v8297_v52 = vor.u32 %v8789_v56, %v8296_v7  ;;  %v8766_v45 = vld [vmem:[#allocation2 + $0x148] sm:$0xf0] }
 0x67c   : > { %4487 = vmatmul.bf16.gmra.mxu1 %v4411_v46  ;;  %v8292_v46 = vld [vmem:[#allocation2 + $0xd4] sm:$0xf]  ;;  %v8197_v7 = vor.u32 %v8766_v45, %v8196_v5  ;;  %vm12805_vm5 = vnez %v12654_v27 }
 0x67d   : > { %9265 = vpow2.f32 %v4896_v61  ;;  %v4965_v23 = vpack.c.bf16 %v4953_v12, %v4952_v63  ;;  %v8293_v0 = vor.u32 %v8788_v3, %v8292_v46 }
 0x680   : > { %v4293_v33 = vpop.xlane.xlu0 %4292 }
 0x681   : > { %v4310_v53 = vsub.f32 %v11650_v41, %v4293_v33 }
 0x683   : > { %v11779_v4 = vpop.eup %9265  ;;  %v4340_v30 = vmul.f32 1.442695, %v4310_v53 }
 0x684   : > { %5057 = vmatmul.bf16.gmra.mxu3 %v4965_v23  ;;  %4928 = vadd.xlane.f32.xlu0 %v11779_v4  ;;  %v8765_v23 = vld [vmem:[#allocation2 + $0x118] sm:$0xf0] }
 0x685   : > { %6292 = vrot.lane.b32.xlu1 %v8305_v44, %s9603_s6  ;;  %9267 = vpow2.f32 %v4340_v30 }
 0x68b   : > { %v11796_v41 = vpop.eup %9267 }
 0x68c   : > { %5460 = vmax.xlane.f32.xlu0 %v11785_v59 }
 0x68d   : > { %5658 = vrot.lane.b32.xlu1 %v8201_v60, %s9602_s26  ;;  %v8193_v60 = vor.u32 %v8765_v23, %v8192_v40 }
 0x691   : > { %v4917_v51 = vpop.xlane.xlu2 %4916 }
 0x692   : > { %9269 = vrcp.f32 %v4917_v51 }
 0x693   : > { %6290 = vrot.lane.b32.xlu2 %v8301_v38, %s9603_s6 }
 0x694   : > { %5462 = vmax.xlane.f32.xlu0 %v11793_v8 }
 0x698   : > { %v9270_v63 = vpop.eup %9269 }
 0x699   : > { %v4955_v13 = vmul.f32 %v9270_v63, %v11654_v19  ;;  %v11819_v63 = vpop.f32.mrf.mxu3 }
 0x69b   : > { %6288 = vrot.lane.b32.xlu2 %v8297_v52, %s9603_s6 }
 0x69c   : > { %4372 = vadd.xlane.f32.xlu0 %v11796_v41 }
 0x69f   : > { %v4915_v61 = vpop.xlane.xlu1 %4914 }
 0x6a0   : > { %9271 = vrcp.f32 %v4915_v61 }
 0x6a1   : > { %v4361_v12 = vpop.xlane.xlu2 %4360  ;;  %v11826_v5 = vpop.f32.mrf.mxu3 }
 0x6a2   : > { %9273 = vrcp.f32 %v4361_v12 }
 0x6a3   : > { %6286 = vrot.lane.b32.xlu2 %v8293_v0, %s9603_s6 }
 0x6a6   : > { %v9272_v49 = vpop.eup %9271 }
 0x6a7   : > { %v4295_v44 = vpop.xlane.xlu1 %4294  ;;  %v4954_v39 = vmul.f32 %v9272_v49, %v11659_v31 }
 0x6a8   : > { %v4311_v6 = vsub.f32 %v11669_v20, %v4295_v44  ;;  %v9274_v38 = vpop.eup %9273  ;;  %v6045_v44 = vpop.f32.mrf.mxu2 }
 0x6a9   : > { %v4363_v33 = vpop.xlane.xlu0 %4362  ;;  %v4966_v53 = vpack.c.bf16 %v4955_v13, %v4954_v39  ;;  %v6089_v19 = vpop.xlane.xlu2 %6088  ;;  %v4400_v20 = vmul.f32 %v9274_v38, %v11663_v15  ;;  %v8288_v38 = vld [vmem:[#allocation2 + $0xa4] sm:$0xf] }
 0x6aa   : > { %9275 = vrcp.f32 %v4363_v33  ;;  %v4342_v30 = vmul.f32 1.442695, %v4311_v6 }
 0x6ab   : > { %5654 = vrot.lane.b32.xlu2 %v8193_v60, %s9602_s26  ;;  %5062 = vmatmul.bf16.gmra.mxu3 %v4966_v53 }
 0x6ac   : > { %9277 = vpow2.f32 %v4342_v30 }
 0x6af   : > { %v11814_v46 = vpop.xlane.xlu1 %6086 }
 0x6b0   : > { %v9276_v31 = vpop.eup %9275  ;;  %5656 = vrot.lane.b32.xlu0 %v8197_v7, %s9602_s26  ;;  %v8787_v7 = vld [vmem:[#allocation2 + $0xb8] sm:$0xf0] }
 0x6b1   : > { %v4401_v56 = vmul.f32 %v9276_v31, %v11672_v10  ;;  %v4919_v3 = vpop.xlane.xlu0 %4918  ;;  %v11817_v61 = vpop.xlane.xlu2 %5452  ;;  %v6119_v31 = vsub.f32 %v11676_v42, %v6089_v19  ;;  %v11846_v19 = vsel %vm12805_vm5, %v6045_v44, -1e+30 }
 0x6b2   : > { %v11812_v51 = vpop.eup %9277  ;;  %9279 = vrcp.f32 %v4919_v3 }
 0x6b3   : > { %v4412_v52 = vpack.c.bf16 %v4401_v56, %v4400_v20  ;;  %v6136_v3 = vmul.f32 1.442695, %v6119_v31 }
 0x6b5   : > { %4492 = vmatmul.bf16.gmra.mxu1 %v4412_v52  ;;  %v6047_v52 = vpop.f32.mrf.mxu2 }
 0x6b7   : > { %4374 = vadd.xlane.f32.xlu1 %v11812_v51 }
 0x6b8   : > { %v9280_v40 = vpop.eup %9279 }
 0x6b9   : > { %v11821_v12 = vpop.xlane.xlu0 %5454  ;;  %v4956_v13 = vmul.f32 %v9280_v40, %v11684_v24  ;;  %v8289_v24 = vor.u32 %v8787_v7, %v8288_v38 }
 0x6be   : > { %v4921_v0 = vpop.xlane.xlu1 %4920 }
 0x6bf   : > { %9281 = vrcp.f32 %v4921_v0  ;;  %v4367_v49 = vpop.xlane.xlu2 %4366 }
 0x6c0   : > { %v4478_v15 = vpop.f32.mrf.mxu1  ;;  %9283 = vrcp.f32 %v4367_v49  ;;  %v11839_v49 = vsel %vm10402_vm8, %v6047_v52, -1e+30 }
 0x6c1   : > { %v4515_v10 = vpack.c.bf16 %v4478_v15, %v4478_v15  ;;  %v11828_v45 = vpop.xlane.xlu0 %6090 }
 0x6c3   : > { %4531 = vst.msk [vmem:[#allocation3 + $0x14] sm:$0xf] %vm12803_vm3, %v4515_v10  ;;  %vm12811_vm3 = vmmov %vm12801_vm1 }
 0x6c5   : > { %v9282_v23 = vpop.eup %9281 }
 0x6c6   : > { %v4365_v39 = vpop.xlane.xlu1 %4364  ;;  %v4957_v6 = vmul.f32 %v9282_v23, %v11708_v9  ;;  %v9284_v30 = vpop.eup %9283 }
 0x6c7   : > { %9285 = vrcp.f32 %v4365_v39  ;;  %v4403_v56 = vmul.f32 %v9284_v30, %v11710_v22  ;;  %v11842_v22 = vpop.f32.mrf.mxu3 }
 0x6c8   : > { %v4480_v33 = vpop.f32.mrf.mxu1  ;;  %v4967_v60 = vpack.c.bf16 %v4957_v6, %v4956_v13  ;;  %9287 = vpow2.f32 %v6136_v3 }
 0x6c9   : > { %v4516_v53 = vpack.c.bf16 %v4480_v33, %v4480_v33 }
 0x6ca   : > { %5067 = vmatmul.bf16.gmra.mxu3 %v4967_v60 }
 0x6cb   : > { %4532 = vst.msk [vmem:[#allocation3 + $0x1c] sm:$0xf] %vm12804_vm4, %v4516_v53  ;;  %vm12812_vm4 = vmmov %vm12801_vm1 }
 0x6cd   : > { %v9286_v20 = vpop.eup %9285 }
 0x6ce   : > { %v4402_v9 = vmul.f32 %v9286_v20, %v11720_v43  ;;  %v11834_v0 = vpop.xlane.xlu1 %6092  ;;  %v11848_v23 = vpop.eup %9287 }
 0x6cf   : > { %v4925_v10 = vpop.xlane.xlu0 %4924  ;;  %v11859_v7 = vpop.f32.mrf.mxu3 }
 0x6d0   : > { %6284 = vrot.lane.b32.xlu1 %v8289_v24, %s9603_s6  ;;  %v4413_v15 = vpack.c.bf16 %v4403_v56, %v4402_v9  ;;  %9289 = vrcp.f32 %v4925_v10  ;;  %v8188_v9 = vld [vmem:[#allocation2 + $0xd4] sm:$0xf]  ;;  %v8764_v56 = vld [vmem:[#allocation2 + $0xe8] sm:$0xf0] }
 0x6d2   : > { %4497 = vmatmul.bf16.gmra.mxu1 %v4413_v15 }
 0x6d4   : > { %6100 = vmax.xlane.f32.xlu2 %v11839_v49 }
 0x6d6   : > { %v4923_v42 = vpop.xlane.xlu2 %4922  ;;  %v11850_v39 = vpop.xlane.xlu1 %5456 }
 0x6d7   : > { %9291 = vrcp.f32 %v4923_v42  ;;  %v9290_v13 = vpop.eup %9289 }
 0x6d8   : > { %v4483_v43 = vpop.f32.mrf.mxu1  ;;  %v4959_v44 = vmul.f32 %v9290_v13, %v11730_v18  ;;  %v6118_v18 = vsub.f32 %v11688_v26, %v11814_v46  ;;  %v8284_v13 = vld [vmem:[#allocation2 + $0x74] sm:$0xf] }
 0x6d9   : > { %v4517_v40 = vpack.c.bf16 %v4483_v43, %v4483_v43 }
 0x6da   : > { %6098 = vmax.xlane.f32.xlu0 %v11846_v19 }
 0x6db   : > { %4533 = vst.msk [vmem:[#allocation3 + $0x24] sm:$0xf] %vm12806_vm6, %v4517_v40  ;;  %v6134_v40 = vmul.f32 1.442695, %v6118_v18 }
 0x6dc   : > { %6168 = vadd.xlane.f32.xlu2 %v11848_v23 }
 0x6dd   : > { %v9292_v6 = vpop.eup %9291 }
 0x6de   : > { %v11855_v33 = vpop.xlane.xlu2 %5458  ;;  %v4958_v60 = vmul.f32 %v9292_v6, %v11735_v54  ;;  %v8189_v54 = vor.u32 %v8764_v56, %v8188_v9  ;;  %v8786_v6 = vld [vmem:[#allocation2 + $0x88] sm:$0xf0] }
 0x6df   : > { %v4371_v31 = vpop.xlane.xlu1 %4370 }
 0x6e0   : > { %v4485_v53 = vpop.f32.mrf.mxu1  ;;  %v4968_v30 = vpack.c.bf16 %v4959_v44, %v4958_v60  ;;  %9293 = vrcp.f32 %v4371_v31  ;;  %v8285_v44 = vor.u32 %v8786_v6, %v8284_v13  ;;  %v8184_v13 = vld [vmem:[#allocation2 + $0xa4] sm:$0xf]  ;;  %v8763_v6 = vld [vmem:[#allocation2 + $0xb8] sm:$0xf0] }
 0x6e1   : > { %v4518_v38 = vpack.c.bf16 %v4485_v53, %v4485_v53 }
 0x6e2   : > { %5072 = vmatmul.bf16.gmra.mxu3 %v4968_v30 }
 0x6e3   : > { %4534 = vst.msk [vmem:[#allocation3 + $0x2c] sm:$0xf] %vm12807_vm15, %v4518_v38  ;;  %v11874_v38 = vpop.f32.mrf.mxu3 }
 0x6e6   : > { %v11862_v20 = vpop.xlane.xlu2 %6094  ;;  %v4369_v24 = vpop.xlane.xlu0 %4368 }
 0x6e7   : > { %9295 = vrcp.f32 %v4369_v24  ;;  %v9294_v52 = vpop.eup %9293 }
 0x6e8   : > { %v4405_v43 = vmul.f32 %v9294_v52, %v11750_v36  ;;  %9297 = vpow2.f32 %v6134_v40 }
 0x6ed   : > { %v9296_v3 = vpop.eup %9295 }
 0x6ee   : > { %v4927_v15 = vpop.xlane.xlu2 %4926  ;;  %5652 = vrot.lane.b32.xlu0 %v8189_v54, %s9602_s26  ;;  %v11867_v10 = vpop.xlane.xlu0 %6096  ;;  %v4404_v42 = vmul.f32 %v9296_v3, %v11758_v1 }
 0x6ef   : > { %9299 = vrcp.f32 %v4927_v15  ;;  %v11872_v30 = vpop.eup %9297 }
 0x6f0   : > { %v4414_v60 = vpack.c.bf16 %v4405_v43, %v4404_v42  ;;  %v11880_v42 = vpop.f32.mrf.mxu3 }
 0x6f2   : > { %4502 = vmatmul.bf16.gmra.mxu1 %v4414_v60 }
 0x6f4   : > { %6282 = vrot.lane.b32.xlu2 %v8285_v44, %s9603_s6  ;;  %v8185_v44 = vor.u32 %v8763_v6, %v8184_v13 }
 0x6f5   : > { %v9300_v31 = vpop.eup %9299 }
 0x6f6   : > { %v6291_v26 = vpop.permute.xlu2 %6290  ;;  %v4960_v56 = vmul.f32 %v9300_v31, %v11769_v32  ;;  %v5411_v32 = vpop.f32.mrf.mxu0 }
 0x6f7   : > { %v4929_v46 = vpop.xlane.xlu0 %4928  ;;  %v6293_v53 = vpop.permute.xlu1 %6292 }
 0x6f8   : > { %9301 = vrcp.f32 %v4929_v46  ;;  %6302 = vmatpush.bf16.msra.mxu3 %v6293_v53  ;;  %v11892_v46 = vsel %vm12805_vm5, %v5411_v32, -1e+30  ;;  %vm12813_vm5 = vmmov %vm12801_vm1 }
 0x6f9   : > { %v4488_v1 = vpop.f32.mrf.mxu1 }
 0x6fa   : > { %v4519_v36 = vpack.c.bf16 %v4488_v1, %v4488_v1  ;;  %6166 = vadd.xlane.f32.xlu1 %v11872_v30 }
 0x6fc   : > { %4535 = vst.msk [vmem:[#allocation3 + $0x34] sm:$0xf] %vm12808_vm12, %v4519_v36  ;;  %6303 = vmatpush.bf16.msra.mxu3 %v6291_v26 }
 0x6fe   : > { %v9302_v24 = vpop.eup %9301  ;;  %v6289_v9 = vpop.permute.xlu2 %6288 }
 0x6ff   : > { %v4961_v52 = vmul.f32 %v9302_v24, %v11779_v4  ;;  %v5659_v18 = vpop.permute.xlu1 %5658  ;;  %v11883_v43 = vpop.xlane.xlu0 %5460  ;;  %v5484_v4 = vsub.f32 %v11693_v48, %v11817_v61  ;;  %v5485_v24 = vsub.f32 %v11704_v57, %v11821_v12  ;;  %v8276_v57 = vld [vmem:[#allocation2 + $0x14] sm:$0xf]  ;;  %v8784_v12 = vld [vmem:[#allocation2 + $0x28] sm:$0xf0] }
 0x700   : > { %5668 = vmatpush.bf16.msra.mxu1 %v5659_v18  ;;  %6304 = vmatpush.bf16.msra.mxu3 %v6289_v9  ;;  %v5413_v53 = vpop.f32.mrf.mxu0  ;;  %v8762_v18 = vld [vmem:[#allocation2 + $0x88] sm:$0xf0] }
 0x701   : > { %v4490_v54 = vpop.f32.mrf.mxu1  ;;  %v4969_v3 = vpack.c.bf16 %v4961_v52, %v4960_v56  ;;  %v5500_v26 = vmul.f32 1.442695, %v5484_v4  ;;  %v11897_v36 = vsel %vm10402_vm8, %v5413_v53, -1e+30  ;;  %v8785_v56 = vld [vmem:[#allocation2 + $0x58] sm:$0xf0]  ;;  %vm12809_vm8 = vmmov %vm12801_vm1  ;;  %v8277_v53 = vor.u32 %v8784_v12, %v8276_v57 }
 0x702   : > { %v4520_v15 = vpack.c.bf16 %v4490_v54, %v4490_v54  ;;  %v8180_v52 = vld [vmem:[#allocation2 + $0x74] sm:$0xf] }
 0x703   : > { %5077 = vmatmul.bf16.gmra.mxu3 %v4969_v3  ;;  %9303 = vpow2.f32 %v5500_v26  ;;  %v5502_v3 = vmul.f32 1.442695, %v5485_v24  ;;  %v8181_v4 = vor.u32 %v8762_v18, %v8180_v52  ;;  %v8172_v52 = vld [vmem:[#allocation2 + $0x14] sm:$0xf]  ;;  %v8760_v18 = vld [vmem:[#allocation2 + $0x28] sm:$0xf0] }
 0x704   : > { %4536 = vst.msk [vmem:[#allocation3 + $0x3c] sm:$0xf] %vm12801_vm1, %v4520_v15 }
 0x706   : > { %v6287_v40 = vpop.permute.xlu2 %6286 }
 0x707   : > { %6305 = vmatpush.bf16.msra.mxu3 %v6287_v40  ;;  %v11885_v60 = vpop.xlane.xlu0 %5462  ;;  %v8281_v40 = vor.u32 %v8785_v56, %v8280_v35 }
 0x708   : > { %v5416_v57 = vpop.f32.mrf.mxu0 }
 0x709   : > { %v11900_v48 = vpop.eup %9303 }
 0x70e   : > { %v5655_v27 = vpop.permute.xlu2 %5654 }
 0x70f   : > { %v4373_v1 = vpop.xlane.xlu0 %4372 }
 0x710   : > { %9305 = vrcp.f32 %v4373_v1 }
 0x713   : > { %5650 = vrot.lane.b32.xlu1 %v8185_v44, %s9602_s26 }
 0x716   : > { %v9306_v9 = vpop.eup %9305 }
 0x717   : > { %v4406_v13 = vmul.f32 %v9306_v9, %v11796_v41  ;;  %v8176_v41 = vld [vmem:[#allocation2 + $0x44] sm:$0xf] }
 0x718   : > { %5464 = vmax.xlane.f32.xlu0 %v11892_v46 }
 0x71d   : > { %5466 = vmax.xlane.f32.xlu2 %v11897_v36 }
 0x720   : > { %5532 = vadd.xlane.f32.xlu0 %v11900_v48 }
 0x722   : > { %v5657_v61 = vpop.permute.xlu0 %5656 }
 0x723   : > { %5669 = vmatpush.bf16.msra.mxu1 %v5657_v61 }
 0x727   : > { %5670 = vmatpush.bf16.msra.mxu1 %v5655_v27 }
 0x72a   : > { %v4375_v31 = vpop.xlane.xlu1 %4374 }
 0x72b   : > { %9307 = vrcp.f32 %v4375_v31 }
 0x72c   : > { %9309 = vpow2.f32 %v5502_v3  ;;  %v6121_v3 = vsub.f32 %v11728_v47, %v11834_v0 }
 0x731   : > { %v9308_v54 = vpop.eup %9307 }
 0x732   : > { %v4493_v15 = vpop.f32.mrf.mxu1  ;;  %v4407_v6 = vmul.f32 %v9308_v54, %v11812_v51  ;;  %v11910_v61 = vpop.eup %9309  ;;  %v8761_v51 = vld [vmem:[#allocation2 + $0x58] sm:$0xf0]  ;;  %v8173_v54 = vor.u32 %v8760_v18, %v8172_v52  ;;  %v11956_v52 = vsel %vm10417_vm9, %v5416_v57, -1e+30 }
 0x733   : > { %v4521_v32 = vpack.c.bf16 %v4493_v15, %v4493_v15  ;;  %v8177_v31 = vor.u32 %v8761_v51, %v8176_v41 }
 0x734   : > { %6280 = vrot.lane.b32.xlu0 %v8281_v40, %s9603_s6  ;;  %v4415_v44 = vpack.c.bf16 %v4407_v6, %v4406_v13 }
 0x735   : > { %4537 = vst.msk [vmem:[#allocation3 + $0x44] sm:$0xf] %vm12809_vm8, %v4521_v32  ;;  %5648 = vrot.lane.b32.xlu2 %v8181_v4, %s9602_s26  ;;  %v6050_v32 = vpop.f32.mrf.mxu2  ;;  %v6140_v4 = vmul.f32 1.442695, %v6121_v3 }
 0x736   : > { %4507 = vmatmul.bf16.gmra.mxu1 %v4415_v44  ;;  %v11929_v44 = vsel %vm10417_vm9, %v6050_v32, -1e+30  ;;  %vm12815_vm9 = vnez %v12792_v62 }
 0x737   : > { %9311 = vpow2.f32 %v6140_v4  ;;  %v5489_v4 = vsub.f32 %v11793_v8, %v11885_v60 }
 0x73a   : > { %v4495_v26 = vpop.f32.mrf.mxu1 }
 0x73b   : > { %v4522_v1 = vpack.c.bf16 %v4495_v26, %v4495_v26  ;;  %v5487_v26 = vsub.f32 %v11748_v17, %v11855_v33 }
 0x73c   : > { %6278 = vrot.lane.b32.xlu0 %v8277_v53, %s9603_s6  ;;  %v5418_v53 = vpop.f32.mrf.mxu0 }
 0x73d   : > { %4538 = vst.msk [vmem:[#allocation3 + $0x4c] sm:$0xf] %vm12810_vm2, %v4522_v1  ;;  %5534 = vadd.xlane.f32.xlu1 %v11910_v61  ;;  %v11932_v47 = vpop.eup %9311  ;;  %v6052_v0 = vpop.f32.mrf.mxu2  ;;  %v5506_v1 = vmul.f32 1.442695, %v5487_v26  ;;  %v11939_v41 = vsel %vm10437_vm10, %v5418_v53, -1e+30 }
 0x73e   : > { %v11943_v51 = vsel %vm10437_vm10, %v6052_v0, -1e+30  ;;  %vm12814_vm10 = vmmov %vm12801_vm1  ;;  %v5510_v26 = vmul.f32 1.442695, %v5489_v4 }
 0x73f   : > { %9313 = vpow2.f32 %v5506_v1 }
 0x742   : > { %v6285_v27 = vpop.permute.xlu1 %6284 }
 0x743   : > { %6306 = vmatpush.bf16.msra.mxu3 %v6285_v27  ;;  %v5486_v27 = vsub.f32 %v11739_v55, %v11850_v39  ;;  %v6123_v55 = vsub.f32 %v11773_v29, %v11867_v10  ;;  %v6122_v29 = vsub.f32 %v11762_v2, %v11862_v20 }
 0x744   : > { %5646 = vrot.lane.b32.xlu0 %v8177_v31, %s9602_s26  ;;  %v5421_v32 = vpop.f32.mrf.mxu0 }
 0x745   : > { %v6055_v17 = vpop.f32.mrf.mxu2  ;;  %v11952_v11 = vpop.eup %9313  ;;  %v6144_v14 = vmul.f32 1.442695, %v6123_v55 }
 0x746   : > { %v11990_v0 = vsel %vm12787_vm7, %v6055_v17, -1e+30 }
 0x747   : > { %v11916_v24 = vpop.xlane.xlu2 %6100 }
 0x74c   : > { %v5423_v60 = vpop.f32.mrf.mxu0 }
 0x74d   : > { %v11924_v13 = vpop.xlane.xlu0 %6098 }
 0x74f   : > { %v11918_v9 = vpop.xlane.xlu2 %6168  ;;  %v4498_v35 = vpop.f32.mrf.mxu1 }
 0x750   : > { %v4523_v56 = vpack.c.bf16 %v4498_v35, %v4498_v35  ;;  %v6120_v35 = vsub.f32 %v11716_v25, %v11828_v45  ;;  %v11962_v25 = vpop.f32.mrf.mxu3 }
 0x752   : > { %4539 = vst.msk [vmem:[#allocation3 + $0x54] sm:$0xf] %vm12811_vm3, %v4523_v56  ;;  %v5504_v56 = vmul.f32 1.442695, %v5486_v27  ;;  %v6138_v18 = vmul.f32 1.442695, %v6120_v35 }
 0x754   : > { %9315 = vpow2.f32 %v5504_v56  ;;  %v12014_v56 = vsel %vm12737_vm11, %v5423_v60, -1e+30 }
 0x755   : > { %9317 = vpow2.f32 %v6138_v18 }
 0x756   : > { %5644 = vrot.lane.b32.xlu1 %v8173_v54, %s9602_s26  ;;  %v6057_v54 = vpop.f32.mrf.mxu2  ;;  %9319 = vpow2.f32 %v6144_v14 }
 0x757   : > { %v6283_v15 = vpop.permute.xlu2 %6282  ;;  %v4500_v40 = vpop.f32.mrf.mxu1 }
 0x758   : > { %v4524_v6 = vpack.c.bf16 %v4500_v40, %v4500_v40  ;;  %6307 = vmatpush.bf16.msra.mxu3 %v6283_v15  ;;  %v11969_v15 = vsel %vm12737_vm11, %v6057_v54, -1e+30  ;;  %v11984_v57 = vpop.f32.mrf.mxu3  ;;  %vm12818_vm11 = vmmov %vm12801_vm1 }
 0x75a   : > { %4540 = vst.msk [vmem:[#allocation3 + $0x5c] sm:$0xf] %vm12812_vm4, %v4524_v6  ;;  %v11965_v3 = vpop.eup %9315  ;;  %v5488_v6 = vsub.f32 %v11785_v59, %v11883_v43  ;;  %v11996_v59 = vsel %vm12787_vm7, %v5421_v32, -1e+30  ;;  %v6124_v43 = vsub.f32 %v11846_v19, %v11924_v13  ;;  %v5426_v19 = vpop.f32.mrf.mxu0  ;;  %vm12821_vm7 = vcmask 519424  }
 0x75b   : > { %v11977_v10 = vpop.eup %9317  ;;  %vm12823_vm6 = vmmov %vm12821_vm7 }
 0x75c   : > { %v5508_v2 = vmul.f32 1.442695, %v5488_v6  ;;  %v11986_v20 = vpop.eup %9319  ;;  %v6146_v17 = vmul.f32 1.442695, %v6124_v43  ;;  %vm12824_vm15 = vmmov %vm12823_vm6 }
 0x75d   : > { %vm12825_vm12 = vmmov %vm12823_vm6 }
 0x75e   : > { %6102 = vmax.xlane.f32.xlu2 %v11929_v44  ;;  %v6060_v8 = vpop.f32.mrf.mxu2  ;;  %vm12827_vm8 = vmmov %vm12823_vm6 }
 0x75f   : > { %v12032_v32 = vsel %vm12815_vm9, %v6060_v8, -1e+30  ;;  %vm12829_vm3 = vmmov %vm12823_vm6 }
 0x760   : > { %v5653_v12 = vpop.permute.xlu0 %5652  ;;  %v12003_v27 = vpop.f32.mrf.mxu3 }
 0x761   : > { %5671 = vmatpush.bf16.msra.mxu1 %v5653_v12  ;;  %v6142_v12 = vmul.f32 1.442695, %v6122_v29 }
 0x762   : > { %v5428_v6 = vpop.f32.mrf.mxu0 }
 0x763   : > { %9321 = vpow2.f32 %v6142_v12 }
 0x764   : > { %9323 = vpow2.f32 %v5508_v2 }
 0x765   : > { %9325 = vpow2.f32 %v5510_v26 }
 0x766   : > { %6172 = vadd.xlane.f32.xlu2 %v11932_v47  ;;  %9327 = vpow2.f32 %v6146_v17  ;;  %v6062_v35 = vpop.f32.mrf.mxu2 }
 0x767   : > { %v12018_v18 = vsel %vm10517_vm14, %v6062_v35, -1e+30 }
 0x768   : > { %v12020_v55 = vpop.f32.mrf.mxu3 }
 0x769   : > { %v12001_v1 = vpop.eup %9321 }
 0x76d   : > { %v11971_v40 = vpop.xlane.xlu1 %6166 }
 0x76e   : > { %5470 = vmax.xlane.f32.xlu2 %v11939_v41  ;;  %6104 = vmax.xlane.f32.xlu0 %v11943_v51  ;;  %v6065_v26 = vpop.f32.mrf.mxu2 }
 0x76f   : > { %v4503_v31 = vpop.f32.mrf.mxu1 }
 0x770   : > { %v4525_v33 = vpack.c.bf16 %v4503_v31, %v4503_v31  ;;  %v12005_v31 = vpop.eup %9323  ;;  %v12045_v12 = vpop.f32.mrf.mxu3 }
 0x771   : > { %v12009_v21 = vpop.eup %9325  ;;  %12816 = vst [vmem:[#allocation14_spill] sm:$0xff] %v12045_v12 }
 0x772   : > { %4541 = vst.msk [vmem:[#allocation3 + $0x64] sm:$0xf] %vm12813_vm5, %v4525_v33 }
 0x776   : > { %5538 = vadd.xlane.f32.xlu2 %v11952_v11  ;;  %5468 = vmax.xlane.f32.xlu0 %v11956_v52 }
 0x777   : > { %v4505_v39 = vpop.f32.mrf.mxu1 }
 0x778   : > { %v4526_v45 = vpack.c.bf16 %v4505_v39, %v4505_v39  ;;  %v6125_v39 = vsub.f32 %v11839_v49, %v11916_v24  ;;  %v12036_v49 = vsel %vm12815_vm9, %v5426_v19, -1e+30  ;;  %v12061_v8 = vpop.f32.mrf.mxu3  ;;  %v6067_v19 = vpop.f32.mrf.mxu2  ;;  %vm12833_vm9 = vmmov %vm12829_vm3 }
 0x77a   : > { %4542 = vst.msk [vmem:[#allocation3 + $0x6c] sm:$0xf] %vm12814_vm10, %v4526_v45  ;;  %v12026_v45 = vpop.eup %9327  ;;  %v6148_v14 = vmul.f32 1.442695, %v6125_v39  ;;  %vm12832_vm10 = vmmov %vm12829_vm3 }
 0x77c   : > { %9329 = vpow2.f32 %v6148_v14 }
 0x77e   : > { %6108 = vmax.xlane.f32.xlu2 %v11969_v15  ;;  %5536 = vadd.xlane.f32.xlu0 %v11965_v3 }
 0x780   : > { %6170 = vadd.xlane.f32.xlu1 %v11977_v10  ;;  %v12068_v39 = vpop.f32.mrf.mxu3 }
 0x781   : > { %12817 = vst [vmem:[#allocation19_spill] sm:$0xff] %v12068_v39 }
 0x782   : > { %v12049_v2 = vpop.eup %9329 }
 0x785   : > { %v5651_v53 = vpop.permute.xlu1 %5650 }
 0x786   : > { %6106 = vmax.xlane.f32.xlu0 %v11990_v0  ;;  %6176 = vadd.xlane.f32.xlu2 %v11986_v20 }
 0x787   : > { %5672 = vmatpush.bf16.msra.mxu1 %v5651_v53 }
 0x788   : > { %5472 = vmax.xlane.f32.xlu1 %v11996_v59 }
 0x78b   : > { %v5465_v13 = vpop.xlane.xlu0 %5464 }
 0x78c   : > { %v5490_v4 = vsub.f32 %v11892_v46, %v5465_v13  ;;  %v12058_v46 = vsel %vm12795_vm0, %v6065_v26, -1e+30 }
 0x78e   : > { %6174 = vadd.xlane.f32.xlu0 %v12001_v1  ;;  %5540 = vadd.xlane.f32.xlu2 %v12005_v31  ;;  %v5512_v62 = vmul.f32 1.442695, %v5490_v4 }
 0x790   : > { %v5467_v33 = vpop.xlane.xlu2 %5466  ;;  %5542 = vadd.xlane.f32.xlu1 %v12009_v21 }
 0x791   : > { %v5491_v54 = vsub.f32 %v11897_v36, %v5467_v33  ;;  %v12042_v36 = vsel %vm10517_vm14, %v5428_v6, -1e+30  ;;  %vm12820_vm14 = vmmov %vm12801_vm1 }
 0x793   : > { %v5514_v29 = vmul.f32 1.442695, %v5491_v54  ;;  %v5533_v24 = vpop.xlane.xlu0 %5532 }
 0x795   : > { %9331 = vpow2.f32 %v5514_v29 }
 0x796   : > { %5474 = vmax.xlane.f32.xlu0 %v12014_v56  ;;  %6112 = vmax.xlane.f32.xlu2 %v12018_v18  ;;  %9333 = vrcp.f32 %v11971_v40 }
 0x797   : > { %9335 = vrcp.f32 %v11918_v9 }
 0x798   : > { %v5649_v58 = vpop.permute.xlu2 %5648  ;;  %6178 = vadd.xlane.f32.xlu1 %v12026_v45  ;;  %9337 = vpow2.f32 %v5512_v62  ;;  %v12080_v62 = vpop.f32.mrf.mxu3 }
 0x799   : > { %5673 = vmatpush.bf16.msra.mxu1 %v5649_v58  ;;  %v12072_v58 = vsel %vm10549_vm13, %v6067_v19, -1e+30  ;;  %12819 = vst [vmem:[#allocation35_spill] sm:$0xff] %v12080_v62 }
 0x79b   : > { %v12051_v53 = vpop.eup %9331 }
 0x79c   : > { %v9334_v40 = vpop.eup %9333 }
 0x79d   : > { %v9336_v43 = vpop.eup %9335  ;;  %v6214_v60 = vmul.f32 %v9334_v40, %v11872_v30  ;;  %v5431_v30 = vpop.f32.mrf.mxu0 }
 0x79e   : > { %6110 = vmax.xlane.f32.xlu0 %v12032_v32  ;;  %5476 = vmax.xlane.f32.xlu2 %v12036_v49  ;;  %v12064_v9 = vpop.eup %9337  ;;  %v6215_v17 = vmul.f32 %v9336_v43, %v11848_v23  ;;  %v12078_v4 = vsel %vm12795_vm0, %v5431_v30, -1e+30  ;;  %vm12822_vm0 = vcmask 781824  }
 0x79f   : > { %vm12826_vm1 = vmmov %vm12822_vm0 }
 0x7a0   : > { %5478 = vmax.xlane.f32.xlu1 %v12042_v36  ;;  %v6230_v35 = vpack.c.bf16 %v6215_v17, %v6214_v60  ;;  %v12084_v40 = vpop.f32.mrf.mxu3  ;;  %vm12828_vm2 = vmmov %vm12822_vm0 }
 0x7a1   : > { %vm12830_vm4 = vmmov %vm12822_vm0 }
 0x7a2   : > { %vm12831_vm5 = vmmov %vm12822_vm0 }
 0x7a6   : > { %6180 = vadd.xlane.f32.xlu0 %v12049_v2  ;;  %5546 = vadd.xlane.f32.xlu2 %v12051_v53  ;;  %v6281_v16 = vpop.permute.xlu0 %6280 }
 0x7a7   : > { %6308 = vmatpush.bf16.msra.mxu3 %v6281_v16 }
 0x7a8   : > { %6114 = vmax.xlane.f32.xlu1 %v12058_v46 }
 0x7ae   : > { %5544 = vadd.xlane.f32.xlu0 %v12064_v9  ;;  %v6279_v33 = vpop.permute.xlu0 %6278 }
 0x7af   : > { %6309 = vmatpush.bf16.msra.mxu3 %v6279_v33  ;;  %v12088_v33 = vpop.f32.mrf.mxu3 }
 0x7b0   : > { %v5535_v14 = vpop.xlane.xlu1 %5534 }
 0x7b1   : > { %9339 = vrcp.f32 %v5535_v14 }
 0x7b2   : > { %6310 = vmatmul.bf16.vlgmr.msra.gmra.mxu3 %v6230_v35  ;;  %9341 = vrcp.f32 %v5533_v24 }
 0x7b3   : > { %v4508_v13 = vpop.f32.mrf.mxu1 }
 0x7b4   : > { %v4527_v54 = vpack.c.bf16 %v4508_v13, %v4508_v13 }
 0x7b6   : > { %4543 = vst.msk [vmem:[#allocation3 + $0x74] sm:$0xf] %vm12818_vm11, %v4527_v54  ;;  %6116 = vmax.xlane.f32.xlu0 %v12072_v58  ;;  %v5647_v23 = vpop.permute.xlu0 %5646  ;;  %vm12834_vm11 = vmmov %vm12822_vm0 }
 0x7b7   : > { %5674 = vmatpush.bf16.msra.mxu1 %v5647_v23  ;;  %v9340_v26 = vpop.eup %9339  ;;  %v12091_v24 = vpop.f32.mrf.mxu3 }
 0x7b8   : > { %v9342_v16 = vpop.eup %9341  ;;  %v5581_v43 = vmul.f32 %v9340_v26, %v11910_v61  ;;  %v5433_v61 = vpop.f32.mrf.mxu0 }
 0x7b9   : > { %v5580_v60 = vmul.f32 %v9342_v16, %v11900_v48 }
 0x7bb   : > { %v4510_v29 = vpop.f32.mrf.mxu1  ;;  %v5596_v34 = vpack.c.bf16 %v5581_v43, %v5580_v60 }
 0x7bc   : > { %v4528_v6 = vpack.c.bf16 %v4510_v29, %v4510_v29 }
 0x7be   : > { %4544 = vst.msk [vmem:[#allocation3 + $0x7c] sm:$0xf] %vm12820_vm14, %v4528_v6  ;;  %5480 = vmax.xlane.f32.xlu0 %v12078_v4  ;;  %vm12836_vm14 = vmmov %vm12822_vm0 }
 0x7bf   : > { %v12096_v14 = vpop.f32.mrf.mxu3 }
 0x7c8   : > { %v5645_v17 = vpop.permute.xlu1 %5644 }
 0x7c9   : > { %5675 = vmatpush.bf16.msra.mxu1 %v5645_v17  ;;  %v12105_v17 = vpop.f32.mrf.mxu3 }
 0x7cc   : > { %5676 = vmatmul.bf16.vlgmr.msra.gmra.mxu1 %v5596_v34 }
 0x7d1   : > { %v6103_v35 = vpop.xlane.xlu2 %6102 }
 0x7d2   : > { %v6126_v19 = vsub.f32 %v11929_v44, %v6103_v35  ;;  %v12102_v44 = vsel %vm10549_vm13, %v5433_v61, -1e+30  ;;  %vm4006_vm13 = vcmask 1044224  }
 0x7d4   : > { %v6150_v13 = vmul.f32 1.442695, %v6126_v19 }
 0x7d6   : > { %9343 = vpow2.f32 %v6150_v13 }
 0x7d9   : > { %v6173_v54 = vpop.xlane.xlu2 %6172 }
 0x7dc   : > { %v12093_v23 = vpop.eup %9343 }
 0x7dd   : > { %6182 = vadd.xlane.f32.xlu2 %v12093_v23 }
 0x7e1   : > { %v5471_v48 = vpop.xlane.xlu2 %5470  ;;  %v6105_v30 = vpop.xlane.xlu0 %6104 }
 0x7e2   : > { %v5493_v29 = vsub.f32 %v11939_v41, %v5471_v48  ;;  %v6127_v6 = vsub.f32 %v11943_v51, %v6105_v30 }
 0x7e4   : > { %v5518_v26 = vmul.f32 1.442695, %v5493_v29  ;;  %v6152_v16 = vmul.f32 1.442695, %v6127_v6 }
 0x7e5   : > { %5482 = vmax.xlane.f32.xlu2 %v12102_v44 }
 0x7e6   : > { %9345 = vpow2.f32 %v5518_v26 }
 0x7e7   : > { %9347 = vpow2.f32 %v6152_v16 }
 0x7e9   : > { %v5539_v43 = vpop.xlane.xlu2 %5538  ;;  %v5469_v60 = vpop.xlane.xlu0 %5468 }
 0x7ea   : > { %v5492_v34 = vsub.f32 %v11956_v52, %v5469_v60  ;;  %v12117_v52 = vpop.f32.mrf.mxu3 }
 0x7ec   : > { %v12108_v35 = vpop.eup %9345  ;;  %v5516_v41 = vmul.f32 1.442695, %v5492_v34 }
 0x7ed   : > { %v12110_v51 = vpop.eup %9347  ;;  %5550 = vadd.xlane.f32.xlu0 %v12108_v35 }
 0x7ee   : > { %9349 = vpow2.f32 %v5516_v41  ;;  %6184 = vadd.xlane.f32.xlu1 %v12110_v51 }
 0x7ef   : > { %9351 = vrcp.f32 %v5539_v43 }
 0x7f0   : > { %9353 = vrcp.f32 %v6173_v54 }
 0x7f1   : > { %v6109_v28 = vpop.xlane.xlu2 %6108  ;;  %v5537_v19 = vpop.xlane.xlu0 %5536 }
 0x7f2   : > { %v6129_v13 = vsub.f32 %v11969_v15, %v6109_v28  ;;  %9355 = vrcp.f32 %v5537_v19  ;;  %v12128_v12 = vpop.f32.mrf.mxu3 }
 0x7f3   : > { %v6171_v61 = vpop.xlane.xlu1 %6170 }
 0x7f4   : > { %v12115_v48 = vpop.eup %9349  ;;  %v6156_v30 = vmul.f32 1.442695, %v6129_v13  ;;  %9357 = vrcp.f32 %v6171_v61 }
 0x7f5   : > { %v9352_v29 = vpop.eup %9351 }
 0x7f6   : > { %9359 = vpow2.f32 %v6156_v30  ;;  %5548 = vadd.xlane.f32.xlu1 %v12115_v48  ;;  %v9354_v6 = vpop.eup %9353  ;;  %v5583_v15 = vmul.f32 %v9352_v29, %v11952_v11 }
 0x7f7   : > { %v6217_v13 = vmul.f32 %v9354_v6, %v11932_v47 }
 0x7f8   : > { %v9356_v26 = vpop.eup %9355 }
 0x7f9   : > { %v6177_v16 = vpop.xlane.xlu2 %6176  ;;  %v6107_v54 = vpop.xlane.xlu0 %6106  ;;  %v5582_v43 = vmul.f32 %v9356_v26, %v11965_v3 }
 0x7fa   : > { %v9358_v60 = vpop.eup %9357  ;;  %v6128_v34 = vsub.f32 %v11990_v0, %v6107_v54  ;;  %v12137_v6 = vpop.f32.mrf.mxu3 }
 0x7fb   : > { %v5473_v41 = vpop.xlane.xlu1 %5472  ;;  %v5597_v28 = vpack.c.bf16 %v5583_v15, %v5582_v43  ;;  %v6216_v19 = vmul.f32 %v9358_v60, %v11977_v10 }
 0x7fc   : > { %v12125_v61 = vpop.eup %9359  ;;  %v6154_v30 = vmul.f32 1.442695, %v6128_v34  ;;  %v5494_v62 = vsub.f32 %v11996_v59, %v5473_v41 }
 0x7fd   : > { %5681 = vmatmul.bf16.gmra.mxu1 %v5597_v28  ;;  %v6231_v39 = vpack.c.bf16 %v6217_v13, %v6216_v19 }
 0x7fe   : > { %9361 = vpow2.f32 %v6154_v30  ;;  %v5520_v11 = vmul.f32 1.442695, %v5494_v62  ;;  %6188 = vadd.xlane.f32.xlu1 %v12125_v61 }
 0x7ff   : > { %6315 = vmatmul.bf16.gmra.mxu3 %v6231_v39 }
 0x800   : > { %9363 = vpow2.f32 %v5520_v11 }
 0x801   : > { %9365 = vrcp.f32 %v6177_v16  ;;  %v5541_v3 = vpop.xlane.xlu2 %5540  ;;  %v6175_v10 = vpop.xlane.xlu0 %6174 }
 0x802   : > { %9367 = vrcp.f32 %v5541_v3 }
 0x803   : > { %9369 = vrcp.f32 %v6175_v10  ;;  %v5543_v47 = vpop.xlane.xlu1 %5542 }
 0x804   : > { %v12131_v0 = vpop.eup %9361  ;;  %9371 = vrcp.f32 %v5543_v47 }
 0x805   : > { %6186 = vadd.xlane.f32.xlu2 %v12131_v0 }
 0x806   : > { %v12134_v59 = vpop.eup %9363 }
 0x807   : > { %v9366_v29 = vpop.eup %9365  ;;  %5552 = vadd.xlane.f32.xlu0 %v12134_v59 }
 0x808   : > { %v9368_v62 = vpop.eup %9367  ;;  %v6219_v19 = vmul.f32 %v9366_v29, %v11986_v20 }
 0x809   : > { %v9370_v39 = vpop.eup %9369  ;;  %v6113_v26 = vpop.xlane.xlu2 %6112  ;;  %v5584_v41 = vmul.f32 %v9368_v62, %v12005_v31 }
 0x80a   : > { %v5475_v16 = vpop.xlane.xlu0 %5474  ;;  %v9372_v54 = vpop.eup %9371  ;;  %v6131_v43 = vsub.f32 %v12018_v18, %v6113_v26  ;;  %v6218_v60 = vmul.f32 %v9370_v39, %v12001_v1 }
 0x80b   : > { %v5495_v15 = vsub.f32 %v12014_v56, %v5475_v16  ;;  %v6179_v34 = vpop.xlane.xlu1 %6178  ;;  %v5585_v28 = vmul.f32 %v9372_v54, %v12009_v21  ;;  %v12145_v18 = vpop.f32.mrf.mxu3 }
 0x80c   : > { %v6160_v13 = vmul.f32 1.442695, %v6131_v43  ;;  %v6232_v3 = vpack.c.bf16 %v6219_v19, %v6218_v60 }
 0x80d   : > { %v5522_v30 = vmul.f32 1.442695, %v5495_v15  ;;  %v5598_v11 = vpack.c.bf16 %v5585_v28, %v5584_v41 }
 0x80e   : > { %9373 = vpow2.f32 %v6160_v13 }
 0x80f   : > { %9375 = vpow2.f32 %v5522_v30  ;;  %5686 = vmatmul.bf16.gmra.mxu1 %v5598_v11  ;;  %6320 = vmatmul.bf16.gmra.mxu3 %v6232_v3 }
 0x811   : > { %v5477_v56 = vpop.xlane.xlu2 %5476 }
 0x812   : > { %v6111_v10 = vpop.xlane.xlu0 %6110  ;;  %v5496_v1 = vsub.f32 %v12036_v49, %v5477_v56 }
 0x813   : > { %v6130_v31 = vsub.f32 %v12032_v32, %v6111_v10  ;;  %v5479_v47 = vpop.xlane.xlu1 %5478  ;;  %v12156_v49 = vpop.f32.mrf.mxu3 }
 0x814   : > { %v12149_v21 = vpop.eup %9373  ;;  %v5524_v20 = vmul.f32 1.442695, %v5496_v1  ;;  %v5497_v39 = vsub.f32 %v12042_v36, %v5479_v47 }
 0x815   : > { %v6158_v29 = vmul.f32 1.442695, %v6130_v31  ;;  %v12151_v62 = vpop.eup %9375  ;;  %6192 = vadd.xlane.f32.xlu0 %v12149_v21 }
 0x816   : > { %9377 = vpow2.f32 %v5524_v20  ;;  %5554 = vadd.xlane.f32.xlu2 %v12151_v62  ;;  %v5526_v32 = vmul.f32 1.442695, %v5497_v39 }
 0x817   : > { %9379 = vpow2.f32 %v6158_v29 }
 0x818   : > { %9381 = vrcp.f32 %v6179_v34 }
 0x819   : > { %v5547_v43 = vpop.xlane.xlu2 %5546 }
 0x81a   : > { %v6181_v26 = vpop.xlane.xlu0 %6180 }
 0x81b   : > { %9383 = vrcp.f32 %v6181_v26  ;;  %v6115_v16 = vpop.xlane.xlu1 %6114  ;;  %v12165_v19 = vpop.f32.mrf.mxu3 }
 0x81c   : > { %v12158_v54 = vpop.eup %9377  ;;  %v6132_v15 = vsub.f32 %v12058_v46, %v6115_v16  ;;  %9385 = vpow2.f32 %v5526_v32 }
 0x81d   : > { %v12161_v60 = vpop.eup %9379  ;;  %9387 = vrcp.f32 %v5547_v43 }
 0x81e   : > { %v6162_v41 = vmul.f32 1.442695, %v6132_v15  ;;  %5556 = vadd.xlane.f32.xlu2 %v12158_v54  ;;  %6190 = vadd.xlane.f32.xlu1 %v12161_v60  ;;  %v9382_v36 = vpop.eup %9381  ;;  %v3926_v15 = vpack.c.bf16 %v11800_v37, %v11800_v37 }
 0x81f   : > { %v6220_v13 = vmul.f32 %v9382_v36, %v12026_v45 }
 0x820   : > { %9389 = vpow2.f32 %v6162_v41 }
 0x821   : > { %v9384_v34 = vpop.eup %9383 }
 0x822   : > { %v5545_v28 = vpop.xlane.xlu0 %5544  ;;  %v6221_v46 = vmul.f32 %v9384_v34, %v12049_v2  ;;  %v12169_v30 = vpop.eup %9385  ;;  %v5084_v34 = vpack.c.bf16 %v12088_v33, %v12088_v33 }
 0x823   : > { %9391 = vrcp.f32 %v5545_v28  ;;  %v9388_v3 = vpop.eup %9387  ;;  %v12178_v20 = vpop.f32.mrf.mxu3  ;;  %v3927_v28 = vpack.c.bf16 %v11806_v50, %v11806_v50 }
 0x824   : > { %v6233_v11 = vpack.c.bf16 %v6221_v46, %v6220_v13  ;;  %v5587_v47 = vmul.f32 %v9388_v3, %v12051_v53 }
 0x826   : > { %v12171_v56 = vpop.eup %9389  ;;  %5558 = vadd.xlane.f32.xlu1 %v12169_v30  ;;  %6325 = vmatmul.bf16.gmra.mxu3 %v6233_v11 }
 0x827   : > { %6194 = vadd.xlane.f32.xlu0 %v12171_v56 }
 0x829   : > { %v9392_v10 = vpop.eup %9391 }
 0x82a   : > { %v6117_v1 = vpop.xlane.xlu0 %6116  ;;  %v5586_v31 = vmul.f32 %v9392_v10, %v12064_v9 }
 0x82b   : > { %v6133_v45 = vsub.f32 %v12072_v58, %v6117_v1  ;;  %v12183_v16 = vpop.f32.mrf.mxu3 }
 0x82c   : > { %v5599_v2 = vpack.c.bf16 %v5587_v47, %v5586_v31  ;;  %v3929_v31 = vpack.c.bf16 %v11826_v5, %v11826_v5  ;;  %v3928_v47 = vpack.c.bf16 %v11819_v63, %v11819_v63  ;;  %v5086_v63 = vpack.c.bf16 %v12096_v14, %v12096_v14 }
 0x82d   : > { %v6164_v29 = vmul.f32 1.442695, %v6133_v45 }
 0x82e   : > { %5691 = vmatmul.bf16.gmra.mxu1 %v5599_v2 }
 0x82f   : > { %9393 = vpow2.f32 %v6164_v29 }
 0x832   : > { %v5481_v39 = vpop.xlane.xlu0 %5480 }
 0x833   : > { %v5498_v26 = vsub.f32 %v12078_v4, %v5481_v39  ;;  %v12189_v9 = vpop.f32.mrf.mxu3 }
 0x835   : > { %v12181_v32 = vpop.eup %9393  ;;  %v5528_v43 = vmul.f32 1.442695, %v5498_v26 }
 0x836   : > { %6196 = vadd.xlane.f32.xlu2 %v12181_v32 }
 0x837   : > { %9395 = vpow2.f32 %v5528_v43 }
 0x83b   : > { %v12191_v58 = vpop.f32.mrf.mxu3 }
 0x83d   : > { %v12186_v53 = vpop.eup %9395 }
 0x83e   : > { %5560 = vadd.xlane.f32.xlu1 %v12186_v53 }
 0x843   : > { %v12196_v41 = vpop.f32.mrf.mxu3 }
 0x849   : > { %v5677_v4 = vpop.f32.mrf.mxu1 }
 0x84b   : > { %v6311_v13 = vpop.f32.mrf.mxu3 }
 0x84c   : > { %v6351_v3 = vpack.c.bf16 %v6311_v13, %v6311_v13 }
 0x84e   : > { %3958 = vrot.lane.b32.xlu2 %v3926_v15, %s9601_s21 }
 0x850   : > { %v6183_v36 = vpop.xlane.xlu2 %6182 }
 0x851   : > { %v5679_v11 = vpop.f32.mrf.mxu1 }
 0x852   : > { %v5718_v1 = vpack.c.bf16 %v5679_v11, %v5679_v11 }
 0x853   : > { %v6313_v14 = vpop.f32.mrf.mxu3 }
 0x856   : > { %5117 = vrot.lane.b32.xlu2 %v5084_v34, %s9603_s6 }
 0x857   : > { %3960 = vrot.lane.b32.xlu1 %v3927_v28, %s9601_s21 }
 0x858   : > { %v5483_v46 = vpop.xlane.xlu2 %5482 }
 0x859   : > { %v5499_v37 = vsub.f32 %v12102_v44, %v5483_v46 }
 0x85b   : > { %v5530_v10 = vmul.f32 1.442695, %v5499_v37 }
 0x85d   : > { %9397 = vpow2.f32 %v5530_v10 }
 0x85e   : > { %6383 = vrot.lane.b32.xlu2 %v6351_v3, %s9601_s21  ;;  %9399 = vrcp.f32 %v6183_v36 }
 0x85f   : > { %5751 = vrot.lane.b32.xlu1 %v5718_v1, %s9602_s26 }
 0x860   : > { %v5551_v44 = vpop.xlane.xlu0 %5550 }
 0x861   : > { %v6185_v33 = vpop.xlane.xlu1 %6184 }
 0x862   : > { %9401 = vrcp.f32 %v6185_v33 }
 0x863   : > { %v12207_v50 = vpop.eup %9397  ;;  %9403 = vrcp.f32 %v5551_v44 }
 0x864   : > { %5562 = vadd.xlane.f32.xlu0 %v12207_v50  ;;  %v9400_v45 = vpop.eup %9399 }
 0x865   : > { %v6222_v39 = vmul.f32 %v9400_v45, %v12093_v23  ;;  %v5083_v23 = vpack.c.bf16 %v12084_v40, %v12084_v40 }
 0x866   : > { %3964 = vrot.lane.b32.xlu2 %v3929_v31, %s9601_s21 }
 0x867   : > { %3962 = vrot.lane.b32.xlu1 %v3928_v47, %s9601_s21  ;;  %v6352_v47 = vpack.c.bf16 %v6313_v14, %v6313_v14 }
 0x868   : > { %v9402_v2 = vpop.eup %9401 }
 0x869   : > { %v5549_v29 = vpop.xlane.xlu1 %5548  ;;  %v6223_v26 = vmul.f32 %v9402_v2, %v12110_v51  ;;  %v9404_v43 = vpop.eup %9403 }
 0x86a   : > { %9405 = vrcp.f32 %v5549_v29  ;;  %v5589_v34 = vmul.f32 %v9404_v43, %v12108_v35  ;;  %v5085_v29 = vpack.c.bf16 %v12091_v24, %v12091_v24  ;;  %v8428_v24 = vld [vmem:[#allocation9 + $0x70] sm:$0xf] }
 0x86b   : > { %v6234_v5 = vpack.c.bf16 %v6223_v26, %v6222_v39 }
 0x86d   : > { %6330 = vmatmul.bf16.gmra.mxu3 %v6234_v5 }
 0x86f   : > { %5121 = vrot.lane.b32.xlu1 %v5086_v63, %s9603_s6 }
 0x870   : > { %v9406_v15 = vpop.eup %9405 }
 0x871   : > { %v5588_v36 = vmul.f32 %v9406_v15, %v12115_v48  ;;  %v6189_v13 = vpop.xlane.xlu1 %6188  ;;  %v5717_v48 = vpack.c.bf16 %v5677_v4, %v5677_v4 }
 0x872   : > { %9407 = vrcp.f32 %v6189_v13  ;;  %v8823_v13 = vld [vmem:[#allocation9 + $0x74] sm:$0xf0] }
 0x873   : > { %v5600_v28 = vpack.c.bf16 %v5589_v34, %v5588_v36  ;;  %v5087_v36 = vpack.c.bf16 %v12105_v17, %v12105_v17  ;;  %v8429_v14 = vor.u32 %v8823_v13, %v8428_v24  ;;  %v8422_v17 = vld [vmem:[#allocation9 + $0x68] sm:$0xf0]  ;;  %v8396_v13 = vld [vmem:[#allocation9 + $0x30] sm:$0xf] }
 0x875   : > { %5696 = vmatmul.bf16.gmra.mxu1 %v5600_v28  ;;  %6741 = vmatpush.bf16.msrb.mxu0 %v8429_v14 }
 0x878   : > { %5115 = vrot.lane.b32.xlu0 %v5083_v23, %s9603_s6  ;;  %v6187_v51 = vpop.xlane.xlu2 %6186  ;;  %v9408_v37 = vpop.eup %9407  ;;  %v8822_v23 = vld [vmem:[#allocation9 + $0x74] sm:$0xf] }
 0x879   : > { %9409 = vrcp.f32 %v6187_v51  ;;  %v6225_v10 = vmul.f32 %v9408_v37, %v12125_v61 }
 0x87a   : > { %v5682_v46 = vpop.f32.mrf.mxu1  ;;  %v5553_v31 = vpop.xlane.xlu0 %5552 }
 0x87b   : > { %v5719_v11 = vpack.c.bf16 %v5682_v46, %v5682_v46  ;;  %9411 = vrcp.f32 %v5553_v31  ;;  %v8430_v46 = vld [vmem:[#allocation9 + $0x78] sm:$0xf0]  ;;  %v8412_v31 = vld [vmem:[#allocation9 + $0x50] sm:$0xf] }
 0x87c   : > { %v8433_v37 = vor.u32 %v8822_v23, %v8430_v46  ;;  %v8815_v23 = vld [vmem:[#allocation9 + $0x34] sm:$0xf0]  ;;  %v8814_v46 = vld [vmem:[#allocation9 + $0x34] sm:$0xf] }
 0x87d   : > { %5753 = vrot.lane.b32.xlu2 %v5719_v11, %s9602_s26  ;;  %v8821_v11 = vld [vmem:[#allocation9 + $0x64] sm:$0xf0] }
 0x87e   : > { %6839 = vmatpush.bf16.msrb.mxu2 %v8433_v37  ;;  %v5089_v37 = vpack.c.bf16 %v12128_v12, %v12128_v12 }
 0x87f   : > { %v9410_v3 = vpop.eup %9409 }
 0x880   : > { %5749 = vrot.lane.b32.xlu0 %v5717_v48, %s9602_s26  ;;  %v6224_v35 = vmul.f32 %v9410_v3, %v12131_v0  ;;  %v3931_v0 = vpack.c.bf16 %v11859_v7, %v11859_v7  ;;  %v8820_v48 = vld [vmem:[#allocation9 + $0x64] sm:$0xf] }
 0x881   : > { %v9412_v61 = vpop.eup %9411 }
 0x882   : > { %v6316_v40 = vpop.f32.mrf.mxu3  ;;  %v6235_v1 = vpack.c.bf16 %v6225_v10, %v6224_v35  ;;  %v5684_v44 = vpop.f32.mrf.mxu1  ;;  %v5590_v43 = vmul.f32 %v9412_v61, %v12134_v59  ;;  %v8420_v59 = vld [vmem:[#allocation9 + $0x60] sm:$0xf] }
 0x883   : > { %v6353_v33 = vpack.c.bf16 %v6316_v40, %v6316_v40  ;;  %v8421_v35 = vor.u32 %v8821_v11, %v8420_v59  ;;  %v8425_v40 = vor.u32 %v8820_v48, %v8422_v17  ;;  %v8398_v59 = vld [vmem:[#allocation9 + $0x38] sm:$0xf0] }
 0x884   : > { %6335 = vmatmul.bf16.gmra.mxu3 %v6235_v1  ;;  %v8401_v17 = vor.u32 %v8814_v46, %v8398_v59  ;;  %v8492_v59 = vld [vmem:[#allocation9 + $0xf0] sm:$0xf] }
 0x885   : > { %6387 = vrot.lane.b32.xlu1 %v6353_v33, %s9601_s21  ;;  %6742 = vmatpush.bf16.msrb.mxu0 %v8421_v35  ;;  %v5088_v35 = vpack.c.bf16 %v12117_v52, %v12117_v52 }
 0x886   : > { %6840 = vmatpush.bf16.msrb.mxu2 %v8425_v40 }
 0x888   : > { %6385 = vrot.lane.b32.xlu0 %v6352_v47, %s9601_s21  ;;  %v6193_v39 = vpop.xlane.xlu0 %6192  ;;  %v8819_v47 = vld [vmem:[#allocation9 + $0x54] sm:$0xf0] }
 0x889   : > { %v5555_v4 = vpop.xlane.xlu2 %5554 }
 0x88a   : > { %9413 = vrcp.f32 %v5555_v4  ;;  %v6318_v45 = vpop.f32.mrf.mxu3  ;;  %v8818_v4 = vld [vmem:[#allocation9 + $0x54] sm:$0xf] }
 0x88b   : > { %v6354_v2 = vpack.c.bf16 %v6318_v45, %v6318_v45  ;;  %9415 = vrcp.f32 %v6193_v39  ;;  %v8413_v39 = vor.u32 %v8819_v47, %v8412_v31  ;;  %v8811_v31 = vld [vmem:[#allocation9 + $0x14] sm:$0xf0]  ;;  %v8810_v47 = vld [vmem:[#allocation9 + $0x14] sm:$0xf] }
 0x88c   : > { %v5687_v26 = vpop.f32.mrf.mxu1 }
 0x88d   : > { %6389 = vrot.lane.b32.xlu2 %v6354_v2, %s9601_s21  ;;  %3968 = vrot.lane.b32.xlu1 %v3931_v0, %s9601_s21  ;;  %v5721_v28 = vpack.c.bf16 %v5687_v26, %v5687_v26  ;;  %v8414_v2 = vld [vmem:[#allocation9 + $0x58] sm:$0xf0] }
 0x88e   : > { %6743 = vmatpush.bf16.msrb.mxu0 %v8413_v39  ;;  %v8374_v39 = vld [vmem:[#allocation9 + $0x8] sm:$0xf0] }
 0x890   : > { %v9414_v5 = vpop.eup %9413  ;;  %5119 = vrot.lane.b32.xlu0 %v5085_v29, %s9603_s6 }
 0x891   : > { %v6191_v63 = vpop.xlane.xlu1 %6190  ;;  %v5591_v7 = vmul.f32 %v9414_v5, %v12151_v62  ;;  %v5557_v51 = vpop.xlane.xlu2 %5556  ;;  %v5720_v62 = vpack.c.bf16 %v5684_v44, %v5684_v44  ;;  %v8417_v5 = vor.u32 %v8818_v4, %v8414_v2  ;;  %v5090_v4 = vpack.c.bf16 %v12137_v6, %v12137_v6  ;;  %v8809_v2 = vld [vmem:[#allocation9 + $0x4] sm:$0xf0] }
 0x892   : > { %v12241_v15 = vpop.f32.mrf.mxu3  ;;  %9417 = vrcp.f32 %v6191_v63  ;;  %v9416_v3 = vpop.eup %9415  ;;  %v8404_v63 = vld [vmem:[#allocation9 + $0x40] sm:$0xf] }
 0x893   : > { %v5601_v34 = vpack.c.bf16 %v5591_v7, %v5590_v43  ;;  %9419 = vrcp.f32 %v5557_v51  ;;  %v6227_v0 = vmul.f32 %v9416_v3, %v12149_v21  ;;  %v8817_v43 = vld [vmem:[#allocation9 + $0x44] sm:$0xf0]  ;;  %v8816_v7 = vld [vmem:[#allocation9 + $0x44] sm:$0xf]  ;;  %v8406_v21 = vld [vmem:[#allocation9 + $0x48] sm:$0xf0]  ;;  %6841 = vmatpush.bf16.msrb.mxu2 %v8417_v5 }
 0x894   : > { %v5689_v10 = vpop.f32.mrf.mxu1  ;;  %v8409_v24 = vor.u32 %v8816_v7, %v8406_v21  ;;  %v8813_v3 = vld [vmem:[#allocation9 + $0x24] sm:$0xf0] }
 0x895   : > { %5701 = vmatmul.bf16.gmra.mxu1 %v5601_v34  ;;  %5123 = vrot.lane.b32.xlu2 %v5087_v36, %s9603_s6  ;;  %v5722_v61 = vpack.c.bf16 %v5689_v10, %v5689_v10  ;;  %v3930_v34 = vpack.c.bf16 %v11842_v22, %v11842_v22  ;;  %v3932_v22 = vpack.c.bf16 %v11874_v38, %v11874_v38  ;;  %v8390_v38 = vld [vmem:[#allocation9 + $0x28] sm:$0xf0] }
 0x896   : > { %5757 = vrot.lane.b32.xlu1 %v5721_v28, %s9602_s26 }
 0x897   : > { %6842 = vmatpush.bf16.msrb.mxu2 %v8409_v24  ;;  %v3934_v24 = vpack.c.bf16 %v11962_v25, %v11962_v25  ;;  %v8838_v25 = vld [vmem:[#allocation9 + $0xf4] sm:$0xf] }
 0x898   : > { %5755 = vrot.lane.b32.xlu0 %v5720_v62, %s9602_s26  ;;  %v9418_v1 = vpop.eup %9417  ;;  %v8397_v62 = vor.u32 %v8815_v23, %v8396_v13  ;;  %v3935_v13 = vpack.c.bf16 %v11984_v57, %v11984_v57 }
 0x899   : > { %v5559_v33 = vpop.xlane.xlu1 %5558  ;;  %v6226_v45 = vmul.f32 %v9418_v1, %v12161_v60  ;;  %v9420_v36 = vpop.eup %9419  ;;  %v8405_v60 = vor.u32 %v8817_v43, %v8404_v63 }
 0x89a   : > { %9421 = vrcp.f32 %v5559_v33  ;;  %v6323_v44 = vpop.f32.mrf.mxu3  ;;  %v5592_v51 = vmul.f32 %v9420_v36, %v12158_v54  ;;  %v6195_v48 = vpop.xlane.xlu0 %6194  ;;  %v8388_v54 = vld [vmem:[#allocation9 + $0x20] sm:$0xf]  ;;  %v8380_v33 = vld [vmem:[#allocation9 + $0x10] sm:$0xf] }
 0x89b   : > { %v6356_v29 = vpack.c.bf16 %v6323_v44, %v6323_v44  ;;  %v6236_v26 = vpack.c.bf16 %v6227_v0, %v6226_v45  ;;  %6744 = vmatpush.bf16.msrb.mxu0 %v8405_v60  ;;  %9423 = vrcp.f32 %v6195_v48  ;;  %v8389_v10 = vor.u32 %v8813_v3, %v8388_v54  ;;  %6843 = vmatpush.bf16.msrb.mxu2 %v8401_v17  ;;  %v8382_v44 = vld [vmem:[#allocation9 + $0x18] sm:$0xf0]  ;;  %v8372_v0 = vld [vmem:[#allocation9] sm:$0xf]  ;;  %v8837_v17 = vld [vmem:[#allocation9 + $0xe4] sm:$0xf0] }
 0x89c   : > { %v8381_v52 = vor.u32 %v8811_v31, %v8380_v33  ;;  %v8385_v45 = vor.u32 %v8810_v47, %v8382_v44  ;;  %v8373_v63 = vor.u32 %v8809_v2, %v8372_v0  ;;  %v8484_v48 = vld [vmem:[#allocation9 + $0xe0] sm:$0xf]  ;;  %v8836_v54 = vld [vmem:[#allocation9 + $0xe4] sm:$0xf]  ;;  %v8478_v33 = vld [vmem:[#allocation9 + $0xd8] sm:$0xf0]  ;;  %v5091_v47 = vpack.c.bf16 %v12145_v18, %v12145_v18 }
 0x89d   : > { %5759 = vrot.lane.b32.xlu2 %v5722_v61, %s9602_s26  ;;  %6340 = vmatmul.bf16.gmra.mxu3 %v6236_v26  ;;  %v6355_v26 = vpack.c.bf16 %v12241_v15, %v12241_v15  ;;  %v8468_v0 = vld [vmem:[#allocation9 + $0xc0] sm:$0xf]  ;;  %v8833_v2 = vld [vmem:[#allocation9 + $0xc4] sm:$0xf0]  ;;  %v8831_v18 = vld [vmem:[#allocation9 + $0xb4] sm:$0xf0] }
 0x89e   : > { %6393 = vrot.lane.b32.xlu1 %v6356_v29, %s9601_s21  ;;  %v8808_v29 = vld [vmem:[#allocation9 + $0x4] sm:$0xf] }
 0x89f   : > { %6745 = vmatpush.bf16.msrb.mxu0 %v8397_v62 }
 0x8a0   : > { %v9422_v28 = vpop.eup %9421  ;;  %3966 = vrot.lane.b32.xlu0 %v3930_v34, %s9601_s21  ;;  %v8377_v34 = vor.u32 %v8808_v29, %v8374_v39  ;;  %v8469_v29 = vor.u32 %v8833_v2, %v8468_v0  ;;  %v8470_v39 = vld [vmem:[#allocation9 + $0xc8] sm:$0xf0] }
 0x8a1   : > { %v5593_v14 = vmul.f32 %v9422_v28, %v12169_v30  ;;  %v8812_v30 = vld [vmem:[#allocation9 + $0x24] sm:$0xf]  ;;  %v9424_v61 = vpop.eup %9423 }
 0x8a2   : > { %v8393_v40 = vor.u32 %v8812_v30, %v8390_v38  ;;  %v6228_v7 = vmul.f32 %v9424_v61, %v12171_v56  ;;  %v3933_v56 = vpack.c.bf16 %v11880_v42, %v11880_v42  ;;  %v8832_v61 = vld [vmem:[#allocation9 + $0xc4] sm:$0xf] }
 0x8a3   : > { %v5602_v11 = vpack.c.bf16 %v5593_v14, %v5592_v51  ;;  %6746 = vmatpush.bf16.msrb.mxu0 %v8389_v10  ;;  %v5092_v14 = vpack.c.bf16 %v12156_v49, %v12156_v49  ;;  %v8485_v49 = vor.u32 %v8837_v17, %v8484_v48  ;;  %v8476_v10 = vld [vmem:[#allocation9 + $0xd0] sm:$0xf] }
 0x8a4   : > { %6844 = vmatpush.bf16.msrb.mxu2 %v8393_v40  ;;  %v8834_v40 = vld [vmem:[#allocation9 + $0xd4] sm:$0xf] }
 0x8a5   : > { %5706 = vmatmul.bf16.gmra.mxu1 %v5602_v11  ;;  %3970 = vrot.lane.b32.xlu2 %v3932_v22, %s9601_s21  ;;  %v8839_v22 = vld [vmem:[#allocation9 + $0xf4] sm:$0xf0]  ;;  %v8494_v11 = vld [vmem:[#allocation9 + $0xf8] sm:$0xf0]  ;;  %v8481_v31 = vor.u32 %v8834_v40, %v8478_v33 }
 0x8a6   : > { %5127 = vrot.lane.b32.xlu1 %v5089_v37, %s9603_s6  ;;  %v8493_v57 = vor.u32 %v8839_v22, %v8492_v59  ;;  %v8497_v37 = vor.u32 %v8838_v25, %v8494_v11  ;;  %v8446_v59 = vld [vmem:[#allocation9 + $0x98] sm:$0xf0] }
 0x8a7   : > { %6747 = vmatpush.bf16.msrb.mxu0 %v8381_v52 }
 0x8a8   : > { %5125 = vrot.lane.b32.xlu0 %v5088_v35, %s9603_s6  ;;  %6845 = vmatpush.bf16.msrb.mxu2 %v8385_v45  ;;  %v8486_v35 = vld [vmem:[#allocation9 + $0xe8] sm:$0xf0] }
 0x8a9   : > { %v6197_v12 = vpop.xlane.xlu2 %6196  ;;  %v6326_v6 = vpop.f32.mrf.mxu3  ;;  %6790 = vmatpush.bf16.msrb.mxu1 %v8493_v57  ;;  %6888 = vmatpush.bf16.msrb.mxu3 %v8497_v37  ;;  %v8489_v38 = vor.u32 %v8836_v54, %v8486_v35  ;;  %v8824_v35 = vld [vmem:[#allocation9 + $0x84] sm:$0xf] }
 0x8aa   : > { %9425 = vrcp.f32 %v6197_v12  ;;  %v6357_v28 = vpack.c.bf16 %v6326_v6, %v6326_v6  ;;  %v8835_v12 = vld [vmem:[#allocation9 + $0xd4] sm:$0xf0] }
 0x8ab   : > { %v5692_v1 = vpop.f32.mrf.mxu1  ;;  %6748 = vmatpush.bf16.msrb.mxu0 %v8373_v63  ;;  %v8830_v63 = vld [vmem:[#allocation9 + $0xb4] sm:$0xf] }
 0x8ac   : > { %6846 = vmatpush.bf16.msrb.mxu2 %v8377_v34  ;;  %v5723_v23 = vpack.c.bf16 %v5692_v1, %v5692_v1  ;;  %v8477_v1 = vor.u32 %v8835_v12, %v8476_v10 }
 0x8ad   : > { %5129 = vrot.lane.b32.xlu2 %v5090_v4, %s9603_s6  ;;  %6791 = vmatpush.bf16.msrb.mxu1 %v8485_v49 }
 0x8ae   : > { %6889 = vmatpush.bf16.msrb.mxu3 %v8489_v38  ;;  %v8438_v38 = vld [vmem:[#allocation9 + $0x88] sm:$0xf0] }
 0x8b0   : > { %v9426_v5 = vpop.eup %9425  ;;  %6391 = vrot.lane.b32.xlu0 %v6355_v26, %s9601_s21  ;;  %v8473_v26 = vor.u32 %v8832_v61, %v8470_v39 }
 0x8b1   : > { %v3959_v43 = vpop.permute.xlu2 %3958  ;;  %v6229_v36 = vmul.f32 %v9426_v5, %v12181_v32  ;;  %v5561_v51 = vpop.xlane.xlu1 %5560  ;;  %6792 = vmatpush.bf16.msrb.mxu1 %v8477_v1  ;;  %v8460_v5 = vld [vmem:[#allocation9 + $0xb0] sm:$0xf] }
 0x8b2   : > { %4007 = vst.msk [vmem:[#allocation3] sm:$0xf] %vm4006_vm13, %v3959_v43  ;;  %v6328_v46 = vpop.f32.mrf.mxu3  ;;  %6890 = vmatpush.bf16.msrb.mxu3 %v8481_v31  ;;  %9427 = vrcp.f32 %v5561_v51  ;;  %v8461_v6 = vor.u32 %v8831_v18, %v8460_v5  ;;  %v8462_v43 = vld [vmem:[#allocation9 + $0xb8] sm:$0xf0]  ;;  %v8826_v51 = vld [vmem:[#allocation9 + $0x94] sm:$0xf]  ;;  %v3936_v18 = vpack.c.bf16 %v12003_v27, %v12003_v27 }
 0x8b3   : > { %v5694_v21 = vpop.f32.mrf.mxu1  ;;  %v6237_v60 = vpack.c.bf16 %v6229_v36, %v6228_v7  ;;  %v6358_v62 = vpack.c.bf16 %v6328_v46, %v6328_v46  ;;  %v8465_v36 = vor.u32 %v8830_v63, %v8462_v43  ;;  %v8449_v11 = vor.u32 %v8826_v51, %v8446_v59 }
 0x8b4   : > { %v5724_v15 = vpack.c.bf16 %v5694_v21, %v5694_v21  ;;  %v8452_v21 = vld [vmem:[#allocation9 + $0xa0] sm:$0xf]  ;;  %v5093_v63 = vpack.c.bf16 %v12165_v19, %v12165_v19 }
 0x8b5   : > { %6345 = vmatmul.bf16.gmra.mxu3 %v6237_v60  ;;  %6395 = vrot.lane.b32.xlu2 %v6357_v28, %s9601_s21  ;;  %v8829_v60 = vld [vmem:[#allocation9 + $0xa4] sm:$0xf0]  ;;  %v8828_v28 = vld [vmem:[#allocation9 + $0xa4] sm:$0xf] }
 0x8b6   : > { %5763 = vrot.lane.b32.xlu1 %v5724_v15, %s9602_s26  ;;  %6793 = vmatpush.bf16.msrb.mxu1 %v8469_v29 }
 0x8b7   : > { %6891 = vmatpush.bf16.msrb.mxu3 %v8473_v26 }
 0x8b8   : > { %3972 = vrot.lane.b32.xlu0 %v3933_v56, %s9601_s21  ;;  %v9428_v15 = vpop.eup %9427  ;;  %v8453_v56 = vor.u32 %v8829_v60, %v8452_v21 }
 0x8b9   : > { %v5118_v32 = vpop.permute.xlu2 %5117  ;;  %v8308_v52 = vld [vmem:[#allocation3] sm:$0xf]  ;;  %v5594_v25 = vmul.f32 %v9428_v15, %v12186_v53  ;;  %v8441_v53 = vor.u32 %v8824_v35, %v8438_v38 }
 0x8ba   : > { %5164 = vst.msk [vmem:[#allocation3 + $0xc] sm:$0xf] %vm12821_vm7, %v5118_v32  ;;  %6794 = vmatpush.bf16.msrb.mxu1 %v8461_v6  ;;  %v8454_v32 = vld [vmem:[#allocation9 + $0xa8] sm:$0xf0]  ;;  %vm12838_vm7 = vmmov %vm12822_vm0 }
 0x8bb   : > { %6892 = vmatpush.bf16.msrb.mxu3 %v8465_v36 }
 0x8bd   : > { %3976 = vrot.lane.b32.xlu2 %v3935_v13, %s9601_s21  ;;  %v8444_v13 = vld [vmem:[#allocation9 + $0x90] sm:$0xf] }
 0x8be   : > { %3974 = vrot.lane.b32.xlu1 %v3934_v24, %s9601_s21  ;;  %v8457_v24 = vor.u32 %v8828_v28, %v8454_v32  ;;  %6795 = vmatpush.bf16.msrb.mxu1 %v8453_v56 }
 0x8c0   : > { %5761 = vrot.lane.b32.xlu0 %v5723_v23, %s9602_s26  ;;  %v8827_v23 = vld [vmem:[#allocation9 + $0x94] sm:$0xf0]  ;;  %6893 = vmatpush.bf16.msrb.mxu3 %v8457_v24 }
 0x8c1   : > { %v12288_v42 = vpop.permute.xlu2 %6383  ;;  %v8445_v46 = vor.u32 %v8827_v23, %v8444_v13 }
 0x8c3   : > { %6796 = vmatpush.bf16.msrb.mxu1 %v8445_v46 }
 0x8c4   : > { %6894 = vmatpush.bf16.msrb.mxu3 %v8449_v11 }
 0x8c6   : > { %5133 = vrot.lane.b32.xlu1 %v5092_v14, %s9603_s6 }
 0x8c8   : > { %6397 = vrot.lane.b32.xlu0 %v6358_v62, %s9601_s21  ;;  %6895 = vmatpush.bf16.msrb.mxu3 %v8441_v53 }
 0x8c9   : > { %v3965_v3 = vpop.permute.xlu2 %3964  ;;  %v3961_v30 = vpop.permute.xlu1 %3960 }
 0x8ca   : > { %4010 = vst.msk [vmem:[#allocation3 + $0x18] sm:$0xf] %vm4006_vm13, %v3965_v3  ;;  %v8436_v3 = vld [vmem:[#allocation9 + $0x80] sm:$0xf] }
 0x8cb   : > { %4008 = vst.msk [vmem:[#allocation3 + $0x8] sm:$0xf] %vm4006_vm13, %v3961_v30  ;;  %v8825_v30 = vld [vmem:[#allocation9 + $0x84] sm:$0xf0] }
 0x8cc   : > { %v8437_v49 = vor.u32 %v8825_v30, %v8436_v3  ;;  %v12835_v3 = vld [vmem:[#allocation14_spill] sm:$0xff] }
 0x8cd   : > { %v3938_v30 = vpack.c.bf16 %v12835_v3, %v12835_v3 }
 0x8ce   : > { %6797 = vmatpush.bf16.msrb.mxu1 %v8437_v49 }
 0x8d0   : > { %5131 = vrot.lane.b32.xlu0 %v5091_v47, %s9603_s6 }
 0x8d1   : > { %v5752_v4 = vpop.permute.xlu1 %5751  ;;  %v8795_v48 = vld [vmem:[#allocation3 + $0x14] sm:$0xf0] }
 0x8d2   : > { %5798 = vst.msk [vmem:[#allocation3 + $0xc] sm:$0xf] %vm12822_vm0, %v5752_v4  ;;  %v8793_v44 = vld [vmem:[#allocation3 + $0x4] sm:$0xf0]  ;;  %vm12839_vm0 = vmmov %vm12829_vm3 }
 0x8d3   : > { %v8309_v45 = vor.u32 %v8793_v44, %v8308_v52 }
 0x8d5   : > { %6749 = vmatmul.bf16.vlgmr.msrb.gmra.mxu0 %v8309_v45  ;;  %6847 = vmatmul.bf16.vlgmr.msrb.gmra.mxu2 %v8309_v45  ;;  %v3937_v45 = vpack.c.bf16 %v12020_v55, %v12020_v55 }
 0x8d7   : > { %v5563_v7 = vpop.xlane.xlu0 %5562  ;;  %v5754_v22 = vpop.permute.xlu2 %5753 }
 0x8d8   : > { %9429 = vrcp.f32 %v5563_v7  ;;  %v5094_v7 = vpack.c.bf16 %v12178_v20, %v12178_v20 }
 0x8d9   : > { %v3963_v34 = vpop.permute.xlu1 %3962 }
 0x8da   : > { %4009 = vst.msk [vmem:[#allocation3 + $0x10] sm:$0xf] %vm4006_vm13, %v3963_v34 }
 0x8de   : > { %v9430_v14 = vpop.eup %9429 }
 0x8df   : > { %v5595_v57 = vmul.f32 %v9430_v14, %v12207_v50 }
 0x8e1   : > { %v5122_v62 = vpop.permute.xlu1 %5121  ;;  %v8316_v37 = vld [vmem:[#allocation3 + $0x10] sm:$0xf]  ;;  %v5603_v17 = vpack.c.bf16 %v5595_v57, %v5594_v25  ;;  %v3939_v25 = vpack.c.bf16 %v12061_v8, %v12061_v8 }
 0x8e2   : > { %5166 = vst.msk [vmem:[#allocation3 + $0x1c] sm:$0xf] %vm12823_vm6, %v5122_v62  ;;  %v8317_v54 = vor.u32 %v8795_v48, %v8316_v37  ;;  %vm12841_vm6 = vmmov %vm12839_vm0 }
 0x8e3   : > { %5711 = vmatmul.bf16.gmra.mxu1 %v5603_v17  ;;  %v5095_v17 = vpack.c.bf16 %v12183_v16, %v12183_v16 }
 0x8e5   : > { %6754 = vmatmul.bf16.gmra.mxu0 %v8317_v54  ;;  %6852 = vmatmul.bf16.gmra.mxu2 %v8317_v54 }
 0x8e7   : > { %v6390_v50 = vpop.permute.xlu2 %6389 }
 0x8ea   : > { %v5116_v10 = vpop.permute.xlu0 %5115 }
 0x8eb   : > { %5163 = vst.msk [vmem:[#allocation3 + $0x4] sm:$0xf] %vm12824_vm15, %v5116_v10  ;;  %vm12842_vm15 = vmmov %vm12826_vm1 }
 0x8ef   : > { %v5124_v12 = vpop.permute.xlu2 %5123 }
 0x8f0   : > { %v6331_v40 = vpop.f32.mrf.mxu3  ;;  %5167 = vst.msk [vmem:[#allocation3 + $0x24] sm:$0xf] %vm12825_vm12, %v5124_v12  ;;  %vm12843_vm12 = vmmov %vm12839_vm0 }
 0x8f1   : > { %v6359_v1 = vpack.c.bf16 %v6331_v40, %v6331_v40 }
 0x8f2   : > { %v5697_v33 = vpop.f32.mrf.mxu1  ;;  %v5750_v31 = vpop.permute.xlu0 %5749 }
 0x8f3   : > { %v5725_v47 = vpack.c.bf16 %v5697_v33, %v5697_v33  ;;  %6399 = vrot.lane.b32.xlu1 %v6359_v1, %s9601_s21  ;;  %5797 = vst.msk [vmem:[#allocation3 + $0x4] sm:$0xf] %vm12826_vm1, %v5750_v31  ;;  %v5096_v1 = vpack.c.bf16 %v12189_v9, %v12189_v9  ;;  %v5097_v9 = vpack.c.bf16 %v12191_v58, %v12191_v58 }
 0x8f4   : > { %6431 = vst.msk [vmem:[#allocation3 + $0x4] sm:$0xf] %vm4006_vm13, %v12288_v42  ;;  %v5098_v58 = vpack.c.bf16 %v12196_v41, %v12196_v41 }
 0x8f5   : > { %5765 = vrot.lane.b32.xlu2 %v5725_v47, %s9602_s26 }
 0x8f7   : > { %v12311_v4 = vpop.permute.xlu2 %5759  ;;  %v6388_v52 = vpop.permute.xlu1 %6387 }
 0x8f8   : > { %v6333_v44 = vpop.f32.mrf.mxu3 }
 0x8f9   : > { %v6360_v61 = vpack.c.bf16 %v6333_v44, %v6333_v44 }
 0x8fa   : > { %v5699_v0 = vpop.f32.mrf.mxu1  ;;  %v6386_v2 = vpop.permute.xlu0 %6385 }
 0x8fb   : > { %v5726_v29 = vpack.c.bf16 %v5699_v0, %v5699_v0  ;;  %3980 = vrot.lane.b32.xlu1 %v3937_v45, %s9601_s21  ;;  %6432 = vst.msk [vmem:[#allocation3 + $0xc] sm:$0xf] %vm4006_vm13, %v6386_v2  ;;  %v8792_v55 = vld [vmem:[#allocation3 + $0x4] sm:$0xf] }
 0x8fd   : > { %6401 = vrot.lane.b32.xlu2 %v6360_v61, %s9601_s21  ;;  %5767 = vrot.lane.b32.xlu0 %v5726_v29, %s9602_s26  ;;  %v12840_v29 = vld [vmem:[#allocation35_spill] sm:$0xff] }
 0x8ff   : > { %v3971_v42 = vpop.permute.xlu2 %3970  ;;  %v3969_v39 = vpop.permute.xlu1 %3968 }
 0x900   : > { %4013 = vst.msk [vmem:[#allocation3 + $0x30] sm:$0xf] %vm4006_vm13, %v3971_v42  ;;  %v3941_v42 = vpack.c.bf16 %v12840_v29, %v12840_v29 }
 0x901   : > { %4012 = vst.msk [vmem:[#allocation3 + $0x28] sm:$0xf] %vm4006_vm13, %v3969_v39 }
 0x902   : > { %v5120_v26 = vpop.permute.xlu0 %5119  ;;  %v8310_v5 = vld [vmem:[#allocation3 + $0x8] sm:$0xf0] }
 0x903   : > { %5165 = vst.msk [vmem:[#allocation3 + $0x14] sm:$0xf] %vm12827_vm8, %v5120_v26  ;;  %v8313_v6 = vor.u32 %v8792_v55, %v8310_v5  ;;  %vm12844_vm8 = vmmov %vm12839_vm0 }
 0x904   : > { %5799 = vst.msk [vmem:[#allocation3 + $0x14] sm:$0xf] %vm12828_vm2, %v5754_v22  ;;  %vm12845_vm2 = vmmov %vm12826_vm1 }
 0x905   : > { %6433 = vst.msk [vmem:[#allocation3 + $0x14] sm:$0xf] %vm4006_vm13, %v6388_v52  ;;  %5135 = vrot.lane.b32.xlu2 %v5093_v63, %s9603_s6  ;;  %3978 = vrot.lane.b32.xlu0 %v3936_v18, %s9601_s21  ;;  %v12837_v52 = vld [vmem:[#allocation19_spill] sm:$0xff] }
 0x906   : > { %6798 = vmatmul.bf16.vlgmr.msrb.gmra.mxu1 %v8313_v6  ;;  %6896 = vmatmul.bf16.vlgmr.msrb.gmra.mxu3 %v8313_v6  ;;  %v3940_v44 = vpack.c.bf16 %v12837_v52, %v12837_v52 }
 0x907   : > { %v5130_v43 = vpop.permute.xlu2 %5129  ;;  %v6336_v36 = vpop.f32.mrf.mxu3  ;;  %v8332_v47 = vld [vmem:[#allocation3 + $0x30] sm:$0xf] }
 0x908   : > { %5170 = vst.msk [vmem:[#allocation3 + $0x3c] sm:$0xf] %vm12829_vm3, %v5130_v43  ;;  %v5758_v27 = vpop.permute.xlu1 %5757  ;;  %v6361_v15 = vpack.c.bf16 %v6336_v36, %v6336_v36  ;;  %v8797_v22 = vld [vmem:[#allocation3 + $0x24] sm:$0xf0]  ;;  %vm12846_vm3 = vmmov %vm12826_vm1 }
 0x909   : > { %5801 = vst.msk [vmem:[#allocation3 + $0x24] sm:$0xf] %vm12830_vm4, %v5758_v27  ;;  %vm12847_vm4 = vmmov %vm12839_vm0 }
 0x90a   : > { %v5756_v19 = vpop.permute.xlu0 %5755 }
 0x90b   : > { %5800 = vst.msk [vmem:[#allocation3 + $0x1c] sm:$0xf] %vm12831_vm5, %v5756_v19  ;;  %vm12848_vm5 = vmmov %vm12839_vm0 }
 0x90c   : > { %6434 = vst.msk [vmem:[#allocation3 + $0x1c] sm:$0xf] %vm4006_vm13, %v6390_v50  ;;  %v8794_v32 = vld [vmem:[#allocation3 + $0x14] sm:$0xf] }
 0x90d   : > { %5137 = vrot.lane.b32.xlu0 %v5094_v7, %s9603_s6 }
 0x90f   : > { %v12337_v34 = vpop.permute.xlu2 %6395  ;;  %v6338_v23 = vpop.f32.mrf.mxu3 }
 0x910   : > { %v6394_v21 = vpop.permute.xlu1 %6393  ;;  %v6362_v57 = vpack.c.bf16 %v6338_v23, %v6338_v23 }
 0x912   : > { %v5702_v60 = vpop.f32.mrf.mxu1  ;;  %v3967_v28 = vpop.permute.xlu0 %3966 }
 0x913   : > { %v5727_v56 = vpack.c.bf16 %v5702_v60, %v5702_v60  ;;  %4011 = vst.msk [vmem:[#allocation3 + $0x20] sm:$0xf] %vm4006_vm13, %v3967_v28  ;;  %v8318_v24 = vld [vmem:[#allocation3 + $0x18] sm:$0xf0] }
 0x914   : > { %v8321_v13 = vor.u32 %v8794_v32, %v8318_v24 }
 0x915   : > { %6403 = vrot.lane.b32.xlu0 %v6361_v15, %s9601_s21  ;;  %5769 = vrot.lane.b32.xlu1 %v5727_v56, %s9602_s26 }
 0x916   : > { %6803 = vmatmul.bf16.gmra.mxu1 %v8321_v13  ;;  %6901 = vmatmul.bf16.gmra.mxu3 %v8321_v13 }
 0x917   : > { %v3977_v20 = vpop.permute.xlu2 %3976 }
 0x918   : > { %4016 = vst.msk [vmem:[#allocation3 + $0x48] sm:$0xf] %vm4006_vm13, %v3977_v20  ;;  %v5128_v51 = vpop.permute.xlu1 %5127 }
 0x919   : > { %5169 = vst.msk [vmem:[#allocation3 + $0x34] sm:$0xf] %vm12832_vm10, %v5128_v51  ;;  %vm12849_vm10 = vmmov %vm12826_vm1 }
 0x91a   : > { %v5704_v14 = vpop.f32.mrf.mxu1  ;;  %v5126_v46 = vpop.permute.xlu0 %5125  ;;  %v8324_v59 = vld [vmem:[#allocation3 + $0x20] sm:$0xf] }
 0x91b   : > { %v5728_v11 = vpack.c.bf16 %v5704_v14, %v5704_v14  ;;  %5168 = vst.msk [vmem:[#allocation3 + $0x2c] sm:$0xf] %vm12833_vm9, %v5126_v46  ;;  %v8325_v62 = vor.u32 %v8797_v22, %v8324_v59  ;;  %v6495_v59 = vld [vmem:[%s12532_s3] sm:$0x3]  ;;  %vm12850_vm9 = vmmov %vm12826_vm1 }
 0x91c   : > { %5802 = vst.msk [vmem:[#allocation3 + $0x2c] sm:$0xf] %vm12834_vm11, %v12311_v4  ;;  %v12402_v22 = vperm.slane %v6495_v59, 0  ;;  %v12408_v3 = vperm.slane %v6495_v59, 1  ;;  %vm12851_vm11 = vmmov %vm12839_vm0 }
 0x91d   : > { %6436 = vst.msk [vmem:[#allocation3 + $0x2c] sm:$0xf] %vm4006_vm13, %v6394_v21  ;;  %3984 = vrot.lane.b32.xlu0 %v3939_v25, %s9601_s21  ;;  %6405 = vrot.lane.b32.xlu1 %v6362_v57, %s9601_s21 }
 0x91e   : > { %5771 = vrot.lane.b32.xlu2 %v5728_v11, %s9602_s26  ;;  %6759 = vmatmul.bf16.gmra.mxu0 %v8325_v62 }
 0x91f   : > { %6857 = vmatmul.bf16.gmra.mxu2 %v8325_v62  ;;  %v8801_v6 = vld [vmem:[#allocation3 + $0x44] sm:$0xf0] }
 0x920   : > { %v6341_v37 = vpop.f32.mrf.mxu3 }
 0x921   : > { %v6363_v0 = vpack.c.bf16 %v6341_v37, %v6341_v37 }
 0x922   : > { %v5707_v8 = vpop.f32.mrf.mxu1  ;;  %v6392_v48 = vpop.permute.xlu0 %6391 }
 0x923   : > { %v5729_v54 = vpack.c.bf16 %v5707_v8, %v5707_v8  ;;  %6435 = vst.msk [vmem:[#allocation3 + $0x24] sm:$0xf] %vm4006_vm13, %v6392_v48 }
 0x924   : > { %v8326_v16 = vld [vmem:[#allocation3 + $0x28] sm:$0xf0] }
 0x925   : > { %5139 = vrot.lane.b32.xlu1 %v5095_v17, %s9603_s6  ;;  %5773 = vrot.lane.b32.xlu0 %v5729_v54, %s9602_s26 }
 0x926   : > { %3982 = vrot.lane.b32.xlu2 %v3938_v30, %s9601_s21 }
 0x928   : > { %v5764_v49 = vpop.permute.xlu1 %5763  ;;  %v6343_v35 = vpop.f32.mrf.mxu3 }
 0x929   : > { %5804 = vst.msk [vmem:[#allocation3 + $0x3c] sm:$0xf] %vm12836_vm14, %v5764_v49  ;;  %v6364_v10 = vpack.c.bf16 %v6343_v35, %v6343_v35  ;;  %vm12852_vm14 = vmmov %vm12839_vm0 }
 0x92a   : > { %v5709_v38 = vpop.f32.mrf.mxu1  ;;  %v3973_v53 = vpop.permute.xlu0 %3972  ;;  %v8796_v50 = vld [vmem:[#allocation3 + $0x24] sm:$0xf] }
 0x92b   : > { %v5730_v12 = vpack.c.bf16 %v5709_v38, %v5709_v38  ;;  %4014 = vst.msk [vmem:[#allocation3 + $0x38] sm:$0xf] %vm4006_vm13, %v3973_v53  ;;  %v8329_v40 = vor.u32 %v8796_v50, %v8326_v16 }
 0x92d   : > { %5775 = vrot.lane.b32.xlu1 %v5730_v12, %s9602_s26  ;;  %6409 = vrot.lane.b32.xlu0 %v6364_v10, %s9601_s21 }
 0x92e   : > { %5141 = vrot.lane.b32.xlu2 %v5096_v1, %s9603_s6  ;;  %6808 = vmatmul.bf16.gmra.mxu1 %v8329_v40 }
 0x92f   : > { %6906 = vmatmul.bf16.gmra.mxu3 %v8329_v40 }
 0x930   : > { %v3975_v33 = vpop.permute.xlu1 %3974 }
 0x931   : > { %4015 = vst.msk [vmem:[#allocation3 + $0x40] sm:$0xf] %vm4006_vm13, %v3975_v33 }
 0x932   : > { %v5762_v31 = vpop.permute.xlu0 %5761  ;;  %v8799_v4 = vld [vmem:[#allocation3 + $0x34] sm:$0xf0] }
 0x933   : > { %5803 = vst.msk [vmem:[#allocation3 + $0x34] sm:$0xf] %vm12838_vm7, %v5762_v31  ;;  %v8333_v45 = vor.u32 %v8799_v4, %v8332_v47  ;;  %vm12853_vm7 = vmmov %vm12826_vm1 }
 0x934   : > { %6437 = vst.msk [vmem:[#allocation3 + $0x34] sm:$0xf] %vm4006_vm13, %v12337_v34 }
 0x935   : > { %3986 = vrot.lane.b32.xlu1 %v3940_v44, %s9601_s21  ;;  %5143 = vrot.lane.b32.xlu0 %v5097_v9, %s9603_s6 }
 0x936   : > { %6407 = vrot.lane.b32.xlu2 %v6363_v0, %s9601_s21  ;;  %6764 = vmatmul.bf16.gmra.mxu0 %v8333_v45 }
 0x937   : > { %6862 = vmatmul.bf16.gmra.mxu2 %v8333_v45 }
 0x938   : > { %v5134_v2 = vpop.permute.xlu1 %5133  ;;  %v6346_v39 = vpop.f32.mrf.mxu3  ;;  %v8340_v26 = vld [vmem:[#allocation3 + $0x40] sm:$0xf] }
 0x939   : > { %5172 = vst.msk [vmem:[#allocation3 + $0x4c] sm:$0xf] %vm12839_vm0, %v5134_v2  ;;  %v6365_v63 = vpack.c.bf16 %v6346_v39, %v6346_v39  ;;  %v8341_v41 = vor.u32 %v8801_v6, %v8340_v26  ;;  %vm12854_vm0 = vmmov %vm12826_vm1 }
 0x93a   : > { %v6398_v61 = vpop.permute.xlu0 %6397 }
 0x93b   : > { %6438 = vst.msk [vmem:[#allocation3 + $0x3c] sm:$0xf] %vm4006_vm13, %v6398_v61  ;;  %v8798_v5 = vld [vmem:[#allocation3 + $0x34] sm:$0xf] }
 0x93d   : > { %5145 = vrot.lane.b32.xlu1 %v5098_v58, %s9603_s6 }
 0x93e   : > { %3988 = vrot.lane.b32.xlu2 %v3941_v42, %s9601_s21 }
 0x940   : > { %v6348_v60 = vpop.f32.mrf.mxu3 }
 0x941   : > { %v6366_v15 = vpack.c.bf16 %v6348_v60, %v6348_v60 }
 0x942   : > { %v5132_v55 = vpop.permute.xlu0 %5131  ;;  %v8334_v18 = vld [vmem:[#allocation3 + $0x38] sm:$0xf0] }
 0x943   : > { %5171 = vst.msk [vmem:[#allocation3 + $0x44] sm:$0xf] %vm12841_vm6, %v5132_v55  ;;  %v8337_v43 = vor.u32 %v8798_v5, %v8334_v18 }
 0x945   : > { %6411 = vrot.lane.b32.xlu1 %v6365_v63, %s9601_s21  ;;  %6813 = vmatmul.bf16.gmra.mxu1 %v8337_v43 }
 0x946   : > { %6769 = vmatmul.bf16.gmra.mxu0 %v8341_v41  ;;  %6911 = vmatmul.bf16.gmra.mxu3 %v8337_v43 }
 0x947   : > { %6867 = vmatmul.bf16.gmra.mxu2 %v8341_v41 }
 0x94f   : > { %v5766_v27 = vpop.permute.xlu2 %5765 }
 0x950   : > { %5805 = vst.msk [vmem:[#allocation3 + $0x44] sm:$0xf] %vm12842_vm15, %v5766_v27 }
 0x952   : > { %v6750_v20 = vpop.f32.mrf.mxu0 }
 0x953   : > { %v6751_v48 = vadd.f32 %v6750_v20, %v12402_v22 }
 0x957   : > { %v6402_v19 = vpop.permute.xlu2 %6401 }
 0x958   : > { %v6848_v25 = vpop.f32.mrf.mxu2 }
 0x959   : > { %v6849_v38 = vadd.f32 %v6848_v25, %v12408_v3 }
 0x95a   : > { %v6752_v17 = vpop.f32.mrf.mxu0 }
 0x95b   : > { %v6753_v10 = vadd.f32 %v6752_v17, %v12402_v22 }
 0x95f   : > { %v5136_v7 = vpop.permute.xlu2 %5135 }
 0x960   : > { %5173 = vst.msk [vmem:[#allocation3 + $0x54] sm:$0xf] %vm12843_vm12, %v5136_v7  ;;  %v5712_v36 = vpop.f32.mrf.mxu1  ;;  %v6850_v50 = vpop.f32.mrf.mxu2 }
 0x961   : > { %v5731_v34 = vpack.c.bf16 %v5712_v36, %v5712_v36  ;;  %v6851_v4 = vadd.f32 %v6850_v50, %v12408_v3 }
 0x962   : > { %v6755_v1 = vpop.f32.mrf.mxu0 }
 0x963   : > { %5777 = vrot.lane.b32.xlu2 %v5731_v34, %s9602_s26  ;;  %v6756_v9 = vadd.f32 %v6755_v1, %v12402_v22 }
 0x965   : > { %v6400_v21 = vpop.permute.xlu1 %6399 }
 0x966   : > { %6439 = vst.msk [vmem:[#allocation3 + $0x44] sm:$0xf] %vm4006_vm13, %v6400_v21 }
 0x968   : > { %v5714_v28 = vpop.f32.mrf.mxu1  ;;  %v6853_v0 = vpop.f32.mrf.mxu2 }
 0x969   : > { %v5732_v56 = vpack.c.bf16 %v5714_v28, %v5714_v28  ;;  %v6854_v55 = vadd.f32 %v6853_v0, %v12408_v3 }
 0x96a   : > { %v6757_v58 = vpop.f32.mrf.mxu0 }
 0x96b   : > { %6413 = vrot.lane.b32.xlu2 %v6366_v15, %s9601_s21  ;;  %5779 = vrot.lane.b32.xlu0 %v5732_v56, %s9602_s26  ;;  %v6758_v27 = vadd.f32 %v6757_v58, %v12402_v22  ;;  %s9541_s21 = scalar_lea.hbm %s12533_s4, 512 }
 0x96c   : > { %p9543_p9 = scmp.lt.s32.totalorder %s9541_s21, %s9537_s5 }
 0x96d   : > { %v3981_v32 = vpop.permute.xlu1 %3980  ;;  %v8800_v51 = vld [vmem:[#allocation3 + $0x44] sm:$0xf] }
 0x96e   : > { %4018 = vst.msk [vmem:[#allocation3 + $0x58] sm:$0xf] %vm4006_vm13, %v3981_v32  ;;  %p9544_p2 = por %p9543_p9, %p9542_p11 }
 0x96f   : > { %v5768_v24 = vpop.permute.xlu0 %5767 }
 0x970   : > { %5806 = vst.msk [vmem:[#allocation3 + $0x4c] sm:$0xf] %vm12826_vm1, %v5768_v24  ;;  %v6855_v34 = vpop.f32.mrf.mxu2  ;;  %p9545_p10 = pnand %p9544_p2, %p9540_p8 }
 0x971   : > { %6440 = vst.msk [vmem:[#allocation3 + $0x4c] sm:$0xf] %vm4006_vm13, %v6402_v19  ;;  %v6856_v28 = vadd.f32 %v6855_v34, %v12408_v3 }
 0x975   : > { %v8803_v62 = vld [vmem:[#allocation3 + $0x54] sm:$0xf0] }
 0x977   : > { %v3979_v13 = vpop.permute.xlu0 %3978 }
 0x978   : > { %v5772_v23 = vpop.permute.xlu2 %5771  ;;  %4017 = vst.msk [vmem:[#allocation3 + $0x50] sm:$0xf] %vm4006_vm13, %v3979_v13  ;;  %v8342_v14 = vld [vmem:[#allocation3 + $0x48] sm:$0xf0] }
 0x979   : > { %v8345_v46 = vor.u32 %v8800_v51, %v8342_v14 }
 0x97b   : > { %6818 = vmatmul.bf16.gmra.mxu1 %v8345_v46  ;;  %6916 = vmatmul.bf16.gmra.mxu3 %v8345_v46 }
 0x97f   : > { %v5138_v57 = vpop.permute.xlu0 %5137  ;;  %v8348_v11 = vld [vmem:[#allocation3 + $0x50] sm:$0xf] }
 0x980   : > { %v3983_v37 = vpop.permute.xlu2 %3982  ;;  %5174 = vst.msk [vmem:[#allocation3 + $0x5c] sm:$0xf] %vm12844_vm8, %v5138_v57  ;;  %v8349_v8 = vor.u32 %v8803_v62, %v8348_v11 }
 0x981   : > { %4019 = vst.msk [vmem:[#allocation3 + $0x60] sm:$0xf] %vm4006_vm13, %v3983_v37 }
 0x982   : > { %5808 = vst.msk [vmem:[#allocation3 + $0x5c] sm:$0xf] %vm12845_vm2, %v5772_v23  ;;  %6774 = vmatmul.bf16.gmra.mxu0 %v8349_v8  ;;  %6872 = vmatmul.bf16.gmra.mxu2 %v8349_v8 }
 0x983   : > { %v6799_v54 = vpop.f32.mrf.mxu1 }
 0x984   : > { %v6800_v30 = vadd.f32 %v6799_v54, %v6751_v48 }
 0x986   : > { %6937 = vst [vmem:[%s12412_s9] sm:$0xff] %v6800_v30 }
 0x987   : > { %v5770_v49 = vpop.permute.xlu1 %5769  ;;  %v6404_v35 = vpop.permute.xlu0 %6403 }
 0x988   : > { %5807 = vst.msk [vmem:[#allocation3 + $0x54] sm:$0xf] %vm12846_vm3, %v5770_v49  ;;  %v5142_v53 = vpop.permute.xlu2 %5141  ;;  %v8356_v18 = vld [vmem:[#allocation3 + $0x60] sm:$0xf] }
 0x989   : > { %5176 = vst.msk [vmem:[#allocation3 + $0x6c] sm:$0xf] %vm12847_vm4, %v5142_v53  ;;  %v6897_v16 = vpop.f32.mrf.mxu3 }
 0x98a   : > { %6441 = vst.msk [vmem:[#allocation3 + $0x54] sm:$0xf] %vm4006_vm13, %v6404_v35  ;;  %v6898_v12 = vadd.f32 %v6897_v16, %v6849_v38 }
 0x98b   : > { %v6801_v40 = vpop.f32.mrf.mxu1 }
 0x98c   : > { %6938 = vst [vmem:[%s12412_s9 + $0x8] sm:$0xff] %v6898_v12  ;;  %v6802_v33 = vadd.f32 %v6801_v40, %v6753_v10 }
 0x98e   : > { %6939 = vst [vmem:[%s12412_s9 + $0x10] sm:$0xff] %v6802_v33 }
 0x98f   : > { %v6406_v31 = vpop.permute.xlu1 %6405  ;;  %v3985_v47 = vpop.permute.xlu0 %3984 }
 0x990   : > { %6442 = vst.msk [vmem:[#allocation3 + $0x5c] sm:$0xf] %vm4006_vm13, %v6406_v31  ;;  %v6408_v52 = vpop.permute.xlu2 %6407 }
 0x991   : > { %4020 = vst.msk [vmem:[#allocation3 + $0x68] sm:$0xf] %vm4006_vm13, %v3985_v47  ;;  %v6899_v44 = vpop.f32.mrf.mxu3  ;;  %v8802_v39 = vld [vmem:[#allocation3 + $0x54] sm:$0xf] }
 0x992   : > { %v6900_v45 = vadd.f32 %v6899_v44, %v6851_v4 }
 0x993   : > { %v6804_v2 = vpop.f32.mrf.mxu1 }
 0x994   : > { %6940 = vst [vmem:[%s12412_s9 + $0x18] sm:$0xff] %v6900_v45  ;;  %v6805_v61 = vadd.f32 %v6804_v2, %v6756_v9 }
 0x996   : > { %6941 = vst [vmem:[%s12412_s9 + $0x20] sm:$0xff] %v6805_v61 }
 0x997   : > { %v5140_v29 = vpop.permute.xlu1 %5139  ;;  %v5774_v42 = vpop.permute.xlu0 %5773  ;;  %v8350_v26 = vld [vmem:[#allocation3 + $0x58] sm:$0xf0] }
 0x998   : > { %5175 = vst.msk [vmem:[#allocation3 + $0x64] sm:$0xf] %vm12848_vm5, %v5140_v29  ;;  %v3989_v5 = vpop.permute.xlu2 %3988  ;;  %v8805_v63 = vld [vmem:[#allocation3 + $0x64] sm:$0xf0]  ;;  %v8353_v6 = vor.u32 %v8802_v39, %v8350_v26 }
 0x999   : > { %4022 = vst.msk [vmem:[#allocation3 + $0x78] sm:$0xf] %vm4006_vm13, %v3989_v5  ;;  %v8357_v43 = vor.u32 %v8805_v63, %v8356_v18  ;;  %v6902_v41 = vpop.f32.mrf.mxu3 }
 0x99a   : > { %5809 = vst.msk [vmem:[#allocation3 + $0x64] sm:$0xf] %vm12849_vm10, %v5774_v42  ;;  %6823 = vmatmul.bf16.gmra.mxu1 %v8353_v6  ;;  %v6903_v19 = vadd.f32 %v6902_v41, %v6854_v55  ;;  %6921 = vmatmul.bf16.gmra.mxu3 %v8353_v6 }
 0x99b   : > { %6443 = vst.msk [vmem:[#allocation3 + $0x64] sm:$0xf] %vm4006_vm13, %v6408_v52  ;;  %6779 = vmatmul.bf16.gmra.mxu0 %v8357_v43  ;;  %6877 = vmatmul.bf16.gmra.mxu2 %v8357_v43  ;;  %v6806_v7 = vpop.f32.mrf.mxu1  ;;  %v6760_v32 = vpop.f32.mrf.mxu0 }
 0x99c   : > { %6942 = vst [vmem:[%s12412_s9 + $0x28] sm:$0xff] %v6903_v19  ;;  %v6807_v36 = vadd.f32 %v6806_v7, %v6758_v27  ;;  %v6761_v14 = vadd.f32 %v6760_v32, %v12402_v22 }
 0x99e   : > { %6943 = vst [vmem:[%s12412_s9 + $0x30] sm:$0xff] %v6807_v36 }
 0x99f   : > { %v5776_v21 = vpop.permute.xlu1 %5775  ;;  %v6410_v60 = vpop.permute.xlu0 %6409 }
 0x9a0   : > { %5810 = vst.msk [vmem:[#allocation3 + $0x6c] sm:$0xf] %vm12850_vm9, %v5776_v21  ;;  %v8807_v37 = vld [vmem:[#allocation3 + $0x74] sm:$0xf0] }
 0x9a1   : > { %6444 = vst.msk [vmem:[#allocation3 + $0x6c] sm:$0xf] %vm4006_vm13, %v6410_v60  ;;  %v6904_v15 = vpop.f32.mrf.mxu3 }
 0x9a2   : > { %v6905_v56 = vadd.f32 %v6904_v15, %v6856_v28  ;;  %v8804_v20 = vld [vmem:[#allocation3 + $0x64] sm:$0xf]  ;;  %v6858_v59 = vpop.f32.mrf.mxu2 }
 0x9a3   : > { %v6762_v57 = vpop.f32.mrf.mxu0  ;;  %v6859_v48 = vadd.f32 %v6858_v59, %v12408_v3 }
 0x9a4   : > { %6944 = vst [vmem:[%s12412_s9 + $0x38] sm:$0xff] %v6905_v56  ;;  %v6763_v17 = vadd.f32 %v6762_v57, %v12402_v22 }
 0x9a7   : > { %v3987_v24 = vpop.permute.xlu1 %3986  ;;  %v5144_v13 = vpop.permute.xlu0 %5143 }
 0x9a8   : > { %4021 = vst.msk [vmem:[#allocation3 + $0x70] sm:$0xf] %vm4006_vm13, %v3987_v24  ;;  %v8358_v23 = vld [vmem:[#allocation3 + $0x68] sm:$0xf0] }
 0x9a9   : > { %5177 = vst.msk [vmem:[#allocation3 + $0x74] sm:$0xf] %vm12851_vm11, %v5144_v13  ;;  %v8361_v51 = vor.u32 %v8804_v20, %v8358_v23 }
 0x9aa   : > { %v6860_v38 = vpop.f32.mrf.mxu2 }
 0x9ab   : > { %v6809_v46 = vpop.f32.mrf.mxu1  ;;  %6828 = vmatmul.bf16.gmra.mxu1 %v8361_v51  ;;  %6926 = vmatmul.bf16.gmra.mxu3 %v8361_v51  ;;  %v6861_v53 = vadd.f32 %v6860_v38, %v12408_v3 }
 0x9ac   : > { %v6810_v25 = vadd.f32 %v6809_v46, %v6761_v14 }
 0x9ae   : > { %6945 = vst [vmem:[%s12412_s9 + $0x40] sm:$0xff] %v6810_v25 }
 0x9af   : > { %v5146_v11 = vpop.permute.xlu1 %5145  ;;  %v8364_v62 = vld [vmem:[#allocation3 + $0x70] sm:$0xf] }
 0x9b0   : > { %5178 = vst.msk [vmem:[#allocation3 + $0x7c] sm:$0xf] %vm12852_vm14, %v5146_v11  ;;  %v8365_v8 = vor.u32 %v8807_v37, %v8364_v62 }
 0x9b2   : > { %v6907_v54 = vpop.f32.mrf.mxu3  ;;  %6784 = vmatmul.bf16.gmra.mxu0 %v8365_v8  ;;  %6882 = vmatmul.bf16.gmra.mxu2 %v8365_v8 }
 0x9b3   : > { %v6908_v30 = vadd.f32 %v6907_v54, %v6859_v48  ;;  %v6811_v49 = vpop.f32.mrf.mxu1  ;;  %v6765_v10 = vpop.f32.mrf.mxu0 }
 0x9b4   : > { %v6812_v35 = vadd.f32 %v6811_v49, %v6763_v17  ;;  %v6766_v1 = vadd.f32 %v6765_v10, %v12402_v22 }
 0x9b5   : > { %6946 = vst [vmem:[%s12412_s9 + $0x48] sm:$0xff] %v6908_v30 }
 0x9b6   : > { %6947 = vst [vmem:[%s12412_s9 + $0x50] sm:$0xff] %v6812_v35 }
 0x9b7   : > { %v6412_v40 = vpop.permute.xlu1 %6411 }
 0x9ba   : > { %v6909_v50 = vpop.f32.mrf.mxu3  ;;  %v6863_v31 = vpop.f32.mrf.mxu2 }
 0x9bb   : > { %v6910_v16 = vadd.f32 %v6909_v50, %v6861_v53  ;;  %v6767_v4 = vpop.f32.mrf.mxu0  ;;  %v6864_v52 = vadd.f32 %v6863_v31, %v12408_v3 }
 0x9bc   : > { %v6768_v44 = vadd.f32 %v6767_v4, %v12402_v22 }
 0x9bd   : > { %6948 = vst [vmem:[%s12412_s9 + $0x58] sm:$0xff] %v6910_v16  ;;  %v5778_v12 = vpop.permute.xlu2 %5777 }
 0x9be   : > { %5811 = vst.msk [vmem:[#allocation3 + $0x74] sm:$0xf] %vm12853_vm7, %v5778_v12 }
 0x9bf   : > { %6445 = vst.msk [vmem:[#allocation3 + $0x74] sm:$0xf] %vm4006_vm13, %v6412_v40 }
 0x9c2   : > { %v6814_v33 = vpop.f32.mrf.mxu1  ;;  %v6865_v61 = vpop.f32.mrf.mxu2 }
 0x9c3   : > { %v6815_v47 = vadd.f32 %v6814_v33, %v6766_v1  ;;  %v6866_v58 = vadd.f32 %v6865_v61, %v12408_v3  ;;  %v6770_v63 = vpop.f32.mrf.mxu0 }
 0x9c4   : > { %v6771_v6 = vadd.f32 %v6770_v63, %v12402_v22 }
 0x9c5   : > { %6949 = vst [vmem:[%s12412_s9 + $0x60] sm:$0xff] %v6815_v47  ;;  %v6414_v26 = vpop.permute.xlu2 %6413 }
 0x9c6   : > { %v8806_v55 = vld [vmem:[#allocation3 + $0x74] sm:$0xf] }
 0x9c9   : > { %v6912_v9 = vpop.f32.mrf.mxu3 }
 0x9ca   : > { %v6913_v45 = vadd.f32 %v6912_v9, %v6864_v52  ;;  %v6816_v0 = vpop.f32.mrf.mxu1  ;;  %v6868_v43 = vpop.f32.mrf.mxu2 }
 0x9cb   : > { %v6817_v2 = vadd.f32 %v6816_v0, %v6768_v44  ;;  %v6772_v19 = vpop.f32.mrf.mxu0  ;;  %v6869_v7 = vadd.f32 %v6868_v43, %v12408_v3 }
 0x9cc   : > { %6950 = vst [vmem:[%s12412_s9 + $0x68] sm:$0xff] %v6913_v45  ;;  %v6773_v34 = vadd.f32 %v6772_v19, %v12402_v22 }
 0x9cd   : > { %6951 = vst [vmem:[%s12412_s9 + $0x70] sm:$0xff] %v6817_v2 }
 0x9d1   : > { %v6914_v29 = vpop.f32.mrf.mxu3 }
 0x9d2   : > { %v6915_v42 = vadd.f32 %v6914_v29, %v6866_v58  ;;  %v6870_v15 = vpop.f32.mrf.mxu2 }
 0x9d3   : > { %v6871_v56 = vadd.f32 %v6870_v15, %v12408_v3 }
 0x9d4   : > { %6952 = vst [vmem:[%s12412_s9 + $0x78] sm:$0xff] %v6915_v42 }
 0x9dd   : > { %v5780_v39 = vpop.permute.xlu0 %5779 }
 0x9de   : > { %5812 = vst.msk [vmem:[#allocation3 + $0x7c] sm:$0xf] %vm12854_vm0, %v5780_v39 }
 0x9df   : > { %6446 = vst.msk [vmem:[#allocation3 + $0x7c] sm:$0xf] %vm4006_vm13, %v6414_v26 }
 0x9e6   : > { %v8366_v5 = vld [vmem:[#allocation3 + $0x78] sm:$0xf0] }
 0x9e7   : > { %v8369_v18 = vor.u32 %v8806_v55, %v8366_v5 }
 0x9e9   : > { %6833 = vmatmul.bf16.gmra.mxu1 %v8369_v18  ;;  %6931 = vmatmul.bf16.gmra.mxu3 %v8369_v18 }
 0x9f8   : > { %v6819_v41 = vpop.f32.mrf.mxu1 }
 0x9f9   : > { %v6820_v27 = vadd.f32 %v6819_v41, %v6771_v6 }
 0x9fb   : > { %6953 = vst [vmem:[%s12412_s9 + $0x80] sm:$0xff] %v6820_v27 }
 0x9fe   : > { %v6917_v36 = vpop.f32.mrf.mxu3 }
 0x9ff   : > { %v6918_v21 = vadd.f32 %v6917_v36, %v6869_v7  ;;  %v6775_v13 = vpop.f32.mrf.mxu0 }
 0xa00   : > { %v6821_v60 = vpop.f32.mrf.mxu1  ;;  %v6776_v20 = vadd.f32 %v6775_v13, %v12402_v22 }
 0xa01   : > { %6954 = vst [vmem:[%s12412_s9 + $0x88] sm:$0xff] %v6918_v21  ;;  %v6822_v28 = vadd.f32 %v6821_v60, %v6773_v34 }
 0xa03   : > { %6955 = vst [vmem:[%s12412_s9 + $0x90] sm:$0xff] %v6822_v28 }
 0xa05   : > { %v6873_v23 = vpop.f32.mrf.mxu2 }
 0xa06   : > { %v6919_v32 = vpop.f32.mrf.mxu3  ;;  %v6874_v59 = vadd.f32 %v6873_v23, %v12408_v3 }
 0xa07   : > { %v6920_v24 = vadd.f32 %v6919_v32, %v6871_v56  ;;  %v6777_v46 = vpop.f32.mrf.mxu0 }
 0xa08   : > { %v6778_v57 = vadd.f32 %v6777_v46, %v12402_v22 }
 0xa09   : > { %6956 = vst [vmem:[%s12412_s9 + $0x98] sm:$0xff] %v6920_v24 }
 0xa0d   : > { %v6875_v37 = vpop.f32.mrf.mxu2 }
 0xa0e   : > { %v6876_v17 = vadd.f32 %v6875_v37, %v12408_v3 }
 0xa17   : > { %v6824_v51 = vpop.f32.mrf.mxu1 }
 0xa18   : > { %v6825_v14 = vadd.f32 %v6824_v51, %v6776_v20  ;;  %v6780_v48 = vpop.f32.mrf.mxu0 }
 0xa19   : > { %v6781_v49 = vadd.f32 %v6780_v48, %v12402_v22 }
 0xa1a   : > { %6957 = vst [vmem:[%s12412_s9 + $0xa0] sm:$0xff] %v6825_v14 }
 0xa1d   : > { %v6922_v25 = vpop.f32.mrf.mxu3 }
 0xa1e   : > { %v6923_v11 = vadd.f32 %v6922_v25, %v6874_v59  ;;  %v6878_v35 = vpop.f32.mrf.mxu2 }
 0xa1f   : > { %v6826_v62 = vpop.f32.mrf.mxu1  ;;  %v6879_v16 = vadd.f32 %v6878_v35, %v12408_v3 }
 0xa20   : > { %6958 = vst [vmem:[%s12412_s9 + $0xa8] sm:$0xff] %v6923_v11  ;;  %v6827_v8 = vadd.f32 %v6826_v62, %v6778_v57  ;;  %v6782_v50 = vpop.f32.mrf.mxu0 }
 0xa21   : > { %v6783_v12 = vadd.f32 %v6782_v50, %v12402_v22 }
 0xa22   : > { %6959 = vst [vmem:[%s12412_s9 + $0xb0] sm:$0xff] %v6827_v8 }
 0xa25   : > { %v6924_v54 = vpop.f32.mrf.mxu3 }
 0xa26   : > { %v6925_v30 = vadd.f32 %v6924_v54, %v6876_v17  ;;  %v6880_v31 = vpop.f32.mrf.mxu2 }
 0xa27   : > { %v6881_v47 = vadd.f32 %v6880_v31, %v12408_v3 }
 0xa28   : > { %6960 = vst [vmem:[%s12412_s9 + $0xb8] sm:$0xff] %v6925_v30  ;;  %v6829_v38 = vpop.f32.mrf.mxu1 }
 0xa29   : > { %v6830_v53 = vadd.f32 %v6829_v38, %v6781_v49 }
 0xa2b   : > { %6961 = vst [vmem:[%s12412_s9 + $0xc0] sm:$0xff] %v6830_v53 }
 0xa2e   : > { %v6927_v10 = vpop.f32.mrf.mxu3 }
 0xa2f   : > { %v6928_v40 = vadd.f32 %v6927_v10, %v6879_v16  ;;  %v6785_v44 = vpop.f32.mrf.mxu0 }
 0xa30   : > { %v6831_v1 = vpop.f32.mrf.mxu1  ;;  %v6786_v9 = vadd.f32 %v6785_v44, %v12402_v22 }
 0xa31   : > { %6962 = vst [vmem:[%s12412_s9 + $0xc8] sm:$0xff] %v6928_v40  ;;  %v6832_v33 = vadd.f32 %v6831_v1, %v6783_v12 }
 0xa33   : > { %6963 = vst [vmem:[%s12412_s9 + $0xd0] sm:$0xff] %v6832_v33 }
 0xa35   : > { %v6883_v45 = vpop.f32.mrf.mxu2 }
 0xa36   : > { %v6929_v4 = vpop.f32.mrf.mxu3  ;;  %v6884_v58 = vadd.f32 %v6883_v45, %v12408_v3 }
 0xa37   : > { %v6930_v52 = vadd.f32 %v6929_v4, %v6881_v47  ;;  %v6787_v61 = vpop.f32.mrf.mxu0 }
 0xa38   : > { %v6788_v42 = vadd.f32 %v6787_v61, %v12402_v22 }
 0xa39   : > { %6964 = vst [vmem:[%s12412_s9 + $0xd8] sm:$0xff] %v6930_v52 }
 0xa3d   : > { %v6885_v5 = vpop.f32.mrf.mxu2 }
 0xa3e   : > { %v6886_v18 = vadd.f32 %v6885_v5, %v12408_v3 }
 0xa66   : > { %v6834_v0 = vpop.f32.mrf.mxu1 }
 0xa67   : > { %v6835_v2 = vadd.f32 %v6834_v0, %v6786_v9 }
 0xa69   : > { %6965 = vst [vmem:[%s12412_s9 + $0xe0] sm:$0xff] %v6835_v2 }
 0xa6c   : > { %v6932_v29 = vpop.f32.mrf.mxu3 }
 0xa6d   : > { %v6933_v39 = vadd.f32 %v6932_v29, %v6884_v58 }
 0xa6e   : > { %v6836_v26 = vpop.f32.mrf.mxu1 }
 0xa6f   : > { %6966 = vst [vmem:[%s12412_s9 + $0xe8] sm:$0xff] %v6933_v39  ;;  %v6837_v55 = vadd.f32 %v6836_v26, %v6788_v42 }
 0xa71   : > { %6967 = vst [vmem:[%s12412_s9 + $0xf0] sm:$0xff] %v6837_v55 }
 0xa74   : > { %v6934_v63 = vpop.f32.mrf.mxu3 }
 0xa75   : > { %v6935_v22 = vadd.f32 %v6934_v63, %v6886_v18 }
 0xa77   : > { %6968 = vst [vmem:[%s12412_s9 + $0xf8] sm:$0xff] %v6935_v22 }
 0xa78   : > { %9548 = shalt.err (!%p9545_p10)
}
 0xa79   : > { %s9604_s30 = smov 256   ;;  %s9605_s7 = smov 16  }
 0xa7a   : > { %8851 = dma.vmem_to_hbm [thread:$0]  (%p9700_p5), %s6983_s28, 4096, %s6985_s24, %s6970_s19, %s9604_s30, %s9604_s30, %s9605_s7  }
 0xa7b PF: > { %s6999_s8 = sand.u32 1, %s9579_s15   ;;  %p12855_p12 = scmp.ge.s32.totalorder %s9591_s18, 2 }
 0xa7c   : > { %s7000_s9 = scalar_lea.sflag [#allocation6], %s6999_s8 }
 0xa7d   : > { %p8865_p13 = pnand %p12855_p12, %p9666_p6 }
 0xa7f   : > { %p8866_p0 = pneg %p8865_p13 }
 0xa81   : > { %9574 = dma.done.wait (%p8866_p0), %s7000_s9, 4096  }
 0xa82   : > { %9576 = vsyncadd (%p8866_p0), %s7000_s9, 4294963200  ;;  %p18_p3 = scmp.ge.s32.totalorder %s9687_s12, 4   ;;  %s12856_s15 = smov %s9583_s16 }
 0xa83   : > { %s12857_s16 = smov %s9587_s17  ;;  %s12858_s17 = smov %s9696_s20 }
 0xa84   : > { %s12859_s18 = smov %s9687_s12  ;;  %20 = sbr.rel (!%p18_p3) target bundleno = 6 (0x6), region = 89 }
 0xa89   :  { %7006 = vsyncpa [#allocation5], 1 }
 0xa8a   :  { %7008 = vsyncpa [#allocation5 + $0x1], 1 }
 0xa8b   :  { %7009 = vsyncpa [#allocation8], 1 }
 0xa8c   :  { %7010 = vsyncpa [#allocation6], 1 }
 0xa8d   :  { %7012 = vsyncpa [#allocation6 + $0x1], 1 }

</bundles_post_ra>
